<compile_context>
chip_gen: v7x
topology: tpu7x:2x2x1
jax: 0.10.0
libtpu: 0.0.40
codegen_flags: <defaults>
</compile_context>

<pallas_src>
import functools

import jax
import jax.numpy as jnp
from jax.experimental import pallas as pl
from jax.experimental.pallas import tpu as pltpu

BLOCKS, LAYERS, KERNEL_SIZE = 2, 3, 2
NUM_LAYERS = BLOCKS * LAYERS
DILATIONS = tuple(range(1, LAYERS + 1)) * BLOCKS      # (1, 2, 3, 1, 2, 3)
_TIME_SHRINK = sum(DILATIONS)                          # 12
_DELAY_PAD = 8                                         # zeroed rows at top of delay scratch


# ------------------------------- parameters --------------------------------

def receptive_field():
    rf = 1 + (4 - 1)
    for _ in range(BLOCKS):
        add = KERNEL_SIZE - 1
        for _ in range(LAYERS):
            rf += add
            add += KERNEL_SIZE - 1
    return rf


def init_params(key, in_dim, embed_dim, end_dim):
    c_res = embed_dim
    c_skip = 4 * embed_dim
    keys = iter(jax.random.split(key, 256))

    def nrm(shape, scale=0.1):
        return scale * jax.random.normal(next(keys), shape, jnp.float32)

    params = {
        'start_w': nrm((in_dim, c_res)),
        'start_b': nrm((1, c_res)),
        'end_w': nrm((c_skip, end_dim)),
        'end_b': nrm((1, end_dim)),
        'empty_token': nrm((in_dim,)),  # unused: mask_ratio == 0 in this run
        'layers': [],
    }
    eps = 1e-5
    for _b in range(BLOCKS):
        dil = 1
        for _i in range(LAYERS):
            gamma = jnp.ones((1, c_res), jnp.float32)        # BatchNorm defaults
            beta = jnp.zeros((1, c_res), jnp.float32)
            run_mean = jnp.zeros((1, c_res), jnp.float32)
            run_var = jnp.ones((1, c_res), jnp.float32)
            scale = gamma / jnp.sqrt(run_var + eps)
            shift = beta - run_mean * scale
            params['layers'].append(dict(
                dilation=dil,
                filt_w0=nrm((c_res, c_res)), filt_w1=nrm((c_res, c_res)),
                filt_b=nrm((1, c_res)),
                gate_w0=nrm((c_res, c_res)), gate_w1=nrm((c_res, c_res)),
                gate_b=nrm((1, c_res)),
                skip_w=nrm((c_res, c_skip)), skip_b=nrm((1, c_skip)),
                gcn_w=nrm((5 * c_res, c_res)), gcn_b=nrm((1, c_res)),
                bn_scale=scale, bn_shift=shift,
            ))
            dil += 1
    return params


# ------------------- weight packing (plain XLA, outside kernel) --------------

def _prepare_fused(params, supports):
    """Expand per-channel weights to per-(node,channel) operators, fuse & fold."""
    c_res = params['start_w'].shape[1]
    V = supports[0].shape[0]
    eye_v = jnp.eye(V, dtype=jnp.float32)

    def kron_i(w):                   # block-diagonal per-node 1x1 conv
        return jnp.kron(eye_v, w)

    def tile_v(b):                   # per-channel bias -> per-(node,channel)
        return jnp.tile(b, (1, V))

    # propagation matrices in reference concat order: A1, A1^2, A2, A2^2
    a_pows = []
    for a in supports:
        a = a.astype(jnp.float32)
        a_pows.append(a)
        a_pows.append(a @ a)

    wpk, bpk, wsg, bgcn_eff, bnsc = [], [], [], [], []
    bskip_sum = None
    for lp in params['layers']:
        # gated unit, one matrix: rows = [delayed tap (w0) ; current tap (w1)],
        # cols = [filter | gate]
        w0 = jnp.concatenate([kron_i(lp['filt_w0']), kron_i(lp['gate_w0'])], axis=1)
        w1 = jnp.concatenate([kron_i(lp['filt_w1']), kron_i(lp['gate_w1'])], axis=1)
        wpk.append(jnp.concatenate([w0, w1], axis=0))                  # [2VC, 2VC]
        bpk.append(jnp.concatenate([tile_v(lp['filt_b']), tile_v(lp['gate_b'])], axis=1))

        # skip biases are summed once into the skip accumulator initializer
        bs = tile_v(lp['skip_b'])
        bskip_sum = bs if bskip_sum is None else bskip_sum + bs

        # graph conv (x, A1x, A1^2x, A2x, A2^2x -> MLP) as one matrix
        # kron(I,W0) + sum_k kron(A_k, W_k), with BN scale folded into columns
        m = kron_i(lp['gcn_w'][:c_res])
        for k, ak in enumerate(a_pows):
            wk = lp['gcn_w'][(k + 1) * c_res:(k + 2) * c_res]
            m = m + jnp.kron(ak, wk)
        sc = tile_v(lp['bn_scale'])                                    # [1, VC]
        sh = tile_v(lp['bn_shift'])
        # fused [skip conv | scaled gcn] matrix -> one matmul per layer
        wsg.append(jnp.concatenate([kron_i(lp['skip_w']), m * sc], axis=1))
        bgcn_eff.append(tile_v(lp['gcn_b']) * sc + sh)
        bnsc.append(sc)

    bf16 = jnp.bfloat16
    return dict(
        start_w=kron_i(params['start_w']).astype(bf16),
        start_b=tile_v(params['start_b']),
        end_w=kron_i(params['end_w']).astype(bf16),
        end_b=tile_v(params['end_b']),
        wpk=jnp.stack(wpk).astype(bf16),      # [L, 2VC, 2VC]
        bpk=jnp.stack(bpk),                   # [L, 1, 2VC]
        wsg=jnp.stack(wsg).astype(bf16),      # [L, VC, 4VC+VC]
        bskip0=bskip_sum,                     # [1, 4VC]
        bgcn=jnp.stack(bgcn_eff),             # [L, 1, VC]
        bnsc=jnp.stack(bnsc),                 # [L, 1, VC]
    )


# ------------------------------ fused kernel --------------------------------

def _encoder_kernel(x_ref, start_w_ref, start_b_ref,
                    wpk_ref, bpk_ref, wsg_ref,
                    bskip0_ref, bgcn_ref, bnsc_ref,
                    end_w_ref, end_b_ref, out_ref, delay_ref, *, vc, vskip):
    f32, bf16 = jnp.float32, jnp.bfloat16
    rows = out_ref.shape[0]

    def mm(a_bf16, w_bf16):  # bf16 MXU inputs, f32 accumulation
        return jnp.dot(a_bf16, w_bf16, preferred_element_type=f32)

    # zero the delay-buffer pad region once: rows t < d read exact zeros,
    # matching the reference's end-aligned trimming semantics.
    delay_ref[pl.ds(0, _DELAY_PAD), :] = jnp.zeros((_DELAY_PAD, vc), f32)

    # start 1x1 conv (input already bf16)
    x = mm(x_ref[...], start_w_ref[...]) + start_b_ref[...]            # [rows, VC] f32
    # skip accumulator, pre-loaded with the summed skip-conv biases
    skip = jnp.broadcast_to(bskip0_ref[...], (rows, vskip))            # [rows, 4VC] f32

    for li in range(NUM_LAYERS):
        d = DILATIONS[li]
        residual = x
        # dilated (1,2) temporal conv, end-aligned: x_del[t] = x[t - d]
        # (aligned store at offset 8, static read at offset 8 - d; no MXU)
        delay_ref[pl.ds(_DELAY_PAD, rows), :] = x
        x_del = delay_ref[pl.ds(_DELAY_PAD - d, rows), :]
        # gated unit: ONE matmul on the lane-concat [x_del | x], then tanh*sigmoid
        z = mm(jnp.concatenate([x_del, x], axis=1).astype(bf16),
               wpk_ref[li]) + bpk_ref[li]                              # [rows, 2VC]
        g = jnp.tanh(z[:, :vc]) * jax.nn.sigmoid(z[:, vc:])            # [rows, VC]
        # fused [skip conv | graph conv + MLP (BN scale folded)]: ONE matmul,
        # static lane-slice at 4*VC splits the two results.
        h = mm(g.astype(bf16), wsg_ref[li])                            # [rows, 4VC+VC]
        skip = skip + h[:, :vskip]
        x = h[:, vskip:] + bgcn_ref[li] + residual * bnsc_ref[li]

    # relu(skip) -> end 1x1 conv, single lane-dense store to HBM
    out_ref[...] = mm(jnp.maximum(skip, 0.0).astype(bf16),
                      end_w_ref[...]) + end_b_ref[...]


# --------------------------------- forward ----------------------------------

def gwavenet_encoder_forward(params, inp, supports):
    # inp: [B, V, T, in_dim] ; supports: list of 2 adjacency matrices [V, V]
    # TODO(synk): MaskGenerator is not defined in the reference source; we run
    # the mask_ratio == 0 path, so mask is None and empty_token is unused.
    B, V, T, din = inp.shape
    rf = receptive_field()
    x = inp.astype(jnp.float32)
    if T < rf:
        x = jnp.pad(x, ((0, 0), (0, 0), (rf - T, 0), (0, 0)))
    t_pad = x.shape[2]
    t_out = t_pad - _TIME_SHRINK

    c_res = params['start_w'].shape[1]
    c_skip = params['layers'][0]['skip_w'].shape[1]
    c_end = params['end_w'].shape[1]
    vin, vc, vskip, vend = V * din, V * c_res, V * c_skip, V * c_end
    rows = B * t_pad

    fused = _prepare_fused(params, supports)

    # [B, V, T, din] -> rows=(b, t), cols=(v, c); batch folded into rows, bf16 in
    x2 = jnp.transpose(x, (0, 2, 1, 3)).reshape(rows, vin).astype(jnp.bfloat16)

    kernel = functools.partial(_encoder_kernel, vc=vc, vskip=vskip)

    # Single grid-less pallas_call: every operand is a full-array VMEM block,
    # weights land in VMEM exactly once, no per-batch serial grid steps.
    out2 = pl.pallas_call(
        kernel,
        out_shape=jax.ShapeDtypeStruct((rows, vend), jnp.float32),
        scratch_shapes=[pltpu.VMEM((_DELAY_PAD + rows, vc), jnp.float32)],
        compiler_params=pltpu.CompilerParams(
            vmem_limit_bytes=32 * 1024 * 1024),
    )(x2, fused['start_w'], fused['start_b'],
      fused['wpk'], fused['bpk'], fused['wsg'],
      fused['bskip0'], fused['bgcn'], fused['bnsc'],
      fused['end_w'], fused['end_b'])

    # keep only the valid (end-aligned) time steps: [B, V, t_out, c_end]
    out = out2.reshape(B, t_pad, V, c_end)[:, t_pad - t_out:, :, :]
    return jnp.transpose(out, (0, 2, 1, 3)), None


# ------------------------ plain-JAX reference (f32) -------------------------

def _reference_forward(params, inp, supports):
    B, V, T, din = inp.shape
    rf = receptive_field()
    x = inp.astype(jnp.float32)
    if T < rf:
        x = jnp.pad(x, ((0, 0), (0, 0), (rf - T, 0), (0, 0)))
    x = jnp.einsum('bvtc,cd->bvtd', x, params['start_w']) + params['start_b'][0]
    skip = None
    for li, lp in enumerate(params['layers']):
        d = DILATIONS[li]
        residual = x
        tc = x.shape[2]
        xa, xb = x[:, :, :tc - d, :], x[:, :, d:, :]
        filt = jnp.tanh(jnp.einsum('bvtc,cd->bvtd', xa, lp['filt_w0'])
                        + jnp.einsum('bvtc,cd->bvtd', xb, lp['filt_w1'])
                        + lp['filt_b'][0])
        gate = jax.nn.sigmoid(jnp.einsum('bvtc,cd->bvtd', xa, lp['gate_w0'])
                              + jnp.einsum('bvtc,cd->bvtd', xb, lp['gate_w1'])
                              + lp['gate_b'][0])
        x = filt * gate
        s = jnp.einsum('bvtc,cd->bvtd', x, lp['skip_w']) + lp['skip_b'][0]
        skip = s if skip is None else s + skip[:, :, skip.shape[2] - s.shape[2]:, :]
        outs = [x]
        for a in supports:
            x1 = jnp.einsum('bvtc,vw->bwtc', x, a)
            outs.append(x1)
            x2 = jnp.einsum('bvtc,vw->bwtc', x1, a)
            outs.append(x2)
        h = jnp.concatenate(outs, axis=-1)
        x = jnp.einsum('bvtc,cd->bvtd', h, lp['gcn_w']) + lp['gcn_b'][0]
        x = x + residual[:, :, residual.shape[2] - x.shape[2]:, :]
        x = x * lp['bn_scale'][0] + lp['bn_shift'][0]
    return (jnp.einsum('bvtc,cd->bvtd', jnp.maximum(skip, 0.0),
                       params['end_w']) + params['end_b'][0])


# ----------------------------------- main ------------------------------------

if __name__ == "__main__":
    key = jax.random.PRNGKey(0)
    k_params, k_x, k_a1, k_a2 = jax.random.split(key, 4)

    # model_config: dropout=0.1, mask_ratio=0.0, input_dim=2, embed_dim=32, end_dim=32
    in_dim, embed_dim, end_dim = 2, 32, 32
    B, V, T = 2, 8, 16   # T == receptive_field (16), so no left padding needed

    params = init_params(k_params, in_dim, embed_dim, end_dim)
    x = jax.random.normal(k_x, (B, V, T, in_dim), jnp.float32)
    a1 = jax.nn.softmax(jax.random.normal(k_a1, (V, V), jnp.float32), axis=1)
    a2 = jax.nn.softmax(jax.random.normal(k_a2, (V, V), jnp.float32), axis=1)

    fwd = jax.jit(gwavenet_encoder_forward)
    out, mask = fwd(params, x, [a1, a2])
    out = jax.block_until_ready(out)

    assert out.shape == (B, V, 4, end_dim), out.shape   # output_temporal_length = 4
    assert mask is None

    # correctness check vs. plain-JAX f32 reference (loose tol for bf16 MXU)
    ref = _reference_forward(params, x, [a1, a2])
    err = float(jnp.max(jnp.abs(out - ref)))
    scale = float(jnp.max(jnp.abs(ref)))
    assert err <= 0.05 + 0.05 * scale, (err, scale)

    print("KERNEL_OK")
</pallas_src>

<mosaic_0001>
module attributes {stable_mosaic.version = 11 : i64} {
  func.func @_encoder_kernel(%arg0: memref<32x16xbf16, #tpu.memory_space<vmem>>, %arg1: memref<16x256xbf16, #tpu.memory_space<vmem>>, %arg2: memref<1x256xf32, #tpu.memory_space<vmem>>, %arg3: memref<6x512x512xbf16, #tpu.memory_space<vmem>>, %arg4: memref<6x1x512xf32, #tpu.memory_space<vmem>>, %arg5: memref<6x256x1280xbf16, #tpu.memory_space<vmem>>, %arg6: memref<1x1024xf32, #tpu.memory_space<vmem>>, %arg7: memref<6x1x256xf32, #tpu.memory_space<vmem>>, %arg8: memref<6x1x256xf32, #tpu.memory_space<vmem>>, %arg9: memref<1024x256xbf16, #tpu.memory_space<vmem>>, %arg10: memref<1x256xf32, #tpu.memory_space<vmem>>, %arg11: memref<32x256xf32, #tpu.memory_space<vmem>>, %arg12: memref<40x256xf32, #tpu.memory_space<vmem>>) attributes {dimension_semantics = [], scalar_prefetch = 0 : i64, scratch_operands = 1 : i64, tpu.core_type = #tpu.core_type<tc>} {
    %cst = arith.constant 0.000000e+00 : f32
    %0 = vector.broadcast %cst : f32 to vector<8x256xf32>
    %c0 = arith.constant 0 : index
    %c0_0 = arith.constant 0 : index
    %1 = vector.load %arg12[%c0, %c0_0] : memref<40x256xf32, #tpu.memory_space<vmem>>, vector<8x256xf32>
    tpu.vector_store %arg12[%c0, %c0_0], %0 {strides = array<i32>} : memref<40x256xf32, #tpu.memory_space<vmem>>, vector<8x256xf32>,
    %c0_1 = arith.constant 0 : index
    %c0_2 = arith.constant 0 : index
    %2 = vector.load %arg0[%c0_1, %c0_2] : memref<32x16xbf16, #tpu.memory_space<vmem>>, vector<32x16xbf16>
    %c0_3 = arith.constant 0 : index
    %c0_4 = arith.constant 0 : index
    %3 = vector.load %arg1[%c0_3, %c0_4] : memref<16x256xbf16, #tpu.memory_space<vmem>>, vector<16x256xbf16>
    %cst_5 = arith.constant dense<0.000000e+00> : vector<32x256xf32>
    %4 = tpu.matmul %2, %3, %cst_5 {dimension_numbers = #tpu.dot_dimension_numbers<[1], [0], [0], [1], [0, 0, 1, 1], [], []>} : vector<32x16xbf16>, vector<16x256xbf16>, vector<32x256xf32> -> vector<32x256xf32>
    %c0_6 = arith.constant 0 : index
    %c0_7 = arith.constant 0 : index
    %5 = vector.load %arg2[%c0_6, %c0_7] : memref<1x256xf32, #tpu.memory_space<vmem>>, vector<1x256xf32>
    %6 = vector.broadcast %5 : vector<1x256xf32> to vector<32x256xf32>
    %7 = arith.addf %4, %6 : vector<32x256xf32>
    %c0_8 = arith.constant 0 : index
    %c0_9 = arith.constant 0 : index
    %8 = vector.load %arg6[%c0_8, %c0_9] : memref<1x1024xf32, #tpu.memory_space<vmem>>, vector<1x1024xf32>
    %9 = vector.shape_cast %8 : vector<1x1024xf32> to vector<1x1024xf32>
    %10 = vector.broadcast %9 : vector<1x1024xf32> to vector<32x1024xf32>
    %c8 = arith.constant 8 : index
    %c0_10 = arith.constant 0 : index
    %11 = vector.load %arg12[%c8, %c0_10] : memref<40x256xf32, #tpu.memory_space<vmem>>, vector<32x256xf32>
    tpu.vector_store %arg12[%c8, %c0_10], %7 {strides = array<i32>} : memref<40x256xf32, #tpu.memory_space<vmem>>, vector<32x256xf32>,
    %c7 = arith.constant 7 : index
    %c0_11 = arith.constant 0 : index
    %12 = vector.load %arg12[%c7, %c0_11] : memref<40x256xf32, #tpu.memory_space<vmem>>, vector<32x256xf32>
    %13 = tpu.concatenate %12, %7 in 1 : vector<32x256xf32>, vector<32x256xf32> -> vector<32x512xf32>
    %14 = arith.truncf %13 : vector<32x512xf32> to vector<32x512xbf16>
    %c0_12 = arith.constant 0 : index
    %c0_13 = arith.constant 0 : index
    %c0_14 = arith.constant 0 : index
    %15 = vector.load %arg3[%c0_12, %c0_13, %c0_14] : memref<6x512x512xbf16, #tpu.memory_space<vmem>>, vector<1x512x512xbf16>
    %16 = vector.shape_cast %15 : vector<1x512x512xbf16> to vector<512x512xbf16>
    %cst_15 = arith.constant dense<0.000000e+00> : vector<32x512xf32>
    %17 = tpu.matmul %14, %16, %cst_15 {dimension_numbers = #tpu.dot_dimension_numbers<[1], [0], [0], [1], [0, 0, 1, 1], [], []>} : vector<32x512xbf16>, vector<512x512xbf16>, vector<32x512xf32> -> vector<32x512xf32>
    %c0_16 = arith.constant 0 : index
    %c0_17 = arith.constant 0 : index
    %c0_18 = arith.constant 0 : index
    %18 = vector.load %arg4[%c0_16, %c0_17, %c0_18] : memref<6x1x512xf32, #tpu.memory_space<vmem>>, vector<1x1x512xf32>
    %19 = vector.shape_cast %18 : vector<1x1x512xf32> to vector<1x512xf32>
    %20 = vector.broadcast %19 : vector<1x512xf32> to vector<32x512xf32>
    %21 = arith.addf %17, %20 : vector<32x512xf32>
    %22 = vector.extract_strided_slice %21 {offsets = [0, 0], sizes = [32, 256], strides = [1, 1]} : vector<32x512xf32> to vector<32x256xf32>
    %23 = math.tanh %22 : vector<32x256xf32>
    %24 = vector.extract_strided_slice %21 {offsets = [0, 256], sizes = [32, 256], strides = [1, 1]} : vector<32x512xf32> to vector<32x256xf32>
    %25 = arith.negf %24 : vector<32x256xf32>
    %26 = math.exp %25 : vector<32x256xf32>
    %cst_19 = arith.constant 1.000000e+00 : f32
    %27 = vector.broadcast %cst_19 : f32 to vector<32x256xf32>
    %28 = arith.addf %27, %26 : vector<32x256xf32>
    %29 = arith.divf %27, %28 : vector<32x256xf32>
    %30 = arith.mulf %23, %29 : vector<32x256xf32>
    %31 = arith.truncf %30 : vector<32x256xf32> to vector<32x256xbf16>
    %c0_20 = arith.constant 0 : index
    %c0_21 = arith.constant 0 : index
    %c0_22 = arith.constant 0 : index
    %32 = vector.load %arg5[%c0_20, %c0_21, %c0_22] : memref<6x256x1280xbf16, #tpu.memory_space<vmem>>, vector<1x256x1280xbf16>
    %33 = vector.shape_cast %32 : vector<1x256x1280xbf16> to vector<256x1280xbf16>
    %cst_23 = arith.constant dense<0.000000e+00> : vector<32x1280xf32>
    %34 = tpu.matmul %31, %33, %cst_23 {dimension_numbers = #tpu.dot_dimension_numbers<[1], [0], [0], [1], [0, 0, 1, 1], [], []>} : vector<32x256xbf16>, vector<256x1280xbf16>, vector<32x1280xf32> -> vector<32x1280xf32>
    %35 = vector.extract_strided_slice %34 {offsets = [0, 0], sizes = [32, 1024], strides = [1, 1]} : vector<32x1280xf32> to vector<32x1024xf32>
    %36 = arith.addf %10, %35 : vector<32x1024xf32>
    %37 = vector.extract_strided_slice %34 {offsets = [0, 1024], sizes = [32, 256], strides = [1, 1]} : vector<32x1280xf32> to vector<32x256xf32>
    %c0_24 = arith.constant 0 : index
    %c0_25 = arith.constant 0 : index
    %c0_26 = arith.constant 0 : index
    %38 = vector.load %arg7[%c0_24, %c0_25, %c0_26] : memref<6x1x256xf32, #tpu.memory_space<vmem>>, vector<1x1x256xf32>
    %39 = vector.shape_cast %38 : vector<1x1x256xf32> to vector<1x256xf32>
    %40 = vector.broadcast %39 : vector<1x256xf32> to vector<32x256xf32>
    %41 = arith.addf %37, %40 : vector<32x256xf32>
    %c0_27 = arith.constant 0 : index
    %c0_28 = arith.constant 0 : index
    %c0_29 = arith.constant 0 : index
    %42 = vector.load %arg8[%c0_27, %c0_28, %c0_29] : memref<6x1x256xf32, #tpu.memory_space<vmem>>, vector<1x1x256xf32>
    %43 = vector.shape_cast %42 : vector<1x1x256xf32> to vector<1x256xf32>
    %44 = vector.broadcast %43 : vector<1x256xf32> to vector<32x256xf32>
    %45 = arith.mulf %7, %44 : vector<32x256xf32>
    %46 = arith.addf %41, %45 : vector<32x256xf32>
    %c8_30 = arith.constant 8 : index
    %c0_31 = arith.constant 0 : index
    %47 = vector.load %arg12[%c8_30, %c0_31] : memref<40x256xf32, #tpu.memory_space<vmem>>, vector<32x256xf32>
    tpu.vector_store %arg12[%c8_30, %c0_31], %46 {strides = array<i32>} : memref<40x256xf32, #tpu.memory_space<vmem>>, vector<32x256xf32>,
    %c6 = arith.constant 6 : index
    %c0_32 = arith.constant 0 : index
    %48 = vector.load %arg12[%c6, %c0_32] : memref<40x256xf32, #tpu.memory_space<vmem>>, vector<32x256xf32>
    %49 = tpu.concatenate %48, %46 in 1 : vector<32x256xf32>, vector<32x256xf32> -> vector<32x512xf32>
    %50 = arith.truncf %49 : vector<32x512xf32> to vector<32x512xbf16>
    %c1 = arith.constant 1 : index
    %c0_33 = arith.constant 0 : index
    %c0_34 = arith.constant 0 : index
    %51 = vector.load %arg3[%c1, %c0_33, %c0_34] : memref<6x512x512xbf16, #tpu.memory_space<vmem>>, vector<1x512x512xbf16>
    %52 = vector.shape_cast %51 : vector<1x512x512xbf16> to vector<512x512xbf16>
    %cst_35 = arith.constant dense<0.000000e+00> : vector<32x512xf32>
    %53 = tpu.matmul %50, %52, %cst_35 {dimension_numbers = #tpu.dot_dimension_numbers<[1], [0], [0], [1], [0, 0, 1, 1], [], []>} : vector<32x512xbf16>, vector<512x512xbf16>, vector<32x512xf32> -> vector<32x512xf32>
    %c1_36 = arith.constant 1 : index
    %c0_37 = arith.constant 0 : index
    %c0_38 = arith.constant 0 : index
    %54 = vector.load %arg4[%c1_36, %c0_37, %c0_38] : memref<6x1x512xf32, #tpu.memory_space<vmem>>, vector<1x1x512xf32>
    %55 = vector.shape_cast %54 : vector<1x1x512xf32> to vector<1x512xf32>
    %56 = vector.broadcast %55 : vector<1x512xf32> to vector<32x512xf32>
    %57 = arith.addf %53, %56 : vector<32x512xf32>
    %58 = vector.extract_strided_slice %57 {offsets = [0, 0], sizes = [32, 256], strides = [1, 1]} : vector<32x512xf32> to vector<32x256xf32>
    %59 = math.tanh %58 : vector<32x256xf32>
    %60 = vector.extract_strided_slice %57 {offsets = [0, 256], sizes = [32, 256], strides = [1, 1]} : vector<32x512xf32> to vector<32x256xf32>
    %61 = arith.negf %60 : vector<32x256xf32>
    %62 = math.exp %61 : vector<32x256xf32>
    %cst_39 = arith.constant 1.000000e+00 : f32
    %63 = vector.broadcast %cst_39 : f32 to vector<32x256xf32>
    %64 = arith.addf %63, %62 : vector<32x256xf32>
    %65 = arith.divf %63, %64 : vector<32x256xf32>
    %66 = arith.mulf %59, %65 : vector<32x256xf32>
    %67 = arith.truncf %66 : vector<32x256xf32> to vector<32x256xbf16>
    %c1_40 = arith.constant 1 : index
    %c0_41 = arith.constant 0 : index
    %c0_42 = arith.constant 0 : index
    %68 = vector.load %arg5[%c1_40, %c0_41, %c0_42] : memref<6x256x1280xbf16, #tpu.memory_space<vmem>>, vector<1x256x1280xbf16>
    %69 = vector.shape_cast %68 : vector<1x256x1280xbf16> to vector<256x1280xbf16>
    %cst_43 = arith.constant dense<0.000000e+00> : vector<32x1280xf32>
    %70 = tpu.matmul %67, %69, %cst_43 {dimension_numbers = #tpu.dot_dimension_numbers<[1], [0], [0], [1], [0, 0, 1, 1], [], []>} : vector<32x256xbf16>, vector<256x1280xbf16>, vector<32x1280xf32> -> vector<32x1280xf32>
    %71 = vector.extract_strided_slice %70 {offsets = [0, 0], sizes = [32, 1024], strides = [1, 1]} : vector<32x1280xf32> to vector<32x1024xf32>
    %72 = arith.addf %36, %71 : vector<32x1024xf32>
    %73 = vector.extract_strided_slice %70 {offsets = [0, 1024], sizes = [32, 256], strides = [1, 1]} : vector<32x1280xf32> to vector<32x256xf32>
    %c1_44 = arith.constant 1 : index
    %c0_45 = arith.constant 0 : index
    %c0_46 = arith.constant 0 : index
    %74 = vector.load %arg7[%c1_44, %c0_45, %c0_46] : memref<6x1x256xf32, #tpu.memory_space<vmem>>, vector<1x1x256xf32>
    %75 = vector.shape_cast %74 : vector<1x1x256xf32> to vector<1x256xf32>
    %76 = vector.broadcast %75 : vector<1x256xf32> to vector<32x256xf32>
    %77 = arith.addf %73, %76 : vector<32x256xf32>
    %c1_47 = arith.constant 1 : index
    %c0_48 = arith.constant 0 : index
    %c0_49 = arith.constant 0 : index
    %78 = vector.load %arg8[%c1_47, %c0_48, %c0_49] : memref<6x1x256xf32, #tpu.memory_space<vmem>>, vector<1x1x256xf32>
    %79 = vector.shape_cast %78 : vector<1x1x256xf32> to vector<1x256xf32>
    %80 = vector.broadcast %79 : vector<1x256xf32> to vector<32x256xf32>
    %81 = arith.mulf %46, %80 : vector<32x256xf32>
    %82 = arith.addf %77, %81 : vector<32x256xf32>
    %c8_50 = arith.constant 8 : index
    %c0_51 = arith.constant 0 : index
    %83 = vector.load %arg12[%c8_50, %c0_51] : memref<40x256xf32, #tpu.memory_space<vmem>>, vector<32x256xf32>
    tpu.vector_store %arg12[%c8_50, %c0_51], %82 {strides = array<i32>} : memref<40x256xf32, #tpu.memory_space<vmem>>, vector<32x256xf32>,
    %c5 = arith.constant 5 : index
    %c0_52 = arith.constant 0 : index
    %84 = vector.load %arg12[%c5, %c0_52] : memref<40x256xf32, #tpu.memory_space<vmem>>, vector<32x256xf32>
    %85 = tpu.concatenate %84, %82 in 1 : vector<32x256xf32>, vector<32x256xf32> -> vector<32x512xf32>
    %86 = arith.truncf %85 : vector<32x512xf32> to vector<32x512xbf16>
    %c2 = arith.constant 2 : index
    %c0_53 = arith.constant 0 : index
    %c0_54 = arith.constant 0 : index
    %87 = vector.load %arg3[%c2, %c0_53, %c0_54] : memref<6x512x512xbf16, #tpu.memory_space<vmem>>, vector<1x512x512xbf16>
    %88 = vector.shape_cast %87 : vector<1x512x512xbf16> to vector<512x512xbf16>
    %cst_55 = arith.constant dense<0.000000e+00> : vector<32x512xf32>
    %89 = tpu.matmul %86, %88, %cst_55 {dimension_numbers = #tpu.dot_dimension_numbers<[1], [0], [0], [1], [0, 0, 1, 1], [], []>} : vector<32x512xbf16>, vector<512x512xbf16>, vector<32x512xf32> -> vector<32x512xf32>
    %c2_56 = arith.constant 2 : index
    %c0_57 = arith.constant 0 : index
    %c0_58 = arith.constant 0 : index
    %90 = vector.load %arg4[%c2_56, %c0_57, %c0_58] : memref<6x1x512xf32, #tpu.memory_space<vmem>>, vector<1x1x512xf32>
    %91 = vector.shape_cast %90 : vector<1x1x512xf32> to vector<1x512xf32>
    %92 = vector.broadcast %91 : vector<1x512xf32> to vector<32x512xf32>
    %93 = arith.addf %89, %92 : vector<32x512xf32>
    %94 = vector.extract_strided_slice %93 {offsets = [0, 0], sizes = [32, 256], strides = [1, 1]} : vector<32x512xf32> to vector<32x256xf32>
    %95 = math.tanh %94 : vector<32x256xf32>
    %96 = vector.extract_strided_slice %93 {offsets = [0, 256], sizes = [32, 256], strides = [1, 1]} : vector<32x512xf32> to vector<32x256xf32>
    %97 = arith.negf %96 : vector<32x256xf32>
    %98 = math.exp %97 : vector<32x256xf32>
    %cst_59 = arith.constant 1.000000e+00 : f32
    %99 = vector.broadcast %cst_59 : f32 to vector<32x256xf32>
    %100 = arith.addf %99, %98 : vector<32x256xf32>
    %101 = arith.divf %99, %100 : vector<32x256xf32>
    %102 = arith.mulf %95, %101 : vector<32x256xf32>
    %103 = arith.truncf %102 : vector<32x256xf32> to vector<32x256xbf16>
    %c2_60 = arith.constant 2 : index
    %c0_61 = arith.constant 0 : index
    %c0_62 = arith.constant 0 : index
    %104 = vector.load %arg5[%c2_60, %c0_61, %c0_62] : memref<6x256x1280xbf16, #tpu.memory_space<vmem>>, vector<1x256x1280xbf16>
    %105 = vector.shape_cast %104 : vector<1x256x1280xbf16> to vector<256x1280xbf16>
    %cst_63 = arith.constant dense<0.000000e+00> : vector<32x1280xf32>
    %106 = tpu.matmul %103, %105, %cst_63 {dimension_numbers = #tpu.dot_dimension_numbers<[1], [0], [0], [1], [0, 0, 1, 1], [], []>} : vector<32x256xbf16>, vector<256x1280xbf16>, vector<32x1280xf32> -> vector<32x1280xf32>
    %107 = vector.extract_strided_slice %106 {offsets = [0, 0], sizes = [32, 1024], strides = [1, 1]} : vector<32x1280xf32> to vector<32x1024xf32>
    %108 = arith.addf %72, %107 : vector<32x1024xf32>
    %109 = vector.extract_strided_slice %106 {offsets = [0, 1024], sizes = [32, 256], strides = [1, 1]} : vector<32x1280xf32> to vector<32x256xf32>
    %c2_64 = arith.constant 2 : index
    %c0_65 = arith.constant 0 : index
    %c0_66 = arith.constant 0 : index
    %110 = vector.load %arg7[%c2_64, %c0_65, %c0_66] : memref<6x1x256xf32, #tpu.memory_space<vmem>>, vector<1x1x256xf32>
    %111 = vector.shape_cast %110 : vector<1x1x256xf32> to vector<1x256xf32>
    %112 = vector.broadcast %111 : vector<1x256xf32> to vector<32x256xf32>
    %113 = arith.addf %109, %112 : vector<32x256xf32>
    %c2_67 = arith.constant 2 : index
    %c0_68 = arith.constant 0 : index
    %c0_69 = arith.constant 0 : index
    %114 = vector.load %arg8[%c2_67, %c0_68, %c0_69] : memref<6x1x256xf32, #tpu.memory_space<vmem>>, vector<1x1x256xf32>
    %115 = vector.shape_cast %114 : vector<1x1x256xf32> to vector<1x256xf32>
    %116 = vector.broadcast %115 : vector<1x256xf32> to vector<32x256xf32>
    %117 = arith.mulf %82, %116 : vector<32x256xf32>
    %118 = arith.addf %113, %117 : vector<32x256xf32>
    %c8_70 = arith.constant 8 : index
    %c0_71 = arith.constant 0 : index
    %119 = vector.load %arg12[%c8_70, %c0_71] : memref<40x256xf32, #tpu.memory_space<vmem>>, vector<32x256xf32>
    tpu.vector_store %arg12[%c8_70, %c0_71], %118 {strides = array<i32>} : memref<40x256xf32, #tpu.memory_space<vmem>>, vector<32x256xf32>,
    %c7_72 = arith.constant 7 : index
    %c0_73 = arith.constant 0 : index
    %120 = vector.load %arg12[%c7_72, %c0_73] : memref<40x256xf32, #tpu.memory_space<vmem>>, vector<32x256xf32>
    %121 = tpu.concatenate %120, %118 in 1 : vector<32x256xf32>, vector<32x256xf32> -> vector<32x512xf32>
    %122 = arith.truncf %121 : vector<32x512xf32> to vector<32x512xbf16>
    %c3 = arith.constant 3 : index
    %c0_74 = arith.constant 0 : index
    %c0_75 = arith.constant 0 : index
    %123 = vector.load %arg3[%c3, %c0_74, %c0_75] : memref<6x512x512xbf16, #tpu.memory_space<vmem>>, vector<1x512x512xbf16>
    %124 = vector.shape_cast %123 : vector<1x512x512xbf16> to vector<512x512xbf16>
    %cst_76 = arith.constant dense<0.000000e+00> : vector<32x512xf32>
    %125 = tpu.matmul %122, %124, %cst_76 {dimension_numbers = #tpu.dot_dimension_numbers<[1], [0], [0], [1], [0, 0, 1, 1], [], []>} : vector<32x512xbf16>, vector<512x512xbf16>, vector<32x512xf32> -> vector<32x512xf32>
    %c3_77 = arith.constant 3 : index
    %c0_78 = arith.constant 0 : index
    %c0_79 = arith.constant 0 : index
    %126 = vector.load %arg4[%c3_77, %c0_78, %c0_79] : memref<6x1x512xf32, #tpu.memory_space<vmem>>, vector<1x1x512xf32>
    %127 = vector.shape_cast %126 : vector<1x1x512xf32> to vector<1x512xf32>
    %128 = vector.broadcast %127 : vector<1x512xf32> to vector<32x512xf32>
    %129 = arith.addf %125, %128 : vector<32x512xf32>
    %130 = vector.extract_strided_slice %129 {offsets = [0, 0], sizes = [32, 256], strides = [1, 1]} : vector<32x512xf32> to vector<32x256xf32>
    %131 = math.tanh %130 : vector<32x256xf32>
    %132 = vector.extract_strided_slice %129 {offsets = [0, 256], sizes = [32, 256], strides = [1, 1]} : vector<32x512xf32> to vector<32x256xf32>
    %133 = arith.negf %132 : vector<32x256xf32>
    %134 = math.exp %133 : vector<32x256xf32>
    %cst_80 = arith.constant 1.000000e+00 : f32
    %135 = vector.broadcast %cst_80 : f32 to vector<32x256xf32>
    %136 = arith.addf %135, %134 : vector<32x256xf32>
    %137 = arith.divf %135, %136 : vector<32x256xf32>
    %138 = arith.mulf %131, %137 : vector<32x256xf32>
    %139 = arith.truncf %138 : vector<32x256xf32> to vector<32x256xbf16>
    %c3_81 = arith.constant 3 : index
    %c0_82 = arith.constant 0 : index
    %c0_83 = arith.constant 0 : index
    %140 = vector.load %arg5[%c3_81, %c0_82, %c0_83] : memref<6x256x1280xbf16, #tpu.memory_space<vmem>>, vector<1x256x1280xbf16>
    %141 = vector.shape_cast %140 : vector<1x256x1280xbf16> to vector<256x1280xbf16>
    %cst_84 = arith.constant dense<0.000000e+00> : vector<32x1280xf32>
    %142 = tpu.matmul %139, %141, %cst_84 {dimension_numbers = #tpu.dot_dimension_numbers<[1], [0], [0], [1], [0, 0, 1, 1], [], []>} : vector<32x256xbf16>, vector<256x1280xbf16>, vector<32x1280xf32> -> vector<32x1280xf32>
    %143 = vector.extract_strided_slice %142 {offsets = [0, 0], sizes = [32, 1024], strides = [1, 1]} : vector<32x1280xf32> to vector<32x1024xf32>
    %144 = arith.addf %108, %143 : vector<32x1024xf32>
    %145 = vector.extract_strided_slice %142 {offsets = [0, 1024], sizes = [32, 256], strides = [1, 1]} : vector<32x1280xf32> to vector<32x256xf32>
    %c3_85 = arith.constant 3 : index
    %c0_86 = arith.constant 0 : index
    %c0_87 = arith.constant 0 : index
    %146 = vector.load %arg7[%c3_85, %c0_86, %c0_87] : memref<6x1x256xf32, #tpu.memory_space<vmem>>, vector<1x1x256xf32>
    %147 = vector.shape_cast %146 : vector<1x1x256xf32> to vector<1x256xf32>
    %148 = vector.broadcast %147 : vector<1x256xf32> to vector<32x256xf32>
    %149 = arith.addf %145, %148 : vector<32x256xf32>
    %c3_88 = arith.constant 3 : index
    %c0_89 = arith.constant 0 : index
    %c0_90 = arith.constant 0 : index
    %150 = vector.load %arg8[%c3_88, %c0_89, %c0_90] : memref<6x1x256xf32, #tpu.memory_space<vmem>>, vector<1x1x256xf32>
    %151 = vector.shape_cast %150 : vector<1x1x256xf32> to vector<1x256xf32>
    %152 = vector.broadcast %151 : vector<1x256xf32> to vector<32x256xf32>
    %153 = arith.mulf %118, %152 : vector<32x256xf32>
    %154 = arith.addf %149, %153 : vector<32x256xf32>
    %c8_91 = arith.constant 8 : index
    %c0_92 = arith.constant 0 : index
    %155 = vector.load %arg12[%c8_91, %c0_92] : memref<40x256xf32, #tpu.memory_space<vmem>>, vector<32x256xf32>
    tpu.vector_store %arg12[%c8_91, %c0_92], %154 {strides = array<i32>} : memref<40x256xf32, #tpu.memory_space<vmem>>, vector<32x256xf32>,
    %c6_93 = arith.constant 6 : index
    %c0_94 = arith.constant 0 : index
    %156 = vector.load %arg12[%c6_93, %c0_94] : memref<40x256xf32, #tpu.memory_space<vmem>>, vector<32x256xf32>
    %157 = tpu.concatenate %156, %154 in 1 : vector<32x256xf32>, vector<32x256xf32> -> vector<32x512xf32>
    %158 = arith.truncf %157 : vector<32x512xf32> to vector<32x512xbf16>
    %c4 = arith.constant 4 : index
    %c0_95 = arith.constant 0 : index
    %c0_96 = arith.constant 0 : index
    %159 = vector.load %arg3[%c4, %c0_95, %c0_96] : memref<6x512x512xbf16, #tpu.memory_space<vmem>>, vector<1x512x512xbf16>
    %160 = vector.shape_cast %159 : vector<1x512x512xbf16> to vector<512x512xbf16>
    %cst_97 = arith.constant dense<0.000000e+00> : vector<32x512xf32>
    %161 = tpu.matmul %158, %160, %cst_97 {dimension_numbers = #tpu.dot_dimension_numbers<[1], [0], [0], [1], [0, 0, 1, 1], [], []>} : vector<32x512xbf16>, vector<512x512xbf16>, vector<32x512xf32> -> vector<32x512xf32>
    %c4_98 = arith.constant 4 : index
    %c0_99 = arith.constant 0 : index
    %c0_100 = arith.constant 0 : index
    %162 = vector.load %arg4[%c4_98, %c0_99, %c0_100] : memref<6x1x512xf32, #tpu.memory_space<vmem>>, vector<1x1x512xf32>
    %163 = vector.shape_cast %162 : vector<1x1x512xf32> to vector<1x512xf32>
    %164 = vector.broadcast %163 : vector<1x512xf32> to vector<32x512xf32>
    %165 = arith.addf %161, %164 : vector<32x512xf32>
    %166 = vector.extract_strided_slice %165 {offsets = [0, 0], sizes = [32, 256], strides = [1, 1]} : vector<32x512xf32> to vector<32x256xf32>
    %167 = math.tanh %166 : vector<32x256xf32>
    %168 = vector.extract_strided_slice %165 {offsets = [0, 256], sizes = [32, 256], strides = [1, 1]} : vector<32x512xf32> to vector<32x256xf32>
    %169 = arith.negf %168 : vector<32x256xf32>
    %170 = math.exp %169 : vector<32x256xf32>
    %cst_101 = arith.constant 1.000000e+00 : f32
    %171 = vector.broadcast %cst_101 : f32 to vector<32x256xf32>
    %172 = arith.addf %171, %170 : vector<32x256xf32>
    %173 = arith.divf %171, %172 : vector<32x256xf32>
    %174 = arith.mulf %167, %173 : vector<32x256xf32>
    %175 = arith.truncf %174 : vector<32x256xf32> to vector<32x256xbf16>
    %c4_102 = arith.constant 4 : index
    %c0_103 = arith.constant 0 : index
    %c0_104 = arith.constant 0 : index
    %176 = vector.load %arg5[%c4_102, %c0_103, %c0_104] : memref<6x256x1280xbf16, #tpu.memory_space<vmem>>, vector<1x256x1280xbf16>
    %177 = vector.shape_cast %176 : vector<1x256x1280xbf16> to vector<256x1280xbf16>
    %cst_105 = arith.constant dense<0.000000e+00> : vector<32x1280xf32>
    %178 = tpu.matmul %175, %177, %cst_105 {dimension_numbers = #tpu.dot_dimension_numbers<[1], [0], [0], [1], [0, 0, 1, 1], [], []>} : vector<32x256xbf16>, vector<256x1280xbf16>, vector<32x1280xf32> -> vector<32x1280xf32>
    %179 = vector.extract_strided_slice %178 {offsets = [0, 0], sizes = [32, 1024], strides = [1, 1]} : vector<32x1280xf32> to vector<32x1024xf32>
    %180 = arith.addf %144, %179 : vector<32x1024xf32>
    %181 = vector.extract_strided_slice %178 {offsets = [0, 1024], sizes = [32, 256], strides = [1, 1]} : vector<32x1280xf32> to vector<32x256xf32>
    %c4_106 = arith.constant 4 : index
    %c0_107 = arith.constant 0 : index
    %c0_108 = arith.constant 0 : index
    %182 = vector.load %arg7[%c4_106, %c0_107, %c0_108] : memref<6x1x256xf32, #tpu.memory_space<vmem>>, vector<1x1x256xf32>
    %183 = vector.shape_cast %182 : vector<1x1x256xf32> to vector<1x256xf32>
    %184 = vector.broadcast %183 : vector<1x256xf32> to vector<32x256xf32>
    %185 = arith.addf %181, %184 : vector<32x256xf32>
    %c4_109 = arith.constant 4 : index
    %c0_110 = arith.constant 0 : index
    %c0_111 = arith.constant 0 : index
    %186 = vector.load %arg8[%c4_109, %c0_110, %c0_111] : memref<6x1x256xf32, #tpu.memory_space<vmem>>, vector<1x1x256xf32>
    %187 = vector.shape_cast %186 : vector<1x1x256xf32> to vector<1x256xf32>
    %188 = vector.broadcast %187 : vector<1x256xf32> to vector<32x256xf32>
    %189 = arith.mulf %154, %188 : vector<32x256xf32>
    %190 = arith.addf %185, %189 : vector<32x256xf32>
    %c8_112 = arith.constant 8 : index
    %c0_113 = arith.constant 0 : index
    %191 = vector.load %arg12[%c8_112, %c0_113] : memref<40x256xf32, #tpu.memory_space<vmem>>, vector<32x256xf32>
    tpu.vector_store %arg12[%c8_112, %c0_113], %190 {strides = array<i32>} : memref<40x256xf32, #tpu.memory_space<vmem>>, vector<32x256xf32>,
    %c5_114 = arith.constant 5 : index
    %c0_115 = arith.constant 0 : index
    %192 = vector.load %arg12[%c5_114, %c0_115] : memref<40x256xf32, #tpu.memory_space<vmem>>, vector<32x256xf32>
    %193 = tpu.concatenate %192, %190 in 1 : vector<32x256xf32>, vector<32x256xf32> -> vector<32x512xf32>
    %194 = arith.truncf %193 : vector<32x512xf32> to vector<32x512xbf16>
    %c5_116 = arith.constant 5 : index
    %c0_117 = arith.constant 0 : index
    %c0_118 = arith.constant 0 : index
    %195 = vector.load %arg3[%c5_116, %c0_117, %c0_118] : memref<6x512x512xbf16, #tpu.memory_space<vmem>>, vector<1x512x512xbf16>
    %196 = vector.shape_cast %195 : vector<1x512x512xbf16> to vector<512x512xbf16>
    %cst_119 = arith.constant dense<0.000000e+00> : vector<32x512xf32>
    %197 = tpu.matmul %194, %196, %cst_119 {dimension_numbers = #tpu.dot_dimension_numbers<[1], [0], [0], [1], [0, 0, 1, 1], [], []>} : vector<32x512xbf16>, vector<512x512xbf16>, vector<32x512xf32> -> vector<32x512xf32>
    %c5_120 = arith.constant 5 : index
    %c0_121 = arith.constant 0 : index
    %c0_122 = arith.constant 0 : index
    %198 = vector.load %arg4[%c5_120, %c0_121, %c0_122] : memref<6x1x512xf32, #tpu.memory_space<vmem>>, vector<1x1x512xf32>
    %199 = vector.shape_cast %198 : vector<1x1x512xf32> to vector<1x512xf32>
    %200 = vector.broadcast %199 : vector<1x512xf32> to vector<32x512xf32>
    %201 = arith.addf %197, %200 : vector<32x512xf32>
    %202 = vector.extract_strided_slice %201 {offsets = [0, 0], sizes = [32, 256], strides = [1, 1]} : vector<32x512xf32> to vector<32x256xf32>
    %203 = math.tanh %202 : vector<32x256xf32>
    %204 = vector.extract_strided_slice %201 {offsets = [0, 256], sizes = [32, 256], strides = [1, 1]} : vector<32x512xf32> to vector<32x256xf32>
    %205 = arith.negf %204 : vector<32x256xf32>
    %206 = math.exp %205 : vector<32x256xf32>
    %cst_123 = arith.constant 1.000000e+00 : f32
    %207 = vector.broadcast %cst_123 : f32 to vector<32x256xf32>
    %208 = arith.addf %207, %206 : vector<32x256xf32>
    %209 = arith.divf %207, %208 : vector<32x256xf32>
    %210 = arith.mulf %203, %209 : vector<32x256xf32>
    %211 = arith.truncf %210 : vector<32x256xf32> to vector<32x256xbf16>
    %c5_124 = arith.constant 5 : index
    %c0_125 = arith.constant 0 : index
    %c0_126 = arith.constant 0 : index
    %212 = vector.load %arg5[%c5_124, %c0_125, %c0_126] : memref<6x256x1280xbf16, #tpu.memory_space<vmem>>, vector<1x256x1280xbf16>
    %213 = vector.shape_cast %212 : vector<1x256x1280xbf16> to vector<256x1280xbf16>
    %cst_127 = arith.constant dense<0.000000e+00> : vector<32x1280xf32>
    %214 = tpu.matmul %211, %213, %cst_127 {dimension_numbers = #tpu.dot_dimension_numbers<[1], [0], [0], [1], [0, 0, 1, 1], [], []>} : vector<32x256xbf16>, vector<256x1280xbf16>, vector<32x1280xf32> -> vector<32x1280xf32>
    %215 = vector.extract_strided_slice %214 {offsets = [0, 0], sizes = [32, 1024], strides = [1, 1]} : vector<32x1280xf32> to vector<32x1024xf32>
    %216 = arith.addf %180, %215 : vector<32x1024xf32>
    %cst_128 = arith.constant 0.000000e+00 : f32
    %217 = vector.broadcast %cst_128 : f32 to vector<32x1024xf32>
    %218 = arith.maximumf %216, %217 : vector<32x1024xf32>
    %219 = arith.truncf %218 : vector<32x1024xf32> to vector<32x1024xbf16>
    %c0_129 = arith.constant 0 : index
    %c0_130 = arith.constant 0 : index
    %220 = vector.load %arg9[%c0_129, %c0_130] : memref<1024x256xbf16, #tpu.memory_space<vmem>>, vector<1024x256xbf16>
    %cst_131 = arith.constant dense<0.000000e+00> : vector<32x256xf32>
    %221 = tpu.matmul %219, %220, %cst_131 {dimension_numbers = #tpu.dot_dimension_numbers<[1], [0], [0], [1], [0, 0, 1, 1], [], []>} : vector<32x1024xbf16>, vector<1024x256xbf16>, vector<32x256xf32> -> vector<32x256xf32>
    %c0_132 = arith.constant 0 : index
    %c0_133 = arith.constant 0 : index
    %222 = vector.load %arg10[%c0_132, %c0_133] : memref<1x256xf32, #tpu.memory_space<vmem>>, vector<1x256xf32>
    %223 = vector.broadcast %222 : vector<1x256xf32> to vector<32x256xf32>
    %224 = arith.addf %221, %223 : vector<32x256xf32>
    %c0_134 = arith.constant 0 : index
    %c0_135 = arith.constant 0 : index
    %225 = vector.load %arg11[%c0_134, %c0_135] : memref<32x256xf32, #tpu.memory_space<vmem>>, vector<32x256xf32>
    tpu.vector_store %arg11[%c0_134, %c0_135], %224 {strides = array<i32>} : memref<32x256xf32, #tpu.memory_space<vmem>>, vector<32x256xf32>,
    return
  }
}

</mosaic_0001>

<bundles_post_ra>
// kernel: gwavenet_encoder_forward.1
= control target key start
LH: loop header
LB: loop body
LE: loop exit
PB: predicated region body
PF: predicated region fallthrough
CT: control target
= control target key end

     0   :  { %v22907_v1 = vmov 0   ;;  %vm79_vm0 = vcmask 130048   ;;  %v22908_v46 = vmov 0.0   ;;  %vm207_vm1 = vcmask 1046528   ;;  %s29342_s1 = inlined_call_operand.vmem [shape: bf16[16,256], index: 1, kind: input, shape index: {}]   ;;  %s29343_s0 = inlined_call_operand.vmem [shape: bf16[32,16], index: 0, kind: input, shape index: {}]   ;;  %s29344_s3 = inlined_call_operand.vmem [shape: bf16[6,512,512], index: 3, kind: input, shape index: {}]   ;;  %s29345_s2 = inlined_call_operand.vmem [shape: f32[1,256], index: 2, kind: input, shape index: {}]   ;;  %s29346_s5 = inlined_call_operand.vmem [shape: bf16[6,256,1280], index: 5, kind: input, shape index: {}]   ;;  %s29347_s4 = inlined_call_operand.vmem [shape: f32[6,1,512], index: 4, kind: input, shape index: {}]   ;;  %s29348_s7 = inlined_call_operand.vmem [shape: f32[6,1,256], index: 7, kind: input, shape index: {}]   ;;  %s29349_s8 = inlined_call_operand.vmem [shape: f32[6,1,256], index: 8, kind: input, shape index: {}]   ;;  %s29350_s9 = inlined_call_operand.vmem [shape: bf16[1024,256], index: 9, kind: input, shape index: {}]   ;;  %s29351_s6 = inlined_call_operand.vmem [shape: f32[1,1024], index: 6, kind: input, shape index: {}]   ;;  %s29352_s10 = inlined_call_operand.vmem [shape: f32[1,256], index: 10, kind: input, shape index: {}]   ;;  %s29353_s11 = inlined_call_operand.vmem [shape: f32[32,256], index: 11, kind: output, shape index: {}]  }
   0x1   :  { %v19868_v0 = vld [vmem:[%s29342_s1 + $0x4] ss:$8 sps:$4 sm:$0xff]   ;;  %118 = vmatprep.mubr.bf16.mxu0 %v22907_v1  ;;  %v19870_v2 = vld [vmem:[%s29342_s1] ss:$8 sps:$4 sm:$0xff]   ;;  %40 = vst [vmem:[#allocation2 + $0x8] sm:$0xff] %v22908_v46  ;;  %39 = vst [vmem:[#allocation2] sm:$0xff] %v22908_v46 }
   0x2   :  { %86 = vmatprep.subr.bf16.mxu0 %v19868_v0  ;;  %v19871_v3 = vld [vmem:[%s29343_s0] sm:$0xff]   ;;  %v19873_v4 = vld [vmem:[%s29344_s3 + $0x208] ss:$16 sps:$4 sm:$0xff]   ;;  %v19875_v5 = vld [vmem:[%s29344_s3 + $0x20c] ss:$16 sps:$4 sm:$0xff]   ;;  %vm2758_vm3 = vcmask 1045504  }
   0x3   :  { %87 = vmatpush1.bf16.msra.mxu0 %v19870_v2  ;;  %v19876_v6 = vld [vmem:[%s29344_s3 + $0x4] ss:$16 sps:$4 sm:$0xff]   ;;  %v19878_v7 = vld [vmem:[%s29344_s3] ss:$16 sps:$4 sm:$0xff]   ;;  %v19879_v8 = vld [vmem:[%s29344_s3 + $0x228] ss:$16 sps:$4 sm:$0xff]  }
   0x4   :  { %1306 = vmatprep.subr.bf16.mxu0 %v19875_v5  ;;  %v19881_v9 = vld [vmem:[%s29344_s3 + $0x22c] ss:$16 sps:$4 sm:$0xff]   ;;  %1147 = vmatprep.subr.bf16.mxu1 %v19876_v6  ;;  %v19882_v11 = vld [vmem:[%s29344_s3 + $0x24] ss:$16 sps:$4 sm:$0xff]   ;;  %v19884_v12 = vld [vmem:[%s29344_s3 + $0x20] ss:$16 sps:$4 sm:$0xff]  }
   0x5   :  { %v19872_v10 = vld [vmem:[%s29343_s0 + $0x8] sm:$0xff]   ;;  %1148 = vmatpush1.bf16.msra.mxu1 %v19878_v7  ;;  %v19888_v14 = vld [vmem:[%s29344_s3 + $0x44] ss:$16 sps:$4 sm:$0xff]   ;;  %v19890_v17 = vld [vmem:[%s29344_s3 + $0x40] ss:$16 sps:$4 sm:$0xff]   ;;  %v49_v7 = vlaneseq  ;;  %vm2959_vm4 = vcmask 1044480  }
   0x6   :  { %16123 = vmatmul.mubr.msk.bf16.vlgmr.msra.gmra.mrb[0].mxu0 %vm79_vm0, %v19871_v3  ;;  %v19887_v13 = vld [vmem:[%s29344_s3 + $0x24c] ss:$16 sps:$4 sm:$0xff]   ;;  %1149 = vmatprep.subr.bf16.mxu1 %v19882_v11  ;;  %v19885_v15 = vld [vmem:[%s29344_s3 + $0x248] ss:$16 sps:$4 sm:$0xff]   ;;  %v19894_v18 = vld [vmem:[%s29344_s3 + $0x64] ss:$16 sps:$4 sm:$0xff]  }
   0x7   :  { %128 = vmatprep.mubr.bf16.mxu0 %v22907_v1  ;;  %1307 = vmatpush1.bf16.msra.mxu0 %v19873_v4  ;;  %v19893_v16 = vld [vmem:[%s29344_s3 + $0x26c] ss:$16 sps:$4 sm:$0xff]   ;;  %v19891_v19 = vld [vmem:[%s29344_s3 + $0x268] ss:$16 sps:$4 sm:$0xff]   ;;  %v19896_v21 = vld [vmem:[%s29344_s3 + $0x60] ss:$16 sps:$4 sm:$0xff]  }
   0x8   :  { %1308 = vmatprep.subr.bf16.mxu0 %v19881_v9  ;;  %v19899_v20 = vld [vmem:[%s29344_s3 + $0x28c] ss:$16 sps:$4 sm:$0xff]   ;;  %v19900_v22 = vld [vmem:[%s29344_s3 + $0x84] ss:$16 sps:$4 sm:$0xff]   ;;  %v19897_v23 = vld [vmem:[%s29344_s3 + $0x288] ss:$16 sps:$4 sm:$0xff]  }
   0x9   :  { %1150 = vmatpush1.bf16.msra.mxu1 %v19884_v12  ;;  %v19905_v24 = vld [vmem:[%s29344_s3 + $0x2ac] ss:$16 sps:$4 sm:$0xff]   ;;  %v19902_v25 = vld [vmem:[%s29344_s3 + $0x80] ss:$16 sps:$4 sm:$0xff]   ;;  %v19906_v26 = vld [vmem:[%s29344_s3 + $0xa4] ss:$16 sps:$4 sm:$0xff]  }
   0xa   :  { %1151 = vmatprep.subr.bf16.mxu1 %v19888_v14  ;;  %v19903_v27 = vld [vmem:[%s29344_s3 + $0x2a8] ss:$16 sps:$4 sm:$0xff]   ;;  %v19911_v28 = vld [vmem:[%s29344_s3 + $0x2cc] ss:$16 sps:$4 sm:$0xff]   ;;  %v19908_v29 = vld [vmem:[%s29344_s3 + $0xa0] ss:$16 sps:$4 sm:$0xff]  }
   0xb   :  { %1309 = vmatpush1.bf16.msra.mxu0 %v19879_v8  ;;  %v19912_v30 = vld [vmem:[%s29344_s3 + $0xc4] ss:$16 sps:$4 sm:$0xff]   ;;  %v19909_v31 = vld [vmem:[%s29344_s3 + $0x2c8] ss:$16 sps:$4 sm:$0xff]   ;;  %v19914_v32 = vld [vmem:[%s29344_s3 + $0xc0] ss:$16 sps:$4 sm:$0xff]  }
   0xc   :  { %1310 = vmatprep.subr.bf16.mxu0 %v19887_v13  ;;  %v19917_v33 = vld [vmem:[%s29344_s3 + $0x2ec] ss:$16 sps:$4 sm:$0xff]   ;;  %v19918_v34 = vld [vmem:[%s29344_s3 + $0xe4] ss:$16 sps:$4 sm:$0xff]   ;;  %v19915_v35 = vld [vmem:[%s29344_s3 + $0x2e8] ss:$16 sps:$4 sm:$0xff]  }
   0xd   :  { %1152 = vmatpush1.bf16.msra.mxu1 %v19890_v17  ;;  %v19923_v36 = vld [vmem:[%s29344_s3 + $0x30c] ss:$16 sps:$4 sm:$0xff]   ;;  %v19920_v37 = vld [vmem:[%s29344_s3 + $0xe0] ss:$16 sps:$4 sm:$0xff]   ;;  %v19924_v38 = vld [vmem:[%s29344_s3 + $0x104] ss:$16 sps:$4 sm:$0xff]  }
   0xe   :  { %16124 = vmatmul.mubr.msk.bf16.gmra.mrb[4].mxu0 %vm79_vm0, %v19872_v10  ;;  %1153 = vmatprep.subr.bf16.mxu1 %v19894_v18  ;;  %v19921_v39 = vld [vmem:[%s29344_s3 + $0x308] ss:$16 sps:$4 sm:$0xff]   ;;  %v19929_v40 = vld [vmem:[%s29344_s3 + $0x32c] ss:$16 sps:$4 sm:$0xff]   ;;  %v19926_v41 = vld [vmem:[%s29344_s3 + $0x100] ss:$16 sps:$4 sm:$0xff]  }
   0xf   :  { %1311 = vmatpush1.bf16.msra.mxu0 %v19885_v15  ;;  %v19927_v42 = vld [vmem:[%s29344_s3 + $0x328] ss:$16 sps:$4 sm:$0xff]   ;;  %v19930_v43 = vld [vmem:[%s29344_s3 + $0x124] ss:$16 sps:$4 sm:$0xff]   ;;  %v19932_v44 = vld [vmem:[%s29344_s3 + $0x120] ss:$16 sps:$4 sm:$0xff]  }
  0x10   :  { %1312 = vmatprep.subr.bf16.mxu0 %v19893_v16  ;;  %v19936_v45 = vld [vmem:[%s29344_s3 + $0x144] ss:$16 sps:$4 sm:$0xff]   ;;  %v19938_v47 = vld [vmem:[%s29344_s3 + $0x140] ss:$16 sps:$4 sm:$0xff]   ;;  %v19935_v50 = vld [vmem:[%s29344_s3 + $0x34c] ss:$16 sps:$4 sm:$0xff]  }
  0x11   :  { %1154 = vmatpush1.bf16.msra.mxu1 %v19896_v21  ;;  %v19942_v48 = vld [vmem:[%s29344_s3 + $0x164] ss:$16 sps:$4 sm:$0xff]   ;;  %v19944_v49 = vld [vmem:[%s29344_s3 + $0x160] ss:$16 sps:$4 sm:$0xff]   ;;  %v19933_v51 = vld [vmem:[%s29344_s3 + $0x348] ss:$16 sps:$4 sm:$0xff]  }
  0x12   :  { %1155 = vmatprep.subr.bf16.mxu1 %v19900_v22  ;;  %v19948_v52 = vld [vmem:[%s29344_s3 + $0x184] ss:$16 sps:$4 sm:$0xff]   ;;  %v19950_v53 = vld [vmem:[%s29344_s3 + $0x180] ss:$16 sps:$4 sm:$0xff]   ;;  %v19941_v54 = vld [vmem:[%s29344_s3 + $0x36c] ss:$16 sps:$4 sm:$0xff]  }
  0x13   :  { %1313 = vmatpush1.bf16.msra.mxu0 %v19891_v19  ;;  %v19939_v55 = vld [vmem:[%s29344_s3 + $0x368] ss:$16 sps:$4 sm:$0xff]   ;;  %v19954_v56 = vld [vmem:[%s29344_s3 + $0x1a4] ss:$16 sps:$4 sm:$0xff]   ;;  %v19956_v57 = vld [vmem:[%s29344_s3 + $0x1a0] ss:$16 sps:$4 sm:$0xff]  }
  0x14   :  { %1314 = vmatprep.subr.bf16.mxu0 %v19899_v20  ;;  %v19947_v58 = vld [vmem:[%s29344_s3 + $0x38c] ss:$16 sps:$4 sm:$0xff]   ;;  %v19945_v59 = vld [vmem:[%s29344_s3 + $0x388] ss:$16 sps:$4 sm:$0xff]   ;;  %v19960_v60 = vld [vmem:[%s29344_s3 + $0x1c4] ss:$16 sps:$4 sm:$0xff]  }
  0x15   :  { %1156 = vmatpush1.bf16.msra.mxu1 %v19902_v25  ;;  %v19962_v61 = vld [vmem:[%s29344_s3 + $0x1c0] ss:$16 sps:$4 sm:$0xff]   ;;  %v19953_v62 = vld [vmem:[%s29344_s3 + $0x3ac] ss:$16 sps:$4 sm:$0xff]   ;;  %v19951_v63 = vld [vmem:[%s29344_s3 + $0x3a8] ss:$16 sps:$4 sm:$0xff]  }
  0x16   :  { %1157 = vmatprep.subr.bf16.mxu1 %v19906_v26  ;;  %v19966_v0 = vld [vmem:[%s29344_s3 + $0x1e4] ss:$16 sps:$4 sm:$0xff]   ;;  %v19968_v1 = vld [vmem:[%s29344_s3 + $0x1e0] ss:$16 sps:$4 sm:$0xff]   ;;  %v19959_v2 = vld [vmem:[%s29344_s3 + $0x3cc] ss:$16 sps:$4 sm:$0xff]  }
  0x17   :  { %1315 = vmatpush1.bf16.msra.mxu0 %v19897_v23  ;;  %v19957_v3 = vld [vmem:[%s29344_s3 + $0x3c8] ss:$16 sps:$4 sm:$0xff]   ;;  %v19965_v5 = vld [vmem:[%s29344_s3 + $0x3ec] ss:$16 sps:$4 sm:$0xff]   ;;  %v19971_v6 = vld [vmem:[%s29344_s3 + $0x204] ss:$16 sps:$4 sm:$0xff]  }
  0x18   :  { %1316 = vmatprep.subr.bf16.mxu0 %v19905_v24  ;;  %v19963_v4 = vld [vmem:[%s29344_s3 + $0x3e8] ss:$16 sps:$4 sm:$0xff]   ;;  %v23178_v8 = vshrl.u32 %v49_v7, 7  ;;  %v47_v9 = vld [vmem:[%s29345_s2] sm:$0x3] }
  0x19   :  { %1158 = vmatpush1.bf16.msra.mxu1 %v19908_v29  ;;  %v190_v15 = vld [vmem:[#allocation2 + $0x8] sm:$0x80]  ;;  %v189_v16 = vld [vmem:[#allocation2] sm:$0x80]  ;;  %vm394_vm2 = vsmask.f32 4352 }
  0x1a   :  { %1159 = vmatprep.subr.bf16.mxu1 %v19912_v30  ;;  %v23184_v10 = vsub.s32 0, %v23178_v8  ;;  %v23187_v11 = vsub.s32 1, %v23178_v8  ;;  %vm5431_vm5 = vsmask.f32 5376 }
  0x1b   :  { %1317 = vmatpush1.bf16.msra.mxu0 %v19903_v27 }
  0x1c   :  { %1318 = vmatprep.subr.bf16.mxu0 %v19911_v28  ;;  %29356 = vst [vmem:[#allocation3_spill] sm:$0xff] %v23184_v10  ;;  %29357 = vst [vmem:[#allocation4_spill] sm:$0xff] %v23187_v11  ;;  %v52_v12 = vrot.slane %v47_v9, %v23184_v10  ;;  %v56_v13 = vrot.slane %v47_v9, %v23187_v11 }
  0x1d   :  { %1160 = vmatpush1.bf16.msra.mxu1 %v19914_v32 }
  0x1e   :  { %1161 = vmatprep.subr.bf16.mxu1 %v19918_v34 }
  0x1f   :  { %1319 = vmatpush1.bf16.msra.mxu0 %v19909_v31 }
  0x20   :  { %1320 = vmatprep.subr.bf16.mxu0 %v19917_v33 }
  0x21   :  { %1162 = vmatpush1.bf16.msra.mxu1 %v19920_v37 }
  0x22   :  { %1163 = vmatprep.subr.bf16.mxu1 %v19924_v38 }
  0x23   :  { %1321 = vmatpush1.bf16.msra.mxu0 %v19915_v35 }
  0x24   :  { %1322 = vmatprep.subr.bf16.mxu0 %v19923_v36 }
  0x25   :  { %1164 = vmatpush1.bf16.msra.mxu1 %v19926_v41 }
  0x26   :  { %1165 = vmatprep.subr.bf16.mxu1 %v19930_v43 }
  0x27   :  { %1323 = vmatpush1.bf16.msra.mxu0 %v19921_v39 }
  0x28   :  { %1324 = vmatprep.subr.bf16.mxu0 %v19929_v40 }
  0x29   :  { %1166 = vmatpush1.bf16.msra.mxu1 %v19932_v44 }
  0x2a   :  { %1167 = vmatprep.subr.bf16.mxu1 %v19936_v45 }
  0x2b   :  { %1325 = vmatpush1.bf16.msra.mxu0 %v19927_v42 }
  0x2c   :  { %1326 = vmatprep.subr.bf16.mxu0 %v19935_v50 }
  0x2d   :  { %1168 = vmatpush1.bf16.msra.mxu1 %v19938_v47 }
  0x2e   :  { %1169 = vmatprep.subr.bf16.mxu1 %v19942_v48 }
  0x2f   :  { %1327 = vmatpush1.bf16.msra.mxu0 %v19933_v51 }
  0x30   :  { %1328 = vmatprep.subr.bf16.mxu0 %v19941_v54 }
  0x31   :  { %1170 = vmatpush1.bf16.msra.mxu1 %v19944_v49 }
  0x32   :  { %1171 = vmatprep.subr.bf16.mxu1 %v19948_v52 }
  0x33   :  { %1329 = vmatpush1.bf16.msra.mxu0 %v19939_v55 }
  0x34   :  { %1330 = vmatprep.subr.bf16.mxu0 %v19947_v58 }
  0x35   :  { %1172 = vmatpush1.bf16.msra.mxu1 %v19950_v53 }
  0x36   :  { %1173 = vmatprep.subr.bf16.mxu1 %v19954_v56 }
  0x37   :  { %1331 = vmatpush1.bf16.msra.mxu0 %v19945_v59 }
  0x38   :  { %1332 = vmatprep.subr.bf16.mxu0 %v19953_v62 }
  0x39   :  { %1174 = vmatpush1.bf16.msra.mxu1 %v19956_v57 }
  0x3a   :  { %1175 = vmatprep.subr.bf16.mxu1 %v19960_v60 }
  0x3b   :  { %1333 = vmatpush1.bf16.msra.mxu0 %v19951_v63 }
  0x3c   :  { %1334 = vmatprep.subr.bf16.mxu0 %v19959_v2 }
  0x3d   :  { %1176 = vmatpush1.bf16.msra.mxu1 %v19962_v61 }
  0x3e   :  { %1177 = vmatprep.subr.bf16.mxu1 %v19966_v0 }
  0x3f   :  { %1335 = vmatpush1.bf16.msra.mxu0 %v19957_v3 }
  0x40   :  { %1336 = vmatprep.subr.bf16.mxu0 %v19965_v5 }
  0x41   :  { %1178 = vmatpush1.bf16.msra.mxu1 %v19968_v1 }
  0x42   :  { %1200 = vmatprep.subr.bf16.mxu1 %v19971_v6 }
  0x43   :  { %1337 = vmatpush1.bf16.msra.mxu0 %v19963_v4 }
  0xd9   :  { %v120_v14 = vpop.f32.mrb[0].mxu0 }
  0xda   :  { %v23191_v17 = vadd.f32 %v120_v14, %v52_v12  ;;  %v122_v18 = vpop.f32.mrb[1].mxu0 }
  0xdb   :  { %v23193_v19 = vadd.f32 %v122_v18, %v56_v13  ;;  %v124_v20 = vpop.f32.mrb[2].mxu0 }
  0xdc   :  { %v23195_v21 = vadd.f32 %v124_v20, %v52_v12  ;;  %v126_v22 = vpop.f32.mrb[3].mxu0  ;;  %v232_v23 = vpack.c.bf16 %v23191_v17, %v189_v16  ;;  %v208_v24 = vrot.slane %v23191_v17, 1 }
  0xdd   :  { %v209_v25 = vrot.slane %v23193_v19, 1  ;;  %v23200_v26 = vadd.f32 %v126_v22, %v56_v13  ;;  %v233_v27 = vpack.c.bf16 %v23193_v19, %v190_v15 }
  0xde   :  { %v210_v28 = vrot.slane %v23195_v21, 1  ;;  %v396_v29 = vshrl.u32 %v232_v23, 16  ;;  %v399_v30 = vshll.u32 %v232_v23, 16 }
  0xdf   :  { %v212_v31 = vrot.slane %v23200_v26, 1  ;;  %v413_v32 = vshrl.u32 %v233_v27, 16  ;;  %v416_v33 = vshll.u32 %v233_v27, 16 }
  0xe0   :  { %v211_v34 = vsel %vm207_vm1, %v208_v24, %v210_v28  ;;  %v23206_v35 = vrot.slane %v396_v29, 3  ;;  %v23208_v36 = vrot.slane %v399_v30, 4 }
  0xe1   :  { %v234_v37 = vpack.c.bf16 %v211_v34, %v208_v24  ;;  %v213_v38 = vsel %vm207_vm1, %v209_v25, %v212_v31  ;;  %v130_v39 = vpop.f32.mrb[4].mxu0  ;;  %v23211_v40 = vrot.slane %v413_v32, 3  ;;  %v23213_v41 = vrot.slane %v416_v33, 4 }
  0xe2   :  { %v235_v42 = vpack.c.bf16 %v213_v38, %v209_v25  ;;  %v23215_v43 = vadd.f32 %v130_v39, %v52_v12  ;;  %v132_v44 = vpop.f32.mrb[5].mxu0  ;;  %v402_v45 = vor.u32 %v23208_v36, %v23206_v35 }
  0xe3   :  { %v430_v46 = vshrl.u32 %v234_v37, 16  ;;  %v433_v47 = vshll.u32 %v234_v37, 16  ;;  %v23219_v48 = vadd.f32 %v132_v44, %v56_v13  ;;  %v134_v49 = vpop.f32.mrb[6].mxu0  ;;  %v419_v50 = vor.u32 %v23213_v41, %v23211_v40 }
  0xe4   :  { %v214_v51 = vrot.slane %v23215_v43, 1  ;;  %v135_v52 = vadd.f32 %v134_v49, %v52_v12  ;;  %v136_v53 = vpop.f32.mrb[7].mxu0  ;;  %v447_v54 = vshrl.u32 %v235_v42, 16  ;;  %v450_v55 = vshll.u32 %v235_v42, 16 }
  0xe5   :  { %v216_v56 = vrot.slane %v23219_v48, 1  ;;  %v137_v57 = vadd.f32 %v136_v53, %v56_v13  ;;  %v432_v58 = vrot.slane %v430_v46, 3  ;;  %v435_v59 = vrot.slane %v433_v47, 4  ;;  %v19969_v46 = vld [vmem:[%s29344_s3 + $0x200] ss:$16 sps:$4 sm:$0xff]  }
  0xe6   :  { %v215_v60 = vsel %vm207_vm1, %v210_v28, %v214_v51  ;;  %187 = vst [vmem:[#allocation2 + $0x40] sm:$0xff] %v135_v52  ;;  %v218_v61 = vrot.slane %v135_v52, 1  ;;  %v449_v62 = vrot.slane %v447_v54, 3  ;;  %v452_v63 = vrot.slane %v450_v55, 4  ;;  %v19974_v54 = vld [vmem:[%s29344_s3 + $0x224] ss:$16 sps:$4 sm:$0xff]  }
  0xe7   :  { %v217_v0 = vsel %vm207_vm1, %v212_v31, %v216_v56  ;;  %188 = vst [vmem:[#allocation2 + $0x48] sm:$0xff] %v137_v57  ;;  %v220_v1 = vrot.slane %v137_v57, 1  ;;  %v436_v2 = vor.u32 %v435_v59, %v432_v58  ;;  %v237_v3 = vpack.c.bf16 %v23219_v48, %v23200_v26 }
  0xe8   :  { %v219_v4 = vsel %vm207_vm1, %v214_v51, %v218_v61  ;;  %v242_v5 = vpack.c.bf16 %v218_v61, %v218_v61  ;;  %v453_v6 = vor.u32 %v452_v63, %v449_v62  ;;  %v236_v7 = vpack.c.bf16 %v23215_v43, %v23195_v21 }
  0xe9   :  { %v238_v9 = vpack.c.bf16 %v219_v4, %v215_v60  ;;  %v221_v12 = vsel %vm207_vm1, %v216_v56, %v220_v1  ;;  %v243_v13 = vpack.c.bf16 %v220_v1, %v220_v1  ;;  %v421_v14 = vshrl.u32 %v237_v3, 16 }
  0xea   :  { %v239_v15 = vpack.c.bf16 %v221_v12, %v217_v0  ;;  %v424_v16 = vshll.u32 %v237_v3, 16  ;;  %v404_v18 = vshrl.u32 %v236_v7, 16  ;;  %v407_v20 = vshll.u32 %v236_v7, 16  ;;  %v19972_v3 = vld [vmem:[%s29344_s3 + $0x220] ss:$16 sps:$4 sm:$0xff]  }
  0xeb   :  { %v438_v22 = vshrl.u32 %v238_v9, 16  ;;  %v441_v23 = vshll.u32 %v238_v9, 16  ;;  %v491_v24 = vshrl.u32 %v243_v13, 16  ;;  %v494_v25 = vshll.u32 %v243_v13, 16  ;;  %v19975_v12 = vld [vmem:[%s29344_s3 + $0x240] ss:$16 sps:$4 sm:$0xff]  }
  0xec   :  { %v455_v27 = vshrl.u32 %v239_v15, 16  ;;  %v458_v28 = vshll.u32 %v239_v15, 16  ;;  %v423_v29 = vrot.slane %v421_v14, 3  ;;  %v426_v30 = vrot.slane %v424_v16, 4  ;;  %v19980_v15 = vld [vmem:[%s29344_s3 + $0x264] ss:$16 sps:$4 sm:$0xff]  }
  0xed   :  { %v440_v31 = vrot.slane %v438_v22, 3  ;;  %v443_v32 = vrot.slane %v441_v23, 4  ;;  %v493_v33 = vrot.slane %v491_v24, 3  ;;  %v496_v34 = vrot.slane %v494_v25, 4  ;;  %v197_v51 = vld [vmem:[#allocation2 + $0x40] sm:$0x7f] }
  0xee   :  { %v457_v37 = vrot.slane %v455_v27, 3  ;;  %v460_v38 = vrot.slane %v458_v28, 4  ;;  %v427_v39 = vor.u32 %v426_v30, %v423_v29  ;;  %v406_v40 = vrot.slane %v404_v18, 3  ;;  %v198_v41 = vld [vmem:[#allocation2 + $0x48] sm:$0x7f] }
  0xef   :  { %v444_v42 = vor.u32 %v443_v32, %v440_v31  ;;  %v497_v44 = vor.u32 %v496_v34, %v493_v33  ;;  %v409_v47 = vrot.slane %v407_v20, 4  ;;  %v241_v49 = vpack.c.bf16 %v198_v41, %v198_v41  ;;  %v19978_v20 = vld [vmem:[%s29344_s3 + $0x260] ss:$16 sps:$4 sm:$0xff]   ;;  %v19983_v22 = vld [vmem:[%s29344_s3 + $0x284] ss:$16 sps:$4 sm:$0xff]  }
  0xf0   :  { %v461_v52 = vor.u32 %v460_v38, %v457_v37  ;;  %v23237_v53 = vsel %vm394_vm2, %v419_v50, %v427_v39  ;;  %v482_v55 = vshrl.u32 %v242_v5, 16  ;;  %v485_v56 = vshll.u32 %v242_v5, 16  ;;  %v19981_v23 = vld [vmem:[%s29344_s3 + $0x280] ss:$16 sps:$4 sm:$0xff]   ;;  %v19986_v24 = vld [vmem:[%s29344_s3 + $0x2a4] ss:$16 sps:$4 sm:$0xff]  }
  0xf1   :  { %v23243_v57 = vsel %vm394_vm2, %v436_v2, %v444_v42  ;;  %1179 = vmatprep.mubr.bf16.mxu1 %v23237_v53  ;;  %v410_v58 = vor.u32 %v409_v47, %v406_v40  ;;  %v473_v59 = vshrl.u32 %v241_v49, 16  ;;  %v476_v60 = vshll.u32 %v241_v49, 16  ;;  %v19984_v25 = vld [vmem:[%s29344_s3 + $0x2a0] ss:$16 sps:$4 sm:$0xff]   ;;  %v19989_v27 = vld [vmem:[%s29344_s3 + $0x2c4] ss:$16 sps:$4 sm:$0xff]  }
  0xf2   :  { %v462_v61 = vsel %vm394_vm2, %v453_v6, %v461_v52  ;;  %v23248_v62 = vsel %vm394_vm2, %v461_v52, %v497_v44  ;;  %v484_v50 = vrot.slane %v482_v55, 3  ;;  %v487_v63 = vrot.slane %v485_v56, 4  ;;  %v19977_v6 = vld [vmem:[%s29344_s3 + $0x244] ss:$16 sps:$4 sm:$0xff]   ;;  %v19987_v28 = vld [vmem:[%s29344_s3 + $0x2c0] ss:$16 sps:$4 sm:$0xff]  }
  0xf3   :  { %1338 = vmatprep.mubr.bf16.mxu0 %v462_v61  ;;  %v23254_v0 = vsel %vm394_vm2, %v402_v45, %v410_v58  ;;  %v475_v1 = vrot.slane %v473_v59, 3  ;;  %v478_v2 = vrot.slane %v476_v60, 4  ;;  %v240_v4 = vpack.c.bf16 %v197_v51, %v197_v51  ;;  %v19992_v29 = vld [vmem:[%s29344_s3 + $0x2e4] ss:$16 sps:$4 sm:$0xff]   ;;  %v19990_v30 = vld [vmem:[%s29344_s3 + $0x2e0] ss:$16 sps:$4 sm:$0xff]  }
  0xf4   :  { %1339 = vmatmul.mubr.bf16.vlgmr.msra.gmra.mrb[8].mxu0 %v23243_v57  ;;  %1180 = vmatmul.mubr.bf16.vlgmr.msra.gmra.mrb[0].mxu1 %v23254_v0  ;;  %v488_v5 = vor.u32 %v487_v63, %v484_v50  ;;  %v19995_v31 = vld [vmem:[%s29344_s3 + $0x304] ss:$16 sps:$4 sm:$0xff]   ;;  %v19993_v32 = vld [vmem:[%s29344_s3 + $0x300] ss:$16 sps:$4 sm:$0xff]   ;;  %v20017_v55 = vld [vmem:[%s29344_s3 + $0x8] ss:$16 sps:$4 sm:$0xff]  }
  0xf5   :  { %1348 = vmatprep.mubr.bf16.mxu0 %v23248_v62  ;;  %1201 = vmatpush1.bf16.msra.mxu1 %v19969_v46  ;;  %v479_v35 = vor.u32 %v478_v2, %v475_v1  ;;  %v464_v36 = vshrl.u32 %v240_v4, 16  ;;  %v467_v45 = vshll.u32 %v240_v4, 16  ;;  %v19998_v33 = vld [vmem:[%s29344_s3 + $0x324] ss:$16 sps:$4 sm:$0xff]   ;;  %v19996_v34 = vld [vmem:[%s29344_s3 + $0x320] ss:$16 sps:$4 sm:$0xff]  }
  0xf6   :  { %1202 = vmatprep.subr.bf16.mxu1 %v19974_v54  ;;  %v23266_v7 = vsel %vm394_vm2, %v444_v42, %v488_v5  ;;  %v20001_v37 = vld [vmem:[%s29344_s3 + $0x344] ss:$16 sps:$4 sm:$0xff]   ;;  %v19999_v38 = vld [vmem:[%s29344_s3 + $0x340] ss:$16 sps:$4 sm:$0xff]   ;;  %v20019_v54 = vld [vmem:[%s29344_s3 + $0xc] ss:$16 sps:$4 sm:$0xff]  }
  0xf7   :  { %v23269_v9 = vsel %vm394_vm2, %v427_v39, %v479_v35  ;;  %v466_v13 = vrot.slane %v464_v36, 3  ;;  %v469_v14 = vrot.slane %v467_v45, 4  ;;  %v20004_v39 = vld [vmem:[%s29344_s3 + $0x364] ss:$16 sps:$4 sm:$0xff]   ;;  %v20002_v40 = vld [vmem:[%s29344_s3 + $0x360] ss:$16 sps:$4 sm:$0xff]  }
  0xf8   :  { %1189 = vmatprep.mubr.bf16.mxu1 %v23269_v9  ;;  %v20007_v41 = vld [vmem:[%s29344_s3 + $0x384] ss:$16 sps:$4 sm:$0xff]   ;;  %v20005_v42 = vld [vmem:[%s29344_s3 + $0x380] ss:$16 sps:$4 sm:$0xff]   ;;  %v20022_v56 = vld [vmem:[%s29344_s3 + $0x2c] ss:$16 sps:$4 sm:$0xff]  }
  0xf9   :  { %1203 = vmatpush1.bf16.msra.mxu1 %v19972_v3  ;;  %v470_v16 = vor.u32 %v469_v14, %v466_v13  ;;  %v20010_v44 = vld [vmem:[%s29344_s3 + $0x3a4] ss:$16 sps:$4 sm:$0xff]   ;;  %v20008_v46 = vld [vmem:[%s29344_s3 + $0x3a0] ss:$16 sps:$4 sm:$0xff]   ;;  %v20025_v59 = vld [vmem:[%s29344_s3 + $0x4c] ss:$16 sps:$4 sm:$0xff]  }
  0xfa   :  { %1204 = vmatprep.subr.bf16.mxu1 %v19977_v6  ;;  %v20013_v47 = vld [vmem:[%s29344_s3 + $0x3c4] ss:$16 sps:$4 sm:$0xff]   ;;  %v20011_v49 = vld [vmem:[%s29344_s3 + $0x3c0] ss:$16 sps:$4 sm:$0xff]   ;;  %v20023_v60 = vld [vmem:[%s29344_s3 + $0x48] ss:$16 sps:$4 sm:$0xff]  }
  0xfb   :  { %v23279_v18 = vsel %vm394_vm2, %v410_v58, %v470_v16  ;;  %v20016_v51 = vld [vmem:[%s29344_s3 + $0x3e4] ss:$16 sps:$4 sm:$0xff]   ;;  %v20014_v52 = vld [vmem:[%s29344_s3 + $0x3e0] ss:$16 sps:$4 sm:$0xff]   ;;  %v20020_v58 = vld [vmem:[%s29344_s3 + $0x28] ss:$16 sps:$4 sm:$0xff]  }
  0xfc   :  { %1349 = vmatmul.mubr.bf16.gmra.mrb[12].mxu0 %v23266_v7  ;;  %1190 = vmatmul.mubr.bf16.gmra.mrb[4].mxu1 %v23279_v18  ;;  %v20029_v50 = vld [vmem:[%s29344_s3 + $0x88] ss:$16 sps:$4 sm:$0xff]   ;;  %v20034_v63 = vld [vmem:[%s29344_s3 + $0xac] ss:$16 sps:$4 sm:$0xff]  }
  0xfd   :  { %1205 = vmatpush1.bf16.msra.mxu1 %v19975_v12  ;;  %1232 = vmatprep.mubr.bf16.mxu1 %v462_v61  ;;  %v20026_v61 = vld [vmem:[%s29344_s3 + $0x68] ss:$16 sps:$4 sm:$0xff]   ;;  %v20037_v1 = vld [vmem:[%s29344_s3 + $0xcc] ss:$16 sps:$4 sm:$0xff]  }
  0xfe   :  { %1206 = vmatprep.subr.bf16.mxu1 %v19980_v15  ;;  %v20035_v2 = vld [vmem:[%s29344_s3 + $0xc8] ss:$16 sps:$4 sm:$0xff]   ;;  %v20040_v3 = vld [vmem:[%s29344_s3 + $0xec] ss:$16 sps:$4 sm:$0xff]  }
  0xff   :  { %v20038_v4 = vld [vmem:[%s29344_s3 + $0xe8] ss:$16 sps:$4 sm:$0xff]   ;;  %v20043_v5 = vld [vmem:[%s29344_s3 + $0x10c] ss:$16 sps:$4 sm:$0xff]  }
 0x100   :  { %v20041_v6 = vld [vmem:[%s29344_s3 + $0x108] ss:$16 sps:$4 sm:$0xff]   ;;  %v20046_v35 = vld [vmem:[%s29344_s3 + $0x12c] ss:$16 sps:$4 sm:$0xff]  }
 0x101   :  { %1207 = vmatpush1.bf16.msra.mxu1 %v19978_v20  ;;  %v20044_v36 = vld [vmem:[%s29344_s3 + $0x128] ss:$16 sps:$4 sm:$0xff]   ;;  %v20049_v45 = vld [vmem:[%s29344_s3 + $0x14c] ss:$16 sps:$4 sm:$0xff]  }
 0x102   :  { %1208 = vmatprep.subr.bf16.mxu1 %v19983_v22  ;;  %v20052_v12 = vld [vmem:[%s29344_s3 + $0x16c] ss:$16 sps:$4 sm:$0xff]   ;;  %v20050_v13 = vld [vmem:[%s29344_s3 + $0x168] ss:$16 sps:$4 sm:$0xff]  }
 0x103   :  { %v20055_v14 = vld [vmem:[%s29344_s3 + $0x18c] ss:$16 sps:$4 sm:$0xff]   ;;  %v20053_v15 = vld [vmem:[%s29344_s3 + $0x188] ss:$16 sps:$4 sm:$0xff]  }
 0x104   :  { %v20058_v16 = vld [vmem:[%s29344_s3 + $0x1ac] ss:$16 sps:$4 sm:$0xff]   ;;  %v20056_v20 = vld [vmem:[%s29344_s3 + $0x1a8] ss:$16 sps:$4 sm:$0xff]  }
 0x105   :  { %1209 = vmatpush1.bf16.msra.mxu1 %v19981_v23  ;;  %v20061_v22 = vld [vmem:[%s29344_s3 + $0x1cc] ss:$16 sps:$4 sm:$0xff]   ;;  %v20059_v23 = vld [vmem:[%s29344_s3 + $0x1c8] ss:$16 sps:$4 sm:$0xff]  }
 0x106   :  { %1210 = vmatprep.subr.bf16.mxu1 %v19986_v24  ;;  %v20064_v24 = vld [vmem:[%s29344_s3 + $0x1ec] ss:$16 sps:$4 sm:$0xff]  }
 0x109   :  { %1211 = vmatpush1.bf16.msra.mxu1 %v19984_v25  ;;  %v20062_v25 = vld [vmem:[%s29344_s3 + $0x1e8] ss:$16 sps:$4 sm:$0xff]  }
 0x10a   :  { %1212 = vmatprep.subr.bf16.mxu1 %v19989_v27  ;;  %v20065_v27 = vld [vmem:[%s29346_s5] ss:$40 sps:$4 sm:$0xff]  }
 0x10d   :  { %1213 = vmatpush1.bf16.msra.mxu1 %v19987_v28  ;;  %v20067_v28 = vld [vmem:[%s29346_s5 + $0x4] ss:$40 sps:$4 sm:$0xff]  }
 0x10e   :  { %1214 = vmatprep.subr.bf16.mxu1 %v19992_v29  ;;  %v20068_v29 = vld [vmem:[%s29346_s5 + $0x8] ss:$40 sps:$4 sm:$0xff]  }
 0x111   :  { %1215 = vmatpush1.bf16.msra.mxu1 %v19990_v30  ;;  %v20074_v30 = vld [vmem:[%s29346_s5 + $0x58] ss:$40 sps:$4 sm:$0xff]  }
 0x112   :  { %1216 = vmatprep.subr.bf16.mxu1 %v19995_v31  ;;  %v20076_v31 = vld [vmem:[%s29346_s5 + $0x5c] ss:$40 sps:$4 sm:$0xff]  }
 0x115   :  { %1217 = vmatpush1.bf16.msra.mxu1 %v19993_v32  ;;  %v20079_v32 = vld [vmem:[%s29346_s5 + $0xa4] ss:$40 sps:$4 sm:$0xff]  }
 0x116   :  { %1218 = vmatprep.subr.bf16.mxu1 %v19998_v33  ;;  %v20077_v33 = vld [vmem:[%s29346_s5 + $0xa0] ss:$40 sps:$4 sm:$0xff]  }
 0x119   :  { %1219 = vmatpush1.bf16.msra.mxu1 %v19996_v34  ;;  %v20082_v34 = vld [vmem:[%s29346_s5 + $0xac] ss:$40 sps:$4 sm:$0xff]  }
 0x11a   :  { %1220 = vmatprep.subr.bf16.mxu1 %v20001_v37  ;;  %v20080_v37 = vld [vmem:[%s29346_s5 + $0xa8] ss:$40 sps:$4 sm:$0xff]  }
 0x11d   :  { %1221 = vmatpush1.bf16.msra.mxu1 %v19999_v38  ;;  %v20085_v38 = vld [vmem:[%s29346_s5 + $0xf4] ss:$40 sps:$4 sm:$0xff]  }
 0x11e   :  { %1222 = vmatprep.subr.bf16.mxu1 %v20004_v39  ;;  %v20088_v39 = vld [vmem:[%s29346_s5 + $0xfc] ss:$40 sps:$4 sm:$0xff]  }
 0x121   :  { %1223 = vmatpush1.bf16.msra.mxu1 %v20002_v40  ;;  %v20083_v40 = vld [vmem:[%s29346_s5 + $0xf0] ss:$40 sps:$4 sm:$0xff]  }
 0x122   :  { %1224 = vmatprep.subr.bf16.mxu1 %v20007_v41  ;;  %v20086_v41 = vld [vmem:[%s29346_s5 + $0xf8] ss:$40 sps:$4 sm:$0xff]  }
 0x125   :  { %1225 = vmatpush1.bf16.msra.mxu1 %v20005_v42  ;;  %v20091_v42 = vld [vmem:[%s29346_s5 + $0x144] ss:$40 sps:$4 sm:$0xff]  }
 0x126   :  { %1226 = vmatprep.subr.bf16.mxu1 %v20010_v44  ;;  %v20094_v44 = vld [vmem:[%s29346_s5 + $0x14c] ss:$40 sps:$4 sm:$0xff]  }
 0x129   :  { %1227 = vmatpush1.bf16.msra.mxu1 %v20008_v46  ;;  %v20089_v46 = vld [vmem:[%s29346_s5 + $0x140] ss:$40 sps:$4 sm:$0xff]  }
 0x12a   :  { %1228 = vmatprep.subr.bf16.mxu1 %v20013_v47  ;;  %v20092_v47 = vld [vmem:[%s29346_s5 + $0x148] ss:$40 sps:$4 sm:$0xff]  }
 0x12d   :  { %1229 = vmatpush1.bf16.msra.mxu1 %v20011_v49  ;;  %v20097_v49 = vld [vmem:[%s29346_s5 + $0x194] ss:$40 sps:$4 sm:$0xff]  }
 0x12e   :  { %1230 = vmatprep.subr.bf16.mxu1 %v20016_v51  ;;  %v20095_v51 = vld [vmem:[%s29346_s5 + $0x190] ss:$40 sps:$4 sm:$0xff]  }
 0x131   :  { %1231 = vmatpush1.bf16.msra.mxu1 %v20014_v52  ;;  %v20100_v52 = vld [vmem:[%s29346_s5 + $0x19c] ss:$40 sps:$4 sm:$0xff]  }
 0x132   :  { %1253 = vmatprep.subr.bf16.mxu1 %v20019_v54  ;;  %v20098_v54 = vld [vmem:[%s29346_s5 + $0x198] ss:$40 sps:$4 sm:$0xff]  }
 0x134   :  { %1233 = vmatmul.mubr.bf16.vlgmr.msra.gmra.mrb[0].mxu1 %v23243_v57  ;;  %v20028_v57 = vld [vmem:[%s29344_s3 + $0x6c] ss:$16 sps:$4 sm:$0xff]  }
 0x135   :  { %1242 = vmatprep.mubr.bf16.mxu1 %v23248_v62  ;;  %1254 = vmatpush1.bf16.msra.mxu1 %v20017_v55  ;;  %v20031_v62 = vld [vmem:[%s29344_s3 + $0x8c] ss:$16 sps:$4 sm:$0xff]  }
 0x136   :  { %1255 = vmatprep.subr.bf16.mxu1 %v20022_v56  ;;  %v20103_v55 = vld [vmem:[%s29346_s5 + $0x1e4] ss:$40 sps:$4 sm:$0xff]  }
 0x137   :  { %v20106_v56 = vld [vmem:[%s29346_s5 + $0x1ec] ss:$40 sps:$4 sm:$0xff]  }
 0x139   :  { %1256 = vmatpush1.bf16.msra.mxu1 %v20020_v58  ;;  %v20101_v58 = vld [vmem:[%s29346_s5 + $0x1e0] ss:$40 sps:$4 sm:$0xff]  }
 0x13a   :  { %1257 = vmatprep.subr.bf16.mxu1 %v20025_v59  ;;  %v20104_v59 = vld [vmem:[%s29346_s5 + $0x1e8] ss:$40 sps:$4 sm:$0xff]  }
 0x13c   :  { %1243 = vmatmul.mubr.bf16.gmra.mrb[4].mxu1 %v23266_v7  ;;  %v20047_v7 = vld [vmem:[%s29344_s3 + $0x148] ss:$16 sps:$4 sm:$0xff]  }
 0x13d   :  { %1258 = vmatpush1.bf16.msra.mxu1 %v20023_v60  ;;  %1285 = vmatprep.mubr.bf16.mxu1 %v23237_v53  ;;  %v20032_v53 = vld [vmem:[%s29344_s3 + $0xa8] ss:$16 sps:$4 sm:$0xff]  }
 0x13e   :  { %1259 = vmatprep.subr.bf16.mxu1 %v20028_v57 }
 0x141   :  { %1260 = vmatpush1.bf16.msra.mxu1 %v20026_v61  ;;  %v20109_v61 = vld [vmem:[%s29346_s5 + $0x234] ss:$40 sps:$4 sm:$0xff]  }
 0x142   :  { %1261 = vmatprep.subr.bf16.mxu1 %v20031_v62  ;;  %v20112_v62 = vld [vmem:[%s29346_s5 + $0x23c] ss:$40 sps:$4 sm:$0xff]  }
 0x145   :  { %1262 = vmatpush1.bf16.msra.mxu1 %v20029_v50 }
 0x146   :  { %1263 = vmatprep.subr.bf16.mxu1 %v20034_v63  ;;  %v20107_v63 = vld [vmem:[%s29346_s5 + $0x230] ss:$40 sps:$4 sm:$0xff]  }
 0x149   :  { %1264 = vmatpush1.bf16.msra.mxu1 %v20032_v53  ;;  %v20110_v53 = vld [vmem:[%s29346_s5 + $0x238] ss:$40 sps:$4 sm:$0xff]  }
 0x14a   :  { %1265 = vmatprep.subr.bf16.mxu1 %v20037_v1 }
 0x14d   :  { %1266 = vmatpush1.bf16.msra.mxu1 %v20035_v2  ;;  %v20115_v2 = vld [vmem:[%s29346_s5 + $0x284] ss:$40 sps:$4 sm:$0xff]  }
 0x14e   :  { %1267 = vmatprep.subr.bf16.mxu1 %v20040_v3  ;;  %v20118_v3 = vld [vmem:[%s29346_s5 + $0x28c] ss:$40 sps:$4 sm:$0xff]  }
 0x151   :  { %1268 = vmatpush1.bf16.msra.mxu1 %v20038_v4  ;;  %v20113_v4 = vld [vmem:[%s29346_s5 + $0x280] ss:$40 sps:$4 sm:$0xff]  }
 0x152   :  { %1269 = vmatprep.subr.bf16.mxu1 %v20043_v5  ;;  %v20116_v5 = vld [vmem:[%s29346_s5 + $0x288] ss:$40 sps:$4 sm:$0xff]  }
 0x155   :  { %1270 = vmatpush1.bf16.msra.mxu1 %v20041_v6 }
 0x156   :  { %1271 = vmatprep.subr.bf16.mxu1 %v20046_v35 }
 0x159   :  { %1272 = vmatpush1.bf16.msra.mxu1 %v20044_v36  ;;  %v20121_v36 = vld [vmem:[%s29346_s5 + $0x2d4] ss:$40 sps:$4 sm:$0xff]  }
 0x15a   :  { %1273 = vmatprep.subr.bf16.mxu1 %v20049_v45  ;;  %v20124_v45 = vld [vmem:[%s29346_s5 + $0x2dc] ss:$40 sps:$4 sm:$0xff]  }
 0x15d   :  { %1274 = vmatpush1.bf16.msra.mxu1 %v20047_v7 }
 0x15e   :  { %1275 = vmatprep.subr.bf16.mxu1 %v20052_v12  ;;  %v20119_v12 = vld [vmem:[%s29346_s5 + $0x2d0] ss:$40 sps:$4 sm:$0xff]  }
 0x161   :  { %1276 = vmatpush1.bf16.msra.mxu1 %v20050_v13  ;;  %v20122_v13 = vld [vmem:[%s29346_s5 + $0x2d8] ss:$40 sps:$4 sm:$0xff]  }
 0x162   :  { %1277 = vmatprep.subr.bf16.mxu1 %v20055_v14 }
 0x165   :  { %1278 = vmatpush1.bf16.msra.mxu1 %v20053_v15  ;;  %v20127_v15 = vld [vmem:[%s29346_s5 + $0x324] ss:$40 sps:$4 sm:$0xff]  }
 0x166   :  { %1279 = vmatprep.subr.bf16.mxu1 %v20058_v16  ;;  %v20130_v16 = vld [vmem:[%s29346_s5 + $0x32c] ss:$40 sps:$4 sm:$0xff]  }
 0x169   :  { %1280 = vmatpush1.bf16.msra.mxu1 %v20056_v20  ;;  %v20125_v20 = vld [vmem:[%s29346_s5 + $0x320] ss:$40 sps:$4 sm:$0xff]  }
 0x16a   :  { %1281 = vmatprep.subr.bf16.mxu1 %v20061_v22  ;;  %v20128_v22 = vld [vmem:[%s29346_s5 + $0x328] ss:$40 sps:$4 sm:$0xff]  }
 0x16d   :  { %1282 = vmatpush1.bf16.msra.mxu1 %v20059_v23  ;;  %v20133_v23 = vld [vmem:[%s29346_s5 + $0x374] ss:$40 sps:$4 sm:$0xff]  }
 0x16e   :  { %1283 = vmatprep.subr.bf16.mxu1 %v20064_v24  ;;  %v20136_v24 = vld [vmem:[%s29346_s5 + $0x37c] ss:$40 sps:$4 sm:$0xff]  }
 0x171   :  { %1284 = vmatpush1.bf16.msra.mxu1 %v20062_v25  ;;  %v20131_v25 = vld [vmem:[%s29346_s5 + $0x370] ss:$40 sps:$4 sm:$0xff]  }
 0x172   :  { %2387 = vmatprep.subr.bf16.mxu1 %v20067_v28  ;;  %v20139_v28 = vld [vmem:[%s29346_s5 + $0x3c4] ss:$40 sps:$4 sm:$0xff]  }
 0x174   :  { %1286 = vmatmul.mubr.bf16.vlgmr.msra.gmra.mrb[8].mxu1 %v23254_v0  ;;  %v20070_v0 = vld [vmem:[%s29346_s5 + $0xc] ss:$40 sps:$4 sm:$0xff]  }
 0x175   :  { %1295 = vmatprep.mubr.bf16.mxu1 %v23269_v9  ;;  %v20071_v9 = vld [vmem:[%s29346_s5 + $0x50] ss:$40 sps:$4 sm:$0xff]   ;;  %2440 = vmatprep.subr.bf16.mxu0 %v20070_v0  ;;  %v20137_v0 = vld [vmem:[%s29346_s5 + $0x3c0] ss:$40 sps:$4 sm:$0xff]  }
 0x176   :  { %2388 = vmatpush1.bf16.msra.mxu1 %v20065_v27  ;;  %2441 = vmatpush1.bf16.msra.mxu0 %v20068_v29  ;;  %v20134_v27 = vld [vmem:[%s29346_s5 + $0x378] ss:$40 sps:$4 sm:$0xff]   ;;  %v20142_v29 = vld [vmem:[%s29346_s5 + $0x3cc] ss:$40 sps:$4 sm:$0xff]  }
 0x177   :  { %2442 = vmatprep.subr.bf16.mxu0 %v20076_v31  ;;  %v20143_v31 = vld [vmem:[%s29346_s5 + $0x410] ss:$40 sps:$4 sm:$0xff]  }
 0x17a   :  { %2443 = vmatpush1.bf16.msra.mxu0 %v20074_v30  ;;  %v20148_v30 = vld [vmem:[%s29346_s5 + $0x41c] ss:$40 sps:$4 sm:$0xff]  }
 0x17b   :  { %2444 = vmatprep.subr.bf16.mxu0 %v20082_v34  ;;  %v20154_v34 = vld [vmem:[%s29346_s5 + $0x46c] ss:$40 sps:$4 sm:$0xff]  }
 0x17c   :  { %1296 = vmatmul.mubr.bf16.gmra.mrb[12].mxu1 %v23279_v18  ;;  %v20073_v18 = vld [vmem:[%s29346_s5 + $0x54] ss:$40 sps:$4 sm:$0xff]  }
 0x17d   :  { %2389 = vmatprep.subr.bf16.mxu1 %v20073_v18  ;;  %v20145_v18 = vld [vmem:[%s29346_s5 + $0x414] ss:$40 sps:$4 sm:$0xff]  }
 0x17e   :  { %2390 = vmatpush1.bf16.msra.mxu1 %v20071_v9  ;;  %2445 = vmatpush1.bf16.msra.mxu0 %v20080_v37  ;;  %v20140_v9 = vld [vmem:[%s29346_s5 + $0x3c8] ss:$40 sps:$4 sm:$0xff]  }
 0x17f   :  { %2391 = vmatprep.subr.bf16.mxu1 %v20079_v32  ;;  %2446 = vmatprep.subr.bf16.mxu0 %v20088_v39  ;;  %v20146_v32 = vld [vmem:[%s29346_s5 + $0x418] ss:$40 sps:$4 sm:$0xff]  }
 0x180   :  { %v20149_v37 = vld [vmem:[%s29346_s5 + $0x460] ss:$40 sps:$4 sm:$0xff]   ;;  %v20155_v39 = vld [vmem:[%s29346_s5 + $0x4b0] ss:$40 sps:$4 sm:$0xff]  }
 0x182   :  { %2392 = vmatpush1.bf16.msra.mxu1 %v20077_v33  ;;  %2447 = vmatpush1.bf16.msra.mxu0 %v20086_v41  ;;  %v20151_v33 = vld [vmem:[%s29346_s5 + $0x464] ss:$40 sps:$4 sm:$0xff]   ;;  %v20158_v41 = vld [vmem:[%s29346_s5 + $0x4b8] ss:$40 sps:$4 sm:$0xff]  }
 0x183   :  { %2393 = vmatprep.subr.bf16.mxu1 %v20085_v38  ;;  %2448 = vmatprep.subr.bf16.mxu0 %v20094_v44  ;;  %v20152_v38 = vld [vmem:[%s29346_s5 + $0x468] ss:$40 sps:$4 sm:$0xff]   ;;  %v20163_v44 = vld [vmem:[%s29346_s5 + $0x14] ss:$40 sps:$4 sm:$0xff]  }
 0x186   :  { %2394 = vmatpush1.bf16.msra.mxu1 %v20083_v40  ;;  %2449 = vmatpush1.bf16.msra.mxu0 %v20092_v47  ;;  %v20157_v40 = vld [vmem:[%s29346_s5 + $0x4b4] ss:$40 sps:$4 sm:$0xff]  }
 0x187   :  { %2395 = vmatprep.subr.bf16.mxu1 %v20091_v42  ;;  %2450 = vmatprep.subr.bf16.mxu0 %v20100_v52  ;;  %v20160_v42 = vld [vmem:[%s29346_s5 + $0x4bc] ss:$40 sps:$4 sm:$0xff]  }
 0x18a   :  { %2396 = vmatpush1.bf16.msra.mxu1 %v20089_v46  ;;  %2451 = vmatpush1.bf16.msra.mxu0 %v20098_v54  ;;  %v20166_v46 = vld [vmem:[%s29346_s5 + $0x1c] ss:$40 sps:$4 sm:$0xff]  }
 0x18b   :  { %2397 = vmatprep.subr.bf16.mxu1 %v20097_v49  ;;  %2452 = vmatprep.subr.bf16.mxu0 %v20106_v56 }
 0x18e   :  { %2398 = vmatpush1.bf16.msra.mxu1 %v20095_v51  ;;  %2453 = vmatpush1.bf16.msra.mxu0 %v20104_v59  ;;  %v23684_v59 = vsub.s32 2, %v23178_v8 }
 0x18f   :  { %2399 = vmatprep.subr.bf16.mxu1 %v20103_v55  ;;  %2454 = vmatprep.subr.bf16.mxu0 %v20112_v62  ;;  %v23690_v62 = vsub.s32 3, %v23178_v8 }
 0x192   :  { %2400 = vmatpush1.bf16.msra.mxu1 %v20101_v58  ;;  %2455 = vmatpush1.bf16.msra.mxu0 %v20110_v53 }
 0x193   :  { %2401 = vmatprep.subr.bf16.mxu1 %v20109_v61  ;;  %2456 = vmatprep.subr.bf16.mxu0 %v20118_v3  ;;  %v372_v61 = vld [vmem:[%s29347_s4] sm:$0xf] }
 0x194   :  { %v389_v53 = vrot.slane %v372_v61, %v23690_v62 }
 0x196   :  { %2402 = vmatpush1.bf16.msra.mxu1 %v20107_v63  ;;  %2457 = vmatpush1.bf16.msra.mxu0 %v20116_v5  ;;  %v385_v63 = vrot.slane %v372_v61, %v23684_v59 }
 0x197   :  { %2403 = vmatprep.subr.bf16.mxu1 %v20115_v2  ;;  %2458 = vmatprep.subr.bf16.mxu0 %v20124_v45 }
 0x19a   :  { %2404 = vmatpush1.bf16.msra.mxu1 %v20113_v4  ;;  %2459 = vmatpush1.bf16.msra.mxu0 %v20122_v13 }
 0x19b   :  { %2405 = vmatprep.subr.bf16.mxu1 %v20121_v36  ;;  %2460 = vmatprep.subr.bf16.mxu0 %v20130_v16 }
 0x19e   :  { %2406 = vmatpush1.bf16.msra.mxu1 %v20119_v12  ;;  %2461 = vmatpush1.bf16.msra.mxu0 %v20128_v22  ;;  %v381_v22 = vrot.slane %v372_v61, %v23187_v11 }
 0x19f   :  { %2407 = vmatprep.subr.bf16.mxu1 %v20127_v15  ;;  %2462 = vmatprep.subr.bf16.mxu0 %v20136_v24  ;;  %v377_v15 = vrot.slane %v372_v61, %v23184_v10 }
 0x1a2   :  { %2408 = vmatpush1.bf16.msra.mxu1 %v20125_v20  ;;  %2463 = vmatpush1.bf16.msra.mxu0 %v20134_v27 }
 0x1a3   :  { %2409 = vmatprep.subr.bf16.mxu1 %v20133_v23  ;;  %2464 = vmatprep.subr.bf16.mxu0 %v20142_v29 }
 0x1a6   :  { %2410 = vmatpush1.bf16.msra.mxu1 %v20131_v25  ;;  %2465 = vmatpush1.bf16.msra.mxu0 %v20140_v9 }
 0x1a7   :  { %2411 = vmatprep.subr.bf16.mxu1 %v20139_v28  ;;  %2466 = vmatprep.subr.bf16.mxu0 %v20148_v30 }
 0x1aa   :  { %2412 = vmatpush1.bf16.msra.mxu1 %v20137_v0  ;;  %2467 = vmatpush1.bf16.msra.mxu0 %v20146_v32 }
 0x1ab   :  { %2413 = vmatprep.subr.bf16.mxu1 %v20145_v18  ;;  %2468 = vmatprep.subr.bf16.mxu0 %v20154_v34 }
 0x1ae   :  { %2414 = vmatpush1.bf16.msra.mxu1 %v20143_v31  ;;  %2469 = vmatpush1.bf16.msra.mxu0 %v20152_v38 }
 0x1af   :  { %2415 = vmatprep.subr.bf16.mxu1 %v20151_v33  ;;  %2470 = vmatprep.subr.bf16.mxu0 %v20160_v42 }
 0x1b2   :  { %2416 = vmatpush1.bf16.msra.mxu1 %v20149_v37  ;;  %2471 = vmatpush1.bf16.msra.mxu0 %v20158_v41 }
 0x1b3   :  { %2417 = vmatprep.subr.bf16.mxu1 %v20157_v40  ;;  %2546 = vmatprep.subr.bf16.mxu0 %v20166_v46 }
 0x1b6   :  { %2418 = vmatpush1.bf16.msra.mxu1 %v20155_v39 }
 0x1b7   :  { %2493 = vmatprep.subr.bf16.mxu1 %v20163_v44 }
 0x1c7   :  { %v23545_v60 = vpop.f32.mrb[8].mxu0 }
 0x1c8   :  { %v23547_v57 = vpop.f32.mrb[9].mxu0 }
 0x1c9   :  { %v23555_v50 = vpop.f32.mrb[10].mxu0 }
 0x1ca   :  { %v23563_v1 = vpop.f32.mrb[11].mxu0 }
 0x1cf   :  { %v23577_v6 = vpop.f32.mrb[12].mxu0 }
 0x1d0   :  { %v23579_v35 = vpop.f32.mrb[13].mxu0 }
 0x1d1   :  { %v23587_v7 = vpop.f32.mrb[14].mxu0 }
 0x1d2   :  { %v23595_v14 = vpop.f32.mrb[15].mxu0 }
 0x207   :  { %v1234_v47 = vpop.f32.mrb[0].mxu1 }
 0x208   :  { %v1236_v49 = vpop.f32.mrb[1].mxu1  ;;  %v19450_v29 = vadd.f32 %v1234_v47, %v377_v15 }
 0x209   :  { %v1238_v51 = vpop.f32.mrb[2].mxu1  ;;  %v19451_v9 = vadd.f32 %v1236_v49, %v381_v22 }
 0x20a   :  { %v1240_v52 = vpop.f32.mrb[3].mxu1 }
 0x20b   :  { %v19453_v42 = vadd.f32 %v1240_v52, %v381_v22 }
 0x20f   :  { %v23675_v54 = vpop.f32.mrb[4].mxu1 }
 0x210   :  { %v23677_v55 = vpop.f32.mrb[5].mxu1 }
 0x211   :  { %v23679_v56 = vpop.f32.mrb[6].mxu1 }
 0x212   :  { %v23681_v58 = vpop.f32.mrb[7].mxu1 }
 0x247   :  { %v1287_v2 = vpop.f32.mrb[8].mxu1 }
 0x248   :  { %v1288_v3 = vadd.f32 %v1287_v2, %v385_v63  ;;  %v1289_v4 = vpop.f32.mrb[9].mxu1  ;;  %v19456_v2 = vadd.f32 %v23679_v56, %v377_v15 }
 0x249   :  { %v1290_v5 = vadd.f32 %v1289_v4, %v389_v53  ;;  %v1291_v36 = vpop.f32.mrb[10].mxu1  ;;  %v19457_v4 = vadd.f32 %v23681_v58, %v381_v22 }
 0x24a   :  { %v1341_v45 = vadd.f32 %v23545_v60, %v1288_v3  ;;  %v1292_v12 = vadd.f32 %v1291_v36, %v385_v63  ;;  %v1293_v13 = vpop.f32.mrb[11].mxu1 }
 0x24b   :  { %v1343_v16 = vadd.f32 %v23547_v57, %v1290_v5  ;;  %v1294_v20 = vadd.f32 %v1293_v13, %v389_v53  ;;  %v19452_v57 = vadd.f32 %v1238_v51, %v377_v15 }
 0x24c   :  { %v16253_v23 = vmul.f32 -1.442695, %v1341_v45  ;;  %v1345_v24 = vadd.f32 %v23555_v50, %v1292_v12 }
 0x24d   :  { %v16254_v25 = vmul.f32 -1.442695, %v1343_v16  ;;  %v1347_v27 = vadd.f32 %v23563_v1, %v1294_v20 }
 0x24e   :  { %22609 = vpow2.f32 %v16253_v23  ;;  %v16255_v28 = vmul.f32 -1.442695, %v1345_v24 }
 0x24f   :  { %22611 = vpow2.f32 %v16254_v25  ;;  %v16256_v60 = vmul.f32 -1.442695, %v1347_v27  ;;  %v1297_v0 = vpop.f32.mrb[12].mxu1 }
 0x250   :  { %22613 = vpow2.f32 %v16255_v28  ;;  %v1298_v18 = vadd.f32 %v1297_v0, %v385_v63  ;;  %v1299_v30 = vpop.f32.mrb[13].mxu1  ;;  %v20164_v0 = vld [vmem:[%s29346_s5 + $0x18] ss:$40 sps:$4 sm:$0xff]  }
 0x251   :  { %22615 = vpow2.f32 %v16256_v60  ;;  %v1300_v31 = vadd.f32 %v1299_v30, %v389_v53  ;;  %v1301_v32 = vpop.f32.mrb[14].mxu1  ;;  %v20161_v60 = vld [vmem:[%s29346_s5 + $0x10] ss:$40 sps:$4 sm:$0xff]   ;;  %v20169_v30 = vld [vmem:[%s29346_s5 + $0x64] ss:$40 sps:$4 sm:$0xff]  }
 0x252   :  { %v1351_v33 = vadd.f32 %v23577_v6, %v1298_v18  ;;  %v1302_v50 = vadd.f32 %v1301_v32, %v385_v63  ;;  %v1303_v34 = vpop.f32.mrb[15].mxu1  ;;  %22617 = vtanh.f32 %v19450_v29 }
 0x253   :  { %v1353_v1 = vadd.f32 %v23579_v35, %v1300_v31  ;;  %v1304_v37 = vadd.f32 %v1303_v34, %v389_v53  ;;  %22619 = vtanh.f32 %v19451_v9  ;;  %v20167_v34 = vld [vmem:[%s29346_s5 + $0x60] ss:$40 sps:$4 sm:$0xff]  }
 0x254   :  { %v16257_v38 = vmul.f32 -1.442695, %v1351_v33  ;;  %v1355_v39 = vadd.f32 %v23587_v7, %v1302_v50  ;;  %22621 = vtanh.f32 %v19452_v57  ;;  %v19454_v7 = vadd.f32 %v23675_v54, %v377_v15  ;;  %v20172_v57 = vld [vmem:[%s29346_s5 + $0x6c] ss:$40 sps:$4 sm:$0xff]  }
 0x255   :  { %v16258_v40 = vmul.f32 -1.442695, %v1353_v1  ;;  %v1357_v41 = vadd.f32 %v23595_v14, %v1304_v37  ;;  %v19455_v14 = vadd.f32 %v23677_v55, %v381_v22  ;;  %v20170_v1 = vld [vmem:[%s29346_s5 + $0x68] ss:$40 sps:$4 sm:$0xff]  }
 0x256   :  { %22623 = vpow2.f32 %v16257_v38  ;;  %v16259_v44 = vmul.f32 -1.442695, %v1355_v39  ;;  %v20175_v38 = vld [vmem:[%s29346_s5 + $0xb4] ss:$40 sps:$4 sm:$0xff]  }
 0x257   :  { %22625 = vpow2.f32 %v16258_v40  ;;  %v16260_v46 = vmul.f32 -1.442695, %v1357_v41  ;;  %v20178_v39 = vld [vmem:[%s29346_s5 + $0xbc] ss:$40 sps:$4 sm:$0xff]  }
 0x258   :  { %v22610_v6 = vpop.eup %22609  ;;  %22627 = vpow2.f32 %v16259_v44 }
 0x259   :  { %v22612_v47 = vpop.eup %22611  ;;  %v1391_v49 = vadd.f32 1.0, %v22610_v6  ;;  %22629 = vpow2.f32 %v16260_v46 }
 0x25a   :  { %v22614_v35 = vpop.eup %22613  ;;  %22631 = vtanh.f32 %v19453_v42  ;;  %v1392_v51 = vadd.f32 1.0, %v22612_v47  ;;  %v20173_v47 = vld [vmem:[%s29346_s5 + $0xb0] ss:$40 sps:$4 sm:$0xff]  }
 0x25b   :  { %v22616_v61 = vpop.eup %22615  ;;  %22633 = vrcp.f32 %v1391_v49  ;;  %v1393_v63 = vadd.f32 1.0, %v22614_v35  ;;  %v20176_v49 = vld [vmem:[%s29346_s5 + $0xb8] ss:$40 sps:$4 sm:$0xff]  }
 0x25c   :  { %22635 = vrcp.f32 %v1392_v51  ;;  %v1394_v52 = vadd.f32 1.0, %v22616_v61  ;;  %v22618_v53 = vpop.eup %22617  ;;  %v20181_v61 = vld [vmem:[%s29346_s5 + $0x104] ss:$40 sps:$4 sm:$0xff]  }
 0x25d   :  { %22637 = vrcp.f32 %v1393_v63  ;;  %v22620_v3 = vpop.eup %22619  ;;  %v20179_v63 = vld [vmem:[%s29346_s5 + $0x100] ss:$40 sps:$4 sm:$0xff]  }
 0x25e   :  { %22639 = vrcp.f32 %v1394_v52  ;;  %v22622_v5 = vpop.eup %22621  ;;  %v20187_v52 = vld [vmem:[%s29346_s5 + $0x154] ss:$40 sps:$4 sm:$0xff]  }
 0x25f   :  { %22641 = vtanh.f32 %v19454_v7  ;;  %v20184_v7 = vld [vmem:[%s29346_s5 + $0x10c] ss:$40 sps:$4 sm:$0xff]  }
 0x260   :  { %v22624_v36 = vpop.eup %22623  ;;  %22643 = vtanh.f32 %v19455_v14  ;;  %v20182_v14 = vld [vmem:[%s29346_s5 + $0x108] ss:$40 sps:$4 sm:$0xff]  }
 0x261   :  { %v22626_v45 = vpop.eup %22625  ;;  %22645 = vtanh.f32 %v19456_v2  ;;  %v1395_v54 = vadd.f32 1.0, %v22624_v36  ;;  %v20185_v2 = vld [vmem:[%s29346_s5 + $0x150] ss:$40 sps:$4 sm:$0xff]   ;;  %v20191_v36 = vld [vmem:[%s29346_s5 + $0x1a0] ss:$40 sps:$4 sm:$0xff]  }
 0x262   :  { %v22628_v12 = vpop.eup %22627  ;;  %22647 = vtanh.f32 %v19457_v4  ;;  %v1396_v55 = vadd.f32 1.0, %v22626_v45  ;;  %v20193_v4 = vld [vmem:[%s29346_s5 + $0x1a4] ss:$40 sps:$4 sm:$0xff]   ;;  %v20194_v45 = vld [vmem:[%s29346_s5 + $0x1a8] ss:$40 sps:$4 sm:$0xff]  }
 0x263   :  { %v22630_v13 = vpop.eup %22629  ;;  %22649 = vrcp.f32 %v1395_v54  ;;  %v1397_v16 = vadd.f32 1.0, %v22628_v12  ;;  %v20199_v54 = vld [vmem:[%s29346_s5 + $0x1f4] ss:$40 sps:$4 sm:$0xff]  }
 0x264   :  { %v22632_v20 = vpop.eup %22631  ;;  %22651 = vrcp.f32 %v1396_v55  ;;  %v1398_v56 = vadd.f32 1.0, %v22630_v13  ;;  %v20202_v12 = vld [vmem:[%s29346_s5 + $0x1fc] ss:$40 sps:$4 sm:$0xff]   ;;  %v20197_v55 = vld [vmem:[%s29346_s5 + $0x1f0] ss:$40 sps:$4 sm:$0xff]  }
 0x265   :  { %v22634_v15 = vpop.eup %22633  ;;  %22653 = vrcp.f32 %v1397_v16  ;;  %v20200_v13 = vld [vmem:[%s29346_s5 + $0x1f8] ss:$40 sps:$4 sm:$0xff]   ;;  %v20205_v16 = vld [vmem:[%s29346_s5 + $0x244] ss:$40 sps:$4 sm:$0xff]  }
 0x266   :  { %v22636_v58 = vpop.eup %22635  ;;  %22655 = vrcp.f32 %v1398_v56  ;;  %v1415_v22 = vmul.f32 %v22634_v15, %v22618_v53  ;;  %v20190_v53 = vld [vmem:[%s29346_s5 + $0x15c] ss:$40 sps:$4 sm:$0xff]   ;;  %v20203_v56 = vld [vmem:[%s29346_s5 + $0x240] ss:$40 sps:$4 sm:$0xff]  }
 0x267   :  { %v22638_v23 = vpop.eup %22637  ;;  %v1416_v24 = vmul.f32 %v22636_v58, %v22620_v3  ;;  %v20188_v3 = vld [vmem:[%s29346_s5 + $0x158] ss:$40 sps:$4 sm:$0xff]   ;;  %v20206_v15 = vld [vmem:[%s29346_s5 + $0x248] ss:$40 sps:$4 sm:$0xff]   ;;  %v20211_v58 = vld [vmem:[%s29346_s5 + $0x294] ss:$40 sps:$4 sm:$0xff]  }
 0x268   :  { %v22640_v25 = vpop.eup %22639  ;;  %v1417_v27 = vmul.f32 %v22638_v23, %v22622_v5  ;;  %v20196_v5 = vld [vmem:[%s29346_s5 + $0x1ac] ss:$40 sps:$4 sm:$0xff]   ;;  %v20209_v23 = vld [vmem:[%s29346_s5 + $0x290] ss:$40 sps:$4 sm:$0xff]  }
 0x269   :  { %v22642_v28 = vpop.eup %22641  ;;  %v1418_v29 = vmul.f32 %v22640_v25, %v22632_v20  ;;  %v20208_v20 = vld [vmem:[%s29346_s5 + $0x24c] ss:$40 sps:$4 sm:$0xff]  }
 0x26a   :  { %v22644_v9 = vpop.eup %22643  ;;  %v23714_v18 = vpack.c.bf16 %v1417_v27, %v1415_v22  ;;  %v20214_v22 = vld [vmem:[%s29346_s5 + $0x29c] ss:$40 sps:$4 sm:$0xff]   ;;  %v20220_v27 = vld [vmem:[%s29346_s5 + $0x2ec] ss:$40 sps:$4 sm:$0xff]  }
 0x26b   :  { %v22646_v31 = vpop.eup %22645  ;;  %v23722_v32 = vpack.c.bf16 %v1418_v29, %v1416_v24  ;;  %v20212_v24 = vld [vmem:[%s29346_s5 + $0x298] ss:$40 sps:$4 sm:$0xff]   ;;  %v20217_v25 = vld [vmem:[%s29346_s5 + $0x2e4] ss:$40 sps:$4 sm:$0xff]   ;;  %v20218_v29 = vld [vmem:[%s29346_s5 + $0x2e8] ss:$40 sps:$4 sm:$0xff]  }
 0x26c   :  { %v22648_v33 = vpop.eup %22647 }
 0x26d   :  { %v22650_v50 = vpop.eup %22649  ;;  %2419 = vmatprep.mubr.bf16.mxu1 %v23722_v32  ;;  %2472 = vmatprep.mubr.bf16.mxu0 %v23722_v32 }
 0x26e   :  { %v22652_v37 = vpop.eup %22651  ;;  %2420 = vmatmul.mubr.bf16.vlgmr.msra.gmra.mrb[16].mxu1 %v23714_v18  ;;  %2473 = vmatmul.mubr.bf16.vlgmr.msra.gmra.mrb[16].mxu0 %v23714_v18  ;;  %v1419_v40 = vmul.f32 %v22650_v50, %v22642_v28  ;;  %v20215_v28 = vld [vmem:[%s29346_s5 + $0x2e0] ss:$40 sps:$4 sm:$0xff]  }
 0x26f   :  { %v22654_v41 = vpop.eup %22653  ;;  %2494 = vmatpush1.bf16.msra.mxu1 %v20161_v60  ;;  %2547 = vmatpush1.bf16.msra.mxu0 %v20164_v0  ;;  %v1420_v42 = vmul.f32 %v22652_v37, %v22644_v9  ;;  %v20223_v60 = vld [vmem:[%s29346_s5 + $0x334] ss:$40 sps:$4 sm:$0xff]   ;;  %v20221_v9 = vld [vmem:[%s29346_s5 + $0x330] ss:$40 sps:$4 sm:$0xff]  }
 0x270   :  { %v22656_v44 = vpop.eup %22655  ;;  %2495 = vmatprep.subr.bf16.mxu1 %v20169_v30  ;;  %2548 = vmatprep.subr.bf16.mxu0 %v20172_v57  ;;  %v1421_v46 = vmul.f32 %v22654_v41, %v22646_v31  ;;  %v20226_v0 = vld [vmem:[%s29346_s5 + $0x33c] ss:$40 sps:$4 sm:$0xff]   ;;  %v20224_v30 = vld [vmem:[%s29346_s5 + $0x338] ss:$40 sps:$4 sm:$0xff]   ;;  %v20232_v31 = vld [vmem:[%s29346_s5 + $0x38c] ss:$40 sps:$4 sm:$0xff]  }
 0x271   :  { %v1422_v6 = vmul.f32 %v22656_v44, %v22648_v33  ;;  %v20229_v57 = vld [vmem:[%s29346_s5 + $0x384] ss:$40 sps:$4 sm:$0xff]   ;;  %v20227_v33 = vld [vmem:[%s29346_s5 + $0x380] ss:$40 sps:$4 sm:$0xff]   ;;  %v20233_v37 = vld [vmem:[%s29346_s5 + $0x3d0] ss:$40 sps:$4 sm:$0xff]  }
 0x272   :  { %v23746_v35 = vpack.c.bf16 %v1421_v46, %v1419_v40  ;;  %v20230_v50 = vld [vmem:[%s29346_s5 + $0x388] ss:$40 sps:$4 sm:$0xff]   ;;  %v20244_v40 = vld [vmem:[%s29346_s5 + $0x42c] ss:$40 sps:$4 sm:$0xff]   ;;  %v20250_v46 = vld [vmem:[%s29346_s5 + $0x47c] ss:$40 sps:$4 sm:$0xff]  }
 0x273   :  { %2496 = vmatpush1.bf16.msra.mxu1 %v20167_v34  ;;  %2549 = vmatpush1.bf16.msra.mxu0 %v20170_v1  ;;  %v23748_v51 = vpack.c.bf16 %v1422_v6, %v1420_v42  ;;  %v20235_v34 = vld [vmem:[%s29346_s5 + $0x3d4] ss:$40 sps:$4 sm:$0xff]   ;;  %v20239_v41 = vld [vmem:[%s29346_s5 + $0x420] ss:$40 sps:$4 sm:$0xff]   ;;  %v20245_v6 = vld [vmem:[%s29346_s5 + $0x470] ss:$40 sps:$4 sm:$0xff]  }
 0x274   :  { %2497 = vmatprep.subr.bf16.mxu1 %v20175_v38  ;;  %2550 = vmatprep.subr.bf16.mxu0 %v20178_v39  ;;  %v20238_v1 = vld [vmem:[%s29346_s5 + $0x3dc] ss:$40 sps:$4 sm:$0xff]   ;;  %v20236_v38 = vld [vmem:[%s29346_s5 + $0x3d8] ss:$40 sps:$4 sm:$0xff]   ;;  %v20242_v42 = vld [vmem:[%s29346_s5 + $0x428] ss:$40 sps:$4 sm:$0xff]  }
 0x275   :  { %2429 = vmatprep.mubr.bf16.mxu1 %v23748_v51  ;;  %2482 = vmatprep.mubr.bf16.mxu0 %v23748_v51  ;;  %v20241_v39 = vld [vmem:[%s29346_s5 + $0x424] ss:$40 sps:$4 sm:$0xff]   ;;  %v20247_v44 = vld [vmem:[%s29346_s5 + $0x474] ss:$40 sps:$4 sm:$0xff]  }
 0x276   :  { %2430 = vmatmul.mubr.bf16.gmra.mrb[20].mxu1 %v23746_v35  ;;  %2483 = vmatmul.mubr.bf16.gmra.mrb[20].mxu0 %v23746_v35 }
 0x277   :  { %2498 = vmatpush1.bf16.msra.mxu1 %v20173_v47  ;;  %2551 = vmatpush1.bf16.msra.mxu0 %v20176_v49  ;;  %v20248_v47 = vld [vmem:[%s29346_s5 + $0x478] ss:$40 sps:$4 sm:$0xff]   ;;  %v20253_v49 = vld [vmem:[%s29346_s5 + $0x4c4] ss:$40 sps:$4 sm:$0xff]  }
 0x278   :  { %2525 = vmatprep.mubr.bf16.mxu1 %v23722_v32  ;;  %2578 = vmatprep.mubr.bf16.mxu0 %v23722_v32 }
 0x279   :  { %2499 = vmatprep.subr.bf16.mxu1 %v20181_v61  ;;  %2552 = vmatprep.subr.bf16.mxu0 %v20184_v7  ;;  %v20256_v61 = vld [vmem:[%s29346_s5 + $0x4cc] ss:$40 sps:$4 sm:$0xff]   ;;  %v20251_v7 = vld [vmem:[%s29346_s5 + $0x4c0] ss:$40 sps:$4 sm:$0xff]  }
 0x27b   :  { %2500 = vmatpush1.bf16.msra.mxu1 %v20179_v63  ;;  %2553 = vmatpush1.bf16.msra.mxu0 %v20182_v14  ;;  %v20254_v63 = vld [vmem:[%s29346_s5 + $0x4c8] ss:$40 sps:$4 sm:$0xff]   ;;  %v20259_v14 = vld [vmem:[%s29346_s5 + $0x24] ss:$40 sps:$4 sm:$0xff]  }
 0x27c   :  { %2501 = vmatprep.subr.bf16.mxu1 %v20187_v52  ;;  %2554 = vmatprep.subr.bf16.mxu0 %v20190_v53  ;;  %v20307_v52 = vld [vmem:[%s29344_s3 + $0x404] ss:$16 sps:$4 sm:$0xff]   ;;  %v20257_v53 = vld [vmem:[%s29346_s5 + $0x20] ss:$40 sps:$4 sm:$0xff]  }
 0x27f   :  { %2502 = vmatpush1.bf16.msra.mxu1 %v20185_v2  ;;  %2555 = vmatpush1.bf16.msra.mxu0 %v20188_v3  ;;  %v20305_v2 = vld [vmem:[%s29344_s3 + $0x400] ss:$16 sps:$4 sm:$0xff]   ;;  %v20262_v3 = vld [vmem:[%s29346_s5 + $0x74] ss:$40 sps:$4 sm:$0xff]  }
 0x280   :  { %2503 = vmatprep.subr.bf16.mxu1 %v20193_v4  ;;  %2556 = vmatprep.subr.bf16.mxu0 %v20196_v5  ;;  %v20313_v4 = vld [vmem:[%s29344_s3 + $0x424] ss:$16 sps:$4 sm:$0xff]   ;;  %v20260_v5 = vld [vmem:[%s29346_s5 + $0x70] ss:$40 sps:$4 sm:$0xff]  }
 0x283   :  { %2504 = vmatpush1.bf16.msra.mxu1 %v20191_v36  ;;  %2557 = vmatpush1.bf16.msra.mxu0 %v20194_v45  ;;  %v20311_v36 = vld [vmem:[%s29344_s3 + $0x420] ss:$16 sps:$4 sm:$0xff]   ;;  %v20265_v45 = vld [vmem:[%s29346_s5 + $0xc4] ss:$40 sps:$4 sm:$0xff]  }
 0x284   :  { %2505 = vmatprep.subr.bf16.mxu1 %v20199_v54  ;;  %2558 = vmatprep.subr.bf16.mxu0 %v20202_v12  ;;  %v20319_v54 = vld [vmem:[%s29344_s3 + $0x444] ss:$16 sps:$4 sm:$0xff]   ;;  %v20263_v12 = vld [vmem:[%s29346_s5 + $0xc0] ss:$40 sps:$4 sm:$0xff]  }
 0x287   :  { %2506 = vmatpush1.bf16.msra.mxu1 %v20197_v55  ;;  %2559 = vmatpush1.bf16.msra.mxu0 %v20200_v13  ;;  %v20317_v55 = vld [vmem:[%s29344_s3 + $0x440] ss:$16 sps:$4 sm:$0xff]   ;;  %v20268_v13 = vld [vmem:[%s29346_s5 + $0x114] ss:$40 sps:$4 sm:$0xff]  }
 0x288   :  { %2507 = vmatprep.subr.bf16.mxu1 %v20205_v16  ;;  %2560 = vmatprep.subr.bf16.mxu0 %v20208_v20  ;;  %v20325_v16 = vld [vmem:[%s29344_s3 + $0x464] ss:$16 sps:$4 sm:$0xff]   ;;  %v20266_v20 = vld [vmem:[%s29346_s5 + $0x110] ss:$40 sps:$4 sm:$0xff]  }
 0x28b   :  { %2508 = vmatpush1.bf16.msra.mxu1 %v20203_v56  ;;  %2561 = vmatpush1.bf16.msra.mxu0 %v20206_v15  ;;  %v20323_v56 = vld [vmem:[%s29344_s3 + $0x460] ss:$16 sps:$4 sm:$0xff]   ;;  %v20271_v15 = vld [vmem:[%s29346_s5 + $0x164] ss:$40 sps:$4 sm:$0xff]  }
 0x28c   :  { %2509 = vmatprep.subr.bf16.mxu1 %v20211_v58  ;;  %2562 = vmatprep.subr.bf16.mxu0 %v20214_v22  ;;  %v20331_v58 = vld [vmem:[%s29344_s3 + $0x484] ss:$16 sps:$4 sm:$0xff]   ;;  %v20269_v22 = vld [vmem:[%s29346_s5 + $0x160] ss:$40 sps:$4 sm:$0xff]  }
 0x28f   :  { %2510 = vmatpush1.bf16.msra.mxu1 %v20209_v23  ;;  %2563 = vmatpush1.bf16.msra.mxu0 %v20212_v24  ;;  %v20274_v23 = vld [vmem:[%s29346_s5 + $0x1b4] ss:$40 sps:$4 sm:$0xff]  }
 0x290   :  { %2511 = vmatprep.subr.bf16.mxu1 %v20217_v25  ;;  %2564 = vmatprep.subr.bf16.mxu0 %v20220_v27  ;;  %v20337_v24 = vld [vmem:[%s29344_s3 + $0x4a4] ss:$16 sps:$4 sm:$0xff]   ;;  %v20272_v25 = vld [vmem:[%s29346_s5 + $0x1b0] ss:$40 sps:$4 sm:$0xff]  }
 0x291   :  { %v20335_v27 = vld [vmem:[%s29344_s3 + $0x4a0] ss:$16 sps:$4 sm:$0xff]  }
 0x293   :  { %2512 = vmatpush1.bf16.msra.mxu1 %v20215_v28  ;;  %2565 = vmatpush1.bf16.msra.mxu0 %v20218_v29  ;;  %v20277_v28 = vld [vmem:[%s29346_s5 + $0x204] ss:$40 sps:$4 sm:$0xff]  }
 0x294   :  { %2513 = vmatprep.subr.bf16.mxu1 %v20223_v60  ;;  %2566 = vmatprep.subr.bf16.mxu0 %v20226_v0  ;;  %v20343_v29 = vld [vmem:[%s29344_s3 + $0x4c4] ss:$16 sps:$4 sm:$0xff]   ;;  %v20275_v60 = vld [vmem:[%s29346_s5 + $0x200] ss:$40 sps:$4 sm:$0xff]  }
 0x295   :  { %v20341_v0 = vld [vmem:[%s29344_s3 + $0x4c0] ss:$16 sps:$4 sm:$0xff]  }
 0x297   :  { %2514 = vmatpush1.bf16.msra.mxu1 %v20221_v9  ;;  %2567 = vmatpush1.bf16.msra.mxu0 %v20224_v30  ;;  %v20280_v9 = vld [vmem:[%s29346_s5 + $0x254] ss:$40 sps:$4 sm:$0xff]  }
 0x298   :  { %2515 = vmatprep.subr.bf16.mxu1 %v20229_v57  ;;  %2568 = vmatprep.subr.bf16.mxu0 %v20232_v31  ;;  %v20349_v30 = vld [vmem:[%s29344_s3 + $0x4e4] ss:$16 sps:$4 sm:$0xff]   ;;  %v20278_v57 = vld [vmem:[%s29346_s5 + $0x250] ss:$40 sps:$4 sm:$0xff]  }
 0x299   :  { %v20347_v31 = vld [vmem:[%s29344_s3 + $0x4e0] ss:$16 sps:$4 sm:$0xff]  }
 0x29b   :  { %2516 = vmatpush1.bf16.msra.mxu1 %v20227_v33  ;;  %2569 = vmatpush1.bf16.msra.mxu0 %v20230_v50  ;;  %v20283_v33 = vld [vmem:[%s29346_s5 + $0x2a4] ss:$40 sps:$4 sm:$0xff]  }
 0x29c   :  { %2517 = vmatprep.subr.bf16.mxu1 %v20235_v34  ;;  %2570 = vmatprep.subr.bf16.mxu0 %v20238_v1  ;;  %v20355_v50 = vld [vmem:[%s29344_s3 + $0x504] ss:$16 sps:$4 sm:$0xff]   ;;  %v20281_v34 = vld [vmem:[%s29346_s5 + $0x2a0] ss:$40 sps:$4 sm:$0xff]  }
 0x29d   :  { %v20353_v1 = vld [vmem:[%s29344_s3 + $0x500] ss:$16 sps:$4 sm:$0xff]  }
 0x29f   :  { %2518 = vmatpush1.bf16.msra.mxu1 %v20233_v37  ;;  %2571 = vmatpush1.bf16.msra.mxu0 %v20236_v38  ;;  %v20286_v37 = vld [vmem:[%s29346_s5 + $0x2f4] ss:$40 sps:$4 sm:$0xff]  }
 0x2a0   :  { %2519 = vmatprep.subr.bf16.mxu1 %v20241_v39  ;;  %2572 = vmatprep.subr.bf16.mxu0 %v20244_v40  ;;  %v20361_v38 = vld [vmem:[%s29344_s3 + $0x524] ss:$16 sps:$4 sm:$0xff]   ;;  %v20284_v39 = vld [vmem:[%s29346_s5 + $0x2f0] ss:$40 sps:$4 sm:$0xff]  }
 0x2a1   :  { %v20359_v40 = vld [vmem:[%s29344_s3 + $0x520] ss:$16 sps:$4 sm:$0xff]  }
 0x2a3   :  { %2520 = vmatpush1.bf16.msra.mxu1 %v20239_v41  ;;  %2573 = vmatpush1.bf16.msra.mxu0 %v20242_v42  ;;  %v20289_v41 = vld [vmem:[%s29346_s5 + $0x344] ss:$40 sps:$4 sm:$0xff]   ;;  %v20287_v42 = vld [vmem:[%s29346_s5 + $0x340] ss:$40 sps:$4 sm:$0xff]  }
 0x2a4   :  { %2521 = vmatprep.subr.bf16.mxu1 %v20247_v44  ;;  %2574 = vmatprep.subr.bf16.mxu0 %v20250_v46  ;;  %v20292_v44 = vld [vmem:[%s29346_s5 + $0x394] ss:$40 sps:$4 sm:$0xff]   ;;  %v20290_v46 = vld [vmem:[%s29346_s5 + $0x390] ss:$40 sps:$4 sm:$0xff]  }
 0x2a7   :  { %2522 = vmatpush1.bf16.msra.mxu1 %v20245_v6  ;;  %2575 = vmatpush1.bf16.msra.mxu0 %v20248_v47  ;;  %v20295_v6 = vld [vmem:[%s29346_s5 + $0x3e4] ss:$40 sps:$4 sm:$0xff]   ;;  %v20293_v47 = vld [vmem:[%s29346_s5 + $0x3e0] ss:$40 sps:$4 sm:$0xff]  }
 0x2a8   :  { %2523 = vmatprep.subr.bf16.mxu1 %v20253_v49  ;;  %2576 = vmatprep.subr.bf16.mxu0 %v20256_v61  ;;  %v20298_v49 = vld [vmem:[%s29346_s5 + $0x434] ss:$40 sps:$4 sm:$0xff]   ;;  %v20296_v61 = vld [vmem:[%s29346_s5 + $0x430] ss:$40 sps:$4 sm:$0xff]  }
 0x2ab   :  { %2524 = vmatpush1.bf16.msra.mxu1 %v20251_v7  ;;  %2577 = vmatpush1.bf16.msra.mxu0 %v20254_v63  ;;  %v20301_v7 = vld [vmem:[%s29346_s5 + $0x484] ss:$40 sps:$4 sm:$0xff]   ;;  %v20299_v63 = vld [vmem:[%s29346_s5 + $0x480] ss:$40 sps:$4 sm:$0xff]  }
 0x2ac   :  { %2599 = vmatprep.subr.bf16.mxu1 %v20259_v14  ;;  %3628 = vmatprep.subr.bf16.mxu0 %v20307_v52  ;;  %v20304_v14 = vld [vmem:[%s29346_s5 + $0x4d4] ss:$40 sps:$4 sm:$0xff]   ;;  %v20302_v52 = vld [vmem:[%s29346_s5 + $0x4d0] ss:$40 sps:$4 sm:$0xff]  }
 0x2ae   :  { %2526 = vmatmul.mubr.bf16.vlgmr.msra.gmra.mrb[24].mxu1 %v23714_v18  ;;  %2579 = vmatmul.mubr.bf16.vlgmr.msra.gmra.mrb[24].mxu0 %v23714_v18 }
 0x2af   :  { %2535 = vmatprep.mubr.bf16.mxu1 %v23748_v51  ;;  %2588 = vmatprep.mubr.bf16.mxu0 %v23748_v51 }
 0x2b0   :  { %2600 = vmatpush1.bf16.msra.mxu1 %v20257_v53  ;;  %3629 = vmatpush1.bf16.msra.mxu0 %v20305_v2  ;;  %v20310_v53 = vld [vmem:[%s29344_s3 + $0x40c] ss:$16 sps:$4 sm:$0xff]   ;;  %v20308_v2 = vld [vmem:[%s29344_s3 + $0x408] ss:$16 sps:$4 sm:$0xff]  }
 0x2b1   :  { %2601 = vmatprep.subr.bf16.mxu1 %v20262_v3  ;;  %3630 = vmatprep.subr.bf16.mxu0 %v20313_v4  ;;  %v20316_v3 = vld [vmem:[%s29344_s3 + $0x42c] ss:$16 sps:$4 sm:$0xff]   ;;  %v20314_v4 = vld [vmem:[%s29344_s3 + $0x428] ss:$16 sps:$4 sm:$0xff]  }
 0x2b4   :  { %2602 = vmatpush1.bf16.msra.mxu1 %v20260_v5  ;;  %3631 = vmatpush1.bf16.msra.mxu0 %v20311_v36  ;;  %v20322_v5 = vld [vmem:[%s29344_s3 + $0x44c] ss:$16 sps:$4 sm:$0xff]   ;;  %v20320_v36 = vld [vmem:[%s29344_s3 + $0x448] ss:$16 sps:$4 sm:$0xff]  }
 0x2b5   :  { %2603 = vmatprep.subr.bf16.mxu1 %v20265_v45  ;;  %3632 = vmatprep.subr.bf16.mxu0 %v20319_v54  ;;  %v20328_v45 = vld [vmem:[%s29344_s3 + $0x46c] ss:$16 sps:$4 sm:$0xff]   ;;  %v20332_v54 = vld [vmem:[%s29344_s3 + $0x488] ss:$16 sps:$4 sm:$0xff]  }
 0x2b6   :  { %2536 = vmatmul.mubr.bf16.gmra.mrb[28].mxu1 %v23746_v35  ;;  %2589 = vmatmul.mubr.bf16.gmra.mrb[28].mxu0 %v23746_v35 }
 0x2b7   :  { %2631 = vmatprep.mubr.bf16.mxu1 %v23722_v32  ;;  %v20329_v32 = vld [vmem:[%s29344_s3 + $0x480] ss:$16 sps:$4 sm:$0xff]  }
 0x2b8   :  { %2604 = vmatpush1.bf16.msra.mxu1 %v20263_v12  ;;  %3633 = vmatpush1.bf16.msra.mxu0 %v20317_v55  ;;  %v20340_v12 = vld [vmem:[%s29344_s3 + $0x4ac] ss:$16 sps:$4 sm:$0xff]  }
 0x2b9   :  { %2605 = vmatprep.subr.bf16.mxu1 %v20268_v13  ;;  %3634 = vmatprep.subr.bf16.mxu0 %v20325_v16  ;;  %v20346_v55 = vld [vmem:[%s29344_s3 + $0x4cc] ss:$16 sps:$4 sm:$0xff]   ;;  %v20344_v13 = vld [vmem:[%s29344_s3 + $0x4c8] ss:$16 sps:$4 sm:$0xff]  }
 0x2ba   :  { %v20352_v16 = vld [vmem:[%s29344_s3 + $0x4ec] ss:$16 sps:$4 sm:$0xff]  }
 0x2bc   :  { %2606 = vmatpush1.bf16.msra.mxu1 %v20266_v20  ;;  %3635 = vmatpush1.bf16.msra.mxu0 %v20323_v56  ;;  %v20350_v20 = vld [vmem:[%s29344_s3 + $0x4e8] ss:$16 sps:$4 sm:$0xff]   ;;  %v20358_v56 = vld [vmem:[%s29344_s3 + $0x50c] ss:$16 sps:$4 sm:$0xff]  }
 0x2bd   :  { %2607 = vmatprep.subr.bf16.mxu1 %v20271_v15  ;;  %3636 = vmatprep.subr.bf16.mxu0 %v20331_v58  ;;  %v20356_v15 = vld [vmem:[%s29344_s3 + $0x508] ss:$16 sps:$4 sm:$0xff]   ;;  %v20364_v58 = vld [vmem:[%s29344_s3 + $0x52c] ss:$16 sps:$4 sm:$0xff]  }
 0x2c0   :  { %2608 = vmatpush1.bf16.msra.mxu1 %v20269_v22  ;;  %3637 = vmatpush1.bf16.msra.mxu0 %v20329_v32  ;;  %v20362_v22 = vld [vmem:[%s29344_s3 + $0x528] ss:$16 sps:$4 sm:$0xff]   ;;  %v20367_v32 = vld [vmem:[%s29344_s3 + $0x544] ss:$16 sps:$4 sm:$0xff]  }
 0x2c1   :  { %2609 = vmatprep.subr.bf16.mxu1 %v20274_v23  ;;  %3638 = vmatprep.subr.bf16.mxu0 %v20337_v24  ;;  %v20370_v23 = vld [vmem:[%s29344_s3 + $0x54c] ss:$16 sps:$4 sm:$0xff]   ;;  %v20365_v24 = vld [vmem:[%s29344_s3 + $0x540] ss:$16 sps:$4 sm:$0xff]  }
 0x2c4   :  { %2610 = vmatpush1.bf16.msra.mxu1 %v20272_v25  ;;  %3639 = vmatpush1.bf16.msra.mxu0 %v20335_v27  ;;  %v20368_v25 = vld [vmem:[%s29344_s3 + $0x548] ss:$16 sps:$4 sm:$0xff]   ;;  %v20373_v27 = vld [vmem:[%s29344_s3 + $0x564] ss:$16 sps:$4 sm:$0xff]  }
 0x2c5   :  { %2611 = vmatprep.subr.bf16.mxu1 %v20277_v28  ;;  %3640 = vmatprep.subr.bf16.mxu0 %v20343_v29  ;;  %v20376_v28 = vld [vmem:[%s29344_s3 + $0x56c] ss:$16 sps:$4 sm:$0xff]   ;;  %v20371_v29 = vld [vmem:[%s29344_s3 + $0x560] ss:$16 sps:$4 sm:$0xff]  }
 0x2c8   :  { %2612 = vmatpush1.bf16.msra.mxu1 %v20275_v60  ;;  %3641 = vmatpush1.bf16.msra.mxu0 %v20341_v0  ;;  %v20374_v60 = vld [vmem:[%s29344_s3 + $0x568] ss:$16 sps:$4 sm:$0xff]   ;;  %v20379_v0 = vld [vmem:[%s29344_s3 + $0x584] ss:$16 sps:$4 sm:$0xff]  }
 0x2c9   :  { %2613 = vmatprep.subr.bf16.mxu1 %v20280_v9  ;;  %3642 = vmatprep.subr.bf16.mxu0 %v20349_v30  ;;  %v20382_v9 = vld [vmem:[%s29344_s3 + $0x58c] ss:$16 sps:$4 sm:$0xff]   ;;  %v20377_v30 = vld [vmem:[%s29344_s3 + $0x580] ss:$16 sps:$4 sm:$0xff]  }
 0x2cc   :  { %2614 = vmatpush1.bf16.msra.mxu1 %v20278_v57  ;;  %3643 = vmatpush1.bf16.msra.mxu0 %v20347_v31  ;;  %v20380_v57 = vld [vmem:[%s29344_s3 + $0x588] ss:$16 sps:$4 sm:$0xff]   ;;  %v20385_v31 = vld [vmem:[%s29344_s3 + $0x5a4] ss:$16 sps:$4 sm:$0xff]  }
 0x2cd   :  { %2615 = vmatprep.subr.bf16.mxu1 %v20283_v33  ;;  %3644 = vmatprep.subr.bf16.mxu0 %v20355_v50  ;;  %v20388_v33 = vld [vmem:[%s29344_s3 + $0x5ac] ss:$16 sps:$4 sm:$0xff]   ;;  %v20383_v50 = vld [vmem:[%s29344_s3 + $0x5a0] ss:$16 sps:$4 sm:$0xff]  }
 0x2d0   :  { %2616 = vmatpush1.bf16.msra.mxu1 %v20281_v34  ;;  %3645 = vmatpush1.bf16.msra.mxu0 %v20353_v1  ;;  %v20386_v34 = vld [vmem:[%s29344_s3 + $0x5a8] ss:$16 sps:$4 sm:$0xff]   ;;  %v20389_v1 = vld [vmem:[%s29344_s3 + $0x5c0] ss:$16 sps:$4 sm:$0xff]  }
 0x2d1   :  { %2617 = vmatprep.subr.bf16.mxu1 %v20286_v37  ;;  %3646 = vmatprep.subr.bf16.mxu0 %v20361_v38  ;;  %v20391_v37 = vld [vmem:[%s29344_s3 + $0x5c4] ss:$16 sps:$4 sm:$0xff]   ;;  %v20392_v38 = vld [vmem:[%s29344_s3 + $0x5c8] ss:$16 sps:$4 sm:$0xff]  }
 0x2d4   :  { %2618 = vmatpush1.bf16.msra.mxu1 %v20284_v39  ;;  %3647 = vmatpush1.bf16.msra.mxu0 %v20359_v40  ;;  %v20394_v39 = vld [vmem:[%s29344_s3 + $0x5cc] ss:$16 sps:$4 sm:$0xff]   ;;  %v20397_v40 = vld [vmem:[%s29344_s3 + $0x5e4] ss:$16 sps:$4 sm:$0xff]  }
 0x2d5   :  { %2619 = vmatprep.subr.bf16.mxu1 %v20289_v41  ;;  %3648 = vmatprep.subr.bf16.mxu0 %v20367_v32  ;;  %v20400_v41 = vld [vmem:[%s29344_s3 + $0x5ec] ss:$16 sps:$4 sm:$0xff]  }
 0x2d8   :  { %2620 = vmatpush1.bf16.msra.mxu1 %v20287_v42  ;;  %3649 = vmatpush1.bf16.msra.mxu0 %v20365_v24  ;;  %v20395_v42 = vld [vmem:[%s29344_s3 + $0x5e0] ss:$16 sps:$4 sm:$0xff]   ;;  %v2741_v24 = vld [vmem:[#allocation2 + $0x8] sm:$0xc0] }
 0x2d9   :  { %2621 = vmatprep.subr.bf16.mxu1 %v20292_v44  ;;  %3650 = vmatprep.subr.bf16.mxu0 %v20373_v27  ;;  %v20398_v44 = vld [vmem:[%s29344_s3 + $0x5e8] ss:$16 sps:$4 sm:$0xff]  }
 0x2dc   :  { %2622 = vmatpush1.bf16.msra.mxu1 %v20290_v46  ;;  %3651 = vmatpush1.bf16.msra.mxu0 %v20371_v29  ;;  %v20403_v46 = vld [vmem:[%s29344_s3 + $0x604] ss:$16 sps:$4 sm:$0xff]  }
 0x2dd   :  { %2623 = vmatprep.subr.bf16.mxu1 %v20295_v6  ;;  %3652 = vmatprep.subr.bf16.mxu0 %v20379_v0  ;;  %v20406_v6 = vld [vmem:[%s29344_s3 + $0x60c] ss:$16 sps:$4 sm:$0xff]  }
 0x2e0   :  { %2624 = vmatpush1.bf16.msra.mxu1 %v20293_v47  ;;  %3653 = vmatpush1.bf16.msra.mxu0 %v20377_v30  ;;  %v2684_v47 = vld [vmem:[%s29348_s7] sm:$0x3] }
 0x2e1   :  { %2625 = vmatprep.subr.bf16.mxu1 %v20298_v49  ;;  %3654 = vmatprep.subr.bf16.mxu0 %v20385_v31  ;;  %v2704_v49 = vld [vmem:[%s29349_s8] sm:$0x3] }
 0x2e4   :  { %2626 = vmatpush1.bf16.msra.mxu1 %v20296_v61  ;;  %3655 = vmatpush1.bf16.msra.mxu0 %v20383_v50  ;;  %v2689_v61 = vrot.slane %v2684_v47, %v23184_v10 }
 0x2e5   :  { %2627 = vmatprep.subr.bf16.mxu1 %v20301_v7  ;;  %3656 = vmatprep.subr.bf16.mxu0 %v20391_v37  ;;  %v2709_v7 = vrot.slane %v2704_v49, %v23184_v10 }
 0x2e8   :  { %2628 = vmatpush1.bf16.msra.mxu1 %v20299_v63  ;;  %3657 = vmatpush1.bf16.msra.mxu0 %v20389_v1  ;;  %v2693_v63 = vrot.slane %v2684_v47, %v23187_v11 }
 0x2e9   :  { %2629 = vmatprep.subr.bf16.mxu1 %v20304_v14  ;;  %3658 = vmatprep.subr.bf16.mxu0 %v20397_v40  ;;  %v2713_v14 = vrot.slane %v2704_v49, %v23187_v11 }
 0x2ec   :  { %2630 = vmatpush1.bf16.msra.mxu1 %v20302_v52  ;;  %3659 = vmatpush1.bf16.msra.mxu0 %v20395_v42 }
 0x2ed   :  { %3734 = vmatprep.subr.bf16.mxu1 %v20310_v53  ;;  %3681 = vmatprep.subr.bf16.mxu0 %v20403_v46 }
 0x2ef   :  { %2632 = vmatmul.mubr.bf16.vlgmr.msra.gmra.mrb[32].mxu1 %v23714_v18  ;;  %v20326_v18 = vld [vmem:[%s29344_s3 + $0x468] ss:$16 sps:$4 sm:$0xff]  }
 0x2f0   :  { %2641 = vmatprep.mubr.bf16.mxu1 %v23748_v51  ;;  %3735 = vmatpush1.bf16.msra.mxu1 %v20308_v2  ;;  %v20334_v51 = vld [vmem:[%s29344_s3 + $0x48c] ss:$16 sps:$4 sm:$0xff]   ;;  %v2716_v2 = vmul.f32 %v2709_v7, %v23191_v17 }
 0x2f1   :  { %3736 = vmatprep.subr.bf16.mxu1 %v20316_v3 }
 0x2f4   :  { %3737 = vmatpush1.bf16.msra.mxu1 %v20314_v4 }
 0x2f5   :  { %3738 = vmatprep.subr.bf16.mxu1 %v20322_v5  ;;  %v2717_v5 = vmul.f32 %v2713_v14, %v23193_v19 }
 0x2f7   :  { %2642 = vmatmul.mubr.bf16.gmra.mrb[36].mxu1 %v23746_v35  ;;  %v20338_v35 = vld [vmem:[%s29344_s3 + $0x4a8] ss:$16 sps:$4 sm:$0xff]  }
 0x2f8   :  { %3739 = vmatpush1.bf16.msra.mxu1 %v20320_v36 }
 0x2f9   :  { %3740 = vmatprep.subr.bf16.mxu1 %v20328_v45 }
 0x2fc   :  { %3741 = vmatpush1.bf16.msra.mxu1 %v20326_v18 }
 0x2fd   :  { %3742 = vmatprep.subr.bf16.mxu1 %v20334_v51  ;;  %v2718_v51 = vmul.f32 %v2709_v7, %v23195_v21 }
 0x300   :  { %3743 = vmatpush1.bf16.msra.mxu1 %v20332_v54 }
 0x301   :  { %3744 = vmatprep.subr.bf16.mxu1 %v20340_v12 }
 0x304   :  { %3745 = vmatpush1.bf16.msra.mxu1 %v20338_v35 }
 0x305   :  { %3746 = vmatprep.subr.bf16.mxu1 %v20346_v55  ;;  %v2719_v55 = vmul.f32 %v2713_v14, %v23200_v26  ;;  %v2720_v26 = vmul.f32 %v2709_v7, %v23215_v43 }
 0x308   :  { %3747 = vmatpush1.bf16.msra.mxu1 %v20344_v13 }
 0x309   :  { %3748 = vmatprep.subr.bf16.mxu1 %v20352_v16 }
 0x30c   :  { %3749 = vmatpush1.bf16.msra.mxu1 %v20350_v20 }
 0x30d   :  { %3750 = vmatprep.subr.bf16.mxu1 %v20358_v56 }
 0x310   :  { %3751 = vmatpush1.bf16.msra.mxu1 %v20356_v15  ;;  %v2740_v15 = vld [vmem:[#allocation2] sm:$0xc0] }
 0x311   :  { %3752 = vmatprep.subr.bf16.mxu1 %v20364_v58 }
 0x314   :  { %3753 = vmatpush1.bf16.msra.mxu1 %v20362_v22 }
 0x315   :  { %3754 = vmatprep.subr.bf16.mxu1 %v20370_v23  ;;  %v2721_v23 = vmul.f32 %v2713_v14, %v23219_v48 }
 0x318   :  { %3755 = vmatpush1.bf16.msra.mxu1 %v20368_v25 }
 0x319   :  { %3756 = vmatprep.subr.bf16.mxu1 %v20376_v28  ;;  %v22897_v28 = vld [vmem:[#allocation2 + $0x40] sm:$0xff] }
 0x31a   :  { %v2722_v29 = vmul.f32 %v22897_v28, %v2709_v7 }
 0x31c   :  { %3757 = vmatpush1.bf16.msra.mxu1 %v20374_v60 }
 0x31d   :  { %3758 = vmatprep.subr.bf16.mxu1 %v20382_v9 }
 0x320   :  { %3759 = vmatpush1.bf16.msra.mxu1 %v20380_v57 }
 0x321   :  { %3760 = vmatprep.subr.bf16.mxu1 %v20388_v33 }
 0x324   :  { %3761 = vmatpush1.bf16.msra.mxu1 %v20386_v34  ;;  %v22898_v34 = vld [vmem:[#allocation2 + $0x48] sm:$0xff] }
 0x325   :  { %3762 = vmatprep.subr.bf16.mxu1 %v20394_v39  ;;  %v2723_v48 = vmul.f32 %v22898_v34, %v2713_v14  ;;  %v20421_v34 = vld [vmem:[%s29344_s3 + $0x664] ss:$16 sps:$4 sm:$0xff]  }
 0x328   :  { %3763 = vmatpush1.bf16.msra.mxu1 %v20392_v38 }
 0x329   :  { %3764 = vmatprep.subr.bf16.mxu1 %v20400_v41 }
 0x32c   :  { %3765 = vmatpush1.bf16.msra.mxu1 %v20398_v44 }
 0x32d   :  { %3787 = vmatprep.subr.bf16.mxu1 %v20406_v6 }
 0x3c2   :  { %v2633_v52 = vpop.f32.mrb[32].mxu1 }
 0x3c3   :  { %v2696_v53 = vadd.f32 %v2689_v61, %v2633_v52  ;;  %v2635_v3 = vpop.f32.mrb[33].mxu1  ;;  %v20401_v52 = vld [vmem:[%s29344_s3 + $0x600] ss:$16 sps:$4 sm:$0xff]  }
 0x3c4   :  { %v2697_v4 = vadd.f32 %v2693_v63, %v2635_v3  ;;  %v2637_v36 = vpop.f32.mrb[34].mxu1 }
 0x3c5   :  { %v24228_v45 = vadd.f32 %v2716_v2, %v2696_v53  ;;  %v2698_v18 = vadd.f32 %v2689_v61, %v2637_v36  ;;  %v2639_v54 = vpop.f32.mrb[35].mxu1  ;;  %v20404_v53 = vld [vmem:[%s29344_s3 + $0x608] ss:$16 sps:$4 sm:$0xff]   ;;  %v20412_v36 = vld [vmem:[%s29344_s3 + $0x62c] ss:$16 sps:$4 sm:$0xff]  }
 0x3c6   :  { %v24231_v12 = vadd.f32 %v2717_v5, %v2697_v4  ;;  %v2699_v35 = vadd.f32 %v2693_v63, %v2639_v54  ;;  %v20409_v5 = vld [vmem:[%s29344_s3 + $0x624] ss:$16 sps:$4 sm:$0xff]  }
 0x3c7   :  { %v24234_v13 = vadd.f32 %v2718_v51, %v2698_v18  ;;  %v2759_v16 = vrot.slane %v24228_v45, 2  ;;  %v2783_v31 = vpack.c.bf16 %v24228_v45, %v2740_v15 }
 0x3c8   :  { %v24236_v17 = vadd.f32 %v2719_v55, %v2699_v35  ;;  %v2760_v20 = vrot.slane %v24231_v12, 2  ;;  %v2784_v1 = vpack.c.bf16 %v24231_v12, %v2741_v24 }
 0x3c9   :  { %v2761_v19 = vrot.slane %v24234_v13, 2  ;;  %v2960_v6 = vrot.slane %v2783_v31, 3  ;;  %v20416_v31 = vld [vmem:[%s29344_s3 + $0x648] ss:$16 sps:$4 sm:$0xff]  }
 0x3ca   :  { %v2763_v56 = vrot.slane %v24236_v17, 2  ;;  %v2643_v21 = vpop.f32.mrb[36].mxu1 }
 0x3cb   :  { %v2762_v58 = vsel %vm2758_vm3, %v2759_v16, %v2761_v19  ;;  %v2700_v22 = vadd.f32 %v2689_v61, %v2643_v21  ;;  %v2645_v32 = vpop.f32.mrb[37].mxu1  ;;  %v20410_v21 = vld [vmem:[%s29344_s3 + $0x628] ss:$16 sps:$4 sm:$0xff]  }
 0x3cc   :  { %v2701_v25 = vadd.f32 %v2693_v63, %v2645_v32  ;;  %v2647_v27 = vpop.f32.mrb[38].mxu1  ;;  %v2764_v60 = vsel %vm2758_vm3, %v2760_v20, %v2763_v56  ;;  %v2785_v0 = vpack.c.bf16 %v2762_v58, %v2759_v16 }
 0x3cd   :  { %v24246_v9 = vadd.f32 %v2720_v26, %v2700_v22  ;;  %v2702_v30 = vadd.f32 %v2689_v61, %v2647_v27  ;;  %v2649_v57 = vpop.f32.mrb[39].mxu1  ;;  %v2786_v33 = vpack.c.bf16 %v2764_v60, %v2760_v20  ;;  %v2963_v61 = vrot.slane %v2784_v1, 3  ;;  %v20415_v22 = vld [vmem:[%s29344_s3 + $0x644] ss:$16 sps:$4 sm:$0xff]   ;;  %v20418_v26 = vld [vmem:[%s29344_s3 + $0x64c] ss:$16 sps:$4 sm:$0xff]  }
 0x3ce   :  { %v24249_v50 = vadd.f32 %v2721_v23, %v2701_v25  ;;  %v2703_v43 = vadd.f32 %v2693_v63, %v2649_v57  ;;  %v2966_v16 = vrot.slane %v2785_v0, 3  ;;  %v20413_v57 = vld [vmem:[%s29344_s3 + $0x640] ss:$16 sps:$4 sm:$0xff]  }
 0x3cf   :  { %v2765_v37 = vrot.slane %v24246_v9, 2  ;;  %v2730_v38 = vadd.f32 %v2722_v29, %v2702_v30  ;;  %v2787_v39 = vpack.c.bf16 %v24246_v9, %v24234_v13  ;;  %v2969_v15 = vrot.slane %v2786_v33, 3  ;;  %v20419_v1 = vld [vmem:[%s29344_s3 + $0x660] ss:$16 sps:$4 sm:$0xff]  }
 0x3d0   :  { %v2767_v40 = vrot.slane %v24249_v50, 2  ;;  %v2731_v41 = vadd.f32 %v2723_v48, %v2703_v43  ;;  %v2788_v42 = vpack.c.bf16 %v24249_v50, %v24236_v17  ;;  %v20424_v48 = vld [vmem:[%s29344_s3 + $0x66c] ss:$16 sps:$4 sm:$0xff]  }
 0x3d1   :  { %v2766_v44 = vsel %vm2758_vm3, %v2761_v19, %v2765_v37  ;;  %2738 = vst [vmem:[#allocation2 + $0x40] sm:$0xff] %v2730_v38  ;;  %v2769_v46 = vrot.slane %v2730_v38, 2  ;;  %v2961_v47 = vrot.slane %v2787_v39, 3  ;;  %v20427_v38 = vld [vmem:[%s29344_s3 + $0x684] ss:$16 sps:$4 sm:$0xff]  }
 0x3d2   :  { %2739 = vst [vmem:[#allocation2 + $0x48] sm:$0xff] %v2731_v41  ;;  %v2771_v49 = vrot.slane %v2731_v41, 2  ;;  %v2964_v7 = vrot.slane %v2788_v42, 3  ;;  %v2768_v63 = vsel %vm2758_vm3, %v2763_v56, %v2767_v40  ;;  %v20407_v56 = vld [vmem:[%s29344_s3 + $0x620] ss:$16 sps:$4 sm:$0xff]  }
 0x3d3   :  { %v2770_v14 = vsel %vm2758_vm3, %v2765_v37, %v2769_v46  ;;  %v2962_v2 = vsel %vm2959_vm4, %v2960_v6, %v2961_v47  ;;  %v2793_v3 = vpack.c.bf16 %v2769_v46, %v2769_v46  ;;  %v20422_v37 = vld [vmem:[%s29344_s3 + $0x668] ss:$16 sps:$4 sm:$0xff]   ;;  %v20430_v39 = vld [vmem:[%s29344_s3 + $0x68c] ss:$16 sps:$4 sm:$0xff]   ;;  %v20433_v42 = vld [vmem:[%s29344_s3 + $0x6a4] ss:$16 sps:$4 sm:$0xff]  }
 0x3d4   :  { %v2965_v4 = vsel %vm2959_vm4, %v2963_v61, %v2964_v7  ;;  %v2772_v18 = vsel %vm2758_vm3, %v2767_v40, %v2771_v49  ;;  %v2789_v51 = vpack.c.bf16 %v2770_v14, %v2766_v44  ;;  %v2794_v54 = vpack.c.bf16 %v2771_v49, %v2771_v49  ;;  %v20425_v40 = vld [vmem:[%s29344_s3 + $0x680] ss:$16 sps:$4 sm:$0xff]   ;;  %v20428_v41 = vld [vmem:[%s29344_s3 + $0x688] ss:$16 sps:$4 sm:$0xff]   ;;  %v20436_v44 = vld [vmem:[%s29344_s3 + $0x6ac] ss:$16 sps:$4 sm:$0xff]  }
 0x3d5   :  { %3660 = vmatprep.mubr.bf16.mxu0 %v2965_v4  ;;  %3766 = vmatprep.mubr.bf16.mxu1 %v2965_v4  ;;  %v2790_v35 = vpack.c.bf16 %v2772_v18, %v2768_v63  ;;  %v2976_v55 = vrot.slane %v2793_v3, 3  ;;  %v20431_v46 = vld [vmem:[%s29344_s3 + $0x6a0] ss:$16 sps:$4 sm:$0xff]   ;;  %v20434_v6 = vld [vmem:[%s29344_s3 + $0x6a8] ss:$16 sps:$4 sm:$0xff]  }
 0x3d6   :  { %3661 = vmatmul.mubr.bf16.vlgmr.msra.gmra.mrb[32].mxu0 %v2962_v2  ;;  %3767 = vmatmul.mubr.bf16.vlgmr.msra.gmra.mrb[40].mxu1 %v2962_v2  ;;  %v2967_v19 = vrot.slane %v2789_v51, 3  ;;  %v2978_v20 = vrot.slane %v2794_v54, 3  ;;  %v20442_v49 = vld [vmem:[%s29344_s3 + $0x6cc] ss:$16 sps:$4 sm:$0xff]   ;;  %v20437_v61 = vld [vmem:[%s29344_s3 + $0x6c0] ss:$16 sps:$4 sm:$0xff]  }
 0x3d7   :  { %3682 = vmatpush1.bf16.msra.mxu0 %v20401_v52  ;;  %3788 = vmatpush1.bf16.msra.mxu1 %v20404_v53  ;;  %v2970_v58 = vrot.slane %v2790_v35, 3  ;;  %v20445_v63 = vld [vmem:[%s29344_s3 + $0x6e4] ss:$16 sps:$4 sm:$0xff]   ;;  %v20448_v14 = vld [vmem:[%s29344_s3 + $0x6ec] ss:$16 sps:$4 sm:$0xff]  }
 0x3d8   :  { %3683 = vmatprep.subr.bf16.mxu0 %v20409_v5  ;;  %3789 = vmatprep.subr.bf16.mxu1 %v20412_v36  ;;  %v2748_v32 = vld [vmem:[#allocation2 + $0x40] sm:$0x3f]  ;;  %v24289_v23 = vsel %vm2959_vm4, %v2966_v16, %v2967_v19  ;;  %v24292_v24 = vsel %vm2959_vm4, %v2967_v19, %v2976_v55  ;;  %v20446_v53 = vld [vmem:[%s29344_s3 + $0x6e8] ss:$16 sps:$4 sm:$0xff]   ;;  %v20454_v3 = vld [vmem:[%s29344_s3 + $0x70c] ss:$16 sps:$4 sm:$0xff]  }
 0x3d9   :  { %v2749_v25 = vld [vmem:[#allocation2 + $0x48] sm:$0x3f]  ;;  %v2791_v27 = vpack.c.bf16 %v2748_v32, %v2748_v32  ;;  %v2971_v28 = vsel %vm2959_vm4, %v2969_v15, %v2970_v58  ;;  %v24296_v29 = vsel %vm2959_vm4, %v2970_v58, %v2978_v20  ;;  %v20443_v52 = vld [vmem:[%s29344_s3 + $0x6e0] ss:$16 sps:$4 sm:$0xff]   ;;  %v20451_v2 = vld [vmem:[%s29344_s3 + $0x704] ss:$16 sps:$4 sm:$0xff]  }
 0x3da   :  { %v2792_v60 = vpack.c.bf16 %v2749_v25, %v2749_v25  ;;  %v20449_v4 = vld [vmem:[%s29344_s3 + $0x700] ss:$16 sps:$4 sm:$0xff]   ;;  %v20452_v5 = vld [vmem:[%s29344_s3 + $0x708] ss:$16 sps:$4 sm:$0xff]   ;;  %v20457_v36 = vld [vmem:[%s29344_s3 + $0x724] ss:$16 sps:$4 sm:$0xff]  }
 0x3db   :  { %3684 = vmatpush1.bf16.msra.mxu0 %v20407_v56  ;;  %3790 = vmatpush1.bf16.msra.mxu1 %v20410_v21  ;;  %v2972_v0 = vrot.slane %v2791_v27, 3  ;;  %v20460_v18 = vld [vmem:[%s29344_s3 + $0x72c] ss:$16 sps:$4 sm:$0xff]   ;;  %v20455_v51 = vld [vmem:[%s29344_s3 + $0x720] ss:$16 sps:$4 sm:$0xff]  }
 0x3dc   :  { %v2974_v30 = vrot.slane %v2792_v60, 3  ;;  %3685 = vmatprep.subr.bf16.mxu0 %v20415_v22  ;;  %3791 = vmatprep.subr.bf16.mxu1 %v20418_v26  ;;  %v20458_v54 = vld [vmem:[%s29344_s3 + $0x728] ss:$16 sps:$4 sm:$0xff]   ;;  %v20463_v35 = vld [vmem:[%s29344_s3 + $0x744] ss:$16 sps:$4 sm:$0xff]  }
 0x3dd   :  { %v2973_v43 = vsel %vm2959_vm4, %v2961_v47, %v2972_v0  ;;  %v20439_v47 = vld [vmem:[%s29344_s3 + $0x6c4] ss:$16 sps:$4 sm:$0xff]   ;;  %v20466_v55 = vld [vmem:[%s29344_s3 + $0x74c] ss:$16 sps:$4 sm:$0xff]   ;;  %v20461_v16 = vld [vmem:[%s29344_s3 + $0x740] ss:$16 sps:$4 sm:$0xff]  }
 0x3de   :  { %v2975_v33 = vsel %vm2959_vm4, %v2964_v7, %v2974_v30  ;;  %v20440_v7 = vld [vmem:[%s29344_s3 + $0x6c8] ss:$16 sps:$4 sm:$0xff]   ;;  %v20469_v20 = vld [vmem:[%s29344_s3 + $0x764] ss:$16 sps:$4 sm:$0xff]   ;;  %v20472_v56 = vld [vmem:[%s29344_s3 + $0x76c] ss:$16 sps:$4 sm:$0xff]  }
 0x3df   :  { %3670 = vmatprep.mubr.bf16.mxu0 %v2975_v33  ;;  %3776 = vmatprep.mubr.bf16.mxu1 %v2975_v33  ;;  %v20464_v19 = vld [vmem:[%s29344_s3 + $0x748] ss:$16 sps:$4 sm:$0xff]   ;;  %v20467_v21 = vld [vmem:[%s29344_s3 + $0x760] ss:$16 sps:$4 sm:$0xff]   ;;  %v20475_v58 = vld [vmem:[%s29344_s3 + $0x784] ss:$16 sps:$4 sm:$0xff]  }
 0x3e0   :  { %3671 = vmatmul.mubr.bf16.gmra.mrb[36].mxu0 %v2973_v43  ;;  %3777 = vmatmul.mubr.bf16.gmra.mrb[44].mxu1 %v2973_v43  ;;  %v20470_v15 = vld [vmem:[%s29344_s3 + $0x768] ss:$16 sps:$4 sm:$0xff]   ;;  %v20478_v22 = vld [vmem:[%s29344_s3 + $0x78c] ss:$16 sps:$4 sm:$0xff]   ;;  %v20473_v26 = vld [vmem:[%s29344_s3 + $0x780] ss:$16 sps:$4 sm:$0xff]  }
 0x3e1   :  { %3686 = vmatpush1.bf16.msra.mxu0 %v20413_v57  ;;  %3792 = vmatpush1.bf16.msra.mxu1 %v20416_v31  ;;  %v20476_v32 = vld [vmem:[%s29344_s3 + $0x788] ss:$16 sps:$4 sm:$0xff]   ;;  %v20481_v25 = vld [vmem:[%s29344_s3 + $0x7a4] ss:$16 sps:$4 sm:$0xff]   ;;  %v20484_v27 = vld [vmem:[%s29344_s3 + $0x7ac] ss:$16 sps:$4 sm:$0xff]  }
 0x3e2   :  { %3713 = vmatprep.mubr.bf16.mxu0 %v2971_v28  ;;  %3819 = vmatprep.mubr.bf16.mxu1 %v2971_v28  ;;  %v20479_v28 = vld [vmem:[%s29344_s3 + $0x7a0] ss:$16 sps:$4 sm:$0xff]   ;;  %v20482_v60 = vld [vmem:[%s29344_s3 + $0x7a8] ss:$16 sps:$4 sm:$0xff]   ;;  %v20487_v0 = vld [vmem:[%s29344_s3 + $0x7c4] ss:$16 sps:$4 sm:$0xff]  }
 0x3e3   :  { %3687 = vmatprep.subr.bf16.mxu0 %v20421_v34  ;;  %3793 = vmatprep.subr.bf16.mxu1 %v20424_v48  ;;  %v20490_v30 = vld [vmem:[%s29344_s3 + $0x7cc] ss:$16 sps:$4 sm:$0xff]   ;;  %v20485_v57 = vld [vmem:[%s29344_s3 + $0x7c0] ss:$16 sps:$4 sm:$0xff]   ;;  %v20488_v31 = vld [vmem:[%s29344_s3 + $0x7c8] ss:$16 sps:$4 sm:$0xff]  }
 0x3e4   :  { %v20493_v33 = vld [vmem:[%s29344_s3 + $0x7e4] ss:$16 sps:$4 sm:$0xff]   ;;  %v20496_v43 = vld [vmem:[%s29344_s3 + $0x7ec] ss:$16 sps:$4 sm:$0xff]   ;;  %v20491_v34 = vld [vmem:[%s29344_s3 + $0x7e0] ss:$16 sps:$4 sm:$0xff]  }
 0x3e5   :  { %3688 = vmatpush1.bf16.msra.mxu0 %v20419_v1  ;;  %3794 = vmatpush1.bf16.msra.mxu1 %v20422_v37  ;;  %v20494_v48 = vld [vmem:[%s29344_s3 + $0x7e8] ss:$16 sps:$4 sm:$0xff]   ;;  %v20499_v1 = vld [vmem:[%s29346_s5 + $0x504] ss:$40 sps:$4 sm:$0xff]  }
 0x3e6   :  { %3689 = vmatprep.subr.bf16.mxu0 %v20427_v38  ;;  %3795 = vmatprep.subr.bf16.mxu1 %v20430_v39  ;;  %v20502_v37 = vld [vmem:[%s29346_s5 + $0x50c] ss:$40 sps:$4 sm:$0xff]   ;;  %v20497_v38 = vld [vmem:[%s29346_s5 + $0x500] ss:$40 sps:$4 sm:$0xff]  }
 0x3e7   :  { %v20500_v39 = vld [vmem:[%s29346_s5 + $0x508] ss:$40 sps:$4 sm:$0xff]  }
 0x3e9   :  { %3690 = vmatpush1.bf16.msra.mxu0 %v20425_v40  ;;  %3796 = vmatpush1.bf16.msra.mxu1 %v20428_v41  ;;  %v20505_v40 = vld [vmem:[%s29346_s5 + $0x554] ss:$40 sps:$4 sm:$0xff]  }
 0x3ea   :  { %3691 = vmatprep.subr.bf16.mxu0 %v20433_v42  ;;  %3797 = vmatprep.subr.bf16.mxu1 %v20436_v44  ;;  %v20508_v41 = vld [vmem:[%s29346_s5 + $0x55c] ss:$40 sps:$4 sm:$0xff]   ;;  %v20503_v42 = vld [vmem:[%s29346_s5 + $0x550] ss:$40 sps:$4 sm:$0xff]  }
 0x3eb   :  { %v20506_v44 = vld [vmem:[%s29346_s5 + $0x558] ss:$40 sps:$4 sm:$0xff]  }
 0x3ed   :  { %3692 = vmatpush1.bf16.msra.mxu0 %v20431_v46  ;;  %3798 = vmatpush1.bf16.msra.mxu1 %v20434_v6  ;;  %v20509_v46 = vld [vmem:[%s29346_s5 + $0x5a0] ss:$40 sps:$4 sm:$0xff]  }
 0x3ee   :  { %3693 = vmatprep.subr.bf16.mxu0 %v20439_v47  ;;  %3799 = vmatprep.subr.bf16.mxu1 %v20442_v49  ;;  %v20512_v6 = vld [vmem:[%s29346_s5 + $0x5a8] ss:$40 sps:$4 sm:$0xff]   ;;  %v20517_v47 = vld [vmem:[%s29346_s5 + $0x5f4] ss:$40 sps:$4 sm:$0xff]  }
 0x3ef   :  { %v20520_v49 = vld [vmem:[%s29346_s5 + $0x5fc] ss:$40 sps:$4 sm:$0xff]  }
 0x3f1   :  { %3694 = vmatpush1.bf16.msra.mxu0 %v20437_v61  ;;  %3800 = vmatpush1.bf16.msra.mxu1 %v20440_v7  ;;  %v20515_v61 = vld [vmem:[%s29346_s5 + $0x5f0] ss:$40 sps:$4 sm:$0xff]  }
 0x3f2   :  { %3695 = vmatprep.subr.bf16.mxu0 %v20445_v63  ;;  %3801 = vmatprep.subr.bf16.mxu1 %v20448_v14  ;;  %v20518_v7 = vld [vmem:[%s29346_s5 + $0x5f8] ss:$40 sps:$4 sm:$0xff]   ;;  %v20523_v63 = vld [vmem:[%s29346_s5 + $0x644] ss:$40 sps:$4 sm:$0xff]  }
 0x3f3   :  { %v20521_v14 = vld [vmem:[%s29346_s5 + $0x640] ss:$40 sps:$4 sm:$0xff]  }
 0x3f5   :  { %3696 = vmatpush1.bf16.msra.mxu0 %v20443_v52  ;;  %3802 = vmatpush1.bf16.msra.mxu1 %v20446_v53  ;;  %v20524_v52 = vld [vmem:[%s29346_s5 + $0x648] ss:$40 sps:$4 sm:$0xff]   ;;  %v20529_v53 = vld [vmem:[%s29346_s5 + $0x694] ss:$40 sps:$4 sm:$0xff]  }
 0x3f6   :  { %3697 = vmatprep.subr.bf16.mxu0 %v20451_v2  ;;  %3803 = vmatprep.subr.bf16.mxu1 %v20454_v3  ;;  %v20532_v2 = vld [vmem:[%s29346_s5 + $0x69c] ss:$40 sps:$4 sm:$0xff]   ;;  %v20527_v3 = vld [vmem:[%s29346_s5 + $0x690] ss:$40 sps:$4 sm:$0xff]  }
 0x3f9   :  { %3698 = vmatpush1.bf16.msra.mxu0 %v20449_v4  ;;  %3804 = vmatpush1.bf16.msra.mxu1 %v20452_v5  ;;  %v20530_v4 = vld [vmem:[%s29346_s5 + $0x698] ss:$40 sps:$4 sm:$0xff]   ;;  %v20535_v5 = vld [vmem:[%s29346_s5 + $0x6e4] ss:$40 sps:$4 sm:$0xff]  }
 0x3fa   :  { %3699 = vmatprep.subr.bf16.mxu0 %v20457_v36  ;;  %3805 = vmatprep.subr.bf16.mxu1 %v20460_v18  ;;  %v20538_v36 = vld [vmem:[%s29346_s5 + $0x6ec] ss:$40 sps:$4 sm:$0xff]   ;;  %v20533_v18 = vld [vmem:[%s29346_s5 + $0x6e0] ss:$40 sps:$4 sm:$0xff]  }
 0x3fd   :  { %3700 = vmatpush1.bf16.msra.mxu0 %v20455_v51  ;;  %3806 = vmatpush1.bf16.msra.mxu1 %v20458_v54  ;;  %v20536_v51 = vld [vmem:[%s29346_s5 + $0x6e8] ss:$40 sps:$4 sm:$0xff]   ;;  %v20541_v54 = vld [vmem:[%s29346_s5 + $0x734] ss:$40 sps:$4 sm:$0xff]  }
 0x3fe   :  { %3701 = vmatprep.subr.bf16.mxu0 %v20463_v35  ;;  %3807 = vmatprep.subr.bf16.mxu1 %v20466_v55  ;;  %v20544_v35 = vld [vmem:[%s29346_s5 + $0x73c] ss:$40 sps:$4 sm:$0xff]   ;;  %v20539_v55 = vld [vmem:[%s29346_s5 + $0x730] ss:$40 sps:$4 sm:$0xff]  }
 0x401   :  { %3702 = vmatpush1.bf16.msra.mxu0 %v20461_v16  ;;  %3808 = vmatpush1.bf16.msra.mxu1 %v20464_v19  ;;  %v20542_v16 = vld [vmem:[%s29346_s5 + $0x738] ss:$40 sps:$4 sm:$0xff]   ;;  %v20547_v19 = vld [vmem:[%s29346_s5 + $0x784] ss:$40 sps:$4 sm:$0xff]  }
 0x402   :  { %3703 = vmatprep.subr.bf16.mxu0 %v20469_v20  ;;  %3809 = vmatprep.subr.bf16.mxu1 %v20472_v56  ;;  %v20550_v20 = vld [vmem:[%s29346_s5 + $0x78c] ss:$40 sps:$4 sm:$0xff]   ;;  %v20545_v56 = vld [vmem:[%s29346_s5 + $0x780] ss:$40 sps:$4 sm:$0xff]  }
 0x405   :  { %3704 = vmatpush1.bf16.msra.mxu0 %v20467_v21  ;;  %3810 = vmatpush1.bf16.msra.mxu1 %v20470_v15  ;;  %v20548_v21 = vld [vmem:[%s29346_s5 + $0x788] ss:$40 sps:$4 sm:$0xff]   ;;  %v20553_v15 = vld [vmem:[%s29346_s5 + $0x7d4] ss:$40 sps:$4 sm:$0xff]  }
 0x406   :  { %3705 = vmatprep.subr.bf16.mxu0 %v20475_v58  ;;  %3811 = vmatprep.subr.bf16.mxu1 %v20478_v22  ;;  %v20556_v58 = vld [vmem:[%s29346_s5 + $0x7dc] ss:$40 sps:$4 sm:$0xff]   ;;  %v20551_v22 = vld [vmem:[%s29346_s5 + $0x7d0] ss:$40 sps:$4 sm:$0xff]  }
 0x409   :  { %3706 = vmatpush1.bf16.msra.mxu0 %v20473_v26  ;;  %3812 = vmatpush1.bf16.msra.mxu1 %v20476_v32  ;;  %v20554_v26 = vld [vmem:[%s29346_s5 + $0x7d8] ss:$40 sps:$4 sm:$0xff]   ;;  %v20559_v32 = vld [vmem:[%s29346_s5 + $0x824] ss:$40 sps:$4 sm:$0xff]  }
 0x40a   :  { %3707 = vmatprep.subr.bf16.mxu0 %v20481_v25  ;;  %3813 = vmatprep.subr.bf16.mxu1 %v20484_v27  ;;  %v20562_v25 = vld [vmem:[%s29346_s5 + $0x82c] ss:$40 sps:$4 sm:$0xff]   ;;  %v20557_v27 = vld [vmem:[%s29346_s5 + $0x820] ss:$40 sps:$4 sm:$0xff]  }
 0x40d   :  { %3708 = vmatpush1.bf16.msra.mxu0 %v20479_v28  ;;  %3814 = vmatpush1.bf16.msra.mxu1 %v20482_v60  ;;  %v20560_v28 = vld [vmem:[%s29346_s5 + $0x828] ss:$40 sps:$4 sm:$0xff]   ;;  %v20565_v60 = vld [vmem:[%s29346_s5 + $0x874] ss:$40 sps:$4 sm:$0xff]  }
 0x40e   :  { %3709 = vmatprep.subr.bf16.mxu0 %v20487_v0  ;;  %3815 = vmatprep.subr.bf16.mxu1 %v20490_v30  ;;  %v20568_v0 = vld [vmem:[%s29346_s5 + $0x87c] ss:$40 sps:$4 sm:$0xff]   ;;  %v20563_v30 = vld [vmem:[%s29346_s5 + $0x870] ss:$40 sps:$4 sm:$0xff]  }
 0x411   :  { %3710 = vmatpush1.bf16.msra.mxu0 %v20485_v57  ;;  %3816 = vmatpush1.bf16.msra.mxu1 %v20488_v31  ;;  %v20566_v57 = vld [vmem:[%s29346_s5 + $0x878] ss:$40 sps:$4 sm:$0xff]   ;;  %v20571_v31 = vld [vmem:[%s29346_s5 + $0x8c4] ss:$40 sps:$4 sm:$0xff]  }
 0x412   :  { %3711 = vmatprep.subr.bf16.mxu0 %v20493_v33  ;;  %3817 = vmatprep.subr.bf16.mxu1 %v20496_v43  ;;  %v20574_v33 = vld [vmem:[%s29346_s5 + $0x8cc] ss:$40 sps:$4 sm:$0xff]   ;;  %v20569_v43 = vld [vmem:[%s29346_s5 + $0x8c0] ss:$40 sps:$4 sm:$0xff]  }
 0x415   :  { %3712 = vmatpush1.bf16.msra.mxu0 %v20491_v34  ;;  %3818 = vmatpush1.bf16.msra.mxu1 %v20494_v48  ;;  %v20572_v34 = vld [vmem:[%s29346_s5 + $0x8c8] ss:$40 sps:$4 sm:$0xff]   ;;  %v20577_v48 = vld [vmem:[%s29346_s5 + $0x914] ss:$40 sps:$4 sm:$0xff]  }
 0x416   :  { %4869 = vmatprep.subr.bf16.mxu1 %v20499_v1  ;;  %4922 = vmatprep.subr.bf16.mxu0 %v20502_v37  ;;  %v20580_v1 = vld [vmem:[%s29346_s5 + $0x91c] ss:$40 sps:$4 sm:$0xff]   ;;  %v20575_v37 = vld [vmem:[%s29346_s5 + $0x910] ss:$40 sps:$4 sm:$0xff]  }
 0x418   :  { %3714 = vmatmul.mubr.bf16.vlgmr.msra.gmra.mrb[32].mxu0 %v24289_v23  ;;  %3820 = vmatmul.mubr.bf16.vlgmr.msra.gmra.mrb[40].mxu1 %v24289_v23  ;;  %v20511_v23 = vld [vmem:[%s29346_s5 + $0x5a4] ss:$40 sps:$4 sm:$0xff]  }
 0x419   :  { %3723 = vmatprep.mubr.bf16.mxu0 %v24296_v29  ;;  %3829 = vmatprep.mubr.bf16.mxu1 %v24296_v29  ;;  %v20514_v29 = vld [vmem:[%s29346_s5 + $0x5ac] ss:$40 sps:$4 sm:$0xff]  }
 0x41a   :  { %4870 = vmatpush1.bf16.msra.mxu1 %v20497_v38  ;;  %4923 = vmatpush1.bf16.msra.mxu0 %v20500_v39  ;;  %v20578_v38 = vld [vmem:[%s29346_s5 + $0x918] ss:$40 sps:$4 sm:$0xff]   ;;  %v20583_v39 = vld [vmem:[%s29346_s5 + $0x964] ss:$40 sps:$4 sm:$0xff]  }
 0x41b   :  { %4871 = vmatprep.subr.bf16.mxu1 %v20505_v40  ;;  %4924 = vmatprep.subr.bf16.mxu0 %v20508_v41  ;;  %v20586_v40 = vld [vmem:[%s29346_s5 + $0x96c] ss:$40 sps:$4 sm:$0xff]   ;;  %v20581_v41 = vld [vmem:[%s29346_s5 + $0x960] ss:$40 sps:$4 sm:$0xff]  }
 0x41e   :  { %4872 = vmatpush1.bf16.msra.mxu1 %v20503_v42  ;;  %4925 = vmatpush1.bf16.msra.mxu0 %v20506_v44  ;;  %v20584_v42 = vld [vmem:[%s29346_s5 + $0x968] ss:$40 sps:$4 sm:$0xff]   ;;  %v20589_v44 = vld [vmem:[%s29346_s5 + $0x9b4] ss:$40 sps:$4 sm:$0xff]  }
 0x41f   :  { %4873 = vmatprep.subr.bf16.mxu1 %v20511_v23  ;;  %4926 = vmatprep.subr.bf16.mxu0 %v20514_v29  ;;  %v20587_v23 = vld [vmem:[%s29346_s5 + $0x9b0] ss:$40 sps:$4 sm:$0xff]  }
 0x420   :  { %3724 = vmatmul.mubr.bf16.gmra.mrb[36].mxu0 %v24292_v24  ;;  %3830 = vmatmul.mubr.bf16.gmra.mrb[44].mxu1 %v24292_v24  ;;  %v20526_v24 = vld [vmem:[%s29346_s5 + $0x64c] ss:$40 sps:$4 sm:$0xff]   ;;  %v20590_v29 = vld [vmem:[%s29346_s5 + $0x9b8] ss:$40 sps:$4 sm:$0xff]  }
 0x422   :  { %4874 = vmatpush1.bf16.msra.mxu1 %v20509_v46  ;;  %4927 = vmatpush1.bf16.msra.mxu0 %v20512_v6  ;;  %v20592_v46 = vld [vmem:[%s29346_s5 + $0x9bc] ss:$40 sps:$4 sm:$0xff]  }
 0x423   :  { %4875 = vmatprep.subr.bf16.mxu1 %v20517_v47  ;;  %4928 = vmatprep.subr.bf16.mxu0 %v20520_v49  ;;  %v20595_v6 = vld [vmem:[%s29346_s5 + $0x514] ss:$40 sps:$4 sm:$0xff]   ;;  %v16549_v49 = vld [vmem:[%s29347_s4 + $0x4] sm:$0xf] }
 0x424   :  { %v20598_v47 = vld [vmem:[%s29346_s5 + $0x51c] ss:$40 sps:$4 sm:$0xff]  }
 0x426   :  { %4876 = vmatpush1.bf16.msra.mxu1 %v20515_v61  ;;  %4929 = vmatpush1.bf16.msra.mxu0 %v20518_v7  ;;  %v2938_v61 = vrot.slane %v16549_v49, %v23684_v59  ;;  %v2942_v7 = vrot.slane %v16549_v49, %v23690_v62 }
 0x427   :  { %4877 = vmatprep.subr.bf16.mxu1 %v20523_v63  ;;  %4930 = vmatprep.subr.bf16.mxu0 %v20526_v24 }
 0x42a   :  { %4878 = vmatpush1.bf16.msra.mxu1 %v20521_v14  ;;  %4931 = vmatpush1.bf16.msra.mxu0 %v20524_v52 }
 0x42b   :  { %4879 = vmatprep.subr.bf16.mxu1 %v20529_v53  ;;  %4932 = vmatprep.subr.bf16.mxu0 %v20532_v2 }
 0x42e   :  { %4880 = vmatpush1.bf16.msra.mxu1 %v20527_v3  ;;  %4933 = vmatpush1.bf16.msra.mxu0 %v20530_v4 }
 0x42f   :  { %4881 = vmatprep.subr.bf16.mxu1 %v20535_v5  ;;  %4934 = vmatprep.subr.bf16.mxu0 %v20538_v36 }
 0x432   :  { %4882 = vmatpush1.bf16.msra.mxu1 %v20533_v18  ;;  %4935 = vmatpush1.bf16.msra.mxu0 %v20536_v51 }
 0x433   :  { %4883 = vmatprep.subr.bf16.mxu1 %v20541_v54  ;;  %4936 = vmatprep.subr.bf16.mxu0 %v20544_v35  ;;  %v2930_v54 = vrot.slane %v16549_v49, %v23184_v10 }
 0x436   :  { %4884 = vmatpush1.bf16.msra.mxu1 %v20539_v55  ;;  %4937 = vmatpush1.bf16.msra.mxu0 %v20542_v16 }
 0x437   :  { %4885 = vmatprep.subr.bf16.mxu1 %v20547_v19  ;;  %4938 = vmatprep.subr.bf16.mxu0 %v20550_v20  ;;  %v2934_v20 = vrot.slane %v16549_v49, %v23187_v11 }
 0x43a   :  { %4886 = vmatpush1.bf16.msra.mxu1 %v20545_v56  ;;  %4939 = vmatpush1.bf16.msra.mxu0 %v20548_v21 }
 0x43b   :  { %4887 = vmatprep.subr.bf16.mxu1 %v20553_v15  ;;  %4940 = vmatprep.subr.bf16.mxu0 %v20556_v58 }
 0x43e   :  { %4888 = vmatpush1.bf16.msra.mxu1 %v20551_v22  ;;  %4941 = vmatpush1.bf16.msra.mxu0 %v20554_v26 }
 0x43f   :  { %4889 = vmatprep.subr.bf16.mxu1 %v20559_v32  ;;  %4942 = vmatprep.subr.bf16.mxu0 %v20562_v25 }
 0x442   :  { %4890 = vmatpush1.bf16.msra.mxu1 %v20557_v27  ;;  %4943 = vmatpush1.bf16.msra.mxu0 %v20560_v28 }
 0x443   :  { %4891 = vmatprep.subr.bf16.mxu1 %v20565_v60  ;;  %4944 = vmatprep.subr.bf16.mxu0 %v20568_v0 }
 0x446   :  { %4892 = vmatpush1.bf16.msra.mxu1 %v20563_v30  ;;  %4945 = vmatpush1.bf16.msra.mxu0 %v20566_v57 }
 0x447   :  { %4893 = vmatprep.subr.bf16.mxu1 %v20571_v31  ;;  %4946 = vmatprep.subr.bf16.mxu0 %v20574_v33 }
 0x44a   :  { %4894 = vmatpush1.bf16.msra.mxu1 %v20569_v43  ;;  %4947 = vmatpush1.bf16.msra.mxu0 %v20572_v34 }
 0x44b   :  { %4895 = vmatprep.subr.bf16.mxu1 %v20577_v48  ;;  %4948 = vmatprep.subr.bf16.mxu0 %v20580_v1 }
 0x44e   :  { %4896 = vmatpush1.bf16.msra.mxu1 %v20575_v37  ;;  %4949 = vmatpush1.bf16.msra.mxu0 %v20578_v38 }
 0x44f   :  { %4897 = vmatprep.subr.bf16.mxu1 %v20583_v39  ;;  %4950 = vmatprep.subr.bf16.mxu0 %v20586_v40 }
 0x452   :  { %4898 = vmatpush1.bf16.msra.mxu1 %v20581_v41  ;;  %4951 = vmatpush1.bf16.msra.mxu0 %v20584_v42 }
 0x453   :  { %4899 = vmatprep.subr.bf16.mxu1 %v20589_v44  ;;  %4952 = vmatprep.subr.bf16.mxu0 %v20592_v46 }
 0x456   :  { %4900 = vmatpush1.bf16.msra.mxu1 %v20587_v23  ;;  %4953 = vmatpush1.bf16.msra.mxu0 %v20590_v29 }
 0x457   :  { %4975 = vmatprep.subr.bf16.mxu1 %v20595_v6  ;;  %5028 = vmatprep.subr.bf16.mxu0 %v20598_v47 }
 0x4eb   :  { %v3715_v63 = vpop.f32.mrb[32].mxu0  ;;  %v3821_v24 = vpop.f32.mrb[40].mxu1 }
 0x4ec   :  { %v19514_v14 = vadd.f32 %v3821_v24, %v2938_v61  ;;  %v3717_v52 = vpop.f32.mrb[33].mxu0  ;;  %v3823_v53 = vpop.f32.mrb[41].mxu1  ;;  %v19506_v56 = vadd.f32 %v3715_v63, %v2930_v54 }
 0x4ed   :  { %v19515_v2 = vadd.f32 %v3823_v53, %v2942_v7  ;;  %v3719_v3 = vpop.f32.mrb[34].mxu0  ;;  %v3825_v4 = vpop.f32.mrb[42].mxu1  ;;  %v19507_v28 = vadd.f32 %v3717_v52, %v2934_v20 }
 0x4ee   :  { %v16678_v5 = vmul.f32 -1.442695, %v19514_v14  ;;  %v19516_v36 = vadd.f32 %v3825_v4, %v2938_v61  ;;  %v3721_v18 = vpop.f32.mrb[35].mxu0  ;;  %v3827_v51 = vpop.f32.mrb[43].mxu1  ;;  %v19508_v43 = vadd.f32 %v3719_v3, %v2930_v54 }
 0x4ef   :  { %v16679_v35 = vmul.f32 -1.442695, %v19515_v2  ;;  %v19517_v55 = vadd.f32 %v3827_v51, %v2942_v7  ;;  %v19509_v41 = vadd.f32 %v3721_v18, %v2934_v20 }
 0x4f0   :  { %22657 = vpow2.f32 %v16678_v5  ;;  %v16680_v16 = vmul.f32 -1.442695, %v19516_v36 }
 0x4f1   :  { %22659 = vpow2.f32 %v16679_v35  ;;  %v16681_v19 = vmul.f32 -1.442695, %v19517_v55 }
 0x4f2   :  { %22661 = vpow2.f32 %v16680_v16 }
 0x4f3   :  { %v3725_v21 = vpop.f32.mrb[36].mxu0  ;;  %v3831_v15 = vpop.f32.mrb[44].mxu1  ;;  %22663 = vpow2.f32 %v16681_v19 }
 0x4f4   :  { %v19518_v58 = vadd.f32 %v3831_v15, %v2938_v61  ;;  %v3727_v22 = vpop.f32.mrb[37].mxu0  ;;  %v3833_v26 = vpop.f32.mrb[45].mxu1  ;;  %22665 = vtanh.f32 %v19506_v56  ;;  %v19510_v23 = vadd.f32 %v3725_v21, %v2930_v54 }
 0x4f5   :  { %v19519_v32 = vadd.f32 %v3833_v26, %v2942_v7  ;;  %v3729_v25 = vpop.f32.mrb[38].mxu0  ;;  %v3835_v27 = vpop.f32.mrb[46].mxu1  ;;  %v19511_v46 = vadd.f32 %v3727_v22, %v2934_v20  ;;  %v20596_v26 = vld [vmem:[%s29346_s5 + $0x518] ss:$40 sps:$4 sm:$0xff]  }
 0x4f6   :  { %v16682_v60 = vmul.f32 -1.442695, %v19518_v58  ;;  %v19520_v0 = vadd.f32 %v3835_v27, %v2938_v61  ;;  %v3731_v30 = vpop.f32.mrb[39].mxu0  ;;  %v3837_v57 = vpop.f32.mrb[47].mxu1  ;;  %v20604_v27 = vld [vmem:[%s29346_s5 + $0x56c] ss:$40 sps:$4 sm:$0xff]  }
 0x4f7   :  { %v16683_v31 = vmul.f32 -1.442695, %v19519_v32  ;;  %v19521_v33 = vadd.f32 %v3837_v57, %v2942_v7  ;;  %v19512_v7 = vadd.f32 %v3729_v25, %v2930_v54  ;;  %v19513_v3 = vadd.f32 %v3731_v30, %v2934_v20  ;;  %v20593_v20 = vld [vmem:[%s29346_s5 + $0x510] ss:$40 sps:$4 sm:$0xff]   ;;  %v20601_v25 = vld [vmem:[%s29346_s5 + $0x564] ss:$40 sps:$4 sm:$0xff]  }
 0x4f8   :  { %22667 = vpow2.f32 %v16682_v60  ;;  %v16684_v34 = vmul.f32 -1.442695, %v19520_v0  ;;  %v20599_v57 = vld [vmem:[%s29346_s5 + $0x560] ss:$40 sps:$4 sm:$0xff]  }
 0x4f9   :  { %22669 = vpow2.f32 %v16683_v31  ;;  %v16685_v38 = vmul.f32 -1.442695, %v19521_v33  ;;  %v20602_v31 = vld [vmem:[%s29346_s5 + $0x568] ss:$40 sps:$4 sm:$0xff]  }
 0x4fa   :  { %v22658_v48 = vpop.eup %22657  ;;  %22671 = vtanh.f32 %v19507_v28 }
 0x4fb   :  { %v22660_v1 = vpop.eup %22659  ;;  %v3872_v37 = vadd.f32 1.0, %v22658_v48  ;;  %22673 = vpow2.f32 %v16684_v34  ;;  %v20610_v34 = vld [vmem:[%s29346_s5 + $0x5bc] ss:$40 sps:$4 sm:$0xff]  }
 0x4fc   :  { %v3873_v39 = vadd.f32 1.0, %v22660_v1  ;;  %22675 = vtanh.f32 %v19508_v43  ;;  %v22662_v40 = vpop.eup %22661  ;;  %v20607_v43 = vld [vmem:[%s29346_s5 + $0x5b4] ss:$40 sps:$4 sm:$0xff]  }
 0x4fd   :  { %22677 = vrcp.f32 %v3872_v37  ;;  %v3874_v42 = vadd.f32 1.0, %v22662_v40  ;;  %v22664_v44 = vpop.eup %22663  ;;  %v20605_v40 = vld [vmem:[%s29346_s5 + $0x5b0] ss:$40 sps:$4 sm:$0xff]  }
 0x4fe   :  { %22679 = vrcp.f32 %v3873_v39  ;;  %v3875_v29 = vadd.f32 1.0, %v22664_v44  ;;  %v22666_v6 = vpop.eup %22665  ;;  %v20616_v44 = vld [vmem:[%s29346_s5 + $0x60c] ss:$40 sps:$4 sm:$0xff]  }
 0x4ff   :  { %22681 = vpow2.f32 %v16685_v38 }
 0x500   :  { %22683 = vrcp.f32 %v3874_v42  ;;  %v20613_v42 = vld [vmem:[%s29346_s5 + $0x604] ss:$40 sps:$4 sm:$0xff]  }
 0x501   :  { %22685 = vtanh.f32 %v19509_v41  ;;  %v20608_v41 = vld [vmem:[%s29346_s5 + $0x5b8] ss:$40 sps:$4 sm:$0xff]  }
 0x502   :  { %v22668_v47 = vpop.eup %22667  ;;  %22687 = vrcp.f32 %v3875_v29  ;;  %v20614_v29 = vld [vmem:[%s29346_s5 + $0x608] ss:$40 sps:$4 sm:$0xff]  }
 0x503   :  { %v22670_v49 = vpop.eup %22669  ;;  %22689 = vtanh.f32 %v19510_v23  ;;  %v3876_v61 = vadd.f32 1.0, %v22668_v47  ;;  %v20611_v23 = vld [vmem:[%s29346_s5 + $0x600] ss:$40 sps:$4 sm:$0xff]   ;;  %v20617_v47 = vld [vmem:[%s29346_s5 + $0x650] ss:$40 sps:$4 sm:$0xff]  }
 0x504   :  { %v22672_v63 = vpop.eup %22671  ;;  %22691 = vtanh.f32 %v19511_v46  ;;  %v3877_v24 = vadd.f32 1.0, %v22670_v49  ;;  %v20619_v46 = vld [vmem:[%s29346_s5 + $0x654] ss:$40 sps:$4 sm:$0xff]   ;;  %v20620_v49 = vld [vmem:[%s29346_s5 + $0x658] ss:$40 sps:$4 sm:$0xff]  }
 0x505   :  { %v22674_v14 = vpop.eup %22673  ;;  %22693 = vrcp.f32 %v3876_v61  ;;  %v20625_v61 = vld [vmem:[%s29346_s5 + $0x6a4] ss:$40 sps:$4 sm:$0xff]  }
 0x506   :  { %v22676_v52 = vpop.eup %22675  ;;  %22695 = vrcp.f32 %v3877_v24  ;;  %v3878_v53 = vadd.f32 1.0, %v22674_v14  ;;  %v20626_v24 = vld [vmem:[%s29346_s5 + $0x6a8] ss:$40 sps:$4 sm:$0xff]   ;;  %v20631_v14 = vld [vmem:[%s29346_s5 + $0x6f4] ss:$40 sps:$4 sm:$0xff]  }
 0x507   :  { %v22678_v2 = vpop.eup %22677  ;;  %22697 = vtanh.f32 %v19512_v7  ;;  %v20628_v7 = vld [vmem:[%s29346_s5 + $0x6ac] ss:$40 sps:$4 sm:$0xff]  }
 0x508   :  { %v22680_v4 = vpop.eup %22679  ;;  %22699 = vrcp.f32 %v3878_v53  ;;  %v3896_v5 = vmul.f32 %v22678_v2, %v22666_v6  ;;  %v20622_v6 = vld [vmem:[%s29346_s5 + $0x65c] ss:$40 sps:$4 sm:$0xff]   ;;  %v20629_v53 = vld [vmem:[%s29346_s5 + $0x6f0] ss:$40 sps:$4 sm:$0xff]  }
 0x509   :  { %v22682_v36 = vpop.eup %22681  ;;  %v3897_v18 = vmul.f32 %v22680_v4, %v22672_v63  ;;  %22701 = vtanh.f32 %v19513_v3  ;;  %v20623_v63 = vld [vmem:[%s29346_s5 + $0x6a0] ss:$40 sps:$4 sm:$0xff]   ;;  %v20637_v3 = vld [vmem:[%s29346_s5 + $0x744] ss:$40 sps:$4 sm:$0xff]  }
 0x50a   :  { %v22684_v51 = vpop.eup %22683  ;;  %v3879_v35 = vadd.f32 1.0, %v22682_v36  ;;  %v20632_v2 = vld [vmem:[%s29346_s5 + $0x6f8] ss:$40 sps:$4 sm:$0xff]   ;;  %v20640_v4 = vld [vmem:[%s29346_s5 + $0x74c] ss:$40 sps:$4 sm:$0xff]  }
 0x50b   :  { %v22686_v55 = vpop.eup %22685  ;;  %v3898_v54 = vmul.f32 %v22684_v51, %v22676_v52  ;;  %v20634_v52 = vld [vmem:[%s29346_s5 + $0x6fc] ss:$40 sps:$4 sm:$0xff]   ;;  %v20638_v36 = vld [vmem:[%s29346_s5 + $0x748] ss:$40 sps:$4 sm:$0xff]  }
 0x50c   :  { %v22688_v16 = vpop.eup %22687  ;;  %22703 = vrcp.f32 %v3879_v35  ;;  %v20646_v51 = vld [vmem:[%s29346_s5 + $0x79c] ss:$40 sps:$4 sm:$0xff]   ;;  %v20641_v35 = vld [vmem:[%s29346_s5 + $0x790] ss:$40 sps:$4 sm:$0xff]  }
 0x50d   :  { %v22690_v19 = vpop.eup %22689  ;;  %v3899_v56 = vmul.f32 %v22688_v16, %v22686_v55  ;;  %v24673_v21 = vpack.c.bf16 %v3898_v54, %v3896_v5  ;;  %v20635_v5 = vld [vmem:[%s29346_s5 + $0x740] ss:$40 sps:$4 sm:$0xff]   ;;  %v20649_v54 = vld [vmem:[%s29346_s5 + $0x7e4] ss:$40 sps:$4 sm:$0xff]  }
 0x50e   :  { %v22692_v15 = vpop.eup %22691  ;;  %v20644_v55 = vld [vmem:[%s29346_s5 + $0x798] ss:$40 sps:$4 sm:$0xff]   ;;  %v20652_v16 = vld [vmem:[%s29346_s5 + $0x7ec] ss:$40 sps:$4 sm:$0xff]  }
 0x50f   :  { %v22694_v58 = vpop.eup %22693  ;;  %v24675_v22 = vpack.c.bf16 %v3899_v56, %v3897_v18  ;;  %v20643_v18 = vld [vmem:[%s29346_s5 + $0x794] ss:$40 sps:$4 sm:$0xff]   ;;  %v20650_v56 = vld [vmem:[%s29346_s5 + $0x7e8] ss:$40 sps:$4 sm:$0xff]  }
 0x510   :  { %v22696_v32 = vpop.eup %22695  ;;  %v3900_v28 = vmul.f32 %v22694_v58, %v22690_v19  ;;  %v20647_v19 = vld [vmem:[%s29346_s5 + $0x7e0] ss:$40 sps:$4 sm:$0xff]   ;;  %v20658_v58 = vld [vmem:[%s29346_s5 + $0x83c] ss:$40 sps:$4 sm:$0xff]  }
 0x511   :  { %v22698_v60 = vpop.eup %22697  ;;  %4901 = vmatprep.mubr.bf16.mxu1 %v24675_v22  ;;  %4954 = vmatprep.mubr.bf16.mxu0 %v24675_v22  ;;  %v3901_v0 = vmul.f32 %v22696_v32, %v22692_v15  ;;  %v20655_v15 = vld [vmem:[%s29346_s5 + $0x834] ss:$40 sps:$4 sm:$0xff]   ;;  %v20661_v32 = vld [vmem:[%s29346_s5 + $0x884] ss:$40 sps:$4 sm:$0xff]  }
 0x512   :  { %v22700_v30 = vpop.eup %22699  ;;  %4902 = vmatmul.mubr.bf16.vlgmr.msra.gmra.mrb[16].mxu1 %v24673_v21  ;;  %4955 = vmatmul.mubr.bf16.vlgmr.msra.gmra.mrb[16].mxu0 %v24673_v21 }
 0x513   :  { %4976 = vmatpush1.bf16.msra.mxu1 %v20593_v20  ;;  %5029 = vmatpush1.bf16.msra.mxu0 %v20596_v26  ;;  %v3902_v33 = vmul.f32 %v22700_v30, %v22698_v60  ;;  %v22702_v48 = vpop.eup %22701  ;;  %v20653_v20 = vld [vmem:[%s29346_s5 + $0x830] ss:$40 sps:$4 sm:$0xff]   ;;  %v20667_v60 = vld [vmem:[%s29346_s5 + $0x8d4] ss:$40 sps:$4 sm:$0xff]  }
 0x514   :  { %4977 = vmatprep.subr.bf16.mxu1 %v20601_v25  ;;  %5030 = vmatprep.subr.bf16.mxu0 %v20604_v27  ;;  %v20656_v26 = vld [vmem:[%s29346_s5 + $0x838] ss:$40 sps:$4 sm:$0xff]   ;;  %v20664_v25 = vld [vmem:[%s29346_s5 + $0x88c] ss:$40 sps:$4 sm:$0xff]  }
 0x515   :  { %v24705_v1 = vpack.c.bf16 %v3902_v33, %v3900_v28  ;;  %v20659_v27 = vld [vmem:[%s29346_s5 + $0x880] ss:$40 sps:$4 sm:$0xff]   ;;  %v20665_v30 = vld [vmem:[%s29346_s5 + $0x8d0] ss:$40 sps:$4 sm:$0xff]   ;;  %v20676_v33 = vld [vmem:[%s29346_s5 + $0x92c] ss:$40 sps:$4 sm:$0xff]  }
 0x516   :  { %v22704_v37 = vpop.eup %22703  ;;  %v20662_v28 = vld [vmem:[%s29346_s5 + $0x888] ss:$40 sps:$4 sm:$0xff]  }
 0x517   :  { %4978 = vmatpush1.bf16.msra.mxu1 %v20599_v57  ;;  %5031 = vmatpush1.bf16.msra.mxu0 %v20602_v31  ;;  %v3903_v38 = vmul.f32 %v22704_v37, %v22702_v48  ;;  %v20668_v57 = vld [vmem:[%s29346_s5 + $0x8d8] ss:$40 sps:$4 sm:$0xff]   ;;  %v20673_v31 = vld [vmem:[%s29346_s5 + $0x924] ss:$40 sps:$4 sm:$0xff]   ;;  %v20679_v48 = vld [vmem:[%s29346_s5 + $0x974] ss:$40 sps:$4 sm:$0xff]  }
 0x518   :  { %4979 = vmatprep.subr.bf16.mxu1 %v20607_v43  ;;  %5032 = vmatprep.subr.bf16.mxu0 %v20610_v34  ;;  %v20671_v43 = vld [vmem:[%s29346_s5 + $0x920] ss:$40 sps:$4 sm:$0xff]   ;;  %v20682_v37 = vld [vmem:[%s29346_s5 + $0x97c] ss:$40 sps:$4 sm:$0xff]  }
 0x519   :  { %v24707_v39 = vpack.c.bf16 %v3903_v38, %v3901_v0  ;;  %v20670_v0 = vld [vmem:[%s29346_s5 + $0x8dc] ss:$40 sps:$4 sm:$0xff]   ;;  %v20674_v34 = vld [vmem:[%s29346_s5 + $0x928] ss:$40 sps:$4 sm:$0xff]  }
 0x51a   :  { %v20677_v38 = vld [vmem:[%s29346_s5 + $0x970] ss:$40 sps:$4 sm:$0xff]  }
 0x51b   :  { %4911 = vmatprep.mubr.bf16.mxu1 %v24707_v39  ;;  %4964 = vmatprep.mubr.bf16.mxu0 %v24707_v39 }
 0x51c   :  { %4912 = vmatmul.mubr.bf16.gmra.mrb[20].mxu1 %v24705_v1  ;;  %4965 = vmatmul.mubr.bf16.gmra.mrb[20].mxu0 %v24705_v1 }
 0x51d   :  { %4980 = vmatpush1.bf16.msra.mxu1 %v20605_v40  ;;  %5033 = vmatpush1.bf16.msra.mxu0 %v20608_v41  ;;  %v20680_v40 = vld [vmem:[%s29346_s5 + $0x978] ss:$40 sps:$4 sm:$0xff]   ;;  %v20685_v41 = vld [vmem:[%s29346_s5 + $0x9c4] ss:$40 sps:$4 sm:$0xff]  }
 0x51e   :  { %5007 = vmatprep.mubr.bf16.mxu1 %v24675_v22  ;;  %5060 = vmatprep.mubr.bf16.mxu0 %v24675_v22 }
 0x51f   :  { %4981 = vmatprep.subr.bf16.mxu1 %v20613_v42  ;;  %5034 = vmatprep.subr.bf16.mxu0 %v20616_v44  ;;  %v20688_v42 = vld [vmem:[%s29346_s5 + $0x9cc] ss:$40 sps:$4 sm:$0xff]   ;;  %v20683_v44 = vld [vmem:[%s29346_s5 + $0x9c0] ss:$40 sps:$4 sm:$0xff]  }
 0x521   :  { %4982 = vmatpush1.bf16.msra.mxu1 %v20611_v23  ;;  %5035 = vmatpush1.bf16.msra.mxu0 %v20614_v29  ;;  %v20686_v23 = vld [vmem:[%s29346_s5 + $0x9c8] ss:$40 sps:$4 sm:$0xff]   ;;  %v20691_v29 = vld [vmem:[%s29346_s5 + $0x524] ss:$40 sps:$4 sm:$0xff]  }
 0x522   :  { %4983 = vmatprep.subr.bf16.mxu1 %v20619_v46  ;;  %5036 = vmatprep.subr.bf16.mxu0 %v20622_v6  ;;  %v20739_v46 = vld [vmem:[%s29344_s3 + $0x804] ss:$16 sps:$4 sm:$0xff]   ;;  %v20689_v6 = vld [vmem:[%s29346_s5 + $0x520] ss:$40 sps:$4 sm:$0xff]  }
 0x525   :  { %4984 = vmatpush1.bf16.msra.mxu1 %v20617_v47  ;;  %5037 = vmatpush1.bf16.msra.mxu0 %v20620_v49  ;;  %v20737_v47 = vld [vmem:[%s29344_s3 + $0x800] ss:$16 sps:$4 sm:$0xff]   ;;  %v20694_v49 = vld [vmem:[%s29346_s5 + $0x574] ss:$40 sps:$4 sm:$0xff]  }
 0x526   :  { %4985 = vmatprep.subr.bf16.mxu1 %v20625_v61  ;;  %5038 = vmatprep.subr.bf16.mxu0 %v20628_v7  ;;  %v20745_v61 = vld [vmem:[%s29344_s3 + $0x824] ss:$16 sps:$4 sm:$0xff]   ;;  %v20692_v7 = vld [vmem:[%s29346_s5 + $0x570] ss:$40 sps:$4 sm:$0xff]  }
 0x529   :  { %4986 = vmatpush1.bf16.msra.mxu1 %v20623_v63  ;;  %5039 = vmatpush1.bf16.msra.mxu0 %v20626_v24  ;;  %v20743_v63 = vld [vmem:[%s29344_s3 + $0x820] ss:$16 sps:$4 sm:$0xff]   ;;  %v20697_v24 = vld [vmem:[%s29346_s5 + $0x5c4] ss:$40 sps:$4 sm:$0xff]  }
 0x52a   :  { %4987 = vmatprep.subr.bf16.mxu1 %v20631_v14  ;;  %5040 = vmatprep.subr.bf16.mxu0 %v20634_v52  ;;  %v20751_v14 = vld [vmem:[%s29344_s3 + $0x844] ss:$16 sps:$4 sm:$0xff]   ;;  %v20695_v52 = vld [vmem:[%s29346_s5 + $0x5c0] ss:$40 sps:$4 sm:$0xff]  }
 0x52d   :  { %4988 = vmatpush1.bf16.msra.mxu1 %v20629_v53  ;;  %5041 = vmatpush1.bf16.msra.mxu0 %v20632_v2  ;;  %v20749_v53 = vld [vmem:[%s29344_s3 + $0x840] ss:$16 sps:$4 sm:$0xff]   ;;  %v20700_v2 = vld [vmem:[%s29346_s5 + $0x614] ss:$40 sps:$4 sm:$0xff]  }
 0x52e   :  { %4989 = vmatprep.subr.bf16.mxu1 %v20637_v3  ;;  %5042 = vmatprep.subr.bf16.mxu0 %v20640_v4  ;;  %v20757_v3 = vld [vmem:[%s29344_s3 + $0x864] ss:$16 sps:$4 sm:$0xff]   ;;  %v20698_v4 = vld [vmem:[%s29346_s5 + $0x610] ss:$40 sps:$4 sm:$0xff]  }
 0x531   :  { %4990 = vmatpush1.bf16.msra.mxu1 %v20635_v5  ;;  %5043 = vmatpush1.bf16.msra.mxu0 %v20638_v36  ;;  %v20755_v5 = vld [vmem:[%s29344_s3 + $0x860] ss:$16 sps:$4 sm:$0xff]   ;;  %v20703_v36 = vld [vmem:[%s29346_s5 + $0x664] ss:$40 sps:$4 sm:$0xff]  }
 0x532   :  { %4991 = vmatprep.subr.bf16.mxu1 %v20643_v18  ;;  %5044 = vmatprep.subr.bf16.mxu0 %v20646_v51  ;;  %v20701_v18 = vld [vmem:[%s29346_s5 + $0x660] ss:$40 sps:$4 sm:$0xff]  }
 0x533   :  { %v20761_v51 = vld [vmem:[%s29344_s3 + $0x880] ss:$16 sps:$4 sm:$0xff]  }
 0x535   :  { %4992 = vmatpush1.bf16.msra.mxu1 %v20641_v35  ;;  %5045 = vmatpush1.bf16.msra.mxu0 %v20644_v55  ;;  %v20706_v35 = vld [vmem:[%s29346_s5 + $0x6b4] ss:$40 sps:$4 sm:$0xff]  }
 0x536   :  { %4993 = vmatprep.subr.bf16.mxu1 %v20649_v54  ;;  %5046 = vmatprep.subr.bf16.mxu0 %v20652_v16  ;;  %v20769_v55 = vld [vmem:[%s29344_s3 + $0x8a4] ss:$16 sps:$4 sm:$0xff]   ;;  %v20704_v54 = vld [vmem:[%s29346_s5 + $0x6b0] ss:$40 sps:$4 sm:$0xff]  }
 0x537   :  { %v20767_v16 = vld [vmem:[%s29344_s3 + $0x8a0] ss:$16 sps:$4 sm:$0xff]  }
 0x539   :  { %4994 = vmatpush1.bf16.msra.mxu1 %v20647_v19  ;;  %5047 = vmatpush1.bf16.msra.mxu0 %v20650_v56  ;;  %v20709_v19 = vld [vmem:[%s29346_s5 + $0x704] ss:$40 sps:$4 sm:$0xff]  }
 0x53a   :  { %4995 = vmatprep.subr.bf16.mxu1 %v20655_v15  ;;  %5048 = vmatprep.subr.bf16.mxu0 %v20658_v58  ;;  %v20775_v56 = vld [vmem:[%s29344_s3 + $0x8c4] ss:$16 sps:$4 sm:$0xff]   ;;  %v20707_v15 = vld [vmem:[%s29346_s5 + $0x700] ss:$40 sps:$4 sm:$0xff]  }
 0x53b   :  { %v20773_v58 = vld [vmem:[%s29344_s3 + $0x8c0] ss:$16 sps:$4 sm:$0xff]  }
 0x53d   :  { %4996 = vmatpush1.bf16.msra.mxu1 %v20653_v20  ;;  %5049 = vmatpush1.bf16.msra.mxu0 %v20656_v26  ;;  %v20712_v20 = vld [vmem:[%s29346_s5 + $0x754] ss:$40 sps:$4 sm:$0xff]  }
 0x53e   :  { %4997 = vmatprep.subr.bf16.mxu1 %v20661_v32  ;;  %5050 = vmatprep.subr.bf16.mxu0 %v20664_v25  ;;  %v20781_v26 = vld [vmem:[%s29344_s3 + $0x8e4] ss:$16 sps:$4 sm:$0xff]   ;;  %v20710_v32 = vld [vmem:[%s29346_s5 + $0x750] ss:$40 sps:$4 sm:$0xff]  }
 0x53f   :  { %v20779_v25 = vld [vmem:[%s29344_s3 + $0x8e0] ss:$16 sps:$4 sm:$0xff]  }
 0x541   :  { %4998 = vmatpush1.bf16.msra.mxu1 %v20659_v27  ;;  %5051 = vmatpush1.bf16.msra.mxu0 %v20662_v28  ;;  %v20715_v27 = vld [vmem:[%s29346_s5 + $0x7a4] ss:$40 sps:$4 sm:$0xff]  }
 0x542   :  { %4999 = vmatprep.subr.bf16.mxu1 %v20667_v60  ;;  %5052 = vmatprep.subr.bf16.mxu0 %v20670_v0  ;;  %v20787_v28 = vld [vmem:[%s29344_s3 + $0x904] ss:$16 sps:$4 sm:$0xff]   ;;  %v20713_v60 = vld [vmem:[%s29346_s5 + $0x7a0] ss:$40 sps:$4 sm:$0xff]  }
 0x543   :  { %v20785_v0 = vld [vmem:[%s29344_s3 + $0x900] ss:$16 sps:$4 sm:$0xff]  }
 0x545   :  { %5000 = vmatpush1.bf16.msra.mxu1 %v20665_v30  ;;  %5053 = vmatpush1.bf16.msra.mxu0 %v20668_v57  ;;  %v20718_v30 = vld [vmem:[%s29346_s5 + $0x7f4] ss:$40 sps:$4 sm:$0xff]   ;;  %v20716_v57 = vld [vmem:[%s29346_s5 + $0x7f0] ss:$40 sps:$4 sm:$0xff]  }
 0x546   :  { %5001 = vmatprep.subr.bf16.mxu1 %v20673_v31  ;;  %5054 = vmatprep.subr.bf16.mxu0 %v20676_v33  ;;  %v20721_v31 = vld [vmem:[%s29346_s5 + $0x844] ss:$40 sps:$4 sm:$0xff]   ;;  %v20719_v33 = vld [vmem:[%s29346_s5 + $0x840] ss:$40 sps:$4 sm:$0xff]  }
 0x549   :  { %5002 = vmatpush1.bf16.msra.mxu1 %v20671_v43  ;;  %5055 = vmatpush1.bf16.msra.mxu0 %v20674_v34  ;;  %v20724_v43 = vld [vmem:[%s29346_s5 + $0x894] ss:$40 sps:$4 sm:$0xff]   ;;  %v20722_v34 = vld [vmem:[%s29346_s5 + $0x890] ss:$40 sps:$4 sm:$0xff]  }
 0x54a   :  { %5003 = vmatprep.subr.bf16.mxu1 %v20679_v48  ;;  %5056 = vmatprep.subr.bf16.mxu0 %v20682_v37  ;;  %v20727_v48 = vld [vmem:[%s29346_s5 + $0x8e4] ss:$40 sps:$4 sm:$0xff]   ;;  %v20725_v37 = vld [vmem:[%s29346_s5 + $0x8e0] ss:$40 sps:$4 sm:$0xff]  }
 0x54d   :  { %5004 = vmatpush1.bf16.msra.mxu1 %v20677_v38  ;;  %5057 = vmatpush1.bf16.msra.mxu0 %v20680_v40  ;;  %v20730_v38 = vld [vmem:[%s29346_s5 + $0x934] ss:$40 sps:$4 sm:$0xff]   ;;  %v20728_v40 = vld [vmem:[%s29346_s5 + $0x930] ss:$40 sps:$4 sm:$0xff]  }
 0x54e   :  { %5005 = vmatprep.subr.bf16.mxu1 %v20685_v41  ;;  %5058 = vmatprep.subr.bf16.mxu0 %v20688_v42  ;;  %v20733_v41 = vld [vmem:[%s29346_s5 + $0x984] ss:$40 sps:$4 sm:$0xff]   ;;  %v20731_v42 = vld [vmem:[%s29346_s5 + $0x980] ss:$40 sps:$4 sm:$0xff]  }
 0x551   :  { %5006 = vmatpush1.bf16.msra.mxu1 %v20683_v44  ;;  %5059 = vmatpush1.bf16.msra.mxu0 %v20686_v23  ;;  %v20736_v44 = vld [vmem:[%s29346_s5 + $0x9d4] ss:$40 sps:$4 sm:$0xff]   ;;  %v20734_v23 = vld [vmem:[%s29346_s5 + $0x9d0] ss:$40 sps:$4 sm:$0xff]  }
 0x552   :  { %5081 = vmatprep.subr.bf16.mxu0 %v20691_v29  ;;  %6184 = vmatprep.subr.bf16.mxu1 %v20739_v46  ;;  %v20742_v29 = vld [vmem:[%s29344_s3 + $0x80c] ss:$16 sps:$4 sm:$0xff]   ;;  %v20740_v46 = vld [vmem:[%s29344_s3 + $0x808] ss:$16 sps:$4 sm:$0xff]  }
 0x554   :  { %5008 = vmatmul.mubr.bf16.vlgmr.msra.gmra.mrb[24].mxu1 %v24673_v21  ;;  %5061 = vmatmul.mubr.bf16.vlgmr.msra.gmra.mrb[24].mxu0 %v24673_v21 }
 0x555   :  { %5017 = vmatprep.mubr.bf16.mxu1 %v24707_v39  ;;  %5070 = vmatprep.mubr.bf16.mxu0 %v24707_v39 }
 0x556   :  { %5082 = vmatpush1.bf16.msra.mxu0 %v20689_v6  ;;  %6185 = vmatpush1.bf16.msra.mxu1 %v20737_v47  ;;  %v20748_v6 = vld [vmem:[%s29344_s3 + $0x82c] ss:$16 sps:$4 sm:$0xff]   ;;  %v20746_v47 = vld [vmem:[%s29344_s3 + $0x828] ss:$16 sps:$4 sm:$0xff]  }
 0x557   :  { %5083 = vmatprep.subr.bf16.mxu0 %v20694_v49  ;;  %6186 = vmatprep.subr.bf16.mxu1 %v20745_v61  ;;  %v20754_v49 = vld [vmem:[%s29344_s3 + $0x84c] ss:$16 sps:$4 sm:$0xff]   ;;  %v20752_v61 = vld [vmem:[%s29344_s3 + $0x848] ss:$16 sps:$4 sm:$0xff]  }
 0x55a   :  { %5084 = vmatpush1.bf16.msra.mxu0 %v20692_v7  ;;  %6187 = vmatpush1.bf16.msra.mxu1 %v20743_v63  ;;  %v20766_v7 = vld [vmem:[%s29344_s3 + $0x88c] ss:$16 sps:$4 sm:$0xff]   ;;  %v20764_v63 = vld [vmem:[%s29344_s3 + $0x888] ss:$16 sps:$4 sm:$0xff]  }
 0x55b   :  { %5085 = vmatprep.subr.bf16.mxu0 %v20697_v24  ;;  %6188 = vmatprep.subr.bf16.mxu1 %v20751_v14  ;;  %v20770_v24 = vld [vmem:[%s29344_s3 + $0x8a8] ss:$16 sps:$4 sm:$0xff]   ;;  %v20778_v14 = vld [vmem:[%s29344_s3 + $0x8cc] ss:$16 sps:$4 sm:$0xff]  }
 0x55c   :  { %5018 = vmatmul.mubr.bf16.gmra.mrb[28].mxu1 %v24705_v1  ;;  %5071 = vmatmul.mubr.bf16.gmra.mrb[28].mxu0 %v24705_v1 }
 0x55d   :  { %5113 = vmatprep.mubr.bf16.mxu0 %v24675_v22  ;;  %v20763_v22 = vld [vmem:[%s29344_s3 + $0x884] ss:$16 sps:$4 sm:$0xff]  }
 0x55e   :  { %5086 = vmatpush1.bf16.msra.mxu0 %v20695_v52  ;;  %6189 = vmatpush1.bf16.msra.mxu1 %v20749_v53  ;;  %v20776_v52 = vld [vmem:[%s29344_s3 + $0x8c8] ss:$16 sps:$4 sm:$0xff]   ;;  %v20784_v53 = vld [vmem:[%s29344_s3 + $0x8ec] ss:$16 sps:$4 sm:$0xff]  }
 0x55f   :  { %5087 = vmatprep.subr.bf16.mxu0 %v20700_v2  ;;  %6190 = vmatprep.subr.bf16.mxu1 %v20757_v3  ;;  %v20782_v2 = vld [vmem:[%s29344_s3 + $0x8e8] ss:$16 sps:$4 sm:$0xff]   ;;  %v20790_v3 = vld [vmem:[%s29344_s3 + $0x90c] ss:$16 sps:$4 sm:$0xff]  }
 0x562   :  { %5088 = vmatpush1.bf16.msra.mxu0 %v20698_v4  ;;  %6191 = vmatpush1.bf16.msra.mxu1 %v20755_v5  ;;  %v20788_v4 = vld [vmem:[%s29344_s3 + $0x908] ss:$16 sps:$4 sm:$0xff]   ;;  %v20793_v5 = vld [vmem:[%s29344_s3 + $0x924] ss:$16 sps:$4 sm:$0xff]  }
 0x563   :  { %5089 = vmatprep.subr.bf16.mxu0 %v20703_v36  ;;  %6192 = vmatprep.subr.bf16.mxu1 %v20763_v22  ;;  %v20796_v36 = vld [vmem:[%s29344_s3 + $0x92c] ss:$16 sps:$4 sm:$0xff]   ;;  %v20791_v22 = vld [vmem:[%s29344_s3 + $0x920] ss:$16 sps:$4 sm:$0xff]  }
 0x566   :  { %5090 = vmatpush1.bf16.msra.mxu0 %v20701_v18  ;;  %6193 = vmatpush1.bf16.msra.mxu1 %v20761_v51  ;;  %v20794_v18 = vld [vmem:[%s29344_s3 + $0x928] ss:$16 sps:$4 sm:$0xff]   ;;  %v20799_v51 = vld [vmem:[%s29344_s3 + $0x944] ss:$16 sps:$4 sm:$0xff]  }
 0x567   :  { %5091 = vmatprep.subr.bf16.mxu0 %v20706_v35  ;;  %6194 = vmatprep.subr.bf16.mxu1 %v20769_v55  ;;  %v20802_v35 = vld [vmem:[%s29344_s3 + $0x94c] ss:$16 sps:$4 sm:$0xff]   ;;  %v20797_v55 = vld [vmem:[%s29344_s3 + $0x940] ss:$16 sps:$4 sm:$0xff]  }
 0x56a   :  { %5092 = vmatpush1.bf16.msra.mxu0 %v20704_v54  ;;  %6195 = vmatpush1.bf16.msra.mxu1 %v20767_v16  ;;  %v20800_v54 = vld [vmem:[%s29344_s3 + $0x948] ss:$16 sps:$4 sm:$0xff]   ;;  %v20805_v16 = vld [vmem:[%s29344_s3 + $0x964] ss:$16 sps:$4 sm:$0xff]  }
 0x56b   :  { %5093 = vmatprep.subr.bf16.mxu0 %v20709_v19  ;;  %6196 = vmatprep.subr.bf16.mxu1 %v20775_v56  ;;  %v20808_v19 = vld [vmem:[%s29344_s3 + $0x96c] ss:$16 sps:$4 sm:$0xff]   ;;  %v20803_v56 = vld [vmem:[%s29344_s3 + $0x960] ss:$16 sps:$4 sm:$0xff]  }
 0x56e   :  { %5094 = vmatpush1.bf16.msra.mxu0 %v20707_v15  ;;  %6197 = vmatpush1.bf16.msra.mxu1 %v20773_v58  ;;  %v20806_v15 = vld [vmem:[%s29344_s3 + $0x968] ss:$16 sps:$4 sm:$0xff]   ;;  %v20811_v58 = vld [vmem:[%s29344_s3 + $0x984] ss:$16 sps:$4 sm:$0xff]  }
 0x56f   :  { %5095 = vmatprep.subr.bf16.mxu0 %v20712_v20  ;;  %6198 = vmatprep.subr.bf16.mxu1 %v20781_v26  ;;  %v20814_v20 = vld [vmem:[%s29344_s3 + $0x98c] ss:$16 sps:$4 sm:$0xff]   ;;  %v20809_v26 = vld [vmem:[%s29344_s3 + $0x980] ss:$16 sps:$4 sm:$0xff]  }
 0x572   :  { %5096 = vmatpush1.bf16.msra.mxu0 %v20710_v32  ;;  %6199 = vmatpush1.bf16.msra.mxu1 %v20779_v25  ;;  %v20812_v32 = vld [vmem:[%s29344_s3 + $0x988] ss:$16 sps:$4 sm:$0xff]   ;;  %v20817_v25 = vld [vmem:[%s29344_s3 + $0x9a4] ss:$16 sps:$4 sm:$0xff]  }
 0x573   :  { %5097 = vmatprep.subr.bf16.mxu0 %v20715_v27  ;;  %6200 = vmatprep.subr.bf16.mxu1 %v20787_v28  ;;  %v20820_v27 = vld [vmem:[%s29344_s3 + $0x9ac] ss:$16 sps:$4 sm:$0xff]   ;;  %v20815_v28 = vld [vmem:[%s29344_s3 + $0x9a0] ss:$16 sps:$4 sm:$0xff]  }
 0x576   :  { %5098 = vmatpush1.bf16.msra.mxu0 %v20713_v60  ;;  %6201 = vmatpush1.bf16.msra.mxu1 %v20785_v0  ;;  %v20818_v60 = vld [vmem:[%s29344_s3 + $0x9a8] ss:$16 sps:$4 sm:$0xff]   ;;  %v20823_v0 = vld [vmem:[%s29344_s3 + $0x9c4] ss:$16 sps:$4 sm:$0xff]  }
 0x577   :  { %5099 = vmatprep.subr.bf16.mxu0 %v20718_v30  ;;  %6202 = vmatprep.subr.bf16.mxu1 %v20793_v5  ;;  %v20826_v30 = vld [vmem:[%s29344_s3 + $0x9cc] ss:$16 sps:$4 sm:$0xff]  }
 0x57a   :  { %5100 = vmatpush1.bf16.msra.mxu0 %v20716_v57  ;;  %6203 = vmatpush1.bf16.msra.mxu1 %v20791_v22  ;;  %v20821_v57 = vld [vmem:[%s29344_s3 + $0x9c0] ss:$16 sps:$4 sm:$0xff]  }
 0x57b   :  { %5101 = vmatprep.subr.bf16.mxu0 %v20721_v31  ;;  %6204 = vmatprep.subr.bf16.mxu1 %v20799_v51  ;;  %v20824_v31 = vld [vmem:[%s29344_s3 + $0x9c8] ss:$16 sps:$4 sm:$0xff]   ;;  %v22899_v22 = vld [vmem:[#allocation2 + $0x40] sm:$0xff] }
 0x57e   :  { %5102 = vmatpush1.bf16.msra.mxu0 %v20719_v33  ;;  %6205 = vmatpush1.bf16.msra.mxu1 %v20797_v55  ;;  %v20829_v33 = vld [vmem:[%s29344_s3 + $0x9e4] ss:$16 sps:$4 sm:$0xff]  }
 0x57f   :  { %5103 = vmatprep.subr.bf16.mxu0 %v20724_v43  ;;  %6206 = vmatprep.subr.bf16.mxu1 %v20805_v16  ;;  %v20832_v43 = vld [vmem:[%s29344_s3 + $0x9ec] ss:$16 sps:$4 sm:$0xff]  }
 0x582   :  { %5104 = vmatpush1.bf16.msra.mxu0 %v20722_v34  ;;  %6207 = vmatpush1.bf16.msra.mxu1 %v20803_v56  ;;  %v20827_v34 = vld [vmem:[%s29344_s3 + $0x9e0] ss:$16 sps:$4 sm:$0xff]  }
 0x583   :  { %5105 = vmatprep.subr.bf16.mxu0 %v20727_v48  ;;  %6208 = vmatprep.subr.bf16.mxu1 %v20811_v58  ;;  %v20830_v48 = vld [vmem:[%s29344_s3 + $0x9e8] ss:$16 sps:$4 sm:$0xff]  }
 0x586   :  { %5106 = vmatpush1.bf16.msra.mxu0 %v20725_v37  ;;  %6209 = vmatpush1.bf16.msra.mxu1 %v20809_v26  ;;  %v20835_v37 = vld [vmem:[%s29344_s3 + $0xa04] ss:$16 sps:$4 sm:$0xff]  }
 0x587   :  { %5107 = vmatprep.subr.bf16.mxu0 %v20730_v38  ;;  %6210 = vmatprep.subr.bf16.mxu1 %v20817_v25  ;;  %v20838_v38 = vld [vmem:[%s29344_s3 + $0xa0c] ss:$16 sps:$4 sm:$0xff]  }
 0x58a   :  { %5108 = vmatpush1.bf16.msra.mxu0 %v20728_v40  ;;  %6211 = vmatpush1.bf16.msra.mxu1 %v20815_v28  ;;  %v17006_v40 = vld [vmem:[%s29348_s7 + $0x2] sm:$0x3] }
 0x58b   :  { %5109 = vmatprep.subr.bf16.mxu0 %v20733_v41  ;;  %6212 = vmatprep.subr.bf16.mxu1 %v20823_v0  ;;  %v17007_v41 = vld [vmem:[%s29349_s8 + $0x2] sm:$0x3] }
 0x58e   :  { %5110 = vmatpush1.bf16.msra.mxu0 %v20731_v42  ;;  %6213 = vmatpush1.bf16.msra.mxu1 %v20821_v57  ;;  %v5172_v42 = vrot.slane %v17006_v40, %v23184_v10 }
 0x58f   :  { %5111 = vmatprep.subr.bf16.mxu0 %v20736_v44  ;;  %6214 = vmatprep.subr.bf16.mxu1 %v20829_v33  ;;  %v5193_v44 = vrot.slane %v17007_v41, %v23184_v10 }
 0x592   :  { %5112 = vmatpush1.bf16.msra.mxu0 %v20734_v23  ;;  %6215 = vmatpush1.bf16.msra.mxu1 %v20827_v34  ;;  %v5176_v23 = vrot.slane %v17006_v40, %v23187_v11 }
 0x593   :  { %6290 = vmatprep.subr.bf16.mxu0 %v20742_v29  ;;  %6237 = vmatprep.subr.bf16.mxu1 %v20835_v37  ;;  %v5197_v29 = vrot.slane %v17007_v41, %v23187_v11 }
 0x595   :  { %5114 = vmatmul.mubr.bf16.vlgmr.msra.gmra.mrb[40].mxu0 %v24673_v21  ;;  %v20760_v21 = vld [vmem:[%s29344_s3 + $0x86c] ss:$16 sps:$4 sm:$0xff]  }
 0x596   :  { %5123 = vmatprep.mubr.bf16.mxu0 %v24707_v39  ;;  %6291 = vmatpush1.bf16.msra.mxu0 %v20740_v46  ;;  %v20758_v39 = vld [vmem:[%s29344_s3 + $0x868] ss:$16 sps:$4 sm:$0xff]  }
 0x597   :  { %6292 = vmatprep.subr.bf16.mxu0 %v20748_v6 }
 0x59a   :  { %6293 = vmatpush1.bf16.msra.mxu0 %v20746_v47  ;;  %v5200_v47 = vmul.f32 %v5193_v44, %v24228_v45  ;;  %v5204_v45 = vmul.f32 %v5193_v44, %v24246_v9 }
 0x59b   :  { %6294 = vmatprep.subr.bf16.mxu0 %v20754_v49 }
 0x59d   :  { %5124 = vmatmul.mubr.bf16.gmra.mrb[44].mxu0 %v24705_v1  ;;  %v20772_v1 = vld [vmem:[%s29344_s3 + $0x8ac] ss:$16 sps:$4 sm:$0xff]  }
 0x59e   :  { %6295 = vmatpush1.bf16.msra.mxu0 %v20752_v61 }
 0x59f   :  { %6296 = vmatprep.subr.bf16.mxu0 %v20760_v21  ;;  %v5201_v21 = vmul.f32 %v5197_v29, %v24231_v12  ;;  %v5205_v12 = vmul.f32 %v5197_v29, %v24249_v50 }
 0x5a2   :  { %6297 = vmatpush1.bf16.msra.mxu0 %v20758_v39 }
 0x5a3   :  { %6298 = vmatprep.subr.bf16.mxu0 %v20766_v7  ;;  %v5224_v7 = vld [vmem:[#allocation2] sm:$0xe0] }
 0x5a6   :  { %6299 = vmatpush1.bf16.msra.mxu0 %v20764_v63 }
 0x5a7   :  { %6300 = vmatprep.subr.bf16.mxu0 %v20772_v1 }
 0x5aa   :  { %6301 = vmatpush1.bf16.msra.mxu0 %v20770_v24  ;;  %v5202_v24 = vmul.f32 %v5193_v44, %v24234_v13  ;;  %v22900_v13 = vld [vmem:[#allocation2 + $0x48] sm:$0xff] }
 0x5ab   :  { %6302 = vmatprep.subr.bf16.mxu0 %v20778_v14  ;;  %v5207_v51 = vmul.f32 %v22900_v13, %v5197_v29 }
 0x5ae   :  { %6303 = vmatpush1.bf16.msra.mxu0 %v20776_v52  ;;  %v5225_v52 = vld [vmem:[#allocation2 + $0x8] sm:$0xe0] }
 0x5af   :  { %6304 = vmatprep.subr.bf16.mxu0 %v20784_v53 }
 0x5b2   :  { %6305 = vmatpush1.bf16.msra.mxu0 %v20782_v2 }
 0x5b3   :  { %6306 = vmatprep.subr.bf16.mxu0 %v20790_v3  ;;  %v5203_v3 = vmul.f32 %v5197_v29, %v24236_v17 }
 0x5b6   :  { %6307 = vmatpush1.bf16.msra.mxu0 %v20788_v4 }
 0x5b7   :  { %6308 = vmatprep.subr.bf16.mxu0 %v20796_v36 }
 0x5ba   :  { %6309 = vmatpush1.bf16.msra.mxu0 %v20794_v18  ;;  %v5206_v18 = vmul.f32 %v22899_v22, %v5193_v44 }
 0x5bb   :  { %6310 = vmatprep.subr.bf16.mxu0 %v20802_v35 }
 0x5be   :  { %6311 = vmatpush1.bf16.msra.mxu0 %v20800_v54 }
 0x5bf   :  { %6312 = vmatprep.subr.bf16.mxu0 %v20808_v19 }
 0x5c2   :  { %6313 = vmatpush1.bf16.msra.mxu0 %v20806_v15 }
 0x5c3   :  { %6314 = vmatprep.subr.bf16.mxu0 %v20814_v20 }
 0x5c6   :  { %6315 = vmatpush1.bf16.msra.mxu0 %v20812_v32 }
 0x5c7   :  { %6316 = vmatprep.subr.bf16.mxu0 %v20820_v27 }
 0x5ca   :  { %6317 = vmatpush1.bf16.msra.mxu0 %v20818_v60 }
 0x5cb   :  { %6318 = vmatprep.subr.bf16.mxu0 %v20826_v30 }
 0x5ce   :  { %6319 = vmatpush1.bf16.msra.mxu0 %v20824_v31 }
 0x5cf   :  { %6320 = vmatprep.subr.bf16.mxu0 %v20832_v43 }
 0x5d2   :  { %6321 = vmatpush1.bf16.msra.mxu0 %v20830_v48 }
 0x5d3   :  { %6343 = vmatprep.subr.bf16.mxu0 %v20838_v38 }
 0x668   :  { %v5115_v46 = vpop.f32.mrb[40].mxu0 }
 0x669   :  { %v5179_v6 = vadd.f32 %v5172_v42, %v5115_v46  ;;  %v5117_v49 = vpop.f32.mrb[41].mxu0 }
 0x66a   :  { %v5180_v61 = vadd.f32 %v5176_v23, %v5117_v49  ;;  %v5119_v39 = vpop.f32.mrb[42].mxu0 }
 0x66b   :  { %v25193_v63 = vadd.f32 %v5200_v47, %v5179_v6  ;;  %v5181_v1 = vadd.f32 %v5172_v42, %v5119_v39  ;;  %v5121_v14 = vpop.f32.mrb[43].mxu0 }
 0x66c   :  { %v25196_v53 = vadd.f32 %v5201_v21, %v5180_v61  ;;  %v5182_v2 = vadd.f32 %v5176_v23, %v5121_v14 }
 0x66d   :  { %v25199_v4 = vadd.f32 %v5202_v24, %v5181_v1  ;;  %v5267_v5 = vpack.c.bf16 %v25193_v63, %v5224_v7  ;;  %v5243_v55 = vrot.slane %v25193_v63, 3 }
 0x66e   :  { %v25204_v36 = vadd.f32 %v5203_v3, %v5182_v2  ;;  %v5268_v35 = vpack.c.bf16 %v25196_v53, %v5225_v52  ;;  %v5244_v9 = vrot.slane %v25196_v53, 3 }
 0x66f   :  { %v5245_v17 = vrot.slane %v25199_v4, 3  ;;  %v5433_v54 = vshrl.u32 %v5267_v5, 16  ;;  %v5436_v16 = vshll.u32 %v5267_v5, 16 }
 0x670   :  { %v5247_v50 = vrot.slane %v25204_v36, 3  ;;  %v5125_v19 = vpop.f32.mrb[44].mxu0  ;;  %v5450_v56 = vshrl.u32 %v5268_v35, 16  ;;  %v5453_v15 = vshll.u32 %v5268_v35, 16 }
 0x671   :  { %v5246_v58 = vsel %vm2959_vm4, %v5243_v55, %v5245_v17  ;;  %v5183_v20 = vadd.f32 %v5172_v42, %v5125_v19  ;;  %v5127_v26 = vpop.f32.mrb[45].mxu0  ;;  %v5435_v32 = vrot.slane %v5433_v54, 2  ;;  %v5438_v25 = vrot.slane %v5436_v16, 3 }
 0x672   :  { %v5269_v27 = vpack.c.bf16 %v5246_v58, %v5243_v55  ;;  %v5248_v28 = vsel %vm2959_vm4, %v5244_v9, %v5247_v50  ;;  %v5184_v60 = vadd.f32 %v5176_v23, %v5127_v26  ;;  %v5129_v0 = vpop.f32.mrb[46].mxu0  ;;  %v5452_v30 = vrot.slane %v5450_v56, 2  ;;  %v20836_v56 = vld [vmem:[%s29344_s3 + $0xa08] ss:$16 sps:$4 sm:$0xff]   ;;  %v20841_v58 = vld [vmem:[%s29344_s3 + $0xa24] ss:$16 sps:$4 sm:$0xff]  }
 0x673   :  { %v25213_v57 = vadd.f32 %v5204_v45, %v5183_v20  ;;  %v5185_v31 = vadd.f32 %v5172_v42, %v5129_v0  ;;  %v5131_v33 = vpop.f32.mrb[47].mxu0  ;;  %v5455_v43 = vrot.slane %v5453_v15, 3  ;;  %v5439_v34 = vor.u32 %v5438_v25, %v5435_v32 }
 0x674   :  { %v25215_v48 = vadd.f32 %v5205_v12, %v5184_v60  ;;  %v5186_v37 = vadd.f32 %v5176_v23, %v5131_v33  ;;  %v5270_v38 = vpack.c.bf16 %v5248_v28, %v5244_v9  ;;  %v5467_v40 = vshrl.u32 %v5269_v27, 16 }
 0x675   :  { %v5249_v41 = vrot.slane %v25213_v57, 3  ;;  %v5214_v44 = vadd.f32 %v5206_v18, %v5185_v31  ;;  %v5456_v29 = vor.u32 %v5455_v43, %v5452_v30  ;;  %v5271_v46 = vpack.c.bf16 %v25213_v57, %v25199_v4  ;;  %v20844_v31 = vld [vmem:[%s29344_s3 + $0xa2c] ss:$16 sps:$4 sm:$0xff]  }
 0x676   :  { %v5251_v6 = vrot.slane %v25215_v48, 3  ;;  %v5215_v47 = vadd.f32 %v5207_v51, %v5186_v37  ;;  %v5272_v42 = vpack.c.bf16 %v25215_v48, %v25204_v36  ;;  %v5484_v49 = vshrl.u32 %v5270_v38, 16 }
 0x677   :  { %v5250_v61 = vsel %vm2959_vm4, %v5245_v17, %v5249_v41  ;;  %5222 = vst [vmem:[#allocation2 + $0x40] sm:$0xff] %v5214_v44  ;;  %v5253_v23 = vrot.slane %v5214_v44, 3  ;;  %v5441_v21 = vshrl.u32 %v5271_v46, 16  ;;  %v5444_v39 = vshll.u32 %v5271_v46, 16  ;;  %v20833_v17 = vld [vmem:[%s29344_s3 + $0xa00] ss:$16 sps:$4 sm:$0xff]  }
 0x678   :  { %v5252_v7 = vsel %vm2959_vm4, %v5247_v50, %v5251_v6  ;;  %5223 = vst [vmem:[#allocation2 + $0x48] sm:$0xff] %v5215_v47  ;;  %v5255_v1 = vrot.slane %v5215_v47, 3  ;;  %v5458_v24 = vshrl.u32 %v5272_v42, 16  ;;  %v5461_v14 = vshll.u32 %v5272_v42, 16 }
 0x679   :  { %v5254_v52 = vsel %vm2959_vm4, %v5249_v41, %v5253_v23  ;;  %v25226_v2 = vpack.c.bf16 %v5253_v23, %v5253_v23  ;;  %v5443_v3 = vrot.slane %v5441_v21, 2  ;;  %v5446_v45 = vrot.slane %v5444_v39, 3  ;;  %v20847_v23 = vld [vmem:[%s29344_s3 + $0xa44] ss:$16 sps:$4 sm:$0xff]  }
 0x67a   :  { %v5273_v12 = vpack.c.bf16 %v5254_v52, %v5250_v61  ;;  %v5256_v5 = vsel %vm2959_vm4, %v5251_v6, %v5255_v1  ;;  %v5278_v22 = vpack.c.bf16 %v5255_v1, %v5255_v1  ;;  %v5460_v18 = vrot.slane %v5458_v24, 2 }
 0x67b   :  { %v5463_v13 = vrot.slane %v5461_v14, 3  ;;  %v25229_v51 = vor.u32 %v5446_v45, %v5443_v3  ;;  %v5274_v35 = vpack.c.bf16 %v5256_v5, %v5252_v7  ;;  %v5486_v55 = vrot.slane %v5484_v49, 2  ;;  %v20850_v7 = vld [vmem:[%s29344_s3 + $0xa4c] ss:$16 sps:$4 sm:$0xff]  }
 0x67c   :  { %v5487_v54 = vshll.u32 %v5270_v38, 16  ;;  %v5469_v16 = vrot.slane %v5467_v40, 2  ;;  %v5470_v9 = vshll.u32 %v5269_v27, 16  ;;  %v5475_v50 = vshrl.u32 %v5273_v12, 16  ;;  %v20839_v38 = vld [vmem:[%s29344_s3 + $0xa20] ss:$16 sps:$4 sm:$0xff]  }
 0x67d   :  { %v25234_v19 = vor.u32 %v5463_v13, %v5460_v18  ;;  %v5448_v15 = vsel %vm5431_vm5, %v5439_v34, %v25229_v51  ;;  %v5492_v20 = vshrl.u32 %v5274_v35, 16  ;;  %v5495_v26 = vshll.u32 %v5274_v35, 16 }
 0x67e   :  { %v5232_v32 = vld [vmem:[#allocation2 + $0x40] sm:$0x1f]  ;;  %v5489_v25 = vrot.slane %v5487_v54, 3  ;;  %v5472_v28 = vrot.slane %v5470_v9, 3  ;;  %v5477_v27 = vrot.slane %v5475_v50, 2  ;;  %v5478_v60 = vshll.u32 %v5273_v12, 16 }
 0x67f   :  { %v5465_v0 = vsel %vm5431_vm5, %v5456_v29, %v25234_v19  ;;  %v5233_v30 = vld [vmem:[#allocation2 + $0x48] sm:$0x1f]  ;;  %v5275_v33 = vpack.c.bf16 %v5232_v32, %v5232_v32  ;;  %v5494_v43 = vrot.slane %v5492_v20, 2  ;;  %v5497_v34 = vrot.slane %v5495_v26, 3  ;;  %v20859_v32 = vld [vmem:[%s29344_s3 + $0xa84] ss:$16 sps:$4 sm:$0xff]  }
 0x680   :  { %6216 = vmatprep.mubr.bf16.mxu1 %v5465_v0  ;;  %6322 = vmatprep.mubr.bf16.mxu0 %v5465_v0  ;;  %v5276_v37 = vpack.c.bf16 %v5233_v30, %v5233_v30  ;;  %v5490_v40 = vor.u32 %v5489_v25, %v5486_v55  ;;  %v5473_v41 = vor.u32 %v5472_v28, %v5469_v16  ;;  %v5480_v44 = vrot.slane %v5478_v60, 3  ;;  %v20842_v29 = vld [vmem:[%s29344_s3 + $0xa28] ss:$16 sps:$4 sm:$0xff]   ;;  %v20862_v25 = vld [vmem:[%s29344_s3 + $0xa8c] ss:$16 sps:$4 sm:$0xff]  }
 0x681   :  { %6217 = vmatmul.mubr.bf16.vlgmr.msra.gmra.mrb[48].mxu1 %v5448_v15  ;;  %6323 = vmatmul.mubr.bf16.vlgmr.msra.gmra.mrb[48].mxu0 %v5448_v15  ;;  %v5501_v46 = vshrl.u32 %v5275_v33, 16  ;;  %v5504_v6 = vshll.u32 %v5275_v33, 16  ;;  %v5498_v47 = vor.u32 %v5497_v34, %v5494_v43  ;;  %v5528_v42 = vshrl.u32 %v5278_v22, 16  ;;  %v20848_v54 = vld [vmem:[%s29344_s3 + $0xa48] ss:$16 sps:$4 sm:$0xff]  }
 0x682   :  { %6238 = vmatpush1.bf16.msra.mxu1 %v20833_v17  ;;  %6344 = vmatpush1.bf16.msra.mxu0 %v20836_v56  ;;  %v5510_v49 = vshrl.u32 %v5276_v37, 16  ;;  %v5513_v61 = vshll.u32 %v5276_v37, 16  ;;  %v5481_v21 = vor.u32 %v5480_v44, %v5477_v27  ;;  %v5531_v39 = vshll.u32 %v5278_v22, 16  ;;  %v20845_v17 = vld [vmem:[%s29344_s3 + $0xa40] ss:$16 sps:$4 sm:$0xff]  }
 0x683   :  { %6239 = vmatprep.subr.bf16.mxu1 %v20841_v58  ;;  %6345 = vmatprep.subr.bf16.mxu0 %v20844_v31  ;;  %v5503_v1 = vrot.slane %v5501_v46, 2  ;;  %v5506_v24 = vrot.slane %v5504_v6, 3  ;;  %v5499_v14 = vsel %vm5431_vm5, %v5490_v40, %v5498_v47  ;;  %v5530_v52 = vrot.slane %v5528_v42, 2  ;;  %v20853_v15 = vld [vmem:[%s29344_s3 + $0xa64] ss:$16 sps:$4 sm:$0xff]  }
 0x684   :  { %v5512_v3 = vrot.slane %v5510_v49, 2  ;;  %v5515_v45 = vrot.slane %v5513_v61, 3  ;;  %v25263_v12 = vsel %vm5431_vm5, %v5473_v41, %v5481_v21  ;;  %v5533_v5 = vrot.slane %v5531_v39, 3  ;;  %v20856_v58 = vld [vmem:[%s29344_s3 + $0xa6c] ss:$16 sps:$4 sm:$0xff]  }
 0x685   :  { %v5507_v18 = vor.u32 %v5506_v24, %v5503_v1  ;;  %v5519_v22 = vshrl.u32 %v25226_v2, 16  ;;  %v5522_v13 = vshll.u32 %v25226_v2, 16  ;;  %v20857_v28 = vld [vmem:[%s29344_s3 + $0xa80] ss:$16 sps:$4 sm:$0xff]   ;;  %v20860_v27 = vld [vmem:[%s29344_s3 + $0xa88] ss:$16 sps:$4 sm:$0xff]  }
 0x686   :  { %v5516_v35 = vor.u32 %v5515_v45, %v5512_v3  ;;  %6240 = vmatpush1.bf16.msra.mxu1 %v20839_v38  ;;  %6346 = vmatpush1.bf16.msra.mxu0 %v20842_v29  ;;  %v5534_v55 = vor.u32 %v5533_v5, %v5530_v52  ;;  %v20865_v60 = vld [vmem:[%s29344_s3 + $0xaa4] ss:$16 sps:$4 sm:$0xff]   ;;  %v20868_v0 = vld [vmem:[%s29344_s3 + $0xaac] ss:$16 sps:$4 sm:$0xff]   ;;  %v20863_v30 = vld [vmem:[%s29344_s3 + $0xaa0] ss:$16 sps:$4 sm:$0xff]  }
 0x687   :  { %6241 = vmatprep.subr.bf16.mxu1 %v20847_v23  ;;  %6347 = vmatprep.subr.bf16.mxu0 %v20850_v7  ;;  %v5521_v16 = vrot.slane %v5519_v22, 2  ;;  %v5524_v9 = vrot.slane %v5522_v13, 3  ;;  %v5508_v56 = vsel %vm5431_vm5, %v25229_v51, %v5507_v18  ;;  %v20854_v51 = vld [vmem:[%s29344_s3 + $0xa68] ss:$16 sps:$4 sm:$0xff]   ;;  %v20871_v33 = vld [vmem:[%s29344_s3 + $0xac4] ss:$16 sps:$4 sm:$0xff]  }
 0x688   :  { %v5517_v50 = vsel %vm5431_vm5, %v25234_v19, %v5516_v35  ;;  %v25276_v2 = vsel %vm5431_vm5, %v5498_v47, %v5534_v55  ;;  %v20851_v19 = vld [vmem:[%s29344_s3 + $0xa60] ss:$16 sps:$4 sm:$0xff]   ;;  %v20866_v31 = vld [vmem:[%s29344_s3 + $0xaa8] ss:$16 sps:$4 sm:$0xff]   ;;  %v20874_v43 = vld [vmem:[%s29344_s3 + $0xacc] ss:$16 sps:$4 sm:$0xff]  }
 0x689   :  { %6226 = vmatprep.mubr.bf16.mxu1 %v5517_v50  ;;  %6332 = vmatprep.mubr.bf16.mxu0 %v5517_v50  ;;  %v5525_v20 = vor.u32 %v5524_v9, %v5521_v16  ;;  %v20869_v34 = vld [vmem:[%s29344_s3 + $0xac0] ss:$16 sps:$4 sm:$0xff]   ;;  %v20872_v37 = vld [vmem:[%s29344_s3 + $0xac8] ss:$16 sps:$4 sm:$0xff]   ;;  %v20877_v38 = vld [vmem:[%s29344_s3 + $0xae4] ss:$16 sps:$4 sm:$0xff]  }
 0x68a   :  { %6227 = vmatmul.mubr.bf16.gmra.mrb[52].mxu1 %v5508_v56  ;;  %6333 = vmatmul.mubr.bf16.gmra.mrb[52].mxu0 %v5508_v56  ;;  %v20880_v40 = vld [vmem:[%s29344_s3 + $0xaec] ss:$16 sps:$4 sm:$0xff]   ;;  %v20875_v41 = vld [vmem:[%s29344_s3 + $0xae0] ss:$16 sps:$4 sm:$0xff]   ;;  %v20878_v44 = vld [vmem:[%s29344_s3 + $0xae8] ss:$16 sps:$4 sm:$0xff]  }
 0x68b   :  { %6242 = vmatpush1.bf16.msra.mxu1 %v20845_v17  ;;  %6348 = vmatpush1.bf16.msra.mxu0 %v20848_v54  ;;  %v25293_v26 = vsel %vm5431_vm5, %v5481_v21, %v5525_v20  ;;  %v20883_v29 = vld [vmem:[%s29344_s3 + $0xb04] ss:$16 sps:$4 sm:$0xff]   ;;  %v20886_v46 = vld [vmem:[%s29344_s3 + $0xb0c] ss:$16 sps:$4 sm:$0xff]   ;;  %v20881_v6 = vld [vmem:[%s29344_s3 + $0xb00] ss:$16 sps:$4 sm:$0xff]  }
 0x68c   :  { %6269 = vmatprep.mubr.bf16.mxu1 %v5499_v14  ;;  %6375 = vmatprep.mubr.bf16.mxu0 %v5499_v14  ;;  %v20884_v47 = vld [vmem:[%s29344_s3 + $0xb08] ss:$16 sps:$4 sm:$0xff]   ;;  %v20889_v42 = vld [vmem:[%s29344_s3 + $0xb24] ss:$16 sps:$4 sm:$0xff]   ;;  %v20892_v49 = vld [vmem:[%s29344_s3 + $0xb2c] ss:$16 sps:$4 sm:$0xff]  }
 0x68d   :  { %6243 = vmatprep.subr.bf16.mxu1 %v20853_v15  ;;  %6349 = vmatprep.subr.bf16.mxu0 %v20856_v58  ;;  %v20887_v61 = vld [vmem:[%s29344_s3 + $0xb20] ss:$16 sps:$4 sm:$0xff]   ;;  %v20890_v23 = vld [vmem:[%s29344_s3 + $0xb28] ss:$16 sps:$4 sm:$0xff]   ;;  %v20895_v21 = vld [vmem:[%s29344_s3 + $0xb44] ss:$16 sps:$4 sm:$0xff]  }
 0x68e   :  { %v20898_v39 = vld [vmem:[%s29344_s3 + $0xb4c] ss:$16 sps:$4 sm:$0xff]   ;;  %v20893_v7 = vld [vmem:[%s29344_s3 + $0xb40] ss:$16 sps:$4 sm:$0xff]   ;;  %v20896_v1 = vld [vmem:[%s29344_s3 + $0xb48] ss:$16 sps:$4 sm:$0xff]  }
 0x68f   :  { %6244 = vmatpush1.bf16.msra.mxu1 %v20851_v19  ;;  %6350 = vmatpush1.bf16.msra.mxu0 %v20854_v51  ;;  %v20901_v24 = vld [vmem:[%s29344_s3 + $0xb64] ss:$16 sps:$4 sm:$0xff]   ;;  %v20904_v14 = vld [vmem:[%s29344_s3 + $0xb6c] ss:$16 sps:$4 sm:$0xff]   ;;  %v20899_v52 = vld [vmem:[%s29344_s3 + $0xb60] ss:$16 sps:$4 sm:$0xff]  }
 0x690   :  { %6245 = vmatprep.subr.bf16.mxu1 %v20859_v32  ;;  %6351 = vmatprep.subr.bf16.mxu0 %v20862_v25  ;;  %v20902_v3 = vld [vmem:[%s29344_s3 + $0xb68] ss:$16 sps:$4 sm:$0xff]   ;;  %v20907_v45 = vld [vmem:[%s29344_s3 + $0xb84] ss:$16 sps:$4 sm:$0xff]   ;;  %v20910_v5 = vld [vmem:[%s29344_s3 + $0xb8c] ss:$16 sps:$4 sm:$0xff]  }
 0x691   :  { %v20905_v18 = vld [vmem:[%s29344_s3 + $0xb80] ss:$16 sps:$4 sm:$0xff]   ;;  %v20908_v22 = vld [vmem:[%s29344_s3 + $0xb88] ss:$16 sps:$4 sm:$0xff]   ;;  %v20913_v13 = vld [vmem:[%s29344_s3 + $0xba4] ss:$16 sps:$4 sm:$0xff]  }
 0x692   :  { %v20916_v35 = vld [vmem:[%s29344_s3 + $0xbac] ss:$16 sps:$4 sm:$0xff]   ;;  %v20911_v55 = vld [vmem:[%s29344_s3 + $0xba0] ss:$16 sps:$4 sm:$0xff]   ;;  %v20914_v17 = vld [vmem:[%s29344_s3 + $0xba8] ss:$16 sps:$4 sm:$0xff]  }
 0x693   :  { %6246 = vmatpush1.bf16.msra.mxu1 %v20857_v28  ;;  %6352 = vmatpush1.bf16.msra.mxu0 %v20860_v27  ;;  %v20919_v54 = vld [vmem:[%s29344_s3 + $0xbc4] ss:$16 sps:$4 sm:$0xff]   ;;  %v20922_v16 = vld [vmem:[%s29344_s3 + $0xbcc] ss:$16 sps:$4 sm:$0xff]   ;;  %v20917_v9 = vld [vmem:[%s29344_s3 + $0xbc0] ss:$16 sps:$4 sm:$0xff]  }
 0x694   :  { %6247 = vmatprep.subr.bf16.mxu1 %v20865_v60  ;;  %6353 = vmatprep.subr.bf16.mxu0 %v20868_v0  ;;  %v20920_v50 = vld [vmem:[%s29344_s3 + $0xbc8] ss:$16 sps:$4 sm:$0xff]   ;;  %v20925_v56 = vld [vmem:[%s29344_s3 + $0xbe4] ss:$16 sps:$4 sm:$0xff]   ;;  %v20928_v15 = vld [vmem:[%s29344_s3 + $0xbec] ss:$16 sps:$4 sm:$0xff]  }
 0x695   :  { %v20923_v58 = vld [vmem:[%s29344_s3 + $0xbe0] ss:$16 sps:$4 sm:$0xff]   ;;  %v20926_v20 = vld [vmem:[%s29344_s3 + $0xbe8] ss:$16 sps:$4 sm:$0xff]   ;;  %v20931_v19 = vld [vmem:[%s29346_s5 + $0xa04] ss:$40 sps:$4 sm:$0xff]  }
 0x696   :  { %v20934_v51 = vld [vmem:[%s29346_s5 + $0xa0c] ss:$40 sps:$4 sm:$0xff]   ;;  %v20929_v32 = vld [vmem:[%s29346_s5 + $0xa00] ss:$40 sps:$4 sm:$0xff]   ;;  %v20940_v27 = vld [vmem:[%s29346_s5 + $0xa5c] ss:$40 sps:$4 sm:$0xff]  }
 0x697   :  { %6248 = vmatpush1.bf16.msra.mxu1 %v20863_v30  ;;  %6354 = vmatpush1.bf16.msra.mxu0 %v20866_v31  ;;  %v20932_v25 = vld [vmem:[%s29346_s5 + $0xa08] ss:$40 sps:$4 sm:$0xff]   ;;  %v20937_v28 = vld [vmem:[%s29346_s5 + $0xa54] ss:$40 sps:$4 sm:$0xff]   ;;  %v20938_v0 = vld [vmem:[%s29346_s5 + $0xa58] ss:$40 sps:$4 sm:$0xff]  }
 0x698   :  { %6249 = vmatprep.subr.bf16.mxu1 %v20871_v33  ;;  %6355 = vmatprep.subr.bf16.mxu0 %v20874_v43  ;;  %v20935_v60 = vld [vmem:[%s29346_s5 + $0xa50] ss:$40 sps:$4 sm:$0xff]   ;;  %v20941_v30 = vld [vmem:[%s29346_s5 + $0xaa0] ss:$40 sps:$4 sm:$0xff]   ;;  %v20949_v33 = vld [vmem:[%s29346_s5 + $0xaf4] ss:$40 sps:$4 sm:$0xff]  }
 0x699   :  { %v20944_v31 = vld [vmem:[%s29346_s5 + $0xaa8] ss:$40 sps:$4 sm:$0xff]   ;;  %v20952_v43 = vld [vmem:[%s29346_s5 + $0xafc] ss:$40 sps:$4 sm:$0xff]  }
 0x69b   :  { %6250 = vmatpush1.bf16.msra.mxu1 %v20869_v34  ;;  %6356 = vmatpush1.bf16.msra.mxu0 %v20872_v37  ;;  %v20947_v34 = vld [vmem:[%s29346_s5 + $0xaf0] ss:$40 sps:$4 sm:$0xff]  }
 0x69c   :  { %6251 = vmatprep.subr.bf16.mxu1 %v20877_v38  ;;  %6357 = vmatprep.subr.bf16.mxu0 %v20880_v40  ;;  %v20950_v37 = vld [vmem:[%s29346_s5 + $0xaf8] ss:$40 sps:$4 sm:$0xff]   ;;  %v20955_v38 = vld [vmem:[%s29346_s5 + $0xb44] ss:$40 sps:$4 sm:$0xff]  }
 0x69d   :  { %v20953_v40 = vld [vmem:[%s29346_s5 + $0xb40] ss:$40 sps:$4 sm:$0xff]  }
 0x69f   :  { %6252 = vmatpush1.bf16.msra.mxu1 %v20875_v41  ;;  %6358 = vmatpush1.bf16.msra.mxu0 %v20878_v44  ;;  %v20956_v41 = vld [vmem:[%s29346_s5 + $0xb48] ss:$40 sps:$4 sm:$0xff]   ;;  %v20961_v44 = vld [vmem:[%s29346_s5 + $0xb94] ss:$40 sps:$4 sm:$0xff]  }
 0x6a0   :  { %6253 = vmatprep.subr.bf16.mxu1 %v20883_v29  ;;  %6359 = vmatprep.subr.bf16.mxu0 %v20886_v46  ;;  %v20964_v29 = vld [vmem:[%s29346_s5 + $0xb9c] ss:$40 sps:$4 sm:$0xff]   ;;  %v20959_v46 = vld [vmem:[%s29346_s5 + $0xb90] ss:$40 sps:$4 sm:$0xff]  }
 0x6a3   :  { %6254 = vmatpush1.bf16.msra.mxu1 %v20881_v6  ;;  %6360 = vmatpush1.bf16.msra.mxu0 %v20884_v47  ;;  %v20962_v6 = vld [vmem:[%s29346_s5 + $0xb98] ss:$40 sps:$4 sm:$0xff]   ;;  %v20967_v47 = vld [vmem:[%s29346_s5 + $0xbe4] ss:$40 sps:$4 sm:$0xff]  }
 0x6a4   :  { %6255 = vmatprep.subr.bf16.mxu1 %v20889_v42  ;;  %6361 = vmatprep.subr.bf16.mxu0 %v20892_v49  ;;  %v20970_v42 = vld [vmem:[%s29346_s5 + $0xbec] ss:$40 sps:$4 sm:$0xff]   ;;  %v20965_v49 = vld [vmem:[%s29346_s5 + $0xbe0] ss:$40 sps:$4 sm:$0xff]  }
 0x6a7   :  { %6256 = vmatpush1.bf16.msra.mxu1 %v20887_v61  ;;  %6362 = vmatpush1.bf16.msra.mxu0 %v20890_v23  ;;  %v20968_v61 = vld [vmem:[%s29346_s5 + $0xbe8] ss:$40 sps:$4 sm:$0xff]   ;;  %v20973_v23 = vld [vmem:[%s29346_s5 + $0xc34] ss:$40 sps:$4 sm:$0xff]  }
 0x6a8   :  { %6257 = vmatprep.subr.bf16.mxu1 %v20895_v21  ;;  %6363 = vmatprep.subr.bf16.mxu0 %v20898_v39  ;;  %v20976_v21 = vld [vmem:[%s29346_s5 + $0xc3c] ss:$40 sps:$4 sm:$0xff]   ;;  %v20971_v39 = vld [vmem:[%s29346_s5 + $0xc30] ss:$40 sps:$4 sm:$0xff]  }
 0x6ab   :  { %6258 = vmatpush1.bf16.msra.mxu1 %v20893_v7  ;;  %6364 = vmatpush1.bf16.msra.mxu0 %v20896_v1  ;;  %v20974_v7 = vld [vmem:[%s29346_s5 + $0xc38] ss:$40 sps:$4 sm:$0xff]   ;;  %v20979_v1 = vld [vmem:[%s29346_s5 + $0xc84] ss:$40 sps:$4 sm:$0xff]  }
 0x6ac   :  { %6259 = vmatprep.subr.bf16.mxu1 %v20901_v24  ;;  %6365 = vmatprep.subr.bf16.mxu0 %v20904_v14  ;;  %v20982_v24 = vld [vmem:[%s29346_s5 + $0xc8c] ss:$40 sps:$4 sm:$0xff]   ;;  %v20977_v14 = vld [vmem:[%s29346_s5 + $0xc80] ss:$40 sps:$4 sm:$0xff]  }
 0x6af   :  { %6260 = vmatpush1.bf16.msra.mxu1 %v20899_v52  ;;  %6366 = vmatpush1.bf16.msra.mxu0 %v20902_v3  ;;  %v20980_v52 = vld [vmem:[%s29346_s5 + $0xc88] ss:$40 sps:$4 sm:$0xff]   ;;  %v20985_v3 = vld [vmem:[%s29346_s5 + $0xcd4] ss:$40 sps:$4 sm:$0xff]  }
 0x6b0   :  { %6261 = vmatprep.subr.bf16.mxu1 %v20907_v45  ;;  %6367 = vmatprep.subr.bf16.mxu0 %v20910_v5  ;;  %v20988_v45 = vld [vmem:[%s29346_s5 + $0xcdc] ss:$40 sps:$4 sm:$0xff]   ;;  %v20983_v5 = vld [vmem:[%s29346_s5 + $0xcd0] ss:$40 sps:$4 sm:$0xff]  }
 0x6b3   :  { %6262 = vmatpush1.bf16.msra.mxu1 %v20905_v18  ;;  %6368 = vmatpush1.bf16.msra.mxu0 %v20908_v22  ;;  %v20986_v18 = vld [vmem:[%s29346_s5 + $0xcd8] ss:$40 sps:$4 sm:$0xff]   ;;  %v20991_v22 = vld [vmem:[%s29346_s5 + $0xd24] ss:$40 sps:$4 sm:$0xff]  }
 0x6b4   :  { %6263 = vmatprep.subr.bf16.mxu1 %v20913_v13  ;;  %6369 = vmatprep.subr.bf16.mxu0 %v20916_v35  ;;  %v20994_v13 = vld [vmem:[%s29346_s5 + $0xd2c] ss:$40 sps:$4 sm:$0xff]   ;;  %v20989_v35 = vld [vmem:[%s29346_s5 + $0xd20] ss:$40 sps:$4 sm:$0xff]  }
 0x6b7   :  { %6264 = vmatpush1.bf16.msra.mxu1 %v20911_v55  ;;  %6370 = vmatpush1.bf16.msra.mxu0 %v20914_v17  ;;  %v20992_v55 = vld [vmem:[%s29346_s5 + $0xd28] ss:$40 sps:$4 sm:$0xff]   ;;  %v20997_v17 = vld [vmem:[%s29346_s5 + $0xd74] ss:$40 sps:$4 sm:$0xff]  }
 0x6b8   :  { %6265 = vmatprep.subr.bf16.mxu1 %v20919_v54  ;;  %6371 = vmatprep.subr.bf16.mxu0 %v20922_v16  ;;  %v21000_v54 = vld [vmem:[%s29346_s5 + $0xd7c] ss:$40 sps:$4 sm:$0xff]   ;;  %v20995_v16 = vld [vmem:[%s29346_s5 + $0xd70] ss:$40 sps:$4 sm:$0xff]  }
 0x6bb   :  { %6266 = vmatpush1.bf16.msra.mxu1 %v20917_v9  ;;  %6372 = vmatpush1.bf16.msra.mxu0 %v20920_v50  ;;  %v20998_v9 = vld [vmem:[%s29346_s5 + $0xd78] ss:$40 sps:$4 sm:$0xff]   ;;  %v21003_v50 = vld [vmem:[%s29346_s5 + $0xdc4] ss:$40 sps:$4 sm:$0xff]  }
 0x6bc   :  { %6267 = vmatprep.subr.bf16.mxu1 %v20925_v56  ;;  %6373 = vmatprep.subr.bf16.mxu0 %v20928_v15  ;;  %v21006_v56 = vld [vmem:[%s29346_s5 + $0xdcc] ss:$40 sps:$4 sm:$0xff]   ;;  %v21001_v15 = vld [vmem:[%s29346_s5 + $0xdc0] ss:$40 sps:$4 sm:$0xff]  }
 0x6bf   :  { %6268 = vmatpush1.bf16.msra.mxu1 %v20923_v58  ;;  %6374 = vmatpush1.bf16.msra.mxu0 %v20926_v20  ;;  %v21004_v58 = vld [vmem:[%s29346_s5 + $0xdc8] ss:$40 sps:$4 sm:$0xff]   ;;  %v21009_v20 = vld [vmem:[%s29346_s5 + $0xe14] ss:$40 sps:$4 sm:$0xff]  }
 0x6c0   :  { %7425 = vmatprep.subr.bf16.mxu1 %v20931_v19  ;;  %7478 = vmatprep.subr.bf16.mxu0 %v20934_v51  ;;  %v21012_v19 = vld [vmem:[%s29346_s5 + $0xe1c] ss:$40 sps:$4 sm:$0xff]   ;;  %v21007_v51 = vld [vmem:[%s29346_s5 + $0xe10] ss:$40 sps:$4 sm:$0xff]  }
 0x6c2   :  { %6270 = vmatmul.mubr.bf16.vlgmr.msra.gmra.mrb[48].mxu1 %v25263_v12  ;;  %6376 = vmatmul.mubr.bf16.vlgmr.msra.gmra.mrb[48].mxu0 %v25263_v12  ;;  %v20943_v12 = vld [vmem:[%s29346_s5 + $0xaa4] ss:$40 sps:$4 sm:$0xff]  }
 0x6c3   :  { %6279 = vmatprep.mubr.bf16.mxu1 %v25276_v2  ;;  %6385 = vmatprep.mubr.bf16.mxu0 %v25276_v2  ;;  %v20946_v2 = vld [vmem:[%s29346_s5 + $0xaac] ss:$40 sps:$4 sm:$0xff]  }
 0x6c4   :  { %7426 = vmatpush1.bf16.msra.mxu1 %v20929_v32  ;;  %7479 = vmatpush1.bf16.msra.mxu0 %v20932_v25  ;;  %v21010_v32 = vld [vmem:[%s29346_s5 + $0xe18] ss:$40 sps:$4 sm:$0xff]  }
 0x6c5   :  { %7427 = vmatprep.subr.bf16.mxu1 %v20937_v28  ;;  %7480 = vmatprep.subr.bf16.mxu0 %v20940_v27  ;;  %v21013_v25 = vld [vmem:[%s29346_s5 + $0xe60] ss:$40 sps:$4 sm:$0xff]   ;;  %v21015_v28 = vld [vmem:[%s29346_s5 + $0xe64] ss:$40 sps:$4 sm:$0xff]  }
 0x6c6   :  { %v21016_v27 = vld [vmem:[%s29346_s5 + $0xe68] ss:$40 sps:$4 sm:$0xff]  }
 0x6c8   :  { %7428 = vmatpush1.bf16.msra.mxu1 %v20935_v60  ;;  %7481 = vmatpush1.bf16.msra.mxu0 %v20938_v0  ;;  %v21018_v60 = vld [vmem:[%s29346_s5 + $0xe6c] ss:$40 sps:$4 sm:$0xff]  }
 0x6c9   :  { %7429 = vmatprep.subr.bf16.mxu1 %v20943_v12  ;;  %7482 = vmatprep.subr.bf16.mxu0 %v20946_v2  ;;  %v21021_v0 = vld [vmem:[%s29346_s5 + $0xeb4] ss:$40 sps:$4 sm:$0xff]   ;;  %v21019_v2 = vld [vmem:[%s29346_s5 + $0xeb0] ss:$40 sps:$4 sm:$0xff]  }
 0x6ca   :  { %6280 = vmatmul.mubr.bf16.gmra.mrb[52].mxu1 %v25293_v26  ;;  %6386 = vmatmul.mubr.bf16.gmra.mrb[52].mxu0 %v25293_v26  ;;  %v20958_v26 = vld [vmem:[%s29346_s5 + $0xb4c] ss:$40 sps:$4 sm:$0xff]   ;;  %v21024_v12 = vld [vmem:[%s29346_s5 + $0xebc] ss:$40 sps:$4 sm:$0xff]  }
 0x6cc   :  { %7430 = vmatpush1.bf16.msra.mxu1 %v20941_v30  ;;  %7483 = vmatpush1.bf16.msra.mxu0 %v20944_v31  ;;  %v21022_v30 = vld [vmem:[%s29346_s5 + $0xeb8] ss:$40 sps:$4 sm:$0xff]   ;;  %v21027_v31 = vld [vmem:[%s29346_s5 + $0xa14] ss:$40 sps:$4 sm:$0xff]  }
 0x6cd   :  { %7431 = vmatprep.subr.bf16.mxu1 %v20949_v33  ;;  %7484 = vmatprep.subr.bf16.mxu0 %v20952_v43  ;;  %v21030_v33 = vld [vmem:[%s29346_s5 + $0xa1c] ss:$40 sps:$4 sm:$0xff]   ;;  %v17136_v43 = vld [vmem:[%s29347_s4 + $0x8] sm:$0xf] }
 0x6d0   :  { %7432 = vmatpush1.bf16.msra.mxu1 %v20947_v34  ;;  %7485 = vmatpush1.bf16.msra.mxu0 %v20950_v37  ;;  %v5422_v34 = vrot.slane %v17136_v43, %v23684_v59  ;;  %v5426_v37 = vrot.slane %v17136_v43, %v23690_v62 }
 0x6d1   :  { %7433 = vmatprep.subr.bf16.mxu1 %v20955_v38  ;;  %7486 = vmatprep.subr.bf16.mxu0 %v20958_v26 }
 0x6d4   :  { %7434 = vmatpush1.bf16.msra.mxu1 %v20953_v40  ;;  %7487 = vmatpush1.bf16.msra.mxu0 %v20956_v41 }
 0x6d5   :  { %7435 = vmatprep.subr.bf16.mxu1 %v20961_v44  ;;  %7488 = vmatprep.subr.bf16.mxu0 %v20964_v29 }
 0x6d8   :  { %7436 = vmatpush1.bf16.msra.mxu1 %v20959_v46  ;;  %7489 = vmatpush1.bf16.msra.mxu0 %v20962_v6 }
 0x6d9   :  { %7437 = vmatprep.subr.bf16.mxu1 %v20967_v47  ;;  %7490 = vmatprep.subr.bf16.mxu0 %v20970_v42 }
 0x6dc   :  { %7438 = vmatpush1.bf16.msra.mxu1 %v20965_v49  ;;  %7491 = vmatpush1.bf16.msra.mxu0 %v20968_v61 }
 0x6dd   :  { %7439 = vmatprep.subr.bf16.mxu1 %v20973_v23  ;;  %7492 = vmatprep.subr.bf16.mxu0 %v20976_v21  ;;  %v5414_v23 = vrot.slane %v17136_v43, %v23184_v10 }
 0x6e0   :  { %7440 = vmatpush1.bf16.msra.mxu1 %v20971_v39  ;;  %7493 = vmatpush1.bf16.msra.mxu0 %v20974_v7 }
 0x6e1   :  { %7441 = vmatprep.subr.bf16.mxu1 %v20979_v1  ;;  %7494 = vmatprep.subr.bf16.mxu0 %v20982_v24  ;;  %v5418_v24 = vrot.slane %v17136_v43, %v23187_v11 }
 0x6e4   :  { %7442 = vmatpush1.bf16.msra.mxu1 %v20977_v14  ;;  %7495 = vmatpush1.bf16.msra.mxu0 %v20980_v52 }
 0x6e5   :  { %7443 = vmatprep.subr.bf16.mxu1 %v20985_v3  ;;  %7496 = vmatprep.subr.bf16.mxu0 %v20988_v45 }
 0x6e8   :  { %7444 = vmatpush1.bf16.msra.mxu1 %v20983_v5  ;;  %7497 = vmatpush1.bf16.msra.mxu0 %v20986_v18 }
 0x6e9   :  { %7445 = vmatprep.subr.bf16.mxu1 %v20991_v22  ;;  %7498 = vmatprep.subr.bf16.mxu0 %v20994_v13 }
 0x6ec   :  { %7446 = vmatpush1.bf16.msra.mxu1 %v20989_v35  ;;  %7499 = vmatpush1.bf16.msra.mxu0 %v20992_v55 }
 0x6ed   :  { %7447 = vmatprep.subr.bf16.mxu1 %v20997_v17  ;;  %7500 = vmatprep.subr.bf16.mxu0 %v21000_v54 }
 0x6f0   :  { %7448 = vmatpush1.bf16.msra.mxu1 %v20995_v16  ;;  %7501 = vmatpush1.bf16.msra.mxu0 %v20998_v9 }
 0x6f1   :  { %7449 = vmatprep.subr.bf16.mxu1 %v21003_v50  ;;  %7502 = vmatprep.subr.bf16.mxu0 %v21006_v56 }
 0x6f4   :  { %7450 = vmatpush1.bf16.msra.mxu1 %v21001_v15  ;;  %7503 = vmatpush1.bf16.msra.mxu0 %v21004_v58 }
 0x6f5   :  { %7451 = vmatprep.subr.bf16.mxu1 %v21009_v20  ;;  %7504 = vmatprep.subr.bf16.mxu0 %v21012_v19 }
 0x6f8   :  { %7452 = vmatpush1.bf16.msra.mxu1 %v21007_v51  ;;  %7505 = vmatpush1.bf16.msra.mxu0 %v21010_v32 }
 0x6f9   :  { %7453 = vmatprep.subr.bf16.mxu1 %v21015_v28  ;;  %7506 = vmatprep.subr.bf16.mxu0 %v21018_v60 }
 0x6fc   :  { %7454 = vmatpush1.bf16.msra.mxu1 %v21013_v25  ;;  %7507 = vmatpush1.bf16.msra.mxu0 %v21016_v27 }
 0x6fd   :  { %7455 = vmatprep.subr.bf16.mxu1 %v21021_v0  ;;  %7508 = vmatprep.subr.bf16.mxu0 %v21024_v12 }
 0x700   :  { %7456 = vmatpush1.bf16.msra.mxu1 %v21019_v2  ;;  %7509 = vmatpush1.bf16.msra.mxu0 %v21022_v30 }
 0x701   :  { %7531 = vmatprep.subr.bf16.mxu1 %v21027_v31  ;;  %7584 = vmatprep.subr.bf16.mxu0 %v21030_v33 }
 0x795   :  { %v6271_v38 = vpop.f32.mrb[48].mxu1  ;;  %v6377_v26 = vpop.f32.mrb[48].mxu0 }
 0x796   :  { %v19530_v40 = vadd.f32 %v6377_v26, %v5422_v34  ;;  %v6273_v41 = vpop.f32.mrb[49].mxu1  ;;  %v6379_v44 = vpop.f32.mrb[49].mxu0  ;;  %v19522_v14 = vadd.f32 %v6271_v38, %v5414_v23 }
 0x797   :  { %v19531_v29 = vadd.f32 %v6379_v44, %v5426_v37  ;;  %v6275_v46 = vpop.f32.mrb[50].mxu1  ;;  %v6381_v6 = vpop.f32.mrb[50].mxu0  ;;  %v19523_v55 = vadd.f32 %v6273_v41, %v5418_v24 }
 0x798   :  { %v17265_v47 = vmul.f32 -1.442695, %v19530_v40  ;;  %v19532_v42 = vadd.f32 %v6381_v6, %v5422_v34  ;;  %v6277_v49 = vpop.f32.mrb[51].mxu1  ;;  %v6383_v61 = vpop.f32.mrb[51].mxu0  ;;  %v19524_v15 = vadd.f32 %v6275_v46, %v5414_v23 }
 0x799   :  { %v17266_v21 = vmul.f32 -1.442695, %v19531_v29  ;;  %v19533_v39 = vadd.f32 %v6383_v61, %v5426_v37  ;;  %v19525_v27 = vadd.f32 %v6277_v49, %v5418_v24 }
 0x79a   :  { %22705 = vpow2.f32 %v17265_v47  ;;  %v17267_v7 = vmul.f32 -1.442695, %v19532_v42 }
 0x79b   :  { %22707 = vpow2.f32 %v17266_v21  ;;  %v17268_v1 = vmul.f32 -1.442695, %v19533_v39 }
 0x79c   :  { %22709 = vpow2.f32 %v17267_v7 }
 0x79d   :  { %v6281_v52 = vpop.f32.mrb[52].mxu1  ;;  %v6387_v3 = vpop.f32.mrb[52].mxu0  ;;  %22711 = vpow2.f32 %v17268_v1 }
 0x79e   :  { %v19534_v45 = vadd.f32 %v6387_v3, %v5422_v34  ;;  %v6283_v5 = vpop.f32.mrb[53].mxu1  ;;  %v6389_v18 = vpop.f32.mrb[53].mxu0  ;;  %22713 = vtanh.f32 %v19522_v14  ;;  %v19526_v12 = vadd.f32 %v6281_v52, %v5414_v23 }
 0x79f   :  { %v19535_v22 = vadd.f32 %v6389_v18, %v5426_v37  ;;  %v6285_v13 = vpop.f32.mrb[54].mxu1  ;;  %v6391_v35 = vpop.f32.mrb[54].mxu0  ;;  %v19527_v30 = vadd.f32 %v6283_v5, %v5418_v24  ;;  %v21028_v18 = vld [vmem:[%s29346_s5 + $0xa18] ss:$40 sps:$4 sm:$0xff]  }
 0x7a0   :  { %v17269_v17 = vmul.f32 -1.442695, %v19534_v45  ;;  %v19536_v54 = vadd.f32 %v6391_v35, %v5422_v34  ;;  %v6287_v16 = vpop.f32.mrb[55].mxu1  ;;  %v6393_v9 = vpop.f32.mrb[55].mxu0  ;;  %v21036_v35 = vld [vmem:[%s29346_s5 + $0xa6c] ss:$40 sps:$4 sm:$0xff]  }
 0x7a1   :  { %v17270_v50 = vmul.f32 -1.442695, %v19535_v22  ;;  %v19537_v56 = vadd.f32 %v6393_v9, %v5426_v37  ;;  %v19528_v37 = vadd.f32 %v6285_v13, %v5414_v23  ;;  %v19529_v46 = vadd.f32 %v6287_v16, %v5418_v24  ;;  %v21025_v24 = vld [vmem:[%s29346_s5 + $0xa10] ss:$40 sps:$4 sm:$0xff]   ;;  %v21033_v13 = vld [vmem:[%s29346_s5 + $0xa64] ss:$40 sps:$4 sm:$0xff]  }
 0x7a2   :  { %22715 = vpow2.f32 %v17269_v17  ;;  %v17271_v58 = vmul.f32 -1.442695, %v19536_v54  ;;  %v21031_v9 = vld [vmem:[%s29346_s5 + $0xa60] ss:$40 sps:$4 sm:$0xff]  }
 0x7a3   :  { %22717 = vpow2.f32 %v17270_v50  ;;  %v17272_v32 = vmul.f32 -1.442695, %v19537_v56  ;;  %v21034_v50 = vld [vmem:[%s29346_s5 + $0xa68] ss:$40 sps:$4 sm:$0xff]  }
 0x7a4   :  { %v22706_v20 = vpop.eup %22705  ;;  %22719 = vtanh.f32 %v19523_v55 }
 0x7a5   :  { %v22708_v19 = vpop.eup %22707  ;;  %v6428_v51 = vadd.f32 1.0, %v22706_v20  ;;  %22721 = vpow2.f32 %v17271_v58  ;;  %v21042_v58 = vld [vmem:[%s29346_s5 + $0xabc] ss:$40 sps:$4 sm:$0xff]  }
 0x7a6   :  { %v6429_v25 = vadd.f32 1.0, %v22708_v19  ;;  %22723 = vtanh.f32 %v19524_v15  ;;  %v22710_v28 = vpop.eup %22709  ;;  %v21039_v15 = vld [vmem:[%s29346_s5 + $0xab4] ss:$40 sps:$4 sm:$0xff]  }
 0x7a7   :  { %22725 = vrcp.f32 %v6428_v51  ;;  %v6430_v60 = vadd.f32 1.0, %v22710_v28  ;;  %v22712_v0 = vpop.eup %22711  ;;  %v21037_v28 = vld [vmem:[%s29346_s5 + $0xab0] ss:$40 sps:$4 sm:$0xff]  }
 0x7a8   :  { %22727 = vrcp.f32 %v6429_v25  ;;  %v6431_v2 = vadd.f32 1.0, %v22712_v0  ;;  %v22714_v31 = vpop.eup %22713  ;;  %v21048_v0 = vld [vmem:[%s29346_s5 + $0xb0c] ss:$40 sps:$4 sm:$0xff]  }
 0x7a9   :  { %22729 = vpow2.f32 %v17272_v32 }
 0x7aa   :  { %22731 = vrcp.f32 %v6430_v60  ;;  %v21045_v60 = vld [vmem:[%s29346_s5 + $0xb04] ss:$40 sps:$4 sm:$0xff]  }
 0x7ab   :  { %22733 = vtanh.f32 %v19525_v27  ;;  %v21040_v27 = vld [vmem:[%s29346_s5 + $0xab8] ss:$40 sps:$4 sm:$0xff]  }
 0x7ac   :  { %v22716_v33 = vpop.eup %22715  ;;  %22735 = vrcp.f32 %v6431_v2  ;;  %v21046_v2 = vld [vmem:[%s29346_s5 + $0xb08] ss:$40 sps:$4 sm:$0xff]  }
 0x7ad   :  { %v22718_v43 = vpop.eup %22717  ;;  %22737 = vtanh.f32 %v19526_v12  ;;  %v6432_v34 = vadd.f32 1.0, %v22716_v33  ;;  %v21043_v12 = vld [vmem:[%s29346_s5 + $0xb00] ss:$40 sps:$4 sm:$0xff]   ;;  %v21049_v33 = vld [vmem:[%s29346_s5 + $0xb50] ss:$40 sps:$4 sm:$0xff]  }
 0x7ae   :  { %v22720_v38 = vpop.eup %22719  ;;  %22739 = vtanh.f32 %v19527_v30  ;;  %v6433_v26 = vadd.f32 1.0, %v22718_v43  ;;  %v21051_v30 = vld [vmem:[%s29346_s5 + $0xb54] ss:$40 sps:$4 sm:$0xff]   ;;  %v21052_v43 = vld [vmem:[%s29346_s5 + $0xb58] ss:$40 sps:$4 sm:$0xff]  }
 0x7af   :  { %v22722_v40 = vpop.eup %22721  ;;  %22741 = vrcp.f32 %v6432_v34  ;;  %v21057_v34 = vld [vmem:[%s29346_s5 + $0xba4] ss:$40 sps:$4 sm:$0xff]  }
 0x7b0   :  { %v22724_v41 = vpop.eup %22723  ;;  %22743 = vrcp.f32 %v6433_v26  ;;  %v6434_v44 = vadd.f32 1.0, %v22722_v40  ;;  %v21058_v26 = vld [vmem:[%s29346_s5 + $0xba8] ss:$40 sps:$4 sm:$0xff]   ;;  %v21063_v40 = vld [vmem:[%s29346_s5 + $0xbf4] ss:$40 sps:$4 sm:$0xff]  }
 0x7b1   :  { %v22726_v29 = vpop.eup %22725  ;;  %22745 = vtanh.f32 %v19528_v37  ;;  %v21060_v37 = vld [vmem:[%s29346_s5 + $0xbac] ss:$40 sps:$4 sm:$0xff]  }
 0x7b2   :  { %v22728_v6 = vpop.eup %22727  ;;  %22747 = vrcp.f32 %v6434_v44  ;;  %v6452_v47 = vmul.f32 %v22726_v29, %v22714_v31  ;;  %v21054_v31 = vld [vmem:[%s29346_s5 + $0xb5c] ss:$40 sps:$4 sm:$0xff]   ;;  %v21061_v44 = vld [vmem:[%s29346_s5 + $0xbf0] ss:$40 sps:$4 sm:$0xff]  }
 0x7b3   :  { %v22730_v42 = vpop.eup %22729  ;;  %v6453_v49 = vmul.f32 %v22728_v6, %v22720_v38  ;;  %22749 = vtanh.f32 %v19529_v46  ;;  %v21055_v38 = vld [vmem:[%s29346_s5 + $0xba0] ss:$40 sps:$4 sm:$0xff]   ;;  %v21069_v46 = vld [vmem:[%s29346_s5 + $0xc44] ss:$40 sps:$4 sm:$0xff]  }
 0x7b4   :  { %v22732_v61 = vpop.eup %22731  ;;  %v6435_v21 = vadd.f32 1.0, %v22730_v42  ;;  %v21064_v29 = vld [vmem:[%s29346_s5 + $0xbf8] ss:$40 sps:$4 sm:$0xff]   ;;  %v21072_v6 = vld [vmem:[%s29346_s5 + $0xc4c] ss:$40 sps:$4 sm:$0xff]  }
 0x7b5   :  { %v22734_v39 = vpop.eup %22733  ;;  %v6454_v23 = vmul.f32 %v22732_v61, %v22724_v41  ;;  %v21066_v41 = vld [vmem:[%s29346_s5 + $0xbfc] ss:$40 sps:$4 sm:$0xff]   ;;  %v21070_v42 = vld [vmem:[%s29346_s5 + $0xc48] ss:$40 sps:$4 sm:$0xff]  }
 0x7b6   :  { %v22736_v7 = vpop.eup %22735  ;;  %22751 = vrcp.f32 %v6435_v21  ;;  %v21078_v61 = vld [vmem:[%s29346_s5 + $0xc9c] ss:$40 sps:$4 sm:$0xff]   ;;  %v21073_v21 = vld [vmem:[%s29346_s5 + $0xc90] ss:$40 sps:$4 sm:$0xff]  }
 0x7b7   :  { %v22738_v1 = vpop.eup %22737  ;;  %v6455_v14 = vmul.f32 %v22736_v7, %v22734_v39  ;;  %v25650_v52 = vpack.c.bf16 %v6454_v23, %v6452_v47  ;;  %v21067_v47 = vld [vmem:[%s29346_s5 + $0xc40] ss:$40 sps:$4 sm:$0xff]   ;;  %v21081_v23 = vld [vmem:[%s29346_s5 + $0xce4] ss:$40 sps:$4 sm:$0xff]  }
 0x7b8   :  { %v22740_v3 = vpop.eup %22739  ;;  %v21076_v39 = vld [vmem:[%s29346_s5 + $0xc98] ss:$40 sps:$4 sm:$0xff]   ;;  %v21084_v7 = vld [vmem:[%s29346_s5 + $0xcec] ss:$40 sps:$4 sm:$0xff]  }
 0x7b9   :  { %v22742_v45 = vpop.eup %22741  ;;  %v25652_v5 = vpack.c.bf16 %v6455_v14, %v6453_v49  ;;  %v21075_v49 = vld [vmem:[%s29346_s5 + $0xc94] ss:$40 sps:$4 sm:$0xff]   ;;  %v21082_v14 = vld [vmem:[%s29346_s5 + $0xce8] ss:$40 sps:$4 sm:$0xff]  }
 0x7ba   :  { %v22744_v22 = vpop.eup %22743  ;;  %v6456_v55 = vmul.f32 %v22742_v45, %v22738_v1  ;;  %v21079_v1 = vld [vmem:[%s29346_s5 + $0xce0] ss:$40 sps:$4 sm:$0xff]   ;;  %v21090_v45 = vld [vmem:[%s29346_s5 + $0xd3c] ss:$40 sps:$4 sm:$0xff]  }
 0x7bb   :  { %v22746_v17 = vpop.eup %22745  ;;  %7457 = vmatprep.mubr.bf16.mxu1 %v25652_v5  ;;  %7510 = vmatprep.mubr.bf16.mxu0 %v25652_v5  ;;  %v6457_v54 = vmul.f32 %v22744_v22, %v22740_v3  ;;  %v21087_v3 = vld [vmem:[%s29346_s5 + $0xd34] ss:$40 sps:$4 sm:$0xff]   ;;  %v21093_v22 = vld [vmem:[%s29346_s5 + $0xd84] ss:$40 sps:$4 sm:$0xff]  }
 0x7bc   :  { %v22748_v16 = vpop.eup %22747  ;;  %7458 = vmatmul.mubr.bf16.vlgmr.msra.gmra.mrb[16].mxu1 %v25650_v52  ;;  %7511 = vmatmul.mubr.bf16.vlgmr.msra.gmra.mrb[16].mxu0 %v25650_v52 }
 0x7bd   :  { %7532 = vmatpush1.bf16.msra.mxu1 %v21025_v24  ;;  %7585 = vmatpush1.bf16.msra.mxu0 %v21028_v18  ;;  %v6458_v56 = vmul.f32 %v22748_v16, %v22746_v17  ;;  %v22750_v20 = vpop.eup %22749  ;;  %v21085_v24 = vld [vmem:[%s29346_s5 + $0xd30] ss:$40 sps:$4 sm:$0xff]   ;;  %v21099_v17 = vld [vmem:[%s29346_s5 + $0xdd4] ss:$40 sps:$4 sm:$0xff]  }
 0x7be   :  { %7533 = vmatprep.subr.bf16.mxu1 %v21033_v13  ;;  %7586 = vmatprep.subr.bf16.mxu0 %v21036_v35  ;;  %v21088_v18 = vld [vmem:[%s29346_s5 + $0xd38] ss:$40 sps:$4 sm:$0xff]   ;;  %v21096_v13 = vld [vmem:[%s29346_s5 + $0xd8c] ss:$40 sps:$4 sm:$0xff]  }
 0x7bf   :  { %v25682_v19 = vpack.c.bf16 %v6458_v56, %v6456_v55  ;;  %v21091_v35 = vld [vmem:[%s29346_s5 + $0xd80] ss:$40 sps:$4 sm:$0xff]   ;;  %v21097_v16 = vld [vmem:[%s29346_s5 + $0xdd0] ss:$40 sps:$4 sm:$0xff]   ;;  %v21108_v56 = vld [vmem:[%s29346_s5 + $0xe2c] ss:$40 sps:$4 sm:$0xff]  }
 0x7c0   :  { %v22752_v51 = vpop.eup %22751  ;;  %v21094_v55 = vld [vmem:[%s29346_s5 + $0xd88] ss:$40 sps:$4 sm:$0xff]  }
 0x7c1   :  { %7534 = vmatpush1.bf16.msra.mxu1 %v21031_v9  ;;  %7587 = vmatpush1.bf16.msra.mxu0 %v21034_v50  ;;  %v6459_v32 = vmul.f32 %v22752_v51, %v22750_v20  ;;  %v21100_v9 = vld [vmem:[%s29346_s5 + $0xdd8] ss:$40 sps:$4 sm:$0xff]   ;;  %v21105_v50 = vld [vmem:[%s29346_s5 + $0xe24] ss:$40 sps:$4 sm:$0xff]   ;;  %v21111_v20 = vld [vmem:[%s29346_s5 + $0xe74] ss:$40 sps:$4 sm:$0xff]  }
 0x7c2   :  { %7535 = vmatprep.subr.bf16.mxu1 %v21039_v15  ;;  %7588 = vmatprep.subr.bf16.mxu0 %v21042_v58  ;;  %v21103_v15 = vld [vmem:[%s29346_s5 + $0xe20] ss:$40 sps:$4 sm:$0xff]   ;;  %v21114_v51 = vld [vmem:[%s29346_s5 + $0xe7c] ss:$40 sps:$4 sm:$0xff]  }
 0x7c3   :  { %v25684_v25 = vpack.c.bf16 %v6459_v32, %v6457_v54  ;;  %v21102_v54 = vld [vmem:[%s29346_s5 + $0xddc] ss:$40 sps:$4 sm:$0xff]   ;;  %v21106_v58 = vld [vmem:[%s29346_s5 + $0xe28] ss:$40 sps:$4 sm:$0xff]  }
 0x7c4   :  { %v21109_v32 = vld [vmem:[%s29346_s5 + $0xe70] ss:$40 sps:$4 sm:$0xff]  }
 0x7c5   :  { %7467 = vmatprep.mubr.bf16.mxu1 %v25684_v25  ;;  %7520 = vmatprep.mubr.bf16.mxu0 %v25684_v25 }
 0x7c6   :  { %7468 = vmatmul.mubr.bf16.gmra.mrb[20].mxu1 %v25682_v19  ;;  %7521 = vmatmul.mubr.bf16.gmra.mrb[20].mxu0 %v25682_v19 }
 0x7c7   :  { %7536 = vmatpush1.bf16.msra.mxu1 %v21037_v28  ;;  %7589 = vmatpush1.bf16.msra.mxu0 %v21040_v27  ;;  %v21112_v28 = vld [vmem:[%s29346_s5 + $0xe78] ss:$40 sps:$4 sm:$0xff]   ;;  %v21117_v27 = vld [vmem:[%s29346_s5 + $0xec4] ss:$40 sps:$4 sm:$0xff]  }
 0x7c8   :  { %7563 = vmatprep.mubr.bf16.mxu1 %v25652_v5  ;;  %7616 = vmatprep.mubr.bf16.mxu0 %v25652_v5 }
 0x7c9   :  { %7537 = vmatprep.subr.bf16.mxu1 %v21045_v60  ;;  %7590 = vmatprep.subr.bf16.mxu0 %v21048_v0  ;;  %v21120_v60 = vld [vmem:[%s29346_s5 + $0xecc] ss:$40 sps:$4 sm:$0xff]   ;;  %v21115_v0 = vld [vmem:[%s29346_s5 + $0xec0] ss:$40 sps:$4 sm:$0xff]  }
 0x7cb   :  { %7538 = vmatpush1.bf16.msra.mxu1 %v21043_v12  ;;  %7591 = vmatpush1.bf16.msra.mxu0 %v21046_v2  ;;  %v21118_v12 = vld [vmem:[%s29346_s5 + $0xec8] ss:$40 sps:$4 sm:$0xff]   ;;  %v21123_v2 = vld [vmem:[%s29346_s5 + $0xa24] ss:$40 sps:$4 sm:$0xff]  }
 0x7cc   :  { %7539 = vmatprep.subr.bf16.mxu1 %v21051_v30  ;;  %7592 = vmatprep.subr.bf16.mxu0 %v21054_v31  ;;  %v21171_v30 = vld [vmem:[%s29344_s3 + $0xc04] ss:$16 sps:$4 sm:$0xff]   ;;  %v21121_v31 = vld [vmem:[%s29346_s5 + $0xa20] ss:$40 sps:$4 sm:$0xff]  }
 0x7cf   :  { %7540 = vmatpush1.bf16.msra.mxu1 %v21049_v33  ;;  %7593 = vmatpush1.bf16.msra.mxu0 %v21052_v43  ;;  %v21169_v33 = vld [vmem:[%s29344_s3 + $0xc00] ss:$16 sps:$4 sm:$0xff]   ;;  %v21126_v43 = vld [vmem:[%s29346_s5 + $0xa74] ss:$40 sps:$4 sm:$0xff]  }
 0x7d0   :  { %7541 = vmatprep.subr.bf16.mxu1 %v21057_v34  ;;  %7594 = vmatprep.subr.bf16.mxu0 %v21060_v37  ;;  %v21177_v34 = vld [vmem:[%s29344_s3 + $0xc24] ss:$16 sps:$4 sm:$0xff]   ;;  %v21124_v37 = vld [vmem:[%s29346_s5 + $0xa70] ss:$40 sps:$4 sm:$0xff]  }
 0x7d3   :  { %7542 = vmatpush1.bf16.msra.mxu1 %v21055_v38  ;;  %7595 = vmatpush1.bf16.msra.mxu0 %v21058_v26  ;;  %v21175_v38 = vld [vmem:[%s29344_s3 + $0xc20] ss:$16 sps:$4 sm:$0xff]   ;;  %v21129_v26 = vld [vmem:[%s29346_s5 + $0xac4] ss:$40 sps:$4 sm:$0xff]  }
 0x7d4   :  { %7543 = vmatprep.subr.bf16.mxu1 %v21063_v40  ;;  %7596 = vmatprep.subr.bf16.mxu0 %v21066_v41  ;;  %v21183_v40 = vld [vmem:[%s29344_s3 + $0xc44] ss:$16 sps:$4 sm:$0xff]   ;;  %v21127_v41 = vld [vmem:[%s29346_s5 + $0xac0] ss:$40 sps:$4 sm:$0xff]  }
 0x7d7   :  { %7544 = vmatpush1.bf16.msra.mxu1 %v21061_v44  ;;  %7597 = vmatpush1.bf16.msra.mxu0 %v21064_v29  ;;  %v21181_v44 = vld [vmem:[%s29344_s3 + $0xc40] ss:$16 sps:$4 sm:$0xff]   ;;  %v21132_v29 = vld [vmem:[%s29346_s5 + $0xb14] ss:$40 sps:$4 sm:$0xff]  }
 0x7d8   :  { %7545 = vmatprep.subr.bf16.mxu1 %v21069_v46  ;;  %7598 = vmatprep.subr.bf16.mxu0 %v21072_v6  ;;  %v21189_v46 = vld [vmem:[%s29344_s3 + $0xc64] ss:$16 sps:$4 sm:$0xff]   ;;  %v21130_v6 = vld [vmem:[%s29346_s5 + $0xb10] ss:$40 sps:$4 sm:$0xff]  }
 0x7db   :  { %7546 = vmatpush1.bf16.msra.mxu1 %v21067_v47  ;;  %7599 = vmatpush1.bf16.msra.mxu0 %v21070_v42  ;;  %v21187_v47 = vld [vmem:[%s29344_s3 + $0xc60] ss:$16 sps:$4 sm:$0xff]   ;;  %v21135_v42 = vld [vmem:[%s29346_s5 + $0xb64] ss:$40 sps:$4 sm:$0xff]  }
 0x7dc   :  { %7547 = vmatprep.subr.bf16.mxu1 %v21075_v49  ;;  %7600 = vmatprep.subr.bf16.mxu0 %v21078_v61  ;;  %v21133_v49 = vld [vmem:[%s29346_s5 + $0xb60] ss:$40 sps:$4 sm:$0xff]  }
 0x7dd   :  { %v21193_v61 = vld [vmem:[%s29344_s3 + $0xc80] ss:$16 sps:$4 sm:$0xff]  }
 0x7df   :  { %7548 = vmatpush1.bf16.msra.mxu1 %v21073_v21  ;;  %7601 = vmatpush1.bf16.msra.mxu0 %v21076_v39  ;;  %v21138_v21 = vld [vmem:[%s29346_s5 + $0xbb4] ss:$40 sps:$4 sm:$0xff]  }
 0x7e0   :  { %7549 = vmatprep.subr.bf16.mxu1 %v21081_v23  ;;  %7602 = vmatprep.subr.bf16.mxu0 %v21084_v7  ;;  %v21201_v39 = vld [vmem:[%s29344_s3 + $0xca4] ss:$16 sps:$4 sm:$0xff]   ;;  %v21136_v23 = vld [vmem:[%s29346_s5 + $0xbb0] ss:$40 sps:$4 sm:$0xff]  }
 0x7e1   :  { %v21199_v7 = vld [vmem:[%s29344_s3 + $0xca0] ss:$16 sps:$4 sm:$0xff]  }
 0x7e3   :  { %7550 = vmatpush1.bf16.msra.mxu1 %v21079_v1  ;;  %7603 = vmatpush1.bf16.msra.mxu0 %v21082_v14  ;;  %v21141_v1 = vld [vmem:[%s29346_s5 + $0xc04] ss:$40 sps:$4 sm:$0xff]  }
 0x7e4   :  { %7551 = vmatprep.subr.bf16.mxu1 %v21087_v3  ;;  %7604 = vmatprep.subr.bf16.mxu0 %v21090_v45  ;;  %v21207_v14 = vld [vmem:[%s29344_s3 + $0xcc4] ss:$16 sps:$4 sm:$0xff]   ;;  %v21139_v3 = vld [vmem:[%s29346_s5 + $0xc00] ss:$40 sps:$4 sm:$0xff]  }
 0x7e5   :  { %v21205_v45 = vld [vmem:[%s29344_s3 + $0xcc0] ss:$16 sps:$4 sm:$0xff]  }
 0x7e7   :  { %7552 = vmatpush1.bf16.msra.mxu1 %v21085_v24  ;;  %7605 = vmatpush1.bf16.msra.mxu0 %v21088_v18  ;;  %v21144_v24 = vld [vmem:[%s29346_s5 + $0xc54] ss:$40 sps:$4 sm:$0xff]  }
 0x7e8   :  { %7553 = vmatprep.subr.bf16.mxu1 %v21093_v22  ;;  %7606 = vmatprep.subr.bf16.mxu0 %v21096_v13  ;;  %v21213_v18 = vld [vmem:[%s29344_s3 + $0xce4] ss:$16 sps:$4 sm:$0xff]   ;;  %v21142_v22 = vld [vmem:[%s29346_s5 + $0xc50] ss:$40 sps:$4 sm:$0xff]  }
 0x7e9   :  { %v21211_v13 = vld [vmem:[%s29344_s3 + $0xce0] ss:$16 sps:$4 sm:$0xff]  }
 0x7eb   :  { %7554 = vmatpush1.bf16.msra.mxu1 %v21091_v35  ;;  %7607 = vmatpush1.bf16.msra.mxu0 %v21094_v55  ;;  %v21147_v35 = vld [vmem:[%s29346_s5 + $0xca4] ss:$40 sps:$4 sm:$0xff]  }
 0x7ec   :  { %7555 = vmatprep.subr.bf16.mxu1 %v21099_v17  ;;  %7608 = vmatprep.subr.bf16.mxu0 %v21102_v54  ;;  %v21219_v55 = vld [vmem:[%s29344_s3 + $0xd04] ss:$16 sps:$4 sm:$0xff]   ;;  %v21145_v17 = vld [vmem:[%s29346_s5 + $0xca0] ss:$40 sps:$4 sm:$0xff]  }
 0x7ed   :  { %v21217_v54 = vld [vmem:[%s29344_s3 + $0xd00] ss:$16 sps:$4 sm:$0xff]  }
 0x7ef   :  { %7556 = vmatpush1.bf16.msra.mxu1 %v21097_v16  ;;  %7609 = vmatpush1.bf16.msra.mxu0 %v21100_v9  ;;  %v21150_v16 = vld [vmem:[%s29346_s5 + $0xcf4] ss:$40 sps:$4 sm:$0xff]   ;;  %v21148_v9 = vld [vmem:[%s29346_s5 + $0xcf0] ss:$40 sps:$4 sm:$0xff]  }
 0x7f0   :  { %7557 = vmatprep.subr.bf16.mxu1 %v21105_v50  ;;  %7610 = vmatprep.subr.bf16.mxu0 %v21108_v56  ;;  %v21153_v50 = vld [vmem:[%s29346_s5 + $0xd44] ss:$40 sps:$4 sm:$0xff]   ;;  %v21151_v56 = vld [vmem:[%s29346_s5 + $0xd40] ss:$40 sps:$4 sm:$0xff]  }
 0x7f3   :  { %7558 = vmatpush1.bf16.msra.mxu1 %v21103_v15  ;;  %7611 = vmatpush1.bf16.msra.mxu0 %v21106_v58  ;;  %v21156_v15 = vld [vmem:[%s29346_s5 + $0xd94] ss:$40 sps:$4 sm:$0xff]   ;;  %v21154_v58 = vld [vmem:[%s29346_s5 + $0xd90] ss:$40 sps:$4 sm:$0xff]  }
 0x7f4   :  { %7559 = vmatprep.subr.bf16.mxu1 %v21111_v20  ;;  %7612 = vmatprep.subr.bf16.mxu0 %v21114_v51  ;;  %v21159_v20 = vld [vmem:[%s29346_s5 + $0xde4] ss:$40 sps:$4 sm:$0xff]   ;;  %v21157_v51 = vld [vmem:[%s29346_s5 + $0xde0] ss:$40 sps:$4 sm:$0xff]  }
 0x7f7   :  { %7560 = vmatpush1.bf16.msra.mxu1 %v21109_v32  ;;  %7613 = vmatpush1.bf16.msra.mxu0 %v21112_v28  ;;  %v21162_v32 = vld [vmem:[%s29346_s5 + $0xe34] ss:$40 sps:$4 sm:$0xff]   ;;  %v21160_v28 = vld [vmem:[%s29346_s5 + $0xe30] ss:$40 sps:$4 sm:$0xff]  }
 0x7f8   :  { %7561 = vmatprep.subr.bf16.mxu1 %v21117_v27  ;;  %7614 = vmatprep.subr.bf16.mxu0 %v21120_v60  ;;  %v21165_v27 = vld [vmem:[%s29346_s5 + $0xe84] ss:$40 sps:$4 sm:$0xff]   ;;  %v21163_v60 = vld [vmem:[%s29346_s5 + $0xe80] ss:$40 sps:$4 sm:$0xff]  }
 0x7fb   :  { %7562 = vmatpush1.bf16.msra.mxu1 %v21115_v0  ;;  %7615 = vmatpush1.bf16.msra.mxu0 %v21118_v12  ;;  %v21168_v0 = vld [vmem:[%s29346_s5 + $0xed4] ss:$40 sps:$4 sm:$0xff]   ;;  %v21166_v12 = vld [vmem:[%s29346_s5 + $0xed0] ss:$40 sps:$4 sm:$0xff]  }
 0x7fc   :  { %7637 = vmatprep.subr.bf16.mxu1 %v21123_v2  ;;  %8738 = vmatprep.subr.bf16.mxu0 %v21171_v30  ;;  %v21174_v2 = vld [vmem:[%s29344_s3 + $0xc0c] ss:$16 sps:$4 sm:$0xff]   ;;  %v21172_v30 = vld [vmem:[%s29344_s3 + $0xc08] ss:$16 sps:$4 sm:$0xff]  }
 0x7fe   :  { %7564 = vmatmul.mubr.bf16.vlgmr.msra.gmra.mrb[24].mxu1 %v25650_v52  ;;  %7617 = vmatmul.mubr.bf16.vlgmr.msra.gmra.mrb[24].mxu0 %v25650_v52 }
 0x7ff   :  { %7573 = vmatprep.mubr.bf16.mxu1 %v25684_v25  ;;  %7626 = vmatprep.mubr.bf16.mxu0 %v25684_v25 }
 0x800   :  { %7638 = vmatpush1.bf16.msra.mxu1 %v21121_v31  ;;  %8739 = vmatpush1.bf16.msra.mxu0 %v21169_v33  ;;  %v21180_v31 = vld [vmem:[%s29344_s3 + $0xc2c] ss:$16 sps:$4 sm:$0xff]   ;;  %v21178_v33 = vld [vmem:[%s29344_s3 + $0xc28] ss:$16 sps:$4 sm:$0xff]  }
 0x801   :  { %7639 = vmatprep.subr.bf16.mxu1 %v21126_v43  ;;  %8740 = vmatprep.subr.bf16.mxu0 %v21177_v34  ;;  %v21186_v43 = vld [vmem:[%s29344_s3 + $0xc4c] ss:$16 sps:$4 sm:$0xff]   ;;  %v21184_v34 = vld [vmem:[%s29344_s3 + $0xc48] ss:$16 sps:$4 sm:$0xff]  }
 0x804   :  { %7640 = vmatpush1.bf16.msra.mxu1 %v21124_v37  ;;  %8741 = vmatpush1.bf16.msra.mxu0 %v21175_v38  ;;  %v21198_v37 = vld [vmem:[%s29344_s3 + $0xc8c] ss:$16 sps:$4 sm:$0xff]   ;;  %v21196_v38 = vld [vmem:[%s29344_s3 + $0xc88] ss:$16 sps:$4 sm:$0xff]  }
 0x805   :  { %7641 = vmatprep.subr.bf16.mxu1 %v21129_v26  ;;  %8742 = vmatprep.subr.bf16.mxu0 %v21183_v40  ;;  %v21202_v26 = vld [vmem:[%s29344_s3 + $0xca8] ss:$16 sps:$4 sm:$0xff]   ;;  %v21210_v40 = vld [vmem:[%s29344_s3 + $0xccc] ss:$16 sps:$4 sm:$0xff]  }
 0x806   :  { %7574 = vmatmul.mubr.bf16.gmra.mrb[28].mxu1 %v25682_v19  ;;  %7627 = vmatmul.mubr.bf16.gmra.mrb[28].mxu0 %v25682_v19 }
 0x807   :  { %7669 = vmatprep.mubr.bf16.mxu1 %v25652_v5  ;;  %v21195_v5 = vld [vmem:[%s29344_s3 + $0xc84] ss:$16 sps:$4 sm:$0xff]  }
 0x808   :  { %7642 = vmatpush1.bf16.msra.mxu1 %v21127_v41  ;;  %8743 = vmatpush1.bf16.msra.mxu0 %v21181_v44  ;;  %v21208_v41 = vld [vmem:[%s29344_s3 + $0xcc8] ss:$16 sps:$4 sm:$0xff]   ;;  %v21216_v44 = vld [vmem:[%s29344_s3 + $0xcec] ss:$16 sps:$4 sm:$0xff]  }
 0x809   :  { %7643 = vmatprep.subr.bf16.mxu1 %v21132_v29  ;;  %8744 = vmatprep.subr.bf16.mxu0 %v21189_v46  ;;  %v21214_v29 = vld [vmem:[%s29344_s3 + $0xce8] ss:$16 sps:$4 sm:$0xff]   ;;  %v21222_v46 = vld [vmem:[%s29344_s3 + $0xd0c] ss:$16 sps:$4 sm:$0xff]  }
 0x80c   :  { %7644 = vmatpush1.bf16.msra.mxu1 %v21130_v6  ;;  %8745 = vmatpush1.bf16.msra.mxu0 %v21187_v47  ;;  %v21220_v6 = vld [vmem:[%s29344_s3 + $0xd08] ss:$16 sps:$4 sm:$0xff]   ;;  %v21225_v47 = vld [vmem:[%s29344_s3 + $0xd24] ss:$16 sps:$4 sm:$0xff]  }
 0x80d   :  { %7645 = vmatprep.subr.bf16.mxu1 %v21135_v42  ;;  %8746 = vmatprep.subr.bf16.mxu0 %v21195_v5  ;;  %v21228_v42 = vld [vmem:[%s29344_s3 + $0xd2c] ss:$16 sps:$4 sm:$0xff]   ;;  %v21223_v5 = vld [vmem:[%s29344_s3 + $0xd20] ss:$16 sps:$4 sm:$0xff]  }
 0x810   :  { %7646 = vmatpush1.bf16.msra.mxu1 %v21133_v49  ;;  %8747 = vmatpush1.bf16.msra.mxu0 %v21193_v61  ;;  %v21226_v49 = vld [vmem:[%s29344_s3 + $0xd28] ss:$16 sps:$4 sm:$0xff]   ;;  %v21231_v61 = vld [vmem:[%s29344_s3 + $0xd44] ss:$16 sps:$4 sm:$0xff]  }
 0x811   :  { %7647 = vmatprep.subr.bf16.mxu1 %v21138_v21  ;;  %8748 = vmatprep.subr.bf16.mxu0 %v21201_v39  ;;  %v21234_v21 = vld [vmem:[%s29344_s3 + $0xd4c] ss:$16 sps:$4 sm:$0xff]   ;;  %v21229_v39 = vld [vmem:[%s29344_s3 + $0xd40] ss:$16 sps:$4 sm:$0xff]  }
 0x814   :  { %7648 = vmatpush1.bf16.msra.mxu1 %v21136_v23  ;;  %8749 = vmatpush1.bf16.msra.mxu0 %v21199_v7  ;;  %v21232_v23 = vld [vmem:[%s29344_s3 + $0xd48] ss:$16 sps:$4 sm:$0xff]   ;;  %v21237_v7 = vld [vmem:[%s29344_s3 + $0xd64] ss:$16 sps:$4 sm:$0xff]  }
 0x815   :  { %7649 = vmatprep.subr.bf16.mxu1 %v21141_v1  ;;  %8750 = vmatprep.subr.bf16.mxu0 %v21207_v14  ;;  %v21240_v1 = vld [vmem:[%s29344_s3 + $0xd6c] ss:$16 sps:$4 sm:$0xff]   ;;  %v21235_v14 = vld [vmem:[%s29344_s3 + $0xd60] ss:$16 sps:$4 sm:$0xff]  }
 0x818   :  { %7650 = vmatpush1.bf16.msra.mxu1 %v21139_v3  ;;  %8751 = vmatpush1.bf16.msra.mxu0 %v21205_v45  ;;  %v21238_v3 = vld [vmem:[%s29344_s3 + $0xd68] ss:$16 sps:$4 sm:$0xff]   ;;  %v21243_v45 = vld [vmem:[%s29344_s3 + $0xd84] ss:$16 sps:$4 sm:$0xff]  }
 0x819   :  { %7651 = vmatprep.subr.bf16.mxu1 %v21144_v24  ;;  %8752 = vmatprep.subr.bf16.mxu0 %v21213_v18  ;;  %v21246_v24 = vld [vmem:[%s29344_s3 + $0xd8c] ss:$16 sps:$4 sm:$0xff]   ;;  %v21241_v18 = vld [vmem:[%s29344_s3 + $0xd80] ss:$16 sps:$4 sm:$0xff]  }
 0x81c   :  { %7652 = vmatpush1.bf16.msra.mxu1 %v21142_v22  ;;  %8753 = vmatpush1.bf16.msra.mxu0 %v21211_v13  ;;  %v21244_v22 = vld [vmem:[%s29344_s3 + $0xd88] ss:$16 sps:$4 sm:$0xff]   ;;  %v21249_v13 = vld [vmem:[%s29344_s3 + $0xda4] ss:$16 sps:$4 sm:$0xff]  }
 0x81d   :  { %7653 = vmatprep.subr.bf16.mxu1 %v21147_v35  ;;  %8754 = vmatprep.subr.bf16.mxu0 %v21219_v55  ;;  %v21252_v35 = vld [vmem:[%s29344_s3 + $0xdac] ss:$16 sps:$4 sm:$0xff]   ;;  %v21247_v55 = vld [vmem:[%s29344_s3 + $0xda0] ss:$16 sps:$4 sm:$0xff]  }
 0x820   :  { %7654 = vmatpush1.bf16.msra.mxu1 %v21145_v17  ;;  %8755 = vmatpush1.bf16.msra.mxu0 %v21217_v54  ;;  %v21250_v17 = vld [vmem:[%s29344_s3 + $0xda8] ss:$16 sps:$4 sm:$0xff]   ;;  %v21255_v54 = vld [vmem:[%s29344_s3 + $0xdc4] ss:$16 sps:$4 sm:$0xff]  }
 0x821   :  { %7655 = vmatprep.subr.bf16.mxu1 %v21150_v16  ;;  %8756 = vmatprep.subr.bf16.mxu0 %v21225_v47  ;;  %v21253_v16 = vld [vmem:[%s29344_s3 + $0xdc0] ss:$16 sps:$4 sm:$0xff]  }
 0x824   :  { %7656 = vmatpush1.bf16.msra.mxu1 %v21148_v9  ;;  %8757 = vmatpush1.bf16.msra.mxu0 %v21223_v5  ;;  %v21256_v9 = vld [vmem:[%s29344_s3 + $0xdc8] ss:$16 sps:$4 sm:$0xff]   ;;  %v22901_v5 = vld [vmem:[#allocation2 + $0x40] sm:$0xff] }
 0x825   :  { %7657 = vmatprep.subr.bf16.mxu1 %v21153_v50  ;;  %8758 = vmatprep.subr.bf16.mxu0 %v21231_v61  ;;  %v21258_v50 = vld [vmem:[%s29344_s3 + $0xdcc] ss:$16 sps:$4 sm:$0xff]  }
 0x828   :  { %7658 = vmatpush1.bf16.msra.mxu1 %v21151_v56  ;;  %8759 = vmatpush1.bf16.msra.mxu0 %v21229_v39  ;;  %v21261_v56 = vld [vmem:[%s29344_s3 + $0xde4] ss:$16 sps:$4 sm:$0xff]  }
 0x829   :  { %7659 = vmatprep.subr.bf16.mxu1 %v21156_v15  ;;  %8760 = vmatprep.subr.bf16.mxu0 %v21237_v7  ;;  %v21264_v15 = vld [vmem:[%s29344_s3 + $0xdec] ss:$16 sps:$4 sm:$0xff]  }
 0x82c   :  { %7660 = vmatpush1.bf16.msra.mxu1 %v21154_v58  ;;  %8761 = vmatpush1.bf16.msra.mxu0 %v21235_v14  ;;  %v21259_v58 = vld [vmem:[%s29344_s3 + $0xde0] ss:$16 sps:$4 sm:$0xff]  }
 0x82d   :  { %7661 = vmatprep.subr.bf16.mxu1 %v21159_v20  ;;  %8762 = vmatprep.subr.bf16.mxu0 %v21243_v45  ;;  %v21262_v20 = vld [vmem:[%s29344_s3 + $0xde8] ss:$16 sps:$4 sm:$0xff]  }
 0x830   :  { %7662 = vmatpush1.bf16.msra.mxu1 %v21157_v51  ;;  %8763 = vmatpush1.bf16.msra.mxu0 %v21241_v18  ;;  %v21267_v51 = vld [vmem:[%s29344_s3 + $0xe04] ss:$16 sps:$4 sm:$0xff]  }
 0x831   :  { %7663 = vmatprep.subr.bf16.mxu1 %v21162_v32  ;;  %8764 = vmatprep.subr.bf16.mxu0 %v21249_v13  ;;  %v21270_v32 = vld [vmem:[%s29344_s3 + $0xe0c] ss:$16 sps:$4 sm:$0xff]  }
 0x834   :  { %7664 = vmatpush1.bf16.msra.mxu1 %v21160_v28  ;;  %8765 = vmatpush1.bf16.msra.mxu0 %v21247_v55  ;;  %v17593_v28 = vld [vmem:[%s29348_s7 + $0x4] sm:$0x3] }
 0x835   :  { %7665 = vmatprep.subr.bf16.mxu1 %v21165_v27  ;;  %8766 = vmatprep.subr.bf16.mxu0 %v21255_v54  ;;  %v17594_v27 = vld [vmem:[%s29349_s8 + $0x4] sm:$0x3] }
 0x838   :  { %7666 = vmatpush1.bf16.msra.mxu1 %v21163_v60  ;;  %8767 = vmatpush1.bf16.msra.mxu0 %v21253_v16  ;;  %v7728_v60 = vrot.slane %v17593_v28, %v23184_v10 }
 0x839   :  { %7667 = vmatprep.subr.bf16.mxu1 %v21168_v0  ;;  %8768 = vmatprep.subr.bf16.mxu0 %v21261_v56  ;;  %v7749_v0 = vrot.slane %v17594_v27, %v23184_v10 }
 0x83c   :  { %7668 = vmatpush1.bf16.msra.mxu1 %v21166_v12  ;;  %8769 = vmatpush1.bf16.msra.mxu0 %v21259_v58  ;;  %v7732_v12 = vrot.slane %v17593_v28, %v23187_v11 }
 0x83d   :  { %8844 = vmatprep.subr.bf16.mxu1 %v21174_v2  ;;  %8791 = vmatprep.subr.bf16.mxu0 %v21267_v51  ;;  %v7753_v2 = vrot.slane %v17594_v27, %v23187_v11 }
 0x83f   :  { %7670 = vmatmul.mubr.bf16.vlgmr.msra.gmra.mrb[56].mxu1 %v25650_v52  ;;  %v21192_v52 = vld [vmem:[%s29344_s3 + $0xc6c] ss:$16 sps:$4 sm:$0xff]  }
 0x840   :  { %7679 = vmatprep.mubr.bf16.mxu1 %v25684_v25  ;;  %8845 = vmatpush1.bf16.msra.mxu1 %v21172_v30  ;;  %v21190_v25 = vld [vmem:[%s29344_s3 + $0xc68] ss:$16 sps:$4 sm:$0xff]  }
 0x841   :  { %8846 = vmatprep.subr.bf16.mxu1 %v21180_v31 }
 0x844   :  { %8847 = vmatpush1.bf16.msra.mxu1 %v21178_v33  ;;  %v7756_v33 = vmul.f32 %v7749_v0, %v25193_v63  ;;  %v7760_v63 = vmul.f32 %v7749_v0, %v25213_v57 }
 0x845   :  { %8848 = vmatprep.subr.bf16.mxu1 %v21186_v43 }
 0x847   :  { %7680 = vmatmul.mubr.bf16.gmra.mrb[60].mxu1 %v25682_v19  ;;  %v21204_v19 = vld [vmem:[%s29344_s3 + $0xcac] ss:$16 sps:$4 sm:$0xff]  }
 0x848   :  { %8849 = vmatpush1.bf16.msra.mxu1 %v21184_v34 }
 0x849   :  { %8850 = vmatprep.subr.bf16.mxu1 %v21192_v52  ;;  %v7757_v52 = vmul.f32 %v7753_v2, %v25196_v53  ;;  %v7761_v53 = vmul.f32 %v7753_v2, %v25215_v48 }
 0x84c   :  { %8851 = vmatpush1.bf16.msra.mxu1 %v21190_v25 }
 0x84d   :  { %8852 = vmatprep.subr.bf16.mxu1 %v21198_v37  ;;  %v7780_v37 = vld [vmem:[#allocation2] sm:$0x80] }
 0x850   :  { %8853 = vmatpush1.bf16.msra.mxu1 %v21196_v38 }
 0x851   :  { %8854 = vmatprep.subr.bf16.mxu1 %v21204_v19 }
 0x854   :  { %8855 = vmatpush1.bf16.msra.mxu1 %v21202_v26  ;;  %v7758_v26 = vmul.f32 %v7749_v0, %v25199_v4  ;;  %v22902_v4 = vld [vmem:[#allocation2 + $0x48] sm:$0xff] }
 0x855   :  { %8856 = vmatprep.subr.bf16.mxu1 %v21210_v40  ;;  %v7763_v61 = vmul.f32 %v22902_v4, %v7753_v2 }
 0x858   :  { %8857 = vmatpush1.bf16.msra.mxu1 %v21208_v41  ;;  %v7781_v41 = vld [vmem:[#allocation2 + $0x8] sm:$0x80] }
 0x859   :  { %8858 = vmatprep.subr.bf16.mxu1 %v21216_v44 }
 0x85c   :  { %8859 = vmatpush1.bf16.msra.mxu1 %v21214_v29 }
 0x85d   :  { %8860 = vmatprep.subr.bf16.mxu1 %v21222_v46  ;;  %v7759_v46 = vmul.f32 %v7753_v2, %v25204_v36 }
 0x860   :  { %8861 = vmatpush1.bf16.msra.mxu1 %v21220_v6 }
 0x861   :  { %8862 = vmatprep.subr.bf16.mxu1 %v21228_v42 }
 0x864   :  { %8863 = vmatpush1.bf16.msra.mxu1 %v21226_v49  ;;  %v7762_v49 = vmul.f32 %v22901_v5, %v7749_v0 }
 0x865   :  { %8864 = vmatprep.subr.bf16.mxu1 %v21234_v21 }
 0x868   :  { %8865 = vmatpush1.bf16.msra.mxu1 %v21232_v23 }
 0x869   :  { %8866 = vmatprep.subr.bf16.mxu1 %v21240_v1 }
 0x86c   :  { %8867 = vmatpush1.bf16.msra.mxu1 %v21238_v3 }
 0x86d   :  { %8868 = vmatprep.subr.bf16.mxu1 %v21246_v24 }
 0x870   :  { %8869 = vmatpush1.bf16.msra.mxu1 %v21244_v22 }
 0x871   :  { %8870 = vmatprep.subr.bf16.mxu1 %v21252_v35 }
 0x874   :  { %8871 = vmatpush1.bf16.msra.mxu1 %v21250_v17 }
 0x875   :  { %8872 = vmatprep.subr.bf16.mxu1 %v21258_v50 }
 0x878   :  { %8873 = vmatpush1.bf16.msra.mxu1 %v21256_v9 }
 0x879   :  { %8874 = vmatprep.subr.bf16.mxu1 %v21264_v15 }
 0x87c   :  { %8875 = vmatpush1.bf16.msra.mxu1 %v21262_v20 }
 0x87d   :  { %8897 = vmatprep.subr.bf16.mxu1 %v21270_v32 }
 0x912   :  { %v7671_v30 = vpop.f32.mrb[56].mxu1 }
 0x913   :  { %v7735_v31 = vadd.f32 %v7728_v60, %v7671_v30  ;;  %v7673_v43 = vpop.f32.mrb[57].mxu1 }
 0x914   :  { %v7736_v34 = vadd.f32 %v7732_v12, %v7673_v43  ;;  %v7675_v25 = vpop.f32.mrb[58].mxu1 }
 0x915   :  { %v26170_v38 = vadd.f32 %v7756_v33, %v7735_v31  ;;  %v7737_v19 = vadd.f32 %v7728_v60, %v7675_v25  ;;  %v7677_v40 = vpop.f32.mrb[59].mxu1 }
 0x916   :  { %v26173_v44 = vadd.f32 %v7757_v52, %v7736_v34  ;;  %v7738_v29 = vadd.f32 %v7732_v12, %v7677_v40 }
 0x917   :  { %v26176_v6 = vadd.f32 %v7758_v26, %v7737_v19  ;;  %v7822_v47 = vpack.c.bf16 %v26170_v38, %v7780_v37  ;;  %v7798_v39 = vrot.slane %v26170_v38, 1 }
 0x918   :  { %v26181_v42 = vadd.f32 %v7759_v46, %v7738_v29  ;;  %v7823_v21 = vpack.c.bf16 %v26173_v44, %v7781_v41  ;;  %v7799_v57 = vrot.slane %v26173_v44, 1 }
 0x919   :  { %v7800_v36 = vrot.slane %v26176_v6, 1  ;;  %v7987_v23 = vshrl.u32 %v7822_v47, 16  ;;  %v7990_v7 = vshll.u32 %v7822_v47, 16 }
 0x91a   :  { %v7802_v48 = vrot.slane %v26181_v42, 1  ;;  %v7681_v1 = vpop.f32.mrb[60].mxu1  ;;  %v8004_v14 = vshrl.u32 %v7823_v21, 16  ;;  %v8007_v3 = vshll.u32 %v7823_v21, 16 }
 0x91b   :  { %v7801_v45 = vsel %vm207_vm1, %v7798_v39, %v7800_v36  ;;  %v7739_v24 = vadd.f32 %v7728_v60, %v7681_v1  ;;  %v7683_v18 = vpop.f32.mrb[61].mxu1  ;;  %v7989_v22 = vrot.slane %v7987_v23, 3  ;;  %v7992_v13 = vrot.slane %v7990_v7, 4 }
 0x91c   :  { %v7824_v35 = vpack.c.bf16 %v7801_v45, %v7798_v39  ;;  %v7803_v55 = vsel %vm207_vm1, %v7799_v57, %v7802_v48  ;;  %v7740_v17 = vadd.f32 %v7732_v12, %v7683_v18  ;;  %v7685_v54 = vpop.f32.mrb[62].mxu1  ;;  %v8006_v16 = vrot.slane %v8004_v14, 3  ;;  %v21268_v14 = vld [vmem:[%s29344_s3 + $0xe08] ss:$16 sps:$4 sm:$0xff]   ;;  %v21273_v45 = vld [vmem:[%s29344_s3 + $0xe24] ss:$16 sps:$4 sm:$0xff]  }
 0x91d   :  { %v26190_v9 = vadd.f32 %v7760_v63, %v7739_v24  ;;  %v7741_v50 = vadd.f32 %v7728_v60, %v7685_v54  ;;  %v7687_v56 = vpop.f32.mrb[63].mxu1  ;;  %v8009_v15 = vrot.slane %v8007_v3, 4  ;;  %v7993_v58 = vor.u32 %v7992_v13, %v7989_v22 }
 0x91e   :  { %v26192_v20 = vadd.f32 %v7761_v53, %v7740_v17  ;;  %v7742_v51 = vadd.f32 %v7732_v12, %v7687_v56  ;;  %v7825_v32 = vpack.c.bf16 %v7803_v55, %v7799_v57  ;;  %v8021_v28 = vshrl.u32 %v7824_v35, 16 }
 0x91f   :  { %v7804_v27 = vrot.slane %v26190_v9, 1  ;;  %v7770_v0 = vadd.f32 %v7762_v49, %v7741_v50  ;;  %v8010_v2 = vor.u32 %v8009_v15, %v8006_v16  ;;  %v7826_v30 = vpack.c.bf16 %v26190_v9, %v26176_v6  ;;  %v21276_v50 = vld [vmem:[%s29344_s3 + $0xe2c] ss:$16 sps:$4 sm:$0xff]  }
 0x920   :  { %v7806_v31 = vrot.slane %v26192_v20, 1  ;;  %v7771_v33 = vadd.f32 %v7763_v61, %v7742_v51  ;;  %v7827_v60 = vpack.c.bf16 %v26192_v20, %v26181_v42  ;;  %v8038_v43 = vshrl.u32 %v7825_v32, 16 }
 0x921   :  { %v7805_v34 = vsel %vm207_vm1, %v7800_v36, %v7804_v27  ;;  %7778 = vst [vmem:[#allocation2 + $0x40] sm:$0xff] %v7770_v0  ;;  %v7808_v12 = vrot.slane %v7770_v0, 1  ;;  %v7995_v52 = vshrl.u32 %v7826_v30, 16  ;;  %v7998_v25 = vshll.u32 %v7826_v30, 16  ;;  %v21265_v36 = vld [vmem:[%s29344_s3 + $0xe00] ss:$16 sps:$4 sm:$0xff]  }
 0x922   :  { %v7807_v37 = vsel %vm207_vm1, %v7802_v48, %v7806_v31  ;;  %7779 = vst [vmem:[#allocation2 + $0x48] sm:$0xff] %v7771_v33  ;;  %v7810_v19 = vrot.slane %v7771_v33, 1  ;;  %v8012_v26 = vshrl.u32 %v7827_v60, 16  ;;  %v8015_v40 = vshll.u32 %v7827_v60, 16 }
 0x923   :  { %v7809_v41 = vsel %vm207_vm1, %v7804_v27, %v7808_v12  ;;  %v26203_v29 = vpack.c.bf16 %v7808_v12, %v7808_v12  ;;  %v7997_v46 = vrot.slane %v7995_v52, 3  ;;  %v8000_v63 = vrot.slane %v7998_v25, 4  ;;  %v21279_v12 = vld [vmem:[%s29344_s3 + $0xe44] ss:$16 sps:$4 sm:$0xff]  }
 0x924   :  { %v7828_v53 = vpack.c.bf16 %v7809_v41, %v7805_v34  ;;  %v7811_v47 = vsel %vm207_vm1, %v7806_v31, %v7810_v19  ;;  %v7833_v5 = vpack.c.bf16 %v7810_v19, %v7810_v19  ;;  %v8014_v49 = vrot.slane %v8012_v26, 3 }
 0x925   :  { %v8017_v4 = vrot.slane %v8015_v40, 4  ;;  %v26206_v61 = vor.u32 %v8000_v63, %v7997_v46  ;;  %v7829_v21 = vpack.c.bf16 %v7811_v47, %v7807_v37  ;;  %v8040_v39 = vrot.slane %v8038_v43, 3  ;;  %v21282_v37 = vld [vmem:[%s29344_s3 + $0xe4c] ss:$16 sps:$4 sm:$0xff]  }
 0x926   :  { %v8041_v23 = vshll.u32 %v7825_v32, 16  ;;  %v8023_v7 = vrot.slane %v8021_v28, 3  ;;  %v8024_v57 = vshll.u32 %v7824_v35, 16  ;;  %v8029_v48 = vshrl.u32 %v7828_v53, 16  ;;  %v21271_v32 = vld [vmem:[%s29344_s3 + $0xe20] ss:$16 sps:$4 sm:$0xff]  }
 0x927   :  { %v26211_v1 = vor.u32 %v8017_v4, %v8014_v49  ;;  %v8002_v3 = vsel %vm394_vm2, %v7993_v58, %v26206_v61  ;;  %v8046_v24 = vshrl.u32 %v7829_v21, 16  ;;  %v8049_v18 = vshll.u32 %v7829_v21, 16 }
 0x928   :  { %v7788_v22 = vld [vmem:[#allocation2 + $0x40] sm:$0x7f]  ;;  %v8043_v13 = vrot.slane %v8041_v23, 4  ;;  %v8026_v55 = vrot.slane %v8024_v57, 4  ;;  %v8031_v35 = vrot.slane %v8029_v48, 3  ;;  %v8032_v17 = vshll.u32 %v7828_v53, 16 }
 0x929   :  { %v8019_v54 = vsel %vm394_vm2, %v8010_v2, %v26211_v1  ;;  %v7789_v16 = vld [vmem:[#allocation2 + $0x48] sm:$0x7f]  ;;  %v7830_v56 = vpack.c.bf16 %v7788_v22, %v7788_v22  ;;  %v8048_v15 = vrot.slane %v8046_v24, 3  ;;  %v8051_v58 = vrot.slane %v8049_v18, 4  ;;  %v21291_v22 = vld [vmem:[%s29344_s3 + $0xe84] ss:$16 sps:$4 sm:$0xff]  }
 0x92a   :  { %8770 = vmatprep.mubr.bf16.mxu0 %v8019_v54  ;;  %8876 = vmatprep.mubr.bf16.mxu1 %v8019_v54  ;;  %v7831_v51 = vpack.c.bf16 %v7789_v16, %v7789_v16  ;;  %v8044_v28 = vor.u32 %v8043_v13, %v8040_v39  ;;  %v8027_v27 = vor.u32 %v8026_v55, %v8023_v7  ;;  %v8034_v0 = vrot.slane %v8032_v17, 4  ;;  %v21274_v2 = vld [vmem:[%s29344_s3 + $0xe28] ss:$16 sps:$4 sm:$0xff]   ;;  %v21294_v13 = vld [vmem:[%s29344_s3 + $0xe8c] ss:$16 sps:$4 sm:$0xff]  }
 0x92b   :  { %8771 = vmatmul.mubr.bf16.vlgmr.msra.gmra.mrb[56].mxu0 %v8002_v3  ;;  %8877 = vmatmul.mubr.bf16.vlgmr.msra.gmra.mrb[64].mxu1 %v8002_v3  ;;  %v8055_v30 = vshrl.u32 %v7830_v56, 16  ;;  %v8058_v31 = vshll.u32 %v7830_v56, 16  ;;  %v8052_v33 = vor.u32 %v8051_v58, %v8048_v15  ;;  %v8082_v60 = vshrl.u32 %v7833_v5, 16  ;;  %v21280_v23 = vld [vmem:[%s29344_s3 + $0xe48] ss:$16 sps:$4 sm:$0xff]  }
 0x92c   :  { %8792 = vmatpush1.bf16.msra.mxu0 %v21265_v36  ;;  %8898 = vmatpush1.bf16.msra.mxu1 %v21268_v14  ;;  %v8064_v43 = vshrl.u32 %v7831_v51, 16  ;;  %v8067_v34 = vshll.u32 %v7831_v51, 16  ;;  %v8035_v52 = vor.u32 %v8034_v0, %v8031_v35  ;;  %v8085_v25 = vshll.u32 %v7833_v5, 16  ;;  %v21277_v36 = vld [vmem:[%s29344_s3 + $0xe40] ss:$16 sps:$4 sm:$0xff]  }
 0x92d   :  { %8793 = vmatprep.subr.bf16.mxu0 %v21273_v45  ;;  %8899 = vmatprep.subr.bf16.mxu1 %v21276_v50  ;;  %v8057_v19 = vrot.slane %v8055_v30, 3  ;;  %v8060_v26 = vrot.slane %v8058_v31, 4  ;;  %v8053_v40 = vsel %vm394_vm2, %v8044_v28, %v8052_v33  ;;  %v8084_v41 = vrot.slane %v8082_v60, 3  ;;  %v21285_v3 = vld [vmem:[%s29344_s3 + $0xe64] ss:$16 sps:$4 sm:$0xff]  }
 0x92e   :  { %v8066_v46 = vrot.slane %v8064_v43, 3  ;;  %v8069_v63 = vrot.slane %v8067_v34, 4  ;;  %v26240_v53 = vsel %vm394_vm2, %v8027_v27, %v8035_v52  ;;  %v8087_v47 = vrot.slane %v8085_v25, 4  ;;  %v21288_v45 = vld [vmem:[%s29344_s3 + $0xe6c] ss:$16 sps:$4 sm:$0xff]  }
 0x92f   :  { %v8061_v49 = vor.u32 %v8060_v26, %v8057_v19  ;;  %v8073_v5 = vshrl.u32 %v26203_v29, 16  ;;  %v8076_v4 = vshll.u32 %v26203_v29, 16  ;;  %v21289_v55 = vld [vmem:[%s29344_s3 + $0xe80] ss:$16 sps:$4 sm:$0xff]   ;;  %v21292_v35 = vld [vmem:[%s29344_s3 + $0xe88] ss:$16 sps:$4 sm:$0xff]  }
 0x930   :  { %v8070_v21 = vor.u32 %v8069_v63, %v8066_v46  ;;  %8794 = vmatpush1.bf16.msra.mxu0 %v21271_v32  ;;  %8900 = vmatpush1.bf16.msra.mxu1 %v21274_v2  ;;  %v8088_v39 = vor.u32 %v8087_v47, %v8084_v41  ;;  %v21297_v17 = vld [vmem:[%s29344_s3 + $0xea4] ss:$16 sps:$4 sm:$0xff]   ;;  %v21300_v54 = vld [vmem:[%s29344_s3 + $0xeac] ss:$16 sps:$4 sm:$0xff]   ;;  %v21295_v16 = vld [vmem:[%s29344_s3 + $0xea0] ss:$16 sps:$4 sm:$0xff]  }
 0x931   :  { %8795 = vmatprep.subr.bf16.mxu0 %v21279_v12  ;;  %8901 = vmatprep.subr.bf16.mxu1 %v21282_v37  ;;  %v8075_v7 = vrot.slane %v8073_v5, 3  ;;  %v8078_v57 = vrot.slane %v8076_v4, 4  ;;  %v8062_v14 = vsel %vm394_vm2, %v26206_v61, %v8061_v49  ;;  %v21286_v61 = vld [vmem:[%s29344_s3 + $0xe68] ss:$16 sps:$4 sm:$0xff]   ;;  %v21303_v56 = vld [vmem:[%s29344_s3 + $0xec4] ss:$16 sps:$4 sm:$0xff]  }
 0x932   :  { %v8071_v48 = vsel %vm394_vm2, %v26211_v1, %v8070_v21  ;;  %v26253_v29 = vsel %vm394_vm2, %v8052_v33, %v8088_v39  ;;  %v21283_v1 = vld [vmem:[%s29344_s3 + $0xe60] ss:$16 sps:$4 sm:$0xff]   ;;  %v21298_v50 = vld [vmem:[%s29344_s3 + $0xea8] ss:$16 sps:$4 sm:$0xff]   ;;  %v21306_v15 = vld [vmem:[%s29344_s3 + $0xecc] ss:$16 sps:$4 sm:$0xff]  }
 0x933   :  { %8780 = vmatprep.mubr.bf16.mxu0 %v8071_v48  ;;  %8886 = vmatprep.mubr.bf16.mxu1 %v8071_v48  ;;  %v8079_v24 = vor.u32 %v8078_v57, %v8075_v7  ;;  %v21301_v58 = vld [vmem:[%s29344_s3 + $0xec0] ss:$16 sps:$4 sm:$0xff]   ;;  %v21304_v51 = vld [vmem:[%s29344_s3 + $0xec8] ss:$16 sps:$4 sm:$0xff]   ;;  %v21309_v32 = vld [vmem:[%s29344_s3 + $0xee4] ss:$16 sps:$4 sm:$0xff]  }
 0x934   :  { %8781 = vmatmul.mubr.bf16.gmra.mrb[60].mxu0 %v8062_v14  ;;  %8887 = vmatmul.mubr.bf16.gmra.mrb[68].mxu1 %v8062_v14  ;;  %v21312_v28 = vld [vmem:[%s29344_s3 + $0xeec] ss:$16 sps:$4 sm:$0xff]   ;;  %v21307_v27 = vld [vmem:[%s29344_s3 + $0xee0] ss:$16 sps:$4 sm:$0xff]   ;;  %v21310_v0 = vld [vmem:[%s29344_s3 + $0xee8] ss:$16 sps:$4 sm:$0xff]  }
 0x935   :  { %8796 = vmatpush1.bf16.msra.mxu0 %v21277_v36  ;;  %8902 = vmatpush1.bf16.msra.mxu1 %v21280_v23  ;;  %v26270_v18 = vsel %vm394_vm2, %v8035_v52, %v8079_v24  ;;  %v21315_v2 = vld [vmem:[%s29344_s3 + $0xf04] ss:$16 sps:$4 sm:$0xff]   ;;  %v21318_v30 = vld [vmem:[%s29344_s3 + $0xf0c] ss:$16 sps:$4 sm:$0xff]   ;;  %v21313_v31 = vld [vmem:[%s29344_s3 + $0xf00] ss:$16 sps:$4 sm:$0xff]  }
 0x936   :  { %8823 = vmatprep.mubr.bf16.mxu0 %v8053_v40  ;;  %8929 = vmatprep.mubr.bf16.mxu1 %v8053_v40  ;;  %v21316_v33 = vld [vmem:[%s29344_s3 + $0xf08] ss:$16 sps:$4 sm:$0xff]   ;;  %v21321_v60 = vld [vmem:[%s29344_s3 + $0xf24] ss:$16 sps:$4 sm:$0xff]   ;;  %v21324_v43 = vld [vmem:[%s29344_s3 + $0xf2c] ss:$16 sps:$4 sm:$0xff]  }
 0x937   :  { %8797 = vmatprep.subr.bf16.mxu0 %v21285_v3  ;;  %8903 = vmatprep.subr.bf16.mxu1 %v21288_v45  ;;  %v21319_v34 = vld [vmem:[%s29344_s3 + $0xf20] ss:$16 sps:$4 sm:$0xff]   ;;  %v21322_v12 = vld [vmem:[%s29344_s3 + $0xf28] ss:$16 sps:$4 sm:$0xff]   ;;  %v21327_v52 = vld [vmem:[%s29344_s3 + $0xf44] ss:$16 sps:$4 sm:$0xff]  }
 0x938   :  { %v21330_v25 = vld [vmem:[%s29344_s3 + $0xf4c] ss:$16 sps:$4 sm:$0xff]   ;;  %v21325_v37 = vld [vmem:[%s29344_s3 + $0xf40] ss:$16 sps:$4 sm:$0xff]   ;;  %v21328_v19 = vld [vmem:[%s29344_s3 + $0xf48] ss:$16 sps:$4 sm:$0xff]  }
 0x939   :  { %8798 = vmatpush1.bf16.msra.mxu0 %v21283_v1  ;;  %8904 = vmatpush1.bf16.msra.mxu1 %v21286_v61  ;;  %v21333_v26 = vld [vmem:[%s29344_s3 + $0xf64] ss:$16 sps:$4 sm:$0xff]   ;;  %v21336_v40 = vld [vmem:[%s29344_s3 + $0xf6c] ss:$16 sps:$4 sm:$0xff]   ;;  %v21331_v41 = vld [vmem:[%s29344_s3 + $0xf60] ss:$16 sps:$4 sm:$0xff]  }
 0x93a   :  { %8799 = vmatprep.subr.bf16.mxu0 %v21291_v22  ;;  %8905 = vmatprep.subr.bf16.mxu1 %v21294_v13  ;;  %v21334_v46 = vld [vmem:[%s29344_s3 + $0xf68] ss:$16 sps:$4 sm:$0xff]   ;;  %v21339_v63 = vld [vmem:[%s29344_s3 + $0xf84] ss:$16 sps:$4 sm:$0xff]   ;;  %v21342_v47 = vld [vmem:[%s29344_s3 + $0xf8c] ss:$16 sps:$4 sm:$0xff]  }
 0x93b   :  { %v21337_v49 = vld [vmem:[%s29344_s3 + $0xf80] ss:$16 sps:$4 sm:$0xff]   ;;  %v21340_v5 = vld [vmem:[%s29344_s3 + $0xf88] ss:$16 sps:$4 sm:$0xff]   ;;  %v21345_v4 = vld [vmem:[%s29344_s3 + $0xfa4] ss:$16 sps:$4 sm:$0xff]  }
 0x93c   :  { %v21348_v21 = vld [vmem:[%s29344_s3 + $0xfac] ss:$16 sps:$4 sm:$0xff]   ;;  %v21343_v39 = vld [vmem:[%s29344_s3 + $0xfa0] ss:$16 sps:$4 sm:$0xff]   ;;  %v21346_v36 = vld [vmem:[%s29344_s3 + $0xfa8] ss:$16 sps:$4 sm:$0xff]  }
 0x93d   :  { %8800 = vmatpush1.bf16.msra.mxu0 %v21289_v55  ;;  %8906 = vmatpush1.bf16.msra.mxu1 %v21292_v35  ;;  %v21351_v23 = vld [vmem:[%s29344_s3 + $0xfc4] ss:$16 sps:$4 sm:$0xff]   ;;  %v21354_v7 = vld [vmem:[%s29344_s3 + $0xfcc] ss:$16 sps:$4 sm:$0xff]   ;;  %v21349_v57 = vld [vmem:[%s29344_s3 + $0xfc0] ss:$16 sps:$4 sm:$0xff]  }
 0x93e   :  { %8801 = vmatprep.subr.bf16.mxu0 %v21297_v17  ;;  %8907 = vmatprep.subr.bf16.mxu1 %v21300_v54  ;;  %v21352_v48 = vld [vmem:[%s29344_s3 + $0xfc8] ss:$16 sps:$4 sm:$0xff]   ;;  %v21357_v14 = vld [vmem:[%s29344_s3 + $0xfe4] ss:$16 sps:$4 sm:$0xff]   ;;  %v21360_v3 = vld [vmem:[%s29344_s3 + $0xfec] ss:$16 sps:$4 sm:$0xff]  }
 0x93f   :  { %v21355_v45 = vld [vmem:[%s29344_s3 + $0xfe0] ss:$16 sps:$4 sm:$0xff]   ;;  %v21358_v24 = vld [vmem:[%s29344_s3 + $0xfe8] ss:$16 sps:$4 sm:$0xff]   ;;  %v21363_v1 = vld [vmem:[%s29346_s5 + $0xf04] ss:$40 sps:$4 sm:$0xff]  }
 0x940   :  { %v21366_v61 = vld [vmem:[%s29346_s5 + $0xf0c] ss:$40 sps:$4 sm:$0xff]   ;;  %v21361_v22 = vld [vmem:[%s29346_s5 + $0xf00] ss:$40 sps:$4 sm:$0xff]   ;;  %v21372_v35 = vld [vmem:[%s29346_s5 + $0xf5c] ss:$40 sps:$4 sm:$0xff]  }
 0x941   :  { %8802 = vmatpush1.bf16.msra.mxu0 %v21295_v16  ;;  %8908 = vmatpush1.bf16.msra.mxu1 %v21298_v50  ;;  %v21364_v13 = vld [vmem:[%s29346_s5 + $0xf08] ss:$40 sps:$4 sm:$0xff]   ;;  %v21369_v55 = vld [vmem:[%s29346_s5 + $0xf54] ss:$40 sps:$4 sm:$0xff]   ;;  %v21370_v54 = vld [vmem:[%s29346_s5 + $0xf58] ss:$40 sps:$4 sm:$0xff]  }
 0x942   :  { %8803 = vmatprep.subr.bf16.mxu0 %v21303_v56  ;;  %8909 = vmatprep.subr.bf16.mxu1 %v21306_v15  ;;  %v21367_v17 = vld [vmem:[%s29346_s5 + $0xf50] ss:$40 sps:$4 sm:$0xff]   ;;  %v21373_v16 = vld [vmem:[%s29346_s5 + $0xfa0] ss:$40 sps:$4 sm:$0xff]   ;;  %v21381_v56 = vld [vmem:[%s29346_s5 + $0xff4] ss:$40 sps:$4 sm:$0xff]  }
 0x943   :  { %v21376_v50 = vld [vmem:[%s29346_s5 + $0xfa8] ss:$40 sps:$4 sm:$0xff]   ;;  %v21384_v15 = vld [vmem:[%s29346_s5 + $0xffc] ss:$40 sps:$4 sm:$0xff]  }
 0x945   :  { %8804 = vmatpush1.bf16.msra.mxu0 %v21301_v58  ;;  %8910 = vmatpush1.bf16.msra.mxu1 %v21304_v51  ;;  %v21379_v58 = vld [vmem:[%s29346_s5 + $0xff0] ss:$40 sps:$4 sm:$0xff]  }
 0x946   :  { %8805 = vmatprep.subr.bf16.mxu0 %v21309_v32  ;;  %8911 = vmatprep.subr.bf16.mxu1 %v21312_v28  ;;  %v21382_v51 = vld [vmem:[%s29346_s5 + $0xff8] ss:$40 sps:$4 sm:$0xff]   ;;  %v21387_v32 = vld [vmem:[%s29346_s5 + $0x1044] ss:$40 sps:$4 sm:$0xff]  }
 0x947   :  { %v21385_v28 = vld [vmem:[%s29346_s5 + $0x1040] ss:$40 sps:$4 sm:$0xff]  }
 0x949   :  { %8806 = vmatpush1.bf16.msra.mxu0 %v21307_v27  ;;  %8912 = vmatpush1.bf16.msra.mxu1 %v21310_v0  ;;  %v21388_v27 = vld [vmem:[%s29346_s5 + $0x1048] ss:$40 sps:$4 sm:$0xff]   ;;  %v21393_v0 = vld [vmem:[%s29346_s5 + $0x1094] ss:$40 sps:$4 sm:$0xff]  }
 0x94a   :  { %8807 = vmatprep.subr.bf16.mxu0 %v21315_v2  ;;  %8913 = vmatprep.subr.bf16.mxu1 %v21318_v30  ;;  %v21396_v2 = vld [vmem:[%s29346_s5 + $0x109c] ss:$40 sps:$4 sm:$0xff]   ;;  %v21391_v30 = vld [vmem:[%s29346_s5 + $0x1090] ss:$40 sps:$4 sm:$0xff]  }
 0x94d   :  { %8808 = vmatpush1.bf16.msra.mxu0 %v21313_v31  ;;  %8914 = vmatpush1.bf16.msra.mxu1 %v21316_v33  ;;  %v21394_v31 = vld [vmem:[%s29346_s5 + $0x1098] ss:$40 sps:$4 sm:$0xff]   ;;  %v21399_v33 = vld [vmem:[%s29346_s5 + $0x10e4] ss:$40 sps:$4 sm:$0xff]  }
 0x94e   :  { %8809 = vmatprep.subr.bf16.mxu0 %v21321_v60  ;;  %8915 = vmatprep.subr.bf16.mxu1 %v21324_v43  ;;  %v21402_v60 = vld [vmem:[%s29346_s5 + $0x10ec] ss:$40 sps:$4 sm:$0xff]   ;;  %v21397_v43 = vld [vmem:[%s29346_s5 + $0x10e0] ss:$40 sps:$4 sm:$0xff]  }
 0x951   :  { %8810 = vmatpush1.bf16.msra.mxu0 %v21319_v34  ;;  %8916 = vmatpush1.bf16.msra.mxu1 %v21322_v12  ;;  %v21400_v34 = vld [vmem:[%s29346_s5 + $0x10e8] ss:$40 sps:$4 sm:$0xff]   ;;  %v21405_v12 = vld [vmem:[%s29346_s5 + $0x1134] ss:$40 sps:$4 sm:$0xff]  }
 0x952   :  { %8811 = vmatprep.subr.bf16.mxu0 %v21327_v52  ;;  %8917 = vmatprep.subr.bf16.mxu1 %v21330_v25  ;;  %v21408_v52 = vld [vmem:[%s29346_s5 + $0x113c] ss:$40 sps:$4 sm:$0xff]   ;;  %v21403_v25 = vld [vmem:[%s29346_s5 + $0x1130] ss:$40 sps:$4 sm:$0xff]  }
 0x955   :  { %8812 = vmatpush1.bf16.msra.mxu0 %v21325_v37  ;;  %8918 = vmatpush1.bf16.msra.mxu1 %v21328_v19  ;;  %v21406_v37 = vld [vmem:[%s29346_s5 + $0x1138] ss:$40 sps:$4 sm:$0xff]   ;;  %v21411_v19 = vld [vmem:[%s29346_s5 + $0x1184] ss:$40 sps:$4 sm:$0xff]  }
 0x956   :  { %8813 = vmatprep.subr.bf16.mxu0 %v21333_v26  ;;  %8919 = vmatprep.subr.bf16.mxu1 %v21336_v40  ;;  %v21414_v26 = vld [vmem:[%s29346_s5 + $0x118c] ss:$40 sps:$4 sm:$0xff]   ;;  %v21409_v40 = vld [vmem:[%s29346_s5 + $0x1180] ss:$40 sps:$4 sm:$0xff]  }
 0x959   :  { %8814 = vmatpush1.bf16.msra.mxu0 %v21331_v41  ;;  %8920 = vmatpush1.bf16.msra.mxu1 %v21334_v46  ;;  %v21412_v41 = vld [vmem:[%s29346_s5 + $0x1188] ss:$40 sps:$4 sm:$0xff]   ;;  %v21417_v46 = vld [vmem:[%s29346_s5 + $0x11d4] ss:$40 sps:$4 sm:$0xff]  }
 0x95a   :  { %8815 = vmatprep.subr.bf16.mxu0 %v21339_v63  ;;  %8921 = vmatprep.subr.bf16.mxu1 %v21342_v47  ;;  %v21420_v63 = vld [vmem:[%s29346_s5 + $0x11dc] ss:$40 sps:$4 sm:$0xff]   ;;  %v21415_v47 = vld [vmem:[%s29346_s5 + $0x11d0] ss:$40 sps:$4 sm:$0xff]  }
 0x95d   :  { %8816 = vmatpush1.bf16.msra.mxu0 %v21337_v49  ;;  %8922 = vmatpush1.bf16.msra.mxu1 %v21340_v5  ;;  %v21418_v49 = vld [vmem:[%s29346_s5 + $0x11d8] ss:$40 sps:$4 sm:$0xff]   ;;  %v21423_v5 = vld [vmem:[%s29346_s5 + $0x1224] ss:$40 sps:$4 sm:$0xff]  }
 0x95e   :  { %8817 = vmatprep.subr.bf16.mxu0 %v21345_v4  ;;  %8923 = vmatprep.subr.bf16.mxu1 %v21348_v21  ;;  %v21426_v4 = vld [vmem:[%s29346_s5 + $0x122c] ss:$40 sps:$4 sm:$0xff]   ;;  %v21421_v21 = vld [vmem:[%s29346_s5 + $0x1220] ss:$40 sps:$4 sm:$0xff]  }
 0x961   :  { %8818 = vmatpush1.bf16.msra.mxu0 %v21343_v39  ;;  %8924 = vmatpush1.bf16.msra.mxu1 %v21346_v36  ;;  %v21424_v39 = vld [vmem:[%s29346_s5 + $0x1228] ss:$40 sps:$4 sm:$0xff]   ;;  %v21429_v36 = vld [vmem:[%s29346_s5 + $0x1274] ss:$40 sps:$4 sm:$0xff]  }
 0x962   :  { %8819 = vmatprep.subr.bf16.mxu0 %v21351_v23  ;;  %8925 = vmatprep.subr.bf16.mxu1 %v21354_v7  ;;  %v21432_v23 = vld [vmem:[%s29346_s5 + $0x127c] ss:$40 sps:$4 sm:$0xff]   ;;  %v21427_v7 = vld [vmem:[%s29346_s5 + $0x1270] ss:$40 sps:$4 sm:$0xff]  }
 0x965   :  { %8820 = vmatpush1.bf16.msra.mxu0 %v21349_v57  ;;  %8926 = vmatpush1.bf16.msra.mxu1 %v21352_v48  ;;  %v21430_v57 = vld [vmem:[%s29346_s5 + $0x1278] ss:$40 sps:$4 sm:$0xff]   ;;  %v21435_v48 = vld [vmem:[%s29346_s5 + $0x12c4] ss:$40 sps:$4 sm:$0xff]  }
 0x966   :  { %8821 = vmatprep.subr.bf16.mxu0 %v21357_v14  ;;  %8927 = vmatprep.subr.bf16.mxu1 %v21360_v3  ;;  %v21438_v14 = vld [vmem:[%s29346_s5 + $0x12cc] ss:$40 sps:$4 sm:$0xff]   ;;  %v21433_v3 = vld [vmem:[%s29346_s5 + $0x12c0] ss:$40 sps:$4 sm:$0xff]  }
 0x969   :  { %8822 = vmatpush1.bf16.msra.mxu0 %v21355_v45  ;;  %8928 = vmatpush1.bf16.msra.mxu1 %v21358_v24  ;;  %v21436_v45 = vld [vmem:[%s29346_s5 + $0x12c8] ss:$40 sps:$4 sm:$0xff]   ;;  %v21441_v24 = vld [vmem:[%s29346_s5 + $0x1314] ss:$40 sps:$4 sm:$0xff]  }
 0x96a   :  { %9979 = vmatprep.subr.bf16.mxu1 %v21363_v1  ;;  %10032 = vmatprep.subr.bf16.mxu0 %v21366_v61  ;;  %v21444_v1 = vld [vmem:[%s29346_s5 + $0x131c] ss:$40 sps:$4 sm:$0xff]   ;;  %v21439_v61 = vld [vmem:[%s29346_s5 + $0x1310] ss:$40 sps:$4 sm:$0xff]  }
 0x96c   :  { %8824 = vmatmul.mubr.bf16.vlgmr.msra.gmra.mrb[56].mxu0 %v26240_v53  ;;  %8930 = vmatmul.mubr.bf16.vlgmr.msra.gmra.mrb[64].mxu1 %v26240_v53  ;;  %v21375_v53 = vld [vmem:[%s29346_s5 + $0xfa4] ss:$40 sps:$4 sm:$0xff]  }
 0x96d   :  { %8833 = vmatprep.mubr.bf16.mxu0 %v26253_v29  ;;  %8939 = vmatprep.mubr.bf16.mxu1 %v26253_v29  ;;  %v21378_v29 = vld [vmem:[%s29346_s5 + $0xfac] ss:$40 sps:$4 sm:$0xff]  }
 0x96e   :  { %9980 = vmatpush1.bf16.msra.mxu1 %v21361_v22  ;;  %10033 = vmatpush1.bf16.msra.mxu0 %v21364_v13  ;;  %v21442_v22 = vld [vmem:[%s29346_s5 + $0x1318] ss:$40 sps:$4 sm:$0xff]  }
 0x96f   :  { %9981 = vmatprep.subr.bf16.mxu1 %v21369_v55  ;;  %10034 = vmatprep.subr.bf16.mxu0 %v21372_v35  ;;  %v21445_v13 = vld [vmem:[%s29346_s5 + $0x1360] ss:$40 sps:$4 sm:$0xff]   ;;  %v21447_v55 = vld [vmem:[%s29346_s5 + $0x1364] ss:$40 sps:$4 sm:$0xff]  }
 0x970   :  { %v21448_v35 = vld [vmem:[%s29346_s5 + $0x1368] ss:$40 sps:$4 sm:$0xff]  }
 0x972   :  { %9982 = vmatpush1.bf16.msra.mxu1 %v21367_v17  ;;  %10035 = vmatpush1.bf16.msra.mxu0 %v21370_v54  ;;  %v21450_v17 = vld [vmem:[%s29346_s5 + $0x136c] ss:$40 sps:$4 sm:$0xff]  }
 0x973   :  { %9983 = vmatprep.subr.bf16.mxu1 %v21375_v53  ;;  %10036 = vmatprep.subr.bf16.mxu0 %v21378_v29  ;;  %v21453_v54 = vld [vmem:[%s29346_s5 + $0x13b4] ss:$40 sps:$4 sm:$0xff]   ;;  %v21451_v29 = vld [vmem:[%s29346_s5 + $0x13b0] ss:$40 sps:$4 sm:$0xff]  }
 0x974   :  { %8834 = vmatmul.mubr.bf16.gmra.mrb[60].mxu0 %v26270_v18  ;;  %8940 = vmatmul.mubr.bf16.gmra.mrb[68].mxu1 %v26270_v18  ;;  %v21390_v18 = vld [vmem:[%s29346_s5 + $0x104c] ss:$40 sps:$4 sm:$0xff]   ;;  %v21456_v53 = vld [vmem:[%s29346_s5 + $0x13bc] ss:$40 sps:$4 sm:$0xff]  }
 0x976   :  { %9984 = vmatpush1.bf16.msra.mxu1 %v21373_v16  ;;  %10037 = vmatpush1.bf16.msra.mxu0 %v21376_v50  ;;  %v21454_v16 = vld [vmem:[%s29346_s5 + $0x13b8] ss:$40 sps:$4 sm:$0xff]   ;;  %v21459_v50 = vld [vmem:[%s29346_s5 + $0xf14] ss:$40 sps:$4 sm:$0xff]  }
 0x977   :  { %9985 = vmatprep.subr.bf16.mxu1 %v21381_v56  ;;  %10038 = vmatprep.subr.bf16.mxu0 %v21384_v15  ;;  %v21462_v56 = vld [vmem:[%s29346_s5 + $0xf1c] ss:$40 sps:$4 sm:$0xff]   ;;  %v17723_v15 = vld [vmem:[%s29347_s4 + $0xc] sm:$0xf] }
 0x97a   :  { %9986 = vmatpush1.bf16.msra.mxu1 %v21379_v58  ;;  %10039 = vmatpush1.bf16.msra.mxu0 %v21382_v51  ;;  %v7977_v58 = vrot.slane %v17723_v15, %v23684_v59  ;;  %v7981_v51 = vrot.slane %v17723_v15, %v23690_v62 }
 0x97b   :  { %9987 = vmatprep.subr.bf16.mxu1 %v21387_v32  ;;  %10040 = vmatprep.subr.bf16.mxu0 %v21390_v18 }
 0x97e   :  { %9988 = vmatpush1.bf16.msra.mxu1 %v21385_v28  ;;  %10041 = vmatpush1.bf16.msra.mxu0 %v21388_v27 }
 0x97f   :  { %9989 = vmatprep.subr.bf16.mxu1 %v21393_v0  ;;  %10042 = vmatprep.subr.bf16.mxu0 %v21396_v2 }
 0x982   :  { %9990 = vmatpush1.bf16.msra.mxu1 %v21391_v30  ;;  %10043 = vmatpush1.bf16.msra.mxu0 %v21394_v31 }
 0x983   :  { %9991 = vmatprep.subr.bf16.mxu1 %v21399_v33  ;;  %10044 = vmatprep.subr.bf16.mxu0 %v21402_v60 }
 0x986   :  { %9992 = vmatpush1.bf16.msra.mxu1 %v21397_v43  ;;  %10045 = vmatpush1.bf16.msra.mxu0 %v21400_v34 }
 0x987   :  { %9993 = vmatprep.subr.bf16.mxu1 %v21405_v12  ;;  %10046 = vmatprep.subr.bf16.mxu0 %v21408_v52  ;;  %v7969_v12 = vrot.slane %v17723_v15, %v23184_v10 }
 0x98a   :  { %9994 = vmatpush1.bf16.msra.mxu1 %v21403_v25  ;;  %10047 = vmatpush1.bf16.msra.mxu0 %v21406_v37 }
 0x98b   :  { %9995 = vmatprep.subr.bf16.mxu1 %v21411_v19  ;;  %10048 = vmatprep.subr.bf16.mxu0 %v21414_v26  ;;  %v7973_v26 = vrot.slane %v17723_v15, %v23187_v11 }
 0x98e   :  { %9996 = vmatpush1.bf16.msra.mxu1 %v21409_v40  ;;  %10049 = vmatpush1.bf16.msra.mxu0 %v21412_v41 }
 0x98f   :  { %9997 = vmatprep.subr.bf16.mxu1 %v21417_v46  ;;  %10050 = vmatprep.subr.bf16.mxu0 %v21420_v63 }
 0x992   :  { %9998 = vmatpush1.bf16.msra.mxu1 %v21415_v47  ;;  %10051 = vmatpush1.bf16.msra.mxu0 %v21418_v49 }
 0x993   :  { %9999 = vmatprep.subr.bf16.mxu1 %v21423_v5  ;;  %10052 = vmatprep.subr.bf16.mxu0 %v21426_v4 }
 0x996   :  { %10000 = vmatpush1.bf16.msra.mxu1 %v21421_v21  ;;  %10053 = vmatpush1.bf16.msra.mxu0 %v21424_v39 }
 0x997   :  { %10001 = vmatprep.subr.bf16.mxu1 %v21429_v36  ;;  %10054 = vmatprep.subr.bf16.mxu0 %v21432_v23 }
 0x99a   :  { %10002 = vmatpush1.bf16.msra.mxu1 %v21427_v7  ;;  %10055 = vmatpush1.bf16.msra.mxu0 %v21430_v57 }
 0x99b   :  { %10003 = vmatprep.subr.bf16.mxu1 %v21435_v48  ;;  %10056 = vmatprep.subr.bf16.mxu0 %v21438_v14 }
 0x99e   :  { %10004 = vmatpush1.bf16.msra.mxu1 %v21433_v3  ;;  %10057 = vmatpush1.bf16.msra.mxu0 %v21436_v45 }
 0x99f   :  { %10005 = vmatprep.subr.bf16.mxu1 %v21441_v24  ;;  %10058 = vmatprep.subr.bf16.mxu0 %v21444_v1 }
 0x9a2   :  { %10006 = vmatpush1.bf16.msra.mxu1 %v21439_v61  ;;  %10059 = vmatpush1.bf16.msra.mxu0 %v21442_v22 }
 0x9a3   :  { %10007 = vmatprep.subr.bf16.mxu1 %v21447_v55  ;;  %10060 = vmatprep.subr.bf16.mxu0 %v21450_v17 }
 0x9a6   :  { %10008 = vmatpush1.bf16.msra.mxu1 %v21445_v13  ;;  %10061 = vmatpush1.bf16.msra.mxu0 %v21448_v35 }
 0x9a7   :  { %10009 = vmatprep.subr.bf16.mxu1 %v21453_v54  ;;  %10062 = vmatprep.subr.bf16.mxu0 %v21456_v53 }
 0x9aa   :  { %10010 = vmatpush1.bf16.msra.mxu1 %v21451_v29  ;;  %10063 = vmatpush1.bf16.msra.mxu0 %v21454_v16 }
 0x9ab   :  { %10085 = vmatprep.subr.bf16.mxu1 %v21459_v50  ;;  %10138 = vmatprep.subr.bf16.mxu0 %v21462_v56 }
 0xa3f   :  { %v8825_v32 = vpop.f32.mrb[56].mxu0  ;;  %v8931_v18 = vpop.f32.mrb[64].mxu1 }
 0xa40   :  { %v19546_v28 = vadd.f32 %v8931_v18, %v7977_v58  ;;  %v8827_v27 = vpop.f32.mrb[57].mxu0  ;;  %v8933_v0 = vpop.f32.mrb[65].mxu1  ;;  %v19538_v40 = vadd.f32 %v8825_v32, %v7969_v12 }
 0xa41   :  { %v19547_v2 = vadd.f32 %v8933_v0, %v7981_v51  ;;  %v8829_v30 = vpop.f32.mrb[58].mxu0  ;;  %v8935_v31 = vpop.f32.mrb[66].mxu1  ;;  %v19539_v39 = vadd.f32 %v8827_v27, %v7973_v26 }
 0xa42   :  { %v17852_v33 = vmul.f32 -1.442695, %v19546_v28  ;;  %v19548_v60 = vadd.f32 %v8935_v31, %v7977_v58  ;;  %v8831_v43 = vpop.f32.mrb[59].mxu0  ;;  %v8937_v34 = vpop.f32.mrb[67].mxu1  ;;  %v19540_v3 = vadd.f32 %v8829_v30, %v7969_v12 }
 0xa43   :  { %v17853_v52 = vmul.f32 -1.442695, %v19547_v2  ;;  %v19549_v25 = vadd.f32 %v8937_v34, %v7981_v51  ;;  %v19541_v35 = vadd.f32 %v8831_v43, %v7973_v26 }
 0xa44   :  { %22753 = vpow2.f32 %v17852_v33  ;;  %v17854_v37 = vmul.f32 -1.442695, %v19548_v60 }
 0xa45   :  { %22755 = vpow2.f32 %v17853_v52  ;;  %v17855_v19 = vmul.f32 -1.442695, %v19549_v25 }
 0xa46   :  { %22757 = vpow2.f32 %v17854_v37 }
 0xa47   :  { %v8835_v41 = vpop.f32.mrb[60].mxu0  ;;  %v8941_v46 = vpop.f32.mrb[68].mxu1  ;;  %22759 = vpow2.f32 %v17855_v19 }
 0xa48   :  { %v19550_v63 = vadd.f32 %v8941_v46, %v7977_v58  ;;  %v8837_v47 = vpop.f32.mrb[61].mxu0  ;;  %v8943_v49 = vpop.f32.mrb[69].mxu1  ;;  %22761 = vtanh.f32 %v19538_v40  ;;  %v19542_v53 = vadd.f32 %v8835_v41, %v7969_v12 }
 0xa49   :  { %v19551_v5 = vadd.f32 %v8943_v49, %v7981_v51  ;;  %v8839_v4 = vpop.f32.mrb[62].mxu0  ;;  %v8945_v21 = vpop.f32.mrb[70].mxu1  ;;  %v19543_v16 = vadd.f32 %v8837_v47, %v7973_v26  ;;  %v21460_v49 = vld [vmem:[%s29346_s5 + $0xf18] ss:$40 sps:$4 sm:$0xff]  }
 0xa4a   :  { %v17856_v36 = vmul.f32 -1.442695, %v19550_v63  ;;  %v19552_v23 = vadd.f32 %v8945_v21, %v7977_v58  ;;  %v8841_v7 = vpop.f32.mrb[63].mxu0  ;;  %v8947_v57 = vpop.f32.mrb[71].mxu1  ;;  %v21468_v21 = vld [vmem:[%s29346_s5 + $0xf6c] ss:$40 sps:$4 sm:$0xff]  }
 0xa4b   :  { %v17857_v48 = vmul.f32 -1.442695, %v19551_v5  ;;  %v19553_v14 = vadd.f32 %v8947_v57, %v7981_v51  ;;  %v19544_v51 = vadd.f32 %v8839_v4, %v7969_v12  ;;  %v19545_v30 = vadd.f32 %v8841_v7, %v7973_v26  ;;  %v21457_v26 = vld [vmem:[%s29346_s5 + $0xf10] ss:$40 sps:$4 sm:$0xff]   ;;  %v21465_v4 = vld [vmem:[%s29346_s5 + $0xf64] ss:$40 sps:$4 sm:$0xff]  }
 0xa4c   :  { %22763 = vpow2.f32 %v17856_v36  ;;  %v17858_v45 = vmul.f32 -1.442695, %v19552_v23  ;;  %v21463_v57 = vld [vmem:[%s29346_s5 + $0xf60] ss:$40 sps:$4 sm:$0xff]  }
 0xa4d   :  { %22765 = vpow2.f32 %v17857_v48  ;;  %v17859_v22 = vmul.f32 -1.442695, %v19553_v14  ;;  %v21466_v48 = vld [vmem:[%s29346_s5 + $0xf68] ss:$40 sps:$4 sm:$0xff]  }
 0xa4e   :  { %v22754_v24 = vpop.eup %22753  ;;  %22767 = vtanh.f32 %v19539_v39 }
 0xa4f   :  { %v22756_v1 = vpop.eup %22755  ;;  %v8982_v61 = vadd.f32 1.0, %v22754_v24  ;;  %22769 = vpow2.f32 %v17858_v45  ;;  %v21474_v45 = vld [vmem:[%s29346_s5 + $0xfbc] ss:$40 sps:$4 sm:$0xff]  }
 0xa50   :  { %v8983_v13 = vadd.f32 1.0, %v22756_v1  ;;  %22771 = vtanh.f32 %v19540_v3  ;;  %v22758_v55 = vpop.eup %22757  ;;  %v21471_v3 = vld [vmem:[%s29346_s5 + $0xfb4] ss:$40 sps:$4 sm:$0xff]  }
 0xa51   :  { %22773 = vrcp.f32 %v8982_v61  ;;  %v8984_v17 = vadd.f32 1.0, %v22758_v55  ;;  %v22760_v54 = vpop.eup %22759  ;;  %v21469_v55 = vld [vmem:[%s29346_s5 + $0xfb0] ss:$40 sps:$4 sm:$0xff]  }
 0xa52   :  { %22775 = vrcp.f32 %v8983_v13  ;;  %v8985_v29 = vadd.f32 1.0, %v22760_v54  ;;  %v22762_v50 = vpop.eup %22761  ;;  %v21480_v54 = vld [vmem:[%s29346_s5 + $0x100c] ss:$40 sps:$4 sm:$0xff]  }
 0xa53   :  { %22777 = vpow2.f32 %v17859_v22 }
 0xa54   :  { %22779 = vrcp.f32 %v8984_v17  ;;  %v21477_v17 = vld [vmem:[%s29346_s5 + $0x1004] ss:$40 sps:$4 sm:$0xff]  }
 0xa55   :  { %22781 = vtanh.f32 %v19541_v35  ;;  %v21472_v35 = vld [vmem:[%s29346_s5 + $0xfb8] ss:$40 sps:$4 sm:$0xff]  }
 0xa56   :  { %v22764_v56 = vpop.eup %22763  ;;  %22783 = vrcp.f32 %v8985_v29  ;;  %v21478_v29 = vld [vmem:[%s29346_s5 + $0x1008] ss:$40 sps:$4 sm:$0xff]  }
 0xa57   :  { %v22766_v15 = vpop.eup %22765  ;;  %22785 = vtanh.f32 %v19542_v53  ;;  %v8986_v58 = vadd.f32 1.0, %v22764_v56  ;;  %v21475_v53 = vld [vmem:[%s29346_s5 + $0x1000] ss:$40 sps:$4 sm:$0xff]   ;;  %v21481_v56 = vld [vmem:[%s29346_s5 + $0x1050] ss:$40 sps:$4 sm:$0xff]  }
 0xa58   :  { %v22768_v32 = vpop.eup %22767  ;;  %22787 = vtanh.f32 %v19543_v16  ;;  %v8987_v18 = vadd.f32 1.0, %v22766_v15  ;;  %v21483_v16 = vld [vmem:[%s29346_s5 + $0x1054] ss:$40 sps:$4 sm:$0xff]   ;;  %v21484_v15 = vld [vmem:[%s29346_s5 + $0x1058] ss:$40 sps:$4 sm:$0xff]  }
 0xa59   :  { %v22770_v28 = vpop.eup %22769  ;;  %22789 = vrcp.f32 %v8986_v58  ;;  %v21489_v58 = vld [vmem:[%s29346_s5 + $0x10a4] ss:$40 sps:$4 sm:$0xff]  }
 0xa5a   :  { %v22772_v27 = vpop.eup %22771  ;;  %22791 = vrcp.f32 %v8987_v18  ;;  %v8988_v0 = vadd.f32 1.0, %v22770_v28  ;;  %v21490_v18 = vld [vmem:[%s29346_s5 + $0x10a8] ss:$40 sps:$4 sm:$0xff]   ;;  %v21495_v28 = vld [vmem:[%s29346_s5 + $0x10f4] ss:$40 sps:$4 sm:$0xff]  }
 0xa5b   :  { %v22774_v2 = vpop.eup %22773  ;;  %22793 = vtanh.f32 %v19544_v51  ;;  %v21492_v51 = vld [vmem:[%s29346_s5 + $0x10ac] ss:$40 sps:$4 sm:$0xff]  }
 0xa5c   :  { %v22776_v31 = vpop.eup %22775  ;;  %22795 = vrcp.f32 %v8988_v0  ;;  %v9006_v33 = vmul.f32 %v22774_v2, %v22762_v50  ;;  %v21486_v50 = vld [vmem:[%s29346_s5 + $0x105c] ss:$40 sps:$4 sm:$0xff]   ;;  %v21493_v0 = vld [vmem:[%s29346_s5 + $0x10f0] ss:$40 sps:$4 sm:$0xff]  }
 0xa5d   :  { %v22778_v60 = vpop.eup %22777  ;;  %v9007_v43 = vmul.f32 %v22776_v31, %v22768_v32  ;;  %22797 = vtanh.f32 %v19545_v30  ;;  %v21487_v32 = vld [vmem:[%s29346_s5 + $0x10a0] ss:$40 sps:$4 sm:$0xff]   ;;  %v21501_v30 = vld [vmem:[%s29346_s5 + $0x1144] ss:$40 sps:$4 sm:$0xff]  }
 0xa5e   :  { %v22780_v34 = vpop.eup %22779  ;;  %v8989_v52 = vadd.f32 1.0, %v22778_v60  ;;  %v21496_v2 = vld [vmem:[%s29346_s5 + $0x10f8] ss:$40 sps:$4 sm:$0xff]   ;;  %v21504_v31 = vld [vmem:[%s29346_s5 + $0x114c] ss:$40 sps:$4 sm:$0xff]  }
 0xa5f   :  { %v22782_v25 = vpop.eup %22781  ;;  %v9008_v12 = vmul.f32 %v22780_v34, %v22772_v27  ;;  %v21498_v27 = vld [vmem:[%s29346_s5 + $0x10fc] ss:$40 sps:$4 sm:$0xff]   ;;  %v21502_v60 = vld [vmem:[%s29346_s5 + $0x1148] ss:$40 sps:$4 sm:$0xff]  }
 0xa60   :  { %v22784_v37 = vpop.eup %22783  ;;  %22799 = vrcp.f32 %v8989_v52  ;;  %v21510_v34 = vld [vmem:[%s29346_s5 + $0x119c] ss:$40 sps:$4 sm:$0xff]   ;;  %v21505_v52 = vld [vmem:[%s29346_s5 + $0x1190] ss:$40 sps:$4 sm:$0xff]  }
 0xa61   :  { %v22786_v19 = vpop.eup %22785  ;;  %v9009_v40 = vmul.f32 %v22784_v37, %v22782_v25  ;;  %v26627_v41 = vpack.c.bf16 %v9008_v12, %v9006_v33  ;;  %v21499_v33 = vld [vmem:[%s29346_s5 + $0x1140] ss:$40 sps:$4 sm:$0xff]   ;;  %v21513_v12 = vld [vmem:[%s29346_s5 + $0x11e4] ss:$40 sps:$4 sm:$0xff]  }
 0xa62   :  { %v22788_v46 = vpop.eup %22787  ;;  %v21508_v25 = vld [vmem:[%s29346_s5 + $0x1198] ss:$40 sps:$4 sm:$0xff]   ;;  %v21516_v37 = vld [vmem:[%s29346_s5 + $0x11ec] ss:$40 sps:$4 sm:$0xff]  }
 0xa63   :  { %v22790_v63 = vpop.eup %22789  ;;  %v26629_v47 = vpack.c.bf16 %v9009_v40, %v9007_v43  ;;  %v21507_v43 = vld [vmem:[%s29346_s5 + $0x1194] ss:$40 sps:$4 sm:$0xff]   ;;  %v21514_v40 = vld [vmem:[%s29346_s5 + $0x11e8] ss:$40 sps:$4 sm:$0xff]  }
 0xa64   :  { %v22792_v5 = vpop.eup %22791  ;;  %v9010_v39 = vmul.f32 %v22790_v63, %v22786_v19  ;;  %v21511_v19 = vld [vmem:[%s29346_s5 + $0x11e0] ss:$40 sps:$4 sm:$0xff]   ;;  %v21522_v63 = vld [vmem:[%s29346_s5 + $0x123c] ss:$40 sps:$4 sm:$0xff]  }
 0xa65   :  { %v22794_v36 = vpop.eup %22793  ;;  %10011 = vmatprep.mubr.bf16.mxu1 %v26629_v47  ;;  %10064 = vmatprep.mubr.bf16.mxu0 %v26629_v47  ;;  %v9011_v23 = vmul.f32 %v22792_v5, %v22788_v46  ;;  %v21519_v46 = vld [vmem:[%s29346_s5 + $0x1234] ss:$40 sps:$4 sm:$0xff]   ;;  %v21525_v5 = vld [vmem:[%s29346_s5 + $0x1284] ss:$40 sps:$4 sm:$0xff]  }
 0xa66   :  { %v22796_v7 = vpop.eup %22795  ;;  %10012 = vmatmul.mubr.bf16.vlgmr.msra.gmra.mrb[16].mxu1 %v26627_v41  ;;  %10065 = vmatmul.mubr.bf16.vlgmr.msra.gmra.mrb[16].mxu0 %v26627_v41 }
 0xa67   :  { %10086 = vmatpush1.bf16.msra.mxu1 %v21457_v26  ;;  %10139 = vmatpush1.bf16.msra.mxu0 %v21460_v49  ;;  %v9012_v14 = vmul.f32 %v22796_v7, %v22794_v36  ;;  %v22798_v24 = vpop.eup %22797  ;;  %v21517_v26 = vld [vmem:[%s29346_s5 + $0x1230] ss:$40 sps:$4 sm:$0xff]   ;;  %v21531_v36 = vld [vmem:[%s29346_s5 + $0x12d4] ss:$40 sps:$4 sm:$0xff]  }
 0xa68   :  { %10087 = vmatprep.subr.bf16.mxu1 %v21465_v4  ;;  %10140 = vmatprep.subr.bf16.mxu0 %v21468_v21  ;;  %v21520_v49 = vld [vmem:[%s29346_s5 + $0x1238] ss:$40 sps:$4 sm:$0xff]   ;;  %v21528_v4 = vld [vmem:[%s29346_s5 + $0x128c] ss:$40 sps:$4 sm:$0xff]  }
 0xa69   :  { %v26659_v1 = vpack.c.bf16 %v9012_v14, %v9010_v39  ;;  %v21523_v21 = vld [vmem:[%s29346_s5 + $0x1280] ss:$40 sps:$4 sm:$0xff]   ;;  %v21529_v7 = vld [vmem:[%s29346_s5 + $0x12d0] ss:$40 sps:$4 sm:$0xff]   ;;  %v21540_v14 = vld [vmem:[%s29346_s5 + $0x132c] ss:$40 sps:$4 sm:$0xff]  }
 0xa6a   :  { %v22800_v61 = vpop.eup %22799  ;;  %v21526_v39 = vld [vmem:[%s29346_s5 + $0x1288] ss:$40 sps:$4 sm:$0xff]  }
 0xa6b   :  { %10088 = vmatpush1.bf16.msra.mxu1 %v21463_v57  ;;  %10141 = vmatpush1.bf16.msra.mxu0 %v21466_v48  ;;  %v9013_v22 = vmul.f32 %v22800_v61, %v22798_v24  ;;  %v21532_v57 = vld [vmem:[%s29346_s5 + $0x12d8] ss:$40 sps:$4 sm:$0xff]   ;;  %v21537_v48 = vld [vmem:[%s29346_s5 + $0x1324] ss:$40 sps:$4 sm:$0xff]   ;;  %v21543_v24 = vld [vmem:[%s29346_s5 + $0x1374] ss:$40 sps:$4 sm:$0xff]  }
 0xa6c   :  { %10089 = vmatprep.subr.bf16.mxu1 %v21471_v3  ;;  %10142 = vmatprep.subr.bf16.mxu0 %v21474_v45  ;;  %v21535_v3 = vld [vmem:[%s29346_s5 + $0x1320] ss:$40 sps:$4 sm:$0xff]   ;;  %v21546_v61 = vld [vmem:[%s29346_s5 + $0x137c] ss:$40 sps:$4 sm:$0xff]  }
 0xa6d   :  { %v26661_v13 = vpack.c.bf16 %v9013_v22, %v9011_v23  ;;  %v21534_v23 = vld [vmem:[%s29346_s5 + $0x12dc] ss:$40 sps:$4 sm:$0xff]   ;;  %v21538_v45 = vld [vmem:[%s29346_s5 + $0x1328] ss:$40 sps:$4 sm:$0xff]  }
 0xa6e   :  { %v21541_v22 = vld [vmem:[%s29346_s5 + $0x1370] ss:$40 sps:$4 sm:$0xff]  }
 0xa6f   :  { %10021 = vmatprep.mubr.bf16.mxu1 %v26661_v13  ;;  %10074 = vmatprep.mubr.bf16.mxu0 %v26661_v13 }
 0xa70   :  { %10022 = vmatmul.mubr.bf16.gmra.mrb[20].mxu1 %v26659_v1  ;;  %10075 = vmatmul.mubr.bf16.gmra.mrb[20].mxu0 %v26659_v1 }
 0xa71   :  { %10090 = vmatpush1.bf16.msra.mxu1 %v21469_v55  ;;  %10143 = vmatpush1.bf16.msra.mxu0 %v21472_v35  ;;  %v21544_v55 = vld [vmem:[%s29346_s5 + $0x1378] ss:$40 sps:$4 sm:$0xff]   ;;  %v21549_v35 = vld [vmem:[%s29346_s5 + $0x13c4] ss:$40 sps:$4 sm:$0xff]  }
 0xa72   :  { %10117 = vmatprep.mubr.bf16.mxu1 %v26629_v47  ;;  %10170 = vmatprep.mubr.bf16.mxu0 %v26629_v47 }
 0xa73   :  { %10091 = vmatprep.subr.bf16.mxu1 %v21477_v17  ;;  %10144 = vmatprep.subr.bf16.mxu0 %v21480_v54  ;;  %v21552_v17 = vld [vmem:[%s29346_s5 + $0x13cc] ss:$40 sps:$4 sm:$0xff]   ;;  %v21547_v54 = vld [vmem:[%s29346_s5 + $0x13c0] ss:$40 sps:$4 sm:$0xff]  }
 0xa75   :  { %10092 = vmatpush1.bf16.msra.mxu1 %v21475_v53  ;;  %10145 = vmatpush1.bf16.msra.mxu0 %v21478_v29  ;;  %v21550_v53 = vld [vmem:[%s29346_s5 + $0x13c8] ss:$40 sps:$4 sm:$0xff]   ;;  %v21555_v29 = vld [vmem:[%s29346_s5 + $0xf24] ss:$40 sps:$4 sm:$0xff]  }
 0xa76   :  { %10093 = vmatprep.subr.bf16.mxu1 %v21483_v16  ;;  %10146 = vmatprep.subr.bf16.mxu0 %v21486_v50  ;;  %v21603_v16 = vld [vmem:[%s29344_s3 + $0x1004] ss:$16 sps:$4 sm:$0xff]   ;;  %v21553_v50 = vld [vmem:[%s29346_s5 + $0xf20] ss:$40 sps:$4 sm:$0xff]  }
 0xa79   :  { %10094 = vmatpush1.bf16.msra.mxu1 %v21481_v56  ;;  %10147 = vmatpush1.bf16.msra.mxu0 %v21484_v15  ;;  %v21601_v56 = vld [vmem:[%s29344_s3 + $0x1000] ss:$16 sps:$4 sm:$0xff]   ;;  %v21558_v15 = vld [vmem:[%s29346_s5 + $0xf74] ss:$40 sps:$4 sm:$0xff]  }
 0xa7a   :  { %10095 = vmatprep.subr.bf16.mxu1 %v21489_v58  ;;  %10148 = vmatprep.subr.bf16.mxu0 %v21492_v51  ;;  %v21609_v58 = vld [vmem:[%s29344_s3 + $0x1024] ss:$16 sps:$4 sm:$0xff]   ;;  %v21556_v51 = vld [vmem:[%s29346_s5 + $0xf70] ss:$40 sps:$4 sm:$0xff]  }
 0xa7d   :  { %10096 = vmatpush1.bf16.msra.mxu1 %v21487_v32  ;;  %10149 = vmatpush1.bf16.msra.mxu0 %v21490_v18  ;;  %v21607_v32 = vld [vmem:[%s29344_s3 + $0x1020] ss:$16 sps:$4 sm:$0xff]   ;;  %v21561_v18 = vld [vmem:[%s29346_s5 + $0xfc4] ss:$40 sps:$4 sm:$0xff]  }
 0xa7e   :  { %10097 = vmatprep.subr.bf16.mxu1 %v21495_v28  ;;  %10150 = vmatprep.subr.bf16.mxu0 %v21498_v27  ;;  %v21615_v28 = vld [vmem:[%s29344_s3 + $0x1044] ss:$16 sps:$4 sm:$0xff]   ;;  %v21559_v27 = vld [vmem:[%s29346_s5 + $0xfc0] ss:$40 sps:$4 sm:$0xff]  }
 0xa81   :  { %10098 = vmatpush1.bf16.msra.mxu1 %v21493_v0  ;;  %10151 = vmatpush1.bf16.msra.mxu0 %v21496_v2  ;;  %v21613_v0 = vld [vmem:[%s29344_s3 + $0x1040] ss:$16 sps:$4 sm:$0xff]   ;;  %v21564_v2 = vld [vmem:[%s29346_s5 + $0x1014] ss:$40 sps:$4 sm:$0xff]  }
 0xa82   :  { %10099 = vmatprep.subr.bf16.mxu1 %v21501_v30  ;;  %10152 = vmatprep.subr.bf16.mxu0 %v21504_v31  ;;  %v21621_v30 = vld [vmem:[%s29344_s3 + $0x1064] ss:$16 sps:$4 sm:$0xff]   ;;  %v21562_v31 = vld [vmem:[%s29346_s5 + $0x1010] ss:$40 sps:$4 sm:$0xff]  }
 0xa85   :  { %10100 = vmatpush1.bf16.msra.mxu1 %v21499_v33  ;;  %10153 = vmatpush1.bf16.msra.mxu0 %v21502_v60  ;;  %v21619_v33 = vld [vmem:[%s29344_s3 + $0x1060] ss:$16 sps:$4 sm:$0xff]   ;;  %v21567_v60 = vld [vmem:[%s29346_s5 + $0x1064] ss:$40 sps:$4 sm:$0xff]  }
 0xa86   :  { %10101 = vmatprep.subr.bf16.mxu1 %v21507_v43  ;;  %10154 = vmatprep.subr.bf16.mxu0 %v21510_v34  ;;  %v21565_v43 = vld [vmem:[%s29346_s5 + $0x1060] ss:$40 sps:$4 sm:$0xff]  }
 0xa87   :  { %v21625_v34 = vld [vmem:[%s29344_s3 + $0x1080] ss:$16 sps:$4 sm:$0xff]  }
 0xa89   :  { %10102 = vmatpush1.bf16.msra.mxu1 %v21505_v52  ;;  %10155 = vmatpush1.bf16.msra.mxu0 %v21508_v25  ;;  %v21570_v52 = vld [vmem:[%s29346_s5 + $0x10b4] ss:$40 sps:$4 sm:$0xff]  }
 0xa8a   :  { %10103 = vmatprep.subr.bf16.mxu1 %v21513_v12  ;;  %10156 = vmatprep.subr.bf16.mxu0 %v21516_v37  ;;  %v21633_v25 = vld [vmem:[%s29344_s3 + $0x10a4] ss:$16 sps:$4 sm:$0xff]   ;;  %v21568_v12 = vld [vmem:[%s29346_s5 + $0x10b0] ss:$40 sps:$4 sm:$0xff]  }
 0xa8b   :  { %v21631_v37 = vld [vmem:[%s29344_s3 + $0x10a0] ss:$16 sps:$4 sm:$0xff]  }
 0xa8d   :  { %10104 = vmatpush1.bf16.msra.mxu1 %v21511_v19  ;;  %10157 = vmatpush1.bf16.msra.mxu0 %v21514_v40  ;;  %v21573_v19 = vld [vmem:[%s29346_s5 + $0x1104] ss:$40 sps:$4 sm:$0xff]  }
 0xa8e   :  { %10105 = vmatprep.subr.bf16.mxu1 %v21519_v46  ;;  %10158 = vmatprep.subr.bf16.mxu0 %v21522_v63  ;;  %v21639_v40 = vld [vmem:[%s29344_s3 + $0x10c4] ss:$16 sps:$4 sm:$0xff]   ;;  %v21571_v46 = vld [vmem:[%s29346_s5 + $0x1100] ss:$40 sps:$4 sm:$0xff]  }
 0xa8f   :  { %v21637_v63 = vld [vmem:[%s29344_s3 + $0x10c0] ss:$16 sps:$4 sm:$0xff]  }
 0xa91   :  { %10106 = vmatpush1.bf16.msra.mxu1 %v21517_v26  ;;  %10159 = vmatpush1.bf16.msra.mxu0 %v21520_v49  ;;  %v21576_v26 = vld [vmem:[%s29346_s5 + $0x1154] ss:$40 sps:$4 sm:$0xff]  }
 0xa92   :  { %10107 = vmatprep.subr.bf16.mxu1 %v21525_v5  ;;  %10160 = vmatprep.subr.bf16.mxu0 %v21528_v4  ;;  %v21645_v49 = vld [vmem:[%s29344_s3 + $0x10e4] ss:$16 sps:$4 sm:$0xff]   ;;  %v21574_v5 = vld [vmem:[%s29346_s5 + $0x1150] ss:$40 sps:$4 sm:$0xff]  }
 0xa93   :  { %v21643_v4 = vld [vmem:[%s29344_s3 + $0x10e0] ss:$16 sps:$4 sm:$0xff]  }
 0xa95   :  { %10108 = vmatpush1.bf16.msra.mxu1 %v21523_v21  ;;  %10161 = vmatpush1.bf16.msra.mxu0 %v21526_v39  ;;  %v21579_v21 = vld [vmem:[%s29346_s5 + $0x11a4] ss:$40 sps:$4 sm:$0xff]  }
 0xa96   :  { %10109 = vmatprep.subr.bf16.mxu1 %v21531_v36  ;;  %10162 = vmatprep.subr.bf16.mxu0 %v21534_v23  ;;  %v21651_v39 = vld [vmem:[%s29344_s3 + $0x1104] ss:$16 sps:$4 sm:$0xff]   ;;  %v21577_v36 = vld [vmem:[%s29346_s5 + $0x11a0] ss:$40 sps:$4 sm:$0xff]  }
 0xa97   :  { %v21649_v23 = vld [vmem:[%s29344_s3 + $0x1100] ss:$16 sps:$4 sm:$0xff]  }
 0xa99   :  { %10110 = vmatpush1.bf16.msra.mxu1 %v21529_v7  ;;  %10163 = vmatpush1.bf16.msra.mxu0 %v21532_v57  ;;  %v21582_v7 = vld [vmem:[%s29346_s5 + $0x11f4] ss:$40 sps:$4 sm:$0xff]  }
 0xa9a   :  { %10111 = vmatprep.subr.bf16.mxu1 %v21537_v48  ;;  %10164 = vmatprep.subr.bf16.mxu0 %v21540_v14  ;;  %v21657_v57 = vld [vmem:[%s29344_s3 + $0x1124] ss:$16 sps:$4 sm:$0xff]   ;;  %v21580_v48 = vld [vmem:[%s29346_s5 + $0x11f0] ss:$40 sps:$4 sm:$0xff]  }
 0xa9b   :  { %v21655_v14 = vld [vmem:[%s29344_s3 + $0x1120] ss:$16 sps:$4 sm:$0xff]  }
 0xa9d   :  { %10112 = vmatpush1.bf16.msra.mxu1 %v21535_v3  ;;  %10165 = vmatpush1.bf16.msra.mxu0 %v21538_v45  ;;  %v21585_v3 = vld [vmem:[%s29346_s5 + $0x1244] ss:$40 sps:$4 sm:$0xff]   ;;  %v21583_v45 = vld [vmem:[%s29346_s5 + $0x1240] ss:$40 sps:$4 sm:$0xff]  }
 0xa9e   :  { %10113 = vmatprep.subr.bf16.mxu1 %v21543_v24  ;;  %10166 = vmatprep.subr.bf16.mxu0 %v21546_v61  ;;  %v21588_v24 = vld [vmem:[%s29346_s5 + $0x1294] ss:$40 sps:$4 sm:$0xff]   ;;  %v21586_v61 = vld [vmem:[%s29346_s5 + $0x1290] ss:$40 sps:$4 sm:$0xff]  }
 0xaa1   :  { %10114 = vmatpush1.bf16.msra.mxu1 %v21541_v22  ;;  %10167 = vmatpush1.bf16.msra.mxu0 %v21544_v55  ;;  %v21591_v22 = vld [vmem:[%s29346_s5 + $0x12e4] ss:$40 sps:$4 sm:$0xff]   ;;  %v21589_v55 = vld [vmem:[%s29346_s5 + $0x12e0] ss:$40 sps:$4 sm:$0xff]  }
 0xaa2   :  { %10115 = vmatprep.subr.bf16.mxu1 %v21549_v35  ;;  %10168 = vmatprep.subr.bf16.mxu0 %v21552_v17  ;;  %v21594_v35 = vld [vmem:[%s29346_s5 + $0x1334] ss:$40 sps:$4 sm:$0xff]   ;;  %v21592_v17 = vld [vmem:[%s29346_s5 + $0x1330] ss:$40 sps:$4 sm:$0xff]  }
 0xaa5   :  { %10116 = vmatpush1.bf16.msra.mxu1 %v21547_v54  ;;  %10169 = vmatpush1.bf16.msra.mxu0 %v21550_v53  ;;  %v21597_v54 = vld [vmem:[%s29346_s5 + $0x1384] ss:$40 sps:$4 sm:$0xff]   ;;  %v21595_v53 = vld [vmem:[%s29346_s5 + $0x1380] ss:$40 sps:$4 sm:$0xff]  }
 0xaa6   :  { %10191 = vmatprep.subr.bf16.mxu0 %v21555_v29  ;;  %11220 = vmatprep.subr.bf16.mxu1 %v21603_v16  ;;  %v21600_v29 = vld [vmem:[%s29346_s5 + $0x13d4] ss:$40 sps:$4 sm:$0xff]   ;;  %v21598_v16 = vld [vmem:[%s29346_s5 + $0x13d0] ss:$40 sps:$4 sm:$0xff]  }
 0xaa8   :  { %10118 = vmatmul.mubr.bf16.vlgmr.msra.gmra.mrb[24].mxu1 %v26627_v41  ;;  %10171 = vmatmul.mubr.bf16.vlgmr.msra.gmra.mrb[24].mxu0 %v26627_v41 }
 0xaa9   :  { %10127 = vmatprep.mubr.bf16.mxu1 %v26661_v13  ;;  %10180 = vmatprep.mubr.bf16.mxu0 %v26661_v13 }
 0xaaa   :  { %10192 = vmatpush1.bf16.msra.mxu0 %v21553_v50  ;;  %11221 = vmatpush1.bf16.msra.mxu1 %v21601_v56  ;;  %v21606_v50 = vld [vmem:[%s29344_s3 + $0x100c] ss:$16 sps:$4 sm:$0xff]   ;;  %v21604_v56 = vld [vmem:[%s29344_s3 + $0x1008] ss:$16 sps:$4 sm:$0xff]  }
 0xaab   :  { %10193 = vmatprep.subr.bf16.mxu0 %v21558_v15  ;;  %11222 = vmatprep.subr.bf16.mxu1 %v21609_v58  ;;  %v21612_v15 = vld [vmem:[%s29344_s3 + $0x102c] ss:$16 sps:$4 sm:$0xff]   ;;  %v21610_v58 = vld [vmem:[%s29344_s3 + $0x1028] ss:$16 sps:$4 sm:$0xff]  }
 0xaae   :  { %10194 = vmatpush1.bf16.msra.mxu0 %v21556_v51  ;;  %11223 = vmatpush1.bf16.msra.mxu1 %v21607_v32  ;;  %v21618_v51 = vld [vmem:[%s29344_s3 + $0x104c] ss:$16 sps:$4 sm:$0xff]   ;;  %v21616_v32 = vld [vmem:[%s29344_s3 + $0x1048] ss:$16 sps:$4 sm:$0xff]  }
 0xaaf   :  { %10195 = vmatprep.subr.bf16.mxu0 %v21561_v18  ;;  %11224 = vmatprep.subr.bf16.mxu1 %v21615_v28  ;;  %v21630_v18 = vld [vmem:[%s29344_s3 + $0x108c] ss:$16 sps:$4 sm:$0xff]   ;;  %v21628_v28 = vld [vmem:[%s29344_s3 + $0x1088] ss:$16 sps:$4 sm:$0xff]  }
 0xab0   :  { %10128 = vmatmul.mubr.bf16.gmra.mrb[28].mxu1 %v26659_v1  ;;  %10181 = vmatmul.mubr.bf16.gmra.mrb[28].mxu0 %v26659_v1 }
 0xab1   :  { %10223 = vmatprep.mubr.bf16.mxu0 %v26629_v47  ;;  %v21627_v47 = vld [vmem:[%s29344_s3 + $0x1084] ss:$16 sps:$4 sm:$0xff]  }
 0xab2   :  { %10196 = vmatpush1.bf16.msra.mxu0 %v21559_v27  ;;  %11225 = vmatpush1.bf16.msra.mxu1 %v21613_v0  ;;  %v21634_v27 = vld [vmem:[%s29344_s3 + $0x10a8] ss:$16 sps:$4 sm:$0xff]   ;;  %v21642_v0 = vld [vmem:[%s29344_s3 + $0x10cc] ss:$16 sps:$4 sm:$0xff]  }
 0xab3   :  { %10197 = vmatprep.subr.bf16.mxu0 %v21564_v2  ;;  %11226 = vmatprep.subr.bf16.mxu1 %v21621_v30  ;;  %v21640_v2 = vld [vmem:[%s29344_s3 + $0x10c8] ss:$16 sps:$4 sm:$0xff]   ;;  %v21648_v30 = vld [vmem:[%s29344_s3 + $0x10ec] ss:$16 sps:$4 sm:$0xff]  }
 0xab6   :  { %10198 = vmatpush1.bf16.msra.mxu0 %v21562_v31  ;;  %11227 = vmatpush1.bf16.msra.mxu1 %v21619_v33  ;;  %v21646_v31 = vld [vmem:[%s29344_s3 + $0x10e8] ss:$16 sps:$4 sm:$0xff]   ;;  %v21654_v33 = vld [vmem:[%s29344_s3 + $0x110c] ss:$16 sps:$4 sm:$0xff]  }
 0xab7   :  { %10199 = vmatprep.subr.bf16.mxu0 %v21567_v60  ;;  %11228 = vmatprep.subr.bf16.mxu1 %v21627_v47  ;;  %v21652_v60 = vld [vmem:[%s29344_s3 + $0x1108] ss:$16 sps:$4 sm:$0xff]   ;;  %v21660_v47 = vld [vmem:[%s29344_s3 + $0x112c] ss:$16 sps:$4 sm:$0xff]  }
 0xaba   :  { %10200 = vmatpush1.bf16.msra.mxu0 %v21565_v43  ;;  %11229 = vmatpush1.bf16.msra.mxu1 %v21625_v34  ;;  %v21658_v43 = vld [vmem:[%s29344_s3 + $0x1128] ss:$16 sps:$4 sm:$0xff]   ;;  %v21663_v34 = vld [vmem:[%s29344_s3 + $0x1144] ss:$16 sps:$4 sm:$0xff]  }
 0xabb   :  { %10201 = vmatprep.subr.bf16.mxu0 %v21570_v52  ;;  %11230 = vmatprep.subr.bf16.mxu1 %v21633_v25  ;;  %v21666_v52 = vld [vmem:[%s29344_s3 + $0x114c] ss:$16 sps:$4 sm:$0xff]   ;;  %v21661_v25 = vld [vmem:[%s29344_s3 + $0x1140] ss:$16 sps:$4 sm:$0xff]  }
 0xabe   :  { %10202 = vmatpush1.bf16.msra.mxu0 %v21568_v12  ;;  %11231 = vmatpush1.bf16.msra.mxu1 %v21631_v37  ;;  %v21664_v12 = vld [vmem:[%s29344_s3 + $0x1148] ss:$16 sps:$4 sm:$0xff]   ;;  %v21669_v37 = vld [vmem:[%s29344_s3 + $0x1164] ss:$16 sps:$4 sm:$0xff]  }
 0xabf   :  { %10203 = vmatprep.subr.bf16.mxu0 %v21573_v19  ;;  %11232 = vmatprep.subr.bf16.mxu1 %v21639_v40  ;;  %v21672_v19 = vld [vmem:[%s29344_s3 + $0x116c] ss:$16 sps:$4 sm:$0xff]   ;;  %v21667_v40 = vld [vmem:[%s29344_s3 + $0x1160] ss:$16 sps:$4 sm:$0xff]  }
 0xac2   :  { %10204 = vmatpush1.bf16.msra.mxu0 %v21571_v46  ;;  %11233 = vmatpush1.bf16.msra.mxu1 %v21637_v63  ;;  %v21670_v46 = vld [vmem:[%s29344_s3 + $0x1168] ss:$16 sps:$4 sm:$0xff]   ;;  %v21675_v63 = vld [vmem:[%s29344_s3 + $0x1184] ss:$16 sps:$4 sm:$0xff]  }
 0xac3   :  { %10205 = vmatprep.subr.bf16.mxu0 %v21576_v26  ;;  %11234 = vmatprep.subr.bf16.mxu1 %v21645_v49  ;;  %v21678_v26 = vld [vmem:[%s29344_s3 + $0x118c] ss:$16 sps:$4 sm:$0xff]   ;;  %v21673_v49 = vld [vmem:[%s29344_s3 + $0x1180] ss:$16 sps:$4 sm:$0xff]  }
 0xac6   :  { %10206 = vmatpush1.bf16.msra.mxu0 %v21574_v5  ;;  %11235 = vmatpush1.bf16.msra.mxu1 %v21643_v4  ;;  %v21676_v5 = vld [vmem:[%s29344_s3 + $0x1188] ss:$16 sps:$4 sm:$0xff]   ;;  %v21681_v4 = vld [vmem:[%s29344_s3 + $0x11a4] ss:$16 sps:$4 sm:$0xff]  }
 0xac7   :  { %10207 = vmatprep.subr.bf16.mxu0 %v21579_v21  ;;  %11236 = vmatprep.subr.bf16.mxu1 %v21651_v39  ;;  %v21684_v21 = vld [vmem:[%s29344_s3 + $0x11ac] ss:$16 sps:$4 sm:$0xff]   ;;  %v21679_v39 = vld [vmem:[%s29344_s3 + $0x11a0] ss:$16 sps:$4 sm:$0xff]  }
 0xaca   :  { %10208 = vmatpush1.bf16.msra.mxu0 %v21577_v36  ;;  %11237 = vmatpush1.bf16.msra.mxu1 %v21649_v23  ;;  %v21682_v36 = vld [vmem:[%s29344_s3 + $0x11a8] ss:$16 sps:$4 sm:$0xff]   ;;  %v21687_v23 = vld [vmem:[%s29344_s3 + $0x11c4] ss:$16 sps:$4 sm:$0xff]  }
 0xacb   :  { %10209 = vmatprep.subr.bf16.mxu0 %v21582_v7  ;;  %11238 = vmatprep.subr.bf16.mxu1 %v21657_v57  ;;  %v21690_v7 = vld [vmem:[%s29344_s3 + $0x11cc] ss:$16 sps:$4 sm:$0xff]   ;;  %v21685_v57 = vld [vmem:[%s29344_s3 + $0x11c0] ss:$16 sps:$4 sm:$0xff]  }
 0xace   :  { %10210 = vmatpush1.bf16.msra.mxu0 %v21580_v48  ;;  %11239 = vmatpush1.bf16.msra.mxu1 %v21655_v14  ;;  %v21688_v48 = vld [vmem:[%s29344_s3 + $0x11c8] ss:$16 sps:$4 sm:$0xff]   ;;  %v21693_v14 = vld [vmem:[%s29344_s3 + $0x11e4] ss:$16 sps:$4 sm:$0xff]  }
 0xacf   :  { %10211 = vmatprep.subr.bf16.mxu0 %v21585_v3  ;;  %11240 = vmatprep.subr.bf16.mxu1 %v21663_v34  ;;  %v21696_v3 = vld [vmem:[%s29344_s3 + $0x11ec] ss:$16 sps:$4 sm:$0xff]  }
 0xad2   :  { %10212 = vmatpush1.bf16.msra.mxu0 %v21583_v45  ;;  %11241 = vmatpush1.bf16.msra.mxu1 %v21661_v25  ;;  %v21691_v45 = vld [vmem:[%s29344_s3 + $0x11e0] ss:$16 sps:$4 sm:$0xff]   ;;  %v10335_v25 = vld [vmem:[#allocation2 + $0x8] sm:$0xc0] }
 0xad3   :  { %10213 = vmatprep.subr.bf16.mxu0 %v21588_v24  ;;  %11242 = vmatprep.subr.bf16.mxu1 %v21669_v37  ;;  %v21694_v24 = vld [vmem:[%s29344_s3 + $0x11e8] ss:$16 sps:$4 sm:$0xff]  }
 0xad6   :  { %10214 = vmatpush1.bf16.msra.mxu0 %v21586_v61  ;;  %11243 = vmatpush1.bf16.msra.mxu1 %v21667_v40  ;;  %v21699_v61 = vld [vmem:[%s29344_s3 + $0x1204] ss:$16 sps:$4 sm:$0xff]  }
 0xad7   :  { %10215 = vmatprep.subr.bf16.mxu0 %v21591_v22  ;;  %11244 = vmatprep.subr.bf16.mxu1 %v21675_v63  ;;  %v21702_v22 = vld [vmem:[%s29344_s3 + $0x120c] ss:$16 sps:$4 sm:$0xff]  }
 0xada   :  { %10216 = vmatpush1.bf16.msra.mxu0 %v21589_v55  ;;  %11245 = vmatpush1.bf16.msra.mxu1 %v21673_v49  ;;  %v18180_v55 = vld [vmem:[%s29348_s7 + $0x6] sm:$0x3] }
 0xadb   :  { %10217 = vmatprep.subr.bf16.mxu0 %v21594_v35  ;;  %11246 = vmatprep.subr.bf16.mxu1 %v21681_v4  ;;  %v18181_v35 = vld [vmem:[%s29349_s8 + $0x6] sm:$0x3] }
 0xade   :  { %10218 = vmatpush1.bf16.msra.mxu0 %v21592_v17  ;;  %11247 = vmatpush1.bf16.msra.mxu1 %v21679_v39  ;;  %v10282_v17 = vrot.slane %v18180_v55, %v23184_v10 }
 0xadf   :  { %10219 = vmatprep.subr.bf16.mxu0 %v21597_v54  ;;  %11248 = vmatprep.subr.bf16.mxu1 %v21687_v23  ;;  %v10303_v54 = vrot.slane %v18181_v35, %v23184_v10 }
 0xae1   :  { %v10314_v34 = vmul.f32 %v10303_v54, %v26190_v9 }
 0xae2   :  { %10220 = vmatpush1.bf16.msra.mxu0 %v21595_v53  ;;  %11249 = vmatpush1.bf16.msra.mxu1 %v21685_v57  ;;  %v10286_v53 = vrot.slane %v18180_v55, %v23187_v11 }
 0xae3   :  { %10221 = vmatprep.subr.bf16.mxu0 %v21600_v29  ;;  %11250 = vmatprep.subr.bf16.mxu1 %v21693_v14  ;;  %v10307_v29 = vrot.slane %v18181_v35, %v23187_v11 }
 0xae6   :  { %10222 = vmatpush1.bf16.msra.mxu0 %v21598_v16  ;;  %11251 = vmatpush1.bf16.msra.mxu1 %v21691_v45 }
 0xae7   :  { %11326 = vmatprep.subr.bf16.mxu0 %v21606_v50  ;;  %11273 = vmatprep.subr.bf16.mxu1 %v21699_v61 }
 0xae9   :  { %10224 = vmatmul.mubr.bf16.vlgmr.msra.gmra.mrb[64].mxu0 %v26627_v41  ;;  %v21624_v41 = vld [vmem:[%s29344_s3 + $0x106c] ss:$16 sps:$4 sm:$0xff]  }
 0xaea   :  { %10233 = vmatprep.mubr.bf16.mxu0 %v26661_v13  ;;  %11327 = vmatpush1.bf16.msra.mxu0 %v21604_v56  ;;  %v21622_v13 = vld [vmem:[%s29344_s3 + $0x1068] ss:$16 sps:$4 sm:$0xff]   ;;  %v10310_v56 = vmul.f32 %v10303_v54, %v26170_v38 }
 0xaeb   :  { %11328 = vmatprep.subr.bf16.mxu0 %v21612_v15 }
 0xaee   :  { %11329 = vmatpush1.bf16.msra.mxu0 %v21610_v58 }
 0xaef   :  { %11330 = vmatprep.subr.bf16.mxu0 %v21618_v51  ;;  %v10311_v51 = vmul.f32 %v10307_v29, %v26173_v44 }
 0xaf1   :  { %10234 = vmatmul.mubr.bf16.gmra.mrb[68].mxu0 %v26659_v1  ;;  %v21636_v1 = vld [vmem:[%s29344_s3 + $0x10ac] ss:$16 sps:$4 sm:$0xff]  }
 0xaf2   :  { %11331 = vmatpush1.bf16.msra.mxu0 %v21616_v32 }
 0xaf3   :  { %11332 = vmatprep.subr.bf16.mxu0 %v21624_v41 }
 0xaf6   :  { %11333 = vmatpush1.bf16.msra.mxu0 %v21622_v13 }
 0xaf7   :  { %11334 = vmatprep.subr.bf16.mxu0 %v21630_v18  ;;  %v10312_v18 = vmul.f32 %v10303_v54, %v26176_v6  ;;  %v10334_v6 = vld [vmem:[#allocation2] sm:$0xc0] }
 0xafa   :  { %11335 = vmatpush1.bf16.msra.mxu0 %v21628_v28 }
 0xafb   :  { %11336 = vmatprep.subr.bf16.mxu0 %v21636_v1 }
 0xafe   :  { %11337 = vmatpush1.bf16.msra.mxu0 %v21634_v27 }
 0xaff   :  { %11338 = vmatprep.subr.bf16.mxu0 %v21642_v0  ;;  %v10313_v0 = vmul.f32 %v10307_v29, %v26181_v42 }
 0xb02   :  { %11339 = vmatpush1.bf16.msra.mxu0 %v21640_v2 }
 0xb03   :  { %11340 = vmatprep.subr.bf16.mxu0 %v21648_v30 }
 0xb06   :  { %11341 = vmatpush1.bf16.msra.mxu0 %v21646_v31 }
 0xb07   :  { %11342 = vmatprep.subr.bf16.mxu0 %v21654_v33 }
 0xb0a   :  { %11343 = vmatpush1.bf16.msra.mxu0 %v21652_v60 }
 0xb0b   :  { %11344 = vmatprep.subr.bf16.mxu0 %v21660_v47 }
 0xb0e   :  { %11345 = vmatpush1.bf16.msra.mxu0 %v21658_v43 }
 0xb0f   :  { %11346 = vmatprep.subr.bf16.mxu0 %v21666_v52  ;;  %v10315_v52 = vmul.f32 %v10307_v29, %v26192_v20 }
 0xb12   :  { %11347 = vmatpush1.bf16.msra.mxu0 %v21664_v12 }
 0xb13   :  { %11348 = vmatprep.subr.bf16.mxu0 %v21672_v19  ;;  %v22903_v19 = vld [vmem:[#allocation2 + $0x40] sm:$0xff] }
 0xb14   :  { %v10316_v40 = vmul.f32 %v22903_v19, %v10303_v54 }
 0xb16   :  { %11349 = vmatpush1.bf16.msra.mxu0 %v21670_v46 }
 0xb17   :  { %11350 = vmatprep.subr.bf16.mxu0 %v21678_v26 }
 0xb1a   :  { %11351 = vmatpush1.bf16.msra.mxu0 %v21676_v5 }
 0xb1b   :  { %11352 = vmatprep.subr.bf16.mxu0 %v21684_v21 }
 0xb1e   :  { %11353 = vmatpush1.bf16.msra.mxu0 %v21682_v36  ;;  %v22904_v36 = vld [vmem:[#allocation2 + $0x48] sm:$0xff] }
 0xb1f   :  { %11354 = vmatprep.subr.bf16.mxu0 %v21690_v7  ;;  %v10317_v20 = vmul.f32 %v22904_v36, %v10307_v29  ;;  %v21717_v36 = vld [vmem:[%s29344_s3 + $0x1264] ss:$16 sps:$4 sm:$0xff]  }
 0xb22   :  { %11355 = vmatpush1.bf16.msra.mxu0 %v21688_v48 }
 0xb23   :  { %11356 = vmatprep.subr.bf16.mxu0 %v21696_v3 }
 0xb26   :  { %11357 = vmatpush1.bf16.msra.mxu0 %v21694_v24 }
 0xb27   :  { %11379 = vmatprep.subr.bf16.mxu0 %v21702_v22 }
 0xbbc   :  { %v10225_v16 = vpop.f32.mrb[64].mxu0 }
 0xbbd   :  { %v10289_v50 = vadd.f32 %v10282_v17, %v10225_v16  ;;  %v10227_v15 = vpop.f32.mrb[65].mxu0  ;;  %v21697_v16 = vld [vmem:[%s29344_s3 + $0x1200] ss:$16 sps:$4 sm:$0xff]  }
 0xbbe   :  { %v10290_v58 = vadd.f32 %v10286_v53, %v10227_v15  ;;  %v10229_v32 = vpop.f32.mrb[66].mxu0 }
 0xbbf   :  { %v27147_v41 = vadd.f32 %v10310_v56, %v10289_v50  ;;  %v10291_v13 = vadd.f32 %v10282_v17, %v10229_v32  ;;  %v10231_v28 = vpop.f32.mrb[67].mxu0  ;;  %v21700_v50 = vld [vmem:[%s29344_s3 + $0x1208] ss:$16 sps:$4 sm:$0xff]   ;;  %v21708_v32 = vld [vmem:[%s29344_s3 + $0x122c] ss:$16 sps:$4 sm:$0xff]  }
 0xbc0   :  { %v27150_v1 = vadd.f32 %v10311_v51, %v10290_v58  ;;  %v10292_v27 = vadd.f32 %v10286_v53, %v10231_v28  ;;  %v21705_v51 = vld [vmem:[%s29344_s3 + $0x1224] ss:$16 sps:$4 sm:$0xff]  }
 0xbc1   :  { %v27153_v2 = vadd.f32 %v10312_v18, %v10291_v13  ;;  %v10352_v38 = vrot.slane %v27147_v41, 2  ;;  %v10376_v4 = vpack.c.bf16 %v27147_v41, %v10334_v6 }
 0xbc2   :  { %v27155_v30 = vadd.f32 %v10313_v0, %v10292_v27  ;;  %v10353_v31 = vrot.slane %v27150_v1, 2  ;;  %v10377_v23 = vpack.c.bf16 %v27150_v1, %v10335_v25 }
 0xbc3   :  { %v10354_v44 = vrot.slane %v27153_v2, 2  ;;  %v10552_v22 = vrot.slane %v10376_v4, 3  ;;  %v21712_v4 = vld [vmem:[%s29344_s3 + $0x1248] ss:$16 sps:$4 sm:$0xff]  }
 0xbc4   :  { %v10356_v33 = vrot.slane %v27155_v30, 2  ;;  %v10235_v60 = vpop.f32.mrb[68].mxu0 }
 0xbc5   :  { %v10355_v47 = vsel %vm2758_vm3, %v10352_v38, %v10354_v44  ;;  %v10293_v43 = vadd.f32 %v10282_v17, %v10235_v60  ;;  %v10237_v42 = vpop.f32.mrb[69].mxu0  ;;  %v21706_v60 = vld [vmem:[%s29344_s3 + $0x1228] ss:$16 sps:$4 sm:$0xff]  }
 0xbc6   :  { %v10294_v12 = vadd.f32 %v10286_v53, %v10237_v42  ;;  %v10239_v37 = vpop.f32.mrb[70].mxu0  ;;  %v10357_v46 = vsel %vm2758_vm3, %v10353_v31, %v10356_v33  ;;  %v10378_v63 = vpack.c.bf16 %v10355_v47, %v10352_v38 }
 0xbc7   :  { %v27165_v26 = vadd.f32 %v10314_v34, %v10293_v43  ;;  %v10295_v49 = vadd.f32 %v10282_v17, %v10239_v37  ;;  %v10241_v5 = vpop.f32.mrb[71].mxu0  ;;  %v10379_v21 = vpack.c.bf16 %v10357_v46, %v10353_v31  ;;  %v10555_v17 = vrot.slane %v10377_v23, 3  ;;  %v21711_v43 = vld [vmem:[%s29344_s3 + $0x1244] ss:$16 sps:$4 sm:$0xff]   ;;  %v21714_v34 = vld [vmem:[%s29344_s3 + $0x124c] ss:$16 sps:$4 sm:$0xff]  }
 0xbc8   :  { %v27168_v39 = vadd.f32 %v10315_v52, %v10294_v12  ;;  %v10296_v9 = vadd.f32 %v10286_v53, %v10241_v5  ;;  %v10558_v38 = vrot.slane %v10378_v63, 3  ;;  %v21709_v5 = vld [vmem:[%s29344_s3 + $0x1240] ss:$16 sps:$4 sm:$0xff]  }
 0xbc9   :  { %v10358_v7 = vrot.slane %v27165_v26, 2  ;;  %v10324_v57 = vadd.f32 %v10316_v40, %v10295_v49  ;;  %v10380_v48 = vpack.c.bf16 %v27165_v26, %v27153_v2  ;;  %v10561_v6 = vrot.slane %v10379_v21, 3  ;;  %v21715_v23 = vld [vmem:[%s29344_s3 + $0x1260] ss:$16 sps:$4 sm:$0xff]  }
 0xbca   :  { %v10360_v14 = vrot.slane %v27168_v39, 2  ;;  %v10325_v3 = vadd.f32 %v10317_v20, %v10296_v9  ;;  %v10381_v45 = vpack.c.bf16 %v27168_v39, %v27155_v30  ;;  %v21720_v20 = vld [vmem:[%s29344_s3 + $0x126c] ss:$16 sps:$4 sm:$0xff]  }
 0xbcb   :  { %v10359_v24 = vsel %vm2758_vm3, %v10354_v44, %v10358_v7  ;;  %10332 = vst [vmem:[#allocation2 + $0x40] sm:$0xff] %v10324_v57  ;;  %v10362_v61 = vrot.slane %v10324_v57, 2  ;;  %v10553_v55 = vrot.slane %v10380_v48, 3  ;;  %v21723_v57 = vld [vmem:[%s29344_s3 + $0x1284] ss:$16 sps:$4 sm:$0xff]  }
 0xbcc   :  { %10333 = vst [vmem:[#allocation2 + $0x48] sm:$0xff] %v10325_v3  ;;  %v10364_v35 = vrot.slane %v10325_v3, 2  ;;  %v10556_v54 = vrot.slane %v10381_v45, 3  ;;  %v10361_v53 = vsel %vm2758_vm3, %v10356_v33, %v10360_v14  ;;  %v21703_v33 = vld [vmem:[%s29344_s3 + $0x1220] ss:$16 sps:$4 sm:$0xff]  }
 0xbcd   :  { %v10363_v29 = vsel %vm2758_vm3, %v10358_v7, %v10362_v61  ;;  %v10554_v56 = vsel %vm2959_vm4, %v10552_v22, %v10553_v55  ;;  %v10386_v15 = vpack.c.bf16 %v10362_v61, %v10362_v61  ;;  %v21718_v7 = vld [vmem:[%s29344_s3 + $0x1268] ss:$16 sps:$4 sm:$0xff]   ;;  %v21726_v48 = vld [vmem:[%s29344_s3 + $0x128c] ss:$16 sps:$4 sm:$0xff]   ;;  %v21729_v45 = vld [vmem:[%s29344_s3 + $0x12a4] ss:$16 sps:$4 sm:$0xff]  }
 0xbce   :  { %v10557_v58 = vsel %vm2959_vm4, %v10555_v17, %v10556_v54  ;;  %v10365_v13 = vsel %vm2758_vm3, %v10360_v14, %v10364_v35  ;;  %v10382_v18 = vpack.c.bf16 %v10363_v29, %v10359_v24  ;;  %v10387_v28 = vpack.c.bf16 %v10364_v35, %v10364_v35  ;;  %v21721_v14 = vld [vmem:[%s29344_s3 + $0x1280] ss:$16 sps:$4 sm:$0xff]   ;;  %v21724_v3 = vld [vmem:[%s29344_s3 + $0x1288] ss:$16 sps:$4 sm:$0xff]   ;;  %v21732_v24 = vld [vmem:[%s29344_s3 + $0x12ac] ss:$16 sps:$4 sm:$0xff]  }
 0xbcf   :  { %11252 = vmatprep.mubr.bf16.mxu1 %v10557_v58  ;;  %11358 = vmatprep.mubr.bf16.mxu0 %v10557_v58  ;;  %v10383_v27 = vpack.c.bf16 %v10365_v13, %v10361_v53  ;;  %v10568_v0 = vrot.slane %v10386_v15, 3  ;;  %v21727_v61 = vld [vmem:[%s29344_s3 + $0x12a0] ss:$16 sps:$4 sm:$0xff]   ;;  %v21730_v22 = vld [vmem:[%s29344_s3 + $0x12a8] ss:$16 sps:$4 sm:$0xff]  }
 0xbd0   :  { %11253 = vmatmul.mubr.bf16.vlgmr.msra.gmra.mrb[72].mxu1 %v10554_v56  ;;  %11359 = vmatmul.mubr.bf16.vlgmr.msra.gmra.mrb[72].mxu0 %v10554_v56  ;;  %v10559_v44 = vrot.slane %v10382_v18, 3  ;;  %v10570_v31 = vrot.slane %v10387_v28, 3  ;;  %v21738_v35 = vld [vmem:[%s29344_s3 + $0x12cc] ss:$16 sps:$4 sm:$0xff]   ;;  %v21733_v17 = vld [vmem:[%s29344_s3 + $0x12c0] ss:$16 sps:$4 sm:$0xff]  }
 0xbd1   :  { %11274 = vmatpush1.bf16.msra.mxu1 %v21697_v16  ;;  %11380 = vmatpush1.bf16.msra.mxu0 %v21700_v50  ;;  %v10562_v47 = vrot.slane %v10383_v27, 3  ;;  %v21741_v53 = vld [vmem:[%s29344_s3 + $0x12e4] ss:$16 sps:$4 sm:$0xff]   ;;  %v21744_v29 = vld [vmem:[%s29344_s3 + $0x12ec] ss:$16 sps:$4 sm:$0xff]  }
 0xbd2   :  { %11275 = vmatprep.subr.bf16.mxu1 %v21705_v51  ;;  %11381 = vmatprep.subr.bf16.mxu0 %v21708_v32  ;;  %v10342_v42 = vld [vmem:[#allocation2 + $0x40] sm:$0x3f]  ;;  %v27208_v52 = vsel %vm2959_vm4, %v10558_v38, %v10559_v44  ;;  %v27211_v25 = vsel %vm2959_vm4, %v10559_v44, %v10568_v0  ;;  %v21742_v50 = vld [vmem:[%s29344_s3 + $0x12e8] ss:$16 sps:$4 sm:$0xff]   ;;  %v21750_v15 = vld [vmem:[%s29344_s3 + $0x130c] ss:$16 sps:$4 sm:$0xff]  }
 0xbd3   :  { %v10343_v12 = vld [vmem:[#allocation2 + $0x48] sm:$0x3f]  ;;  %v10384_v37 = vpack.c.bf16 %v10342_v42, %v10342_v42  ;;  %v10563_v19 = vsel %vm2959_vm4, %v10561_v6, %v10562_v47  ;;  %v27215_v40 = vsel %vm2959_vm4, %v10562_v47, %v10570_v31  ;;  %v21739_v16 = vld [vmem:[%s29344_s3 + $0x12e0] ss:$16 sps:$4 sm:$0xff]   ;;  %v21747_v56 = vld [vmem:[%s29344_s3 + $0x1304] ss:$16 sps:$4 sm:$0xff]  }
 0xbd4   :  { %v10385_v46 = vpack.c.bf16 %v10343_v12, %v10343_v12  ;;  %v21745_v58 = vld [vmem:[%s29344_s3 + $0x1300] ss:$16 sps:$4 sm:$0xff]   ;;  %v21748_v51 = vld [vmem:[%s29344_s3 + $0x1308] ss:$16 sps:$4 sm:$0xff]   ;;  %v21753_v32 = vld [vmem:[%s29344_s3 + $0x1324] ss:$16 sps:$4 sm:$0xff]  }
 0xbd5   :  { %11276 = vmatpush1.bf16.msra.mxu1 %v21703_v33  ;;  %11382 = vmatpush1.bf16.msra.mxu0 %v21706_v60  ;;  %v10564_v63 = vrot.slane %v10384_v37, 3  ;;  %v21756_v13 = vld [vmem:[%s29344_s3 + $0x132c] ss:$16 sps:$4 sm:$0xff]   ;;  %v21751_v18 = vld [vmem:[%s29344_s3 + $0x1320] ss:$16 sps:$4 sm:$0xff]  }
 0xbd6   :  { %v10566_v49 = vrot.slane %v10385_v46, 3  ;;  %11277 = vmatprep.subr.bf16.mxu1 %v21711_v43  ;;  %11383 = vmatprep.subr.bf16.mxu0 %v21714_v34  ;;  %v21754_v28 = vld [vmem:[%s29344_s3 + $0x1328] ss:$16 sps:$4 sm:$0xff]   ;;  %v21759_v27 = vld [vmem:[%s29344_s3 + $0x1344] ss:$16 sps:$4 sm:$0xff]  }
 0xbd7   :  { %v10565_v9 = vsel %vm2959_vm4, %v10553_v55, %v10564_v63  ;;  %v21735_v55 = vld [vmem:[%s29344_s3 + $0x12c4] ss:$16 sps:$4 sm:$0xff]   ;;  %v21762_v0 = vld [vmem:[%s29344_s3 + $0x134c] ss:$16 sps:$4 sm:$0xff]   ;;  %v21757_v38 = vld [vmem:[%s29344_s3 + $0x1340] ss:$16 sps:$4 sm:$0xff]  }
 0xbd8   :  { %v10567_v21 = vsel %vm2959_vm4, %v10556_v54, %v10566_v49  ;;  %v21736_v54 = vld [vmem:[%s29344_s3 + $0x12c8] ss:$16 sps:$4 sm:$0xff]   ;;  %v21765_v31 = vld [vmem:[%s29344_s3 + $0x1364] ss:$16 sps:$4 sm:$0xff]   ;;  %v21768_v33 = vld [vmem:[%s29344_s3 + $0x136c] ss:$16 sps:$4 sm:$0xff]  }
 0xbd9   :  { %11262 = vmatprep.mubr.bf16.mxu1 %v10567_v21  ;;  %11368 = vmatprep.mubr.bf16.mxu0 %v10567_v21  ;;  %v21760_v44 = vld [vmem:[%s29344_s3 + $0x1348] ss:$16 sps:$4 sm:$0xff]   ;;  %v21763_v60 = vld [vmem:[%s29344_s3 + $0x1360] ss:$16 sps:$4 sm:$0xff]   ;;  %v21771_v47 = vld [vmem:[%s29344_s3 + $0x1384] ss:$16 sps:$4 sm:$0xff]  }
 0xbda   :  { %11263 = vmatmul.mubr.bf16.gmra.mrb[76].mxu1 %v10565_v9  ;;  %11369 = vmatmul.mubr.bf16.gmra.mrb[76].mxu0 %v10565_v9  ;;  %v21766_v6 = vld [vmem:[%s29344_s3 + $0x1368] ss:$16 sps:$4 sm:$0xff]   ;;  %v21774_v43 = vld [vmem:[%s29344_s3 + $0x138c] ss:$16 sps:$4 sm:$0xff]   ;;  %v21769_v34 = vld [vmem:[%s29344_s3 + $0x1380] ss:$16 sps:$4 sm:$0xff]  }
 0xbdb   :  { %11278 = vmatpush1.bf16.msra.mxu1 %v21709_v5  ;;  %11384 = vmatpush1.bf16.msra.mxu0 %v21712_v4  ;;  %v21772_v42 = vld [vmem:[%s29344_s3 + $0x1388] ss:$16 sps:$4 sm:$0xff]   ;;  %v21777_v12 = vld [vmem:[%s29344_s3 + $0x13a4] ss:$16 sps:$4 sm:$0xff]   ;;  %v21780_v37 = vld [vmem:[%s29344_s3 + $0x13ac] ss:$16 sps:$4 sm:$0xff]  }
 0xbdc   :  { %11305 = vmatprep.mubr.bf16.mxu1 %v10563_v19  ;;  %11411 = vmatprep.mubr.bf16.mxu0 %v10563_v19  ;;  %v21775_v19 = vld [vmem:[%s29344_s3 + $0x13a0] ss:$16 sps:$4 sm:$0xff]   ;;  %v21778_v46 = vld [vmem:[%s29344_s3 + $0x13a8] ss:$16 sps:$4 sm:$0xff]   ;;  %v21783_v63 = vld [vmem:[%s29344_s3 + $0x13c4] ss:$16 sps:$4 sm:$0xff]  }
 0xbdd   :  { %11279 = vmatprep.subr.bf16.mxu1 %v21717_v36  ;;  %11385 = vmatprep.subr.bf16.mxu0 %v21720_v20  ;;  %v21786_v49 = vld [vmem:[%s29344_s3 + $0x13cc] ss:$16 sps:$4 sm:$0xff]   ;;  %v21781_v5 = vld [vmem:[%s29344_s3 + $0x13c0] ss:$16 sps:$4 sm:$0xff]   ;;  %v21784_v4 = vld [vmem:[%s29344_s3 + $0x13c8] ss:$16 sps:$4 sm:$0xff]  }
 0xbde   :  { %v21789_v21 = vld [vmem:[%s29344_s3 + $0x13e4] ss:$16 sps:$4 sm:$0xff]   ;;  %v21792_v9 = vld [vmem:[%s29344_s3 + $0x13ec] ss:$16 sps:$4 sm:$0xff]   ;;  %v21787_v36 = vld [vmem:[%s29344_s3 + $0x13e0] ss:$16 sps:$4 sm:$0xff]  }
 0xbdf   :  { %11280 = vmatpush1.bf16.msra.mxu1 %v21715_v23  ;;  %11386 = vmatpush1.bf16.msra.mxu0 %v21718_v7  ;;  %v21790_v20 = vld [vmem:[%s29344_s3 + $0x13e8] ss:$16 sps:$4 sm:$0xff]   ;;  %v21795_v23 = vld [vmem:[%s29346_s5 + $0x1404] ss:$40 sps:$4 sm:$0xff]  }
 0xbe0   :  { %11281 = vmatprep.subr.bf16.mxu1 %v21723_v57  ;;  %11387 = vmatprep.subr.bf16.mxu0 %v21726_v48  ;;  %v21798_v7 = vld [vmem:[%s29346_s5 + $0x140c] ss:$40 sps:$4 sm:$0xff]   ;;  %v21793_v57 = vld [vmem:[%s29346_s5 + $0x1400] ss:$40 sps:$4 sm:$0xff]  }
 0xbe1   :  { %v21796_v48 = vld [vmem:[%s29346_s5 + $0x1408] ss:$40 sps:$4 sm:$0xff]  }
 0xbe3   :  { %11282 = vmatpush1.bf16.msra.mxu1 %v21721_v14  ;;  %11388 = vmatpush1.bf16.msra.mxu0 %v21724_v3  ;;  %v21801_v14 = vld [vmem:[%s29346_s5 + $0x1454] ss:$40 sps:$4 sm:$0xff]  }
 0xbe4   :  { %11283 = vmatprep.subr.bf16.mxu1 %v21729_v45  ;;  %11389 = vmatprep.subr.bf16.mxu0 %v21732_v24  ;;  %v21804_v3 = vld [vmem:[%s29346_s5 + $0x145c] ss:$40 sps:$4 sm:$0xff]   ;;  %v21799_v45 = vld [vmem:[%s29346_s5 + $0x1450] ss:$40 sps:$4 sm:$0xff]  }
 0xbe5   :  { %v21802_v24 = vld [vmem:[%s29346_s5 + $0x1458] ss:$40 sps:$4 sm:$0xff]  }
 0xbe7   :  { %11284 = vmatpush1.bf16.msra.mxu1 %v21727_v61  ;;  %11390 = vmatpush1.bf16.msra.mxu0 %v21730_v22  ;;  %v21805_v61 = vld [vmem:[%s29346_s5 + $0x14a0] ss:$40 sps:$4 sm:$0xff]  }
 0xbe8   :  { %11285 = vmatprep.subr.bf16.mxu1 %v21735_v55  ;;  %11391 = vmatprep.subr.bf16.mxu0 %v21738_v35  ;;  %v21808_v22 = vld [vmem:[%s29346_s5 + $0x14a8] ss:$40 sps:$4 sm:$0xff]   ;;  %v21813_v55 = vld [vmem:[%s29346_s5 + $0x14f4] ss:$40 sps:$4 sm:$0xff]  }
 0xbe9   :  { %v21816_v35 = vld [vmem:[%s29346_s5 + $0x14fc] ss:$40 sps:$4 sm:$0xff]  }
 0xbeb   :  { %11286 = vmatpush1.bf16.msra.mxu1 %v21733_v17  ;;  %11392 = vmatpush1.bf16.msra.mxu0 %v21736_v54  ;;  %v21811_v17 = vld [vmem:[%s29346_s5 + $0x14f0] ss:$40 sps:$4 sm:$0xff]  }
 0xbec   :  { %11287 = vmatprep.subr.bf16.mxu1 %v21741_v53  ;;  %11393 = vmatprep.subr.bf16.mxu0 %v21744_v29  ;;  %v21814_v54 = vld [vmem:[%s29346_s5 + $0x14f8] ss:$40 sps:$4 sm:$0xff]   ;;  %v21819_v53 = vld [vmem:[%s29346_s5 + $0x1544] ss:$40 sps:$4 sm:$0xff]  }
 0xbed   :  { %v21817_v29 = vld [vmem:[%s29346_s5 + $0x1540] ss:$40 sps:$4 sm:$0xff]  }
 0xbef   :  { %11288 = vmatpush1.bf16.msra.mxu1 %v21739_v16  ;;  %11394 = vmatpush1.bf16.msra.mxu0 %v21742_v50  ;;  %v21820_v16 = vld [vmem:[%s29346_s5 + $0x1548] ss:$40 sps:$4 sm:$0xff]   ;;  %v21825_v50 = vld [vmem:[%s29346_s5 + $0x1594] ss:$40 sps:$4 sm:$0xff]  }
 0xbf0   :  { %11289 = vmatprep.subr.bf16.mxu1 %v21747_v56  ;;  %11395 = vmatprep.subr.bf16.mxu0 %v21750_v15  ;;  %v21828_v56 = vld [vmem:[%s29346_s5 + $0x159c] ss:$40 sps:$4 sm:$0xff]   ;;  %v21823_v15 = vld [vmem:[%s29346_s5 + $0x1590] ss:$40 sps:$4 sm:$0xff]  }
 0xbf3   :  { %11290 = vmatpush1.bf16.msra.mxu1 %v21745_v58  ;;  %11396 = vmatpush1.bf16.msra.mxu0 %v21748_v51  ;;  %v21826_v58 = vld [vmem:[%s29346_s5 + $0x1598] ss:$40 sps:$4 sm:$0xff]   ;;  %v21831_v51 = vld [vmem:[%s29346_s5 + $0x15e4] ss:$40 sps:$4 sm:$0xff]  }
 0xbf4   :  { %11291 = vmatprep.subr.bf16.mxu1 %v21753_v32  ;;  %11397 = vmatprep.subr.bf16.mxu0 %v21756_v13  ;;  %v21834_v32 = vld [vmem:[%s29346_s5 + $0x15ec] ss:$40 sps:$4 sm:$0xff]   ;;  %v21829_v13 = vld [vmem:[%s29346_s5 + $0x15e0] ss:$40 sps:$4 sm:$0xff]  }
 0xbf7   :  { %11292 = vmatpush1.bf16.msra.mxu1 %v21751_v18  ;;  %11398 = vmatpush1.bf16.msra.mxu0 %v21754_v28  ;;  %v21832_v18 = vld [vmem:[%s29346_s5 + $0x15e8] ss:$40 sps:$4 sm:$0xff]   ;;  %v21837_v28 = vld [vmem:[%s29346_s5 + $0x1634] ss:$40 sps:$4 sm:$0xff]  }
 0xbf8   :  { %11293 = vmatprep.subr.bf16.mxu1 %v21759_v27  ;;  %11399 = vmatprep.subr.bf16.mxu0 %v21762_v0  ;;  %v21840_v27 = vld [vmem:[%s29346_s5 + $0x163c] ss:$40 sps:$4 sm:$0xff]   ;;  %v21835_v0 = vld [vmem:[%s29346_s5 + $0x1630] ss:$40 sps:$4 sm:$0xff]  }
 0xbfb   :  { %11294 = vmatpush1.bf16.msra.mxu1 %v21757_v38  ;;  %11400 = vmatpush1.bf16.msra.mxu0 %v21760_v44  ;;  %v21838_v38 = vld [vmem:[%s29346_s5 + $0x1638] ss:$40 sps:$4 sm:$0xff]   ;;  %v21843_v44 = vld [vmem:[%s29346_s5 + $0x1684] ss:$40 sps:$4 sm:$0xff]  }
 0xbfc   :  { %11295 = vmatprep.subr.bf16.mxu1 %v21765_v31  ;;  %11401 = vmatprep.subr.bf16.mxu0 %v21768_v33  ;;  %v21846_v31 = vld [vmem:[%s29346_s5 + $0x168c] ss:$40 sps:$4 sm:$0xff]   ;;  %v21841_v33 = vld [vmem:[%s29346_s5 + $0x1680] ss:$40 sps:$4 sm:$0xff]  }
 0xbff   :  { %11296 = vmatpush1.bf16.msra.mxu1 %v21763_v60  ;;  %11402 = vmatpush1.bf16.msra.mxu0 %v21766_v6  ;;  %v21844_v60 = vld [vmem:[%s29346_s5 + $0x1688] ss:$40 sps:$4 sm:$0xff]   ;;  %v21849_v6 = vld [vmem:[%s29346_s5 + $0x16d4] ss:$40 sps:$4 sm:$0xff]  }
 0xc00   :  { %11297 = vmatprep.subr.bf16.mxu1 %v21771_v47  ;;  %11403 = vmatprep.subr.bf16.mxu0 %v21774_v43  ;;  %v21852_v47 = vld [vmem:[%s29346_s5 + $0x16dc] ss:$40 sps:$4 sm:$0xff]   ;;  %v21847_v43 = vld [vmem:[%s29346_s5 + $0x16d0] ss:$40 sps:$4 sm:$0xff]  }
 0xc03   :  { %11298 = vmatpush1.bf16.msra.mxu1 %v21769_v34  ;;  %11404 = vmatpush1.bf16.msra.mxu0 %v21772_v42  ;;  %v21850_v34 = vld [vmem:[%s29346_s5 + $0x16d8] ss:$40 sps:$4 sm:$0xff]   ;;  %v21855_v42 = vld [vmem:[%s29346_s5 + $0x1724] ss:$40 sps:$4 sm:$0xff]  }
 0xc04   :  { %11299 = vmatprep.subr.bf16.mxu1 %v21777_v12  ;;  %11405 = vmatprep.subr.bf16.mxu0 %v21780_v37  ;;  %v21858_v12 = vld [vmem:[%s29346_s5 + $0x172c] ss:$40 sps:$4 sm:$0xff]   ;;  %v21853_v37 = vld [vmem:[%s29346_s5 + $0x1720] ss:$40 sps:$4 sm:$0xff]  }
 0xc07   :  { %11300 = vmatpush1.bf16.msra.mxu1 %v21775_v19  ;;  %11406 = vmatpush1.bf16.msra.mxu0 %v21778_v46  ;;  %v21856_v19 = vld [vmem:[%s29346_s5 + $0x1728] ss:$40 sps:$4 sm:$0xff]   ;;  %v21861_v46 = vld [vmem:[%s29346_s5 + $0x1774] ss:$40 sps:$4 sm:$0xff]  }
 0xc08   :  { %11301 = vmatprep.subr.bf16.mxu1 %v21783_v63  ;;  %11407 = vmatprep.subr.bf16.mxu0 %v21786_v49  ;;  %v21864_v63 = vld [vmem:[%s29346_s5 + $0x177c] ss:$40 sps:$4 sm:$0xff]   ;;  %v21859_v49 = vld [vmem:[%s29346_s5 + $0x1770] ss:$40 sps:$4 sm:$0xff]  }
 0xc0b   :  { %11302 = vmatpush1.bf16.msra.mxu1 %v21781_v5  ;;  %11408 = vmatpush1.bf16.msra.mxu0 %v21784_v4  ;;  %v21862_v5 = vld [vmem:[%s29346_s5 + $0x1778] ss:$40 sps:$4 sm:$0xff]   ;;  %v21867_v4 = vld [vmem:[%s29346_s5 + $0x17c4] ss:$40 sps:$4 sm:$0xff]  }
 0xc0c   :  { %11303 = vmatprep.subr.bf16.mxu1 %v21789_v21  ;;  %11409 = vmatprep.subr.bf16.mxu0 %v21792_v9  ;;  %v21870_v21 = vld [vmem:[%s29346_s5 + $0x17cc] ss:$40 sps:$4 sm:$0xff]   ;;  %v21865_v9 = vld [vmem:[%s29346_s5 + $0x17c0] ss:$40 sps:$4 sm:$0xff]  }
 0xc0f   :  { %11304 = vmatpush1.bf16.msra.mxu1 %v21787_v36  ;;  %11410 = vmatpush1.bf16.msra.mxu0 %v21790_v20  ;;  %v21868_v36 = vld [vmem:[%s29346_s5 + $0x17c8] ss:$40 sps:$4 sm:$0xff]   ;;  %v21873_v20 = vld [vmem:[%s29346_s5 + $0x1814] ss:$40 sps:$4 sm:$0xff]  }
 0xc10   :  { %12461 = vmatprep.subr.bf16.mxu1 %v21795_v23  ;;  %12514 = vmatprep.subr.bf16.mxu0 %v21798_v7  ;;  %v21876_v23 = vld [vmem:[%s29346_s5 + $0x181c] ss:$40 sps:$4 sm:$0xff]   ;;  %v21871_v7 = vld [vmem:[%s29346_s5 + $0x1810] ss:$40 sps:$4 sm:$0xff]  }
 0xc12   :  { %11306 = vmatmul.mubr.bf16.vlgmr.msra.gmra.mrb[72].mxu1 %v27208_v52  ;;  %11412 = vmatmul.mubr.bf16.vlgmr.msra.gmra.mrb[72].mxu0 %v27208_v52  ;;  %v21807_v52 = vld [vmem:[%s29346_s5 + $0x14a4] ss:$40 sps:$4 sm:$0xff]  }
 0xc13   :  { %11315 = vmatprep.mubr.bf16.mxu1 %v27215_v40  ;;  %11421 = vmatprep.mubr.bf16.mxu0 %v27215_v40  ;;  %v21810_v40 = vld [vmem:[%s29346_s5 + $0x14ac] ss:$40 sps:$4 sm:$0xff]  }
 0xc14   :  { %12462 = vmatpush1.bf16.msra.mxu1 %v21793_v57  ;;  %12515 = vmatpush1.bf16.msra.mxu0 %v21796_v48  ;;  %v21874_v57 = vld [vmem:[%s29346_s5 + $0x1818] ss:$40 sps:$4 sm:$0xff]   ;;  %v21879_v48 = vld [vmem:[%s29346_s5 + $0x1864] ss:$40 sps:$4 sm:$0xff]  }
 0xc15   :  { %12463 = vmatprep.subr.bf16.mxu1 %v21801_v14  ;;  %12516 = vmatprep.subr.bf16.mxu0 %v21804_v3  ;;  %v21882_v14 = vld [vmem:[%s29346_s5 + $0x186c] ss:$40 sps:$4 sm:$0xff]   ;;  %v21877_v3 = vld [vmem:[%s29346_s5 + $0x1860] ss:$40 sps:$4 sm:$0xff]  }
 0xc18   :  { %12464 = vmatpush1.bf16.msra.mxu1 %v21799_v45  ;;  %12517 = vmatpush1.bf16.msra.mxu0 %v21802_v24  ;;  %v21880_v45 = vld [vmem:[%s29346_s5 + $0x1868] ss:$40 sps:$4 sm:$0xff]  }
 0xc19   :  { %12465 = vmatprep.subr.bf16.mxu1 %v21807_v52  ;;  %12518 = vmatprep.subr.bf16.mxu0 %v21810_v40  ;;  %v21883_v24 = vld [vmem:[%s29346_s5 + $0x18b0] ss:$40 sps:$4 sm:$0xff]   ;;  %v21885_v52 = vld [vmem:[%s29346_s5 + $0x18b4] ss:$40 sps:$4 sm:$0xff]  }
 0xc1a   :  { %11316 = vmatmul.mubr.bf16.gmra.mrb[76].mxu1 %v27211_v25  ;;  %11422 = vmatmul.mubr.bf16.gmra.mrb[76].mxu0 %v27211_v25  ;;  %v21822_v25 = vld [vmem:[%s29346_s5 + $0x154c] ss:$40 sps:$4 sm:$0xff]   ;;  %v21886_v40 = vld [vmem:[%s29346_s5 + $0x18b8] ss:$40 sps:$4 sm:$0xff]  }
 0xc1c   :  { %12466 = vmatpush1.bf16.msra.mxu1 %v21805_v61  ;;  %12519 = vmatpush1.bf16.msra.mxu0 %v21808_v22  ;;  %v21888_v61 = vld [vmem:[%s29346_s5 + $0x18bc] ss:$40 sps:$4 sm:$0xff]  }
 0xc1d   :  { %12467 = vmatprep.subr.bf16.mxu1 %v21813_v55  ;;  %12520 = vmatprep.subr.bf16.mxu0 %v21816_v35  ;;  %v21891_v22 = vld [vmem:[%s29346_s5 + $0x1414] ss:$40 sps:$4 sm:$0xff]   ;;  %v18310_v35 = vld [vmem:[%s29347_s4 + $0x10] sm:$0xf] }
 0xc1e   :  { %v21894_v55 = vld [vmem:[%s29346_s5 + $0x141c] ss:$40 sps:$4 sm:$0xff]  }
 0xc20   :  { %12468 = vmatpush1.bf16.msra.mxu1 %v21811_v17  ;;  %12521 = vmatpush1.bf16.msra.mxu0 %v21814_v54  ;;  %v10531_v17 = vrot.slane %v18310_v35, %v23684_v59  ;;  %v10535_v54 = vrot.slane %v18310_v35, %v23690_v62 }
 0xc21   :  { %12469 = vmatprep.subr.bf16.mxu1 %v21819_v53  ;;  %12522 = vmatprep.subr.bf16.mxu0 %v21822_v25 }
 0xc24   :  { %12470 = vmatpush1.bf16.msra.mxu1 %v21817_v29  ;;  %12523 = vmatpush1.bf16.msra.mxu0 %v21820_v16 }
 0xc25   :  { %12471 = vmatprep.subr.bf16.mxu1 %v21825_v50  ;;  %12524 = vmatprep.subr.bf16.mxu0 %v21828_v56 }
 0xc28   :  { %12472 = vmatpush1.bf16.msra.mxu1 %v21823_v15  ;;  %12525 = vmatpush1.bf16.msra.mxu0 %v21826_v58 }
 0xc29   :  { %12473 = vmatprep.subr.bf16.mxu1 %v21831_v51  ;;  %12526 = vmatprep.subr.bf16.mxu0 %v21834_v32 }
 0xc2c   :  { %12474 = vmatpush1.bf16.msra.mxu1 %v21829_v13  ;;  %12527 = vmatpush1.bf16.msra.mxu0 %v21832_v18 }
 0xc2d   :  { %12475 = vmatprep.subr.bf16.mxu1 %v21837_v28  ;;  %12528 = vmatprep.subr.bf16.mxu0 %v21840_v27  ;;  %v10523_v28 = vrot.slane %v18310_v35, %v23184_v10 }
 0xc30   :  { %12476 = vmatpush1.bf16.msra.mxu1 %v21835_v0  ;;  %12529 = vmatpush1.bf16.msra.mxu0 %v21838_v38 }
 0xc31   :  { %12477 = vmatprep.subr.bf16.mxu1 %v21843_v44  ;;  %12530 = vmatprep.subr.bf16.mxu0 %v21846_v31  ;;  %v10527_v31 = vrot.slane %v18310_v35, %v23187_v11 }
 0xc34   :  { %12478 = vmatpush1.bf16.msra.mxu1 %v21841_v33  ;;  %12531 = vmatpush1.bf16.msra.mxu0 %v21844_v60 }
 0xc35   :  { %12479 = vmatprep.subr.bf16.mxu1 %v21849_v6  ;;  %12532 = vmatprep.subr.bf16.mxu0 %v21852_v47 }
 0xc38   :  { %12480 = vmatpush1.bf16.msra.mxu1 %v21847_v43  ;;  %12533 = vmatpush1.bf16.msra.mxu0 %v21850_v34 }
 0xc39   :  { %12481 = vmatprep.subr.bf16.mxu1 %v21855_v42  ;;  %12534 = vmatprep.subr.bf16.mxu0 %v21858_v12 }
 0xc3c   :  { %12482 = vmatpush1.bf16.msra.mxu1 %v21853_v37  ;;  %12535 = vmatpush1.bf16.msra.mxu0 %v21856_v19 }
 0xc3d   :  { %12483 = vmatprep.subr.bf16.mxu1 %v21861_v46  ;;  %12536 = vmatprep.subr.bf16.mxu0 %v21864_v63 }
 0xc40   :  { %12484 = vmatpush1.bf16.msra.mxu1 %v21859_v49  ;;  %12537 = vmatpush1.bf16.msra.mxu0 %v21862_v5 }
 0xc41   :  { %12485 = vmatprep.subr.bf16.mxu1 %v21867_v4  ;;  %12538 = vmatprep.subr.bf16.mxu0 %v21870_v21 }
 0xc44   :  { %12486 = vmatpush1.bf16.msra.mxu1 %v21865_v9  ;;  %12539 = vmatpush1.bf16.msra.mxu0 %v21868_v36 }
 0xc45   :  { %12487 = vmatprep.subr.bf16.mxu1 %v21873_v20  ;;  %12540 = vmatprep.subr.bf16.mxu0 %v21876_v23 }
 0xc48   :  { %12488 = vmatpush1.bf16.msra.mxu1 %v21871_v7  ;;  %12541 = vmatpush1.bf16.msra.mxu0 %v21874_v57 }
 0xc49   :  { %12489 = vmatprep.subr.bf16.mxu1 %v21879_v48  ;;  %12542 = vmatprep.subr.bf16.mxu0 %v21882_v14 }
 0xc4c   :  { %12490 = vmatpush1.bf16.msra.mxu1 %v21877_v3  ;;  %12543 = vmatpush1.bf16.msra.mxu0 %v21880_v45 }
 0xc4d   :  { %12491 = vmatprep.subr.bf16.mxu1 %v21885_v52  ;;  %12544 = vmatprep.subr.bf16.mxu0 %v21888_v61 }
 0xc50   :  { %12492 = vmatpush1.bf16.msra.mxu1 %v21883_v24  ;;  %12545 = vmatpush1.bf16.msra.mxu0 %v21886_v40 }
 0xc51   :  { %12567 = vmatprep.subr.bf16.mxu1 %v21891_v22  ;;  %12620 = vmatprep.subr.bf16.mxu0 %v21894_v55 }
 0xce5   :  { %v11307_v53 = vpop.f32.mrb[72].mxu1  ;;  %v11413_v25 = vpop.f32.mrb[72].mxu0 }
 0xce6   :  { %v19562_v29 = vadd.f32 %v11413_v25, %v10531_v17  ;;  %v11309_v16 = vpop.f32.mrb[73].mxu1  ;;  %v11415_v50 = vpop.f32.mrb[73].mxu0  ;;  %v19554_v33 = vadd.f32 %v11307_v53, %v10523_v28 }
 0xce7   :  { %v19563_v56 = vadd.f32 %v11415_v50, %v10535_v54  ;;  %v11311_v15 = vpop.f32.mrb[74].mxu1  ;;  %v11417_v58 = vpop.f32.mrb[74].mxu0  ;;  %v19555_v19 = vadd.f32 %v11309_v16, %v10527_v31 }
 0xce8   :  { %v18439_v51 = vmul.f32 -1.442695, %v19562_v29  ;;  %v19564_v32 = vadd.f32 %v11417_v58, %v10531_v17  ;;  %v11313_v13 = vpop.f32.mrb[75].mxu1  ;;  %v11419_v18 = vpop.f32.mrb[75].mxu0  ;;  %v19556_v9 = vadd.f32 %v11311_v15, %v10523_v28 }
 0xce9   :  { %v18440_v27 = vmul.f32 -1.442695, %v19563_v56  ;;  %v19565_v0 = vadd.f32 %v11419_v18, %v10535_v54  ;;  %v19557_v3 = vadd.f32 %v11313_v13, %v10527_v31 }
 0xcea   :  { %22801 = vpow2.f32 %v18439_v51  ;;  %v18441_v38 = vmul.f32 -1.442695, %v19564_v32 }
 0xceb   :  { %22803 = vpow2.f32 %v18440_v27  ;;  %v18442_v44 = vmul.f32 -1.442695, %v19565_v0 }
 0xcec   :  { %22805 = vpow2.f32 %v18441_v38 }
 0xced   :  { %v11317_v60 = vpop.f32.mrb[76].mxu1  ;;  %v11423_v6 = vpop.f32.mrb[76].mxu0  ;;  %22807 = vpow2.f32 %v18442_v44 }
 0xcee   :  { %v19566_v47 = vadd.f32 %v11423_v6, %v10531_v17  ;;  %v11319_v43 = vpop.f32.mrb[77].mxu1  ;;  %v11425_v34 = vpop.f32.mrb[77].mxu0  ;;  %22809 = vtanh.f32 %v19554_v33  ;;  %v19558_v52 = vadd.f32 %v11317_v60, %v10523_v28 }
 0xcef   :  { %v19567_v42 = vadd.f32 %v11425_v34, %v10535_v54  ;;  %v11321_v12 = vpop.f32.mrb[78].mxu1  ;;  %v11427_v37 = vpop.f32.mrb[78].mxu0  ;;  %v19559_v61 = vadd.f32 %v11319_v43, %v10527_v31  ;;  %v21892_v34 = vld [vmem:[%s29346_s5 + $0x1418] ss:$40 sps:$4 sm:$0xff]  }
 0xcf0   :  { %v18443_v46 = vmul.f32 -1.442695, %v19566_v47  ;;  %v19568_v63 = vadd.f32 %v11427_v37, %v10531_v17  ;;  %v11323_v49 = vpop.f32.mrb[79].mxu1  ;;  %v11429_v5 = vpop.f32.mrb[79].mxu0  ;;  %v21900_v37 = vld [vmem:[%s29346_s5 + $0x146c] ss:$40 sps:$4 sm:$0xff]  }
 0xcf1   :  { %v18444_v4 = vmul.f32 -1.442695, %v19567_v42  ;;  %v19569_v21 = vadd.f32 %v11429_v5, %v10535_v54  ;;  %v19560_v54 = vadd.f32 %v11321_v12, %v10523_v28  ;;  %v19561_v15 = vadd.f32 %v11323_v49, %v10527_v31  ;;  %v21889_v31 = vld [vmem:[%s29346_s5 + $0x1410] ss:$40 sps:$4 sm:$0xff]   ;;  %v21897_v12 = vld [vmem:[%s29346_s5 + $0x1464] ss:$40 sps:$4 sm:$0xff]  }
 0xcf2   :  { %22811 = vpow2.f32 %v18443_v46  ;;  %v18445_v36 = vmul.f32 -1.442695, %v19568_v63  ;;  %v21895_v5 = vld [vmem:[%s29346_s5 + $0x1460] ss:$40 sps:$4 sm:$0xff]  }
 0xcf3   :  { %22813 = vpow2.f32 %v18444_v4  ;;  %v18446_v57 = vmul.f32 -1.442695, %v19569_v21  ;;  %v21898_v4 = vld [vmem:[%s29346_s5 + $0x1468] ss:$40 sps:$4 sm:$0xff]  }
 0xcf4   :  { %v22802_v20 = vpop.eup %22801  ;;  %22815 = vtanh.f32 %v19555_v19 }
 0xcf5   :  { %v22804_v23 = vpop.eup %22803  ;;  %v11464_v7 = vadd.f32 1.0, %v22802_v20  ;;  %22817 = vpow2.f32 %v18445_v36  ;;  %v21906_v36 = vld [vmem:[%s29346_s5 + $0x14bc] ss:$40 sps:$4 sm:$0xff]  }
 0xcf6   :  { %v11465_v48 = vadd.f32 1.0, %v22804_v23  ;;  %22819 = vtanh.f32 %v19556_v9  ;;  %v22806_v14 = vpop.eup %22805  ;;  %v21903_v9 = vld [vmem:[%s29346_s5 + $0x14b4] ss:$40 sps:$4 sm:$0xff]  }
 0xcf7   :  { %22821 = vrcp.f32 %v11464_v7  ;;  %v11466_v45 = vadd.f32 1.0, %v22806_v14  ;;  %v22808_v24 = vpop.eup %22807  ;;  %v21901_v14 = vld [vmem:[%s29346_s5 + $0x14b0] ss:$40 sps:$4 sm:$0xff]  }
 0xcf8   :  { %22823 = vrcp.f32 %v11465_v48  ;;  %v11467_v40 = vadd.f32 1.0, %v22808_v24  ;;  %v22810_v22 = vpop.eup %22809  ;;  %v21912_v24 = vld [vmem:[%s29346_s5 + $0x150c] ss:$40 sps:$4 sm:$0xff]  }
 0xcf9   :  { %22825 = vpow2.f32 %v18446_v57 }
 0xcfa   :  { %22827 = vrcp.f32 %v11466_v45  ;;  %v21909_v45 = vld [vmem:[%s29346_s5 + $0x1504] ss:$40 sps:$4 sm:$0xff]  }
 0xcfb   :  { %22829 = vtanh.f32 %v19557_v3  ;;  %v21904_v3 = vld [vmem:[%s29346_s5 + $0x14b8] ss:$40 sps:$4 sm:$0xff]  }
 0xcfc   :  { %v22812_v55 = vpop.eup %22811  ;;  %22831 = vrcp.f32 %v11467_v40  ;;  %v21910_v40 = vld [vmem:[%s29346_s5 + $0x1508] ss:$40 sps:$4 sm:$0xff]  }
 0xcfd   :  { %v22814_v35 = vpop.eup %22813  ;;  %22833 = vtanh.f32 %v19558_v52  ;;  %v11468_v17 = vadd.f32 1.0, %v22812_v55  ;;  %v21907_v52 = vld [vmem:[%s29346_s5 + $0x1500] ss:$40 sps:$4 sm:$0xff]   ;;  %v21913_v55 = vld [vmem:[%s29346_s5 + $0x1550] ss:$40 sps:$4 sm:$0xff]  }
 0xcfe   :  { %v22816_v53 = vpop.eup %22815  ;;  %22835 = vtanh.f32 %v19559_v61  ;;  %v11469_v25 = vadd.f32 1.0, %v22814_v35  ;;  %v21915_v61 = vld [vmem:[%s29346_s5 + $0x1554] ss:$40 sps:$4 sm:$0xff]   ;;  %v21916_v35 = vld [vmem:[%s29346_s5 + $0x1558] ss:$40 sps:$4 sm:$0xff]  }
 0xcff   :  { %v22818_v29 = vpop.eup %22817  ;;  %22837 = vrcp.f32 %v11468_v17  ;;  %v21921_v17 = vld [vmem:[%s29346_s5 + $0x15a4] ss:$40 sps:$4 sm:$0xff]  }
 0xd00   :  { %v22820_v16 = vpop.eup %22819  ;;  %22839 = vrcp.f32 %v11469_v25  ;;  %v11470_v50 = vadd.f32 1.0, %v22818_v29  ;;  %v21922_v25 = vld [vmem:[%s29346_s5 + $0x15a8] ss:$40 sps:$4 sm:$0xff]   ;;  %v21927_v29 = vld [vmem:[%s29346_s5 + $0x15f4] ss:$40 sps:$4 sm:$0xff]  }
 0xd01   :  { %v22822_v56 = vpop.eup %22821  ;;  %22841 = vtanh.f32 %v19560_v54  ;;  %v21924_v54 = vld [vmem:[%s29346_s5 + $0x15ac] ss:$40 sps:$4 sm:$0xff]  }
 0xd02   :  { %v22824_v58 = vpop.eup %22823  ;;  %22843 = vrcp.f32 %v11470_v50  ;;  %v11488_v51 = vmul.f32 %v22822_v56, %v22810_v22  ;;  %v21918_v22 = vld [vmem:[%s29346_s5 + $0x155c] ss:$40 sps:$4 sm:$0xff]   ;;  %v21925_v50 = vld [vmem:[%s29346_s5 + $0x15f0] ss:$40 sps:$4 sm:$0xff]  }
 0xd03   :  { %v22826_v32 = vpop.eup %22825  ;;  %v11489_v13 = vmul.f32 %v22824_v58, %v22816_v53  ;;  %22845 = vtanh.f32 %v19561_v15  ;;  %v21919_v53 = vld [vmem:[%s29346_s5 + $0x15a0] ss:$40 sps:$4 sm:$0xff]   ;;  %v21933_v15 = vld [vmem:[%s29346_s5 + $0x1644] ss:$40 sps:$4 sm:$0xff]  }
 0xd04   :  { %v22828_v18 = vpop.eup %22827  ;;  %v11471_v27 = vadd.f32 1.0, %v22826_v32  ;;  %v21928_v56 = vld [vmem:[%s29346_s5 + $0x15f8] ss:$40 sps:$4 sm:$0xff]   ;;  %v21936_v58 = vld [vmem:[%s29346_s5 + $0x164c] ss:$40 sps:$4 sm:$0xff]  }
 0xd05   :  { %v22830_v0 = vpop.eup %22829  ;;  %v11490_v28 = vmul.f32 %v22828_v18, %v22820_v16  ;;  %v21930_v16 = vld [vmem:[%s29346_s5 + $0x15fc] ss:$40 sps:$4 sm:$0xff]   ;;  %v21934_v32 = vld [vmem:[%s29346_s5 + $0x1648] ss:$40 sps:$4 sm:$0xff]  }
 0xd06   :  { %v22832_v38 = vpop.eup %22831  ;;  %22847 = vrcp.f32 %v11471_v27  ;;  %v21942_v18 = vld [vmem:[%s29346_s5 + $0x169c] ss:$40 sps:$4 sm:$0xff]   ;;  %v21937_v27 = vld [vmem:[%s29346_s5 + $0x1690] ss:$40 sps:$4 sm:$0xff]  }
 0xd07   :  { %v22834_v44 = vpop.eup %22833  ;;  %v11491_v33 = vmul.f32 %v22832_v38, %v22830_v0  ;;  %v27592_v60 = vpack.c.bf16 %v11490_v28, %v11488_v51  ;;  %v21931_v51 = vld [vmem:[%s29346_s5 + $0x1640] ss:$40 sps:$4 sm:$0xff]   ;;  %v21945_v28 = vld [vmem:[%s29346_s5 + $0x16e4] ss:$40 sps:$4 sm:$0xff]  }
 0xd08   :  { %v22836_v6 = vpop.eup %22835  ;;  %v21940_v0 = vld [vmem:[%s29346_s5 + $0x1698] ss:$40 sps:$4 sm:$0xff]   ;;  %v21948_v38 = vld [vmem:[%s29346_s5 + $0x16ec] ss:$40 sps:$4 sm:$0xff]  }
 0xd09   :  { %v22838_v47 = vpop.eup %22837  ;;  %v27594_v43 = vpack.c.bf16 %v11491_v33, %v11489_v13  ;;  %v21939_v13 = vld [vmem:[%s29346_s5 + $0x1694] ss:$40 sps:$4 sm:$0xff]   ;;  %v21946_v33 = vld [vmem:[%s29346_s5 + $0x16e8] ss:$40 sps:$4 sm:$0xff]  }
 0xd0a   :  { %v22840_v42 = vpop.eup %22839  ;;  %v11492_v19 = vmul.f32 %v22838_v47, %v22834_v44  ;;  %v21943_v44 = vld [vmem:[%s29346_s5 + $0x16e0] ss:$40 sps:$4 sm:$0xff]   ;;  %v21954_v47 = vld [vmem:[%s29346_s5 + $0x173c] ss:$40 sps:$4 sm:$0xff]  }
 0xd0b   :  { %v22842_v46 = vpop.eup %22841  ;;  %12493 = vmatprep.mubr.bf16.mxu1 %v27594_v43  ;;  %12546 = vmatprep.mubr.bf16.mxu0 %v27594_v43  ;;  %v11493_v63 = vmul.f32 %v22840_v42, %v22836_v6  ;;  %v21951_v6 = vld [vmem:[%s29346_s5 + $0x1734] ss:$40 sps:$4 sm:$0xff]   ;;  %v21957_v42 = vld [vmem:[%s29346_s5 + $0x1784] ss:$40 sps:$4 sm:$0xff]  }
 0xd0c   :  { %v22844_v49 = vpop.eup %22843  ;;  %12494 = vmatmul.mubr.bf16.vlgmr.msra.gmra.mrb[16].mxu1 %v27592_v60  ;;  %12547 = vmatmul.mubr.bf16.vlgmr.msra.gmra.mrb[16].mxu0 %v27592_v60 }
 0xd0d   :  { %12568 = vmatpush1.bf16.msra.mxu1 %v21889_v31  ;;  %12621 = vmatpush1.bf16.msra.mxu0 %v21892_v34  ;;  %v11494_v21 = vmul.f32 %v22844_v49, %v22842_v46  ;;  %v22846_v20 = vpop.eup %22845  ;;  %v21949_v31 = vld [vmem:[%s29346_s5 + $0x1730] ss:$40 sps:$4 sm:$0xff]   ;;  %v21963_v46 = vld [vmem:[%s29346_s5 + $0x17d4] ss:$40 sps:$4 sm:$0xff]  }
 0xd0e   :  { %12569 = vmatprep.subr.bf16.mxu1 %v21897_v12  ;;  %12622 = vmatprep.subr.bf16.mxu0 %v21900_v37  ;;  %v21952_v34 = vld [vmem:[%s29346_s5 + $0x1738] ss:$40 sps:$4 sm:$0xff]   ;;  %v21960_v12 = vld [vmem:[%s29346_s5 + $0x178c] ss:$40 sps:$4 sm:$0xff]  }
 0xd0f   :  { %v27624_v23 = vpack.c.bf16 %v11494_v21, %v11492_v19  ;;  %v21955_v37 = vld [vmem:[%s29346_s5 + $0x1780] ss:$40 sps:$4 sm:$0xff]   ;;  %v21961_v49 = vld [vmem:[%s29346_s5 + $0x17d0] ss:$40 sps:$4 sm:$0xff]   ;;  %v21972_v21 = vld [vmem:[%s29346_s5 + $0x182c] ss:$40 sps:$4 sm:$0xff]  }
 0xd10   :  { %v22848_v7 = vpop.eup %22847  ;;  %v21958_v19 = vld [vmem:[%s29346_s5 + $0x1788] ss:$40 sps:$4 sm:$0xff]  }
 0xd11   :  { %12570 = vmatpush1.bf16.msra.mxu1 %v21895_v5  ;;  %12623 = vmatpush1.bf16.msra.mxu0 %v21898_v4  ;;  %v11495_v57 = vmul.f32 %v22848_v7, %v22846_v20  ;;  %v21964_v5 = vld [vmem:[%s29346_s5 + $0x17d8] ss:$40 sps:$4 sm:$0xff]   ;;  %v21969_v4 = vld [vmem:[%s29346_s5 + $0x1824] ss:$40 sps:$4 sm:$0xff]   ;;  %v21975_v20 = vld [vmem:[%s29346_s5 + $0x1874] ss:$40 sps:$4 sm:$0xff]  }
 0xd12   :  { %12571 = vmatprep.subr.bf16.mxu1 %v21903_v9  ;;  %12624 = vmatprep.subr.bf16.mxu0 %v21906_v36  ;;  %v21967_v9 = vld [vmem:[%s29346_s5 + $0x1820] ss:$40 sps:$4 sm:$0xff]   ;;  %v21978_v7 = vld [vmem:[%s29346_s5 + $0x187c] ss:$40 sps:$4 sm:$0xff]  }
 0xd13   :  { %v27626_v48 = vpack.c.bf16 %v11495_v57, %v11493_v63  ;;  %v21966_v63 = vld [vmem:[%s29346_s5 + $0x17dc] ss:$40 sps:$4 sm:$0xff]   ;;  %v21970_v36 = vld [vmem:[%s29346_s5 + $0x1828] ss:$40 sps:$4 sm:$0xff]  }
 0xd14   :  { %v21973_v57 = vld [vmem:[%s29346_s5 + $0x1870] ss:$40 sps:$4 sm:$0xff]  }
 0xd15   :  { %12503 = vmatprep.mubr.bf16.mxu1 %v27626_v48  ;;  %12556 = vmatprep.mubr.bf16.mxu0 %v27626_v48 }
 0xd16   :  { %12504 = vmatmul.mubr.bf16.gmra.mrb[20].mxu1 %v27624_v23  ;;  %12557 = vmatmul.mubr.bf16.gmra.mrb[20].mxu0 %v27624_v23 }
 0xd17   :  { %12572 = vmatpush1.bf16.msra.mxu1 %v21901_v14  ;;  %12625 = vmatpush1.bf16.msra.mxu0 %v21904_v3  ;;  %v21976_v14 = vld [vmem:[%s29346_s5 + $0x1878] ss:$40 sps:$4 sm:$0xff]   ;;  %v21981_v3 = vld [vmem:[%s29346_s5 + $0x18c4] ss:$40 sps:$4 sm:$0xff]  }
 0xd18   :  { %12599 = vmatprep.mubr.bf16.mxu1 %v27594_v43  ;;  %12652 = vmatprep.mubr.bf16.mxu0 %v27594_v43 }
 0xd19   :  { %12573 = vmatprep.subr.bf16.mxu1 %v21909_v45  ;;  %12626 = vmatprep.subr.bf16.mxu0 %v21912_v24  ;;  %v21984_v45 = vld [vmem:[%s29346_s5 + $0x18cc] ss:$40 sps:$4 sm:$0xff]   ;;  %v21979_v24 = vld [vmem:[%s29346_s5 + $0x18c0] ss:$40 sps:$4 sm:$0xff]  }
 0xd1b   :  { %12574 = vmatpush1.bf16.msra.mxu1 %v21907_v52  ;;  %12627 = vmatpush1.bf16.msra.mxu0 %v21910_v40  ;;  %v21982_v52 = vld [vmem:[%s29346_s5 + $0x18c8] ss:$40 sps:$4 sm:$0xff]   ;;  %v21987_v40 = vld [vmem:[%s29346_s5 + $0x1424] ss:$40 sps:$4 sm:$0xff]  }
 0xd1c   :  { %12575 = vmatprep.subr.bf16.mxu1 %v21915_v61  ;;  %12628 = vmatprep.subr.bf16.mxu0 %v21918_v22  ;;  %v22035_v61 = vld [vmem:[%s29344_s3 + $0x1404] ss:$16 sps:$4 sm:$0xff]   ;;  %v21985_v22 = vld [vmem:[%s29346_s5 + $0x1420] ss:$40 sps:$4 sm:$0xff]  }
 0xd1f   :  { %12576 = vmatpush1.bf16.msra.mxu1 %v21913_v55  ;;  %12629 = vmatpush1.bf16.msra.mxu0 %v21916_v35  ;;  %v22033_v55 = vld [vmem:[%s29344_s3 + $0x1400] ss:$16 sps:$4 sm:$0xff]   ;;  %v21990_v35 = vld [vmem:[%s29346_s5 + $0x1474] ss:$40 sps:$4 sm:$0xff]  }
 0xd20   :  { %12577 = vmatprep.subr.bf16.mxu1 %v21921_v17  ;;  %12630 = vmatprep.subr.bf16.mxu0 %v21924_v54  ;;  %v22041_v17 = vld [vmem:[%s29344_s3 + $0x1424] ss:$16 sps:$4 sm:$0xff]   ;;  %v21988_v54 = vld [vmem:[%s29346_s5 + $0x1470] ss:$40 sps:$4 sm:$0xff]  }
 0xd23   :  { %12578 = vmatpush1.bf16.msra.mxu1 %v21919_v53  ;;  %12631 = vmatpush1.bf16.msra.mxu0 %v21922_v25  ;;  %v22039_v53 = vld [vmem:[%s29344_s3 + $0x1420] ss:$16 sps:$4 sm:$0xff]   ;;  %v21993_v25 = vld [vmem:[%s29346_s5 + $0x14c4] ss:$40 sps:$4 sm:$0xff]  }
 0xd24   :  { %12579 = vmatprep.subr.bf16.mxu1 %v21927_v29  ;;  %12632 = vmatprep.subr.bf16.mxu0 %v21930_v16  ;;  %v22047_v29 = vld [vmem:[%s29344_s3 + $0x1444] ss:$16 sps:$4 sm:$0xff]   ;;  %v21991_v16 = vld [vmem:[%s29346_s5 + $0x14c0] ss:$40 sps:$4 sm:$0xff]  }
 0xd27   :  { %12580 = vmatpush1.bf16.msra.mxu1 %v21925_v50  ;;  %12633 = vmatpush1.bf16.msra.mxu0 %v21928_v56  ;;  %v22045_v50 = vld [vmem:[%s29344_s3 + $0x1440] ss:$16 sps:$4 sm:$0xff]   ;;  %v21996_v56 = vld [vmem:[%s29346_s5 + $0x1514] ss:$40 sps:$4 sm:$0xff]  }
 0xd28   :  { %12581 = vmatprep.subr.bf16.mxu1 %v21933_v15  ;;  %12634 = vmatprep.subr.bf16.mxu0 %v21936_v58  ;;  %v22053_v15 = vld [vmem:[%s29344_s3 + $0x1464] ss:$16 sps:$4 sm:$0xff]   ;;  %v21994_v58 = vld [vmem:[%s29346_s5 + $0x1510] ss:$40 sps:$4 sm:$0xff]  }
 0xd2b   :  { %12582 = vmatpush1.bf16.msra.mxu1 %v21931_v51  ;;  %12635 = vmatpush1.bf16.msra.mxu0 %v21934_v32  ;;  %v22051_v51 = vld [vmem:[%s29344_s3 + $0x1460] ss:$16 sps:$4 sm:$0xff]   ;;  %v21999_v32 = vld [vmem:[%s29346_s5 + $0x1564] ss:$40 sps:$4 sm:$0xff]  }
 0xd2c   :  { %12583 = vmatprep.subr.bf16.mxu1 %v21939_v13  ;;  %12636 = vmatprep.subr.bf16.mxu0 %v21942_v18  ;;  %v21997_v13 = vld [vmem:[%s29346_s5 + $0x1560] ss:$40 sps:$4 sm:$0xff]  }
 0xd2d   :  { %v22057_v18 = vld [vmem:[%s29344_s3 + $0x1480] ss:$16 sps:$4 sm:$0xff]  }
 0xd2f   :  { %12584 = vmatpush1.bf16.msra.mxu1 %v21937_v27  ;;  %12637 = vmatpush1.bf16.msra.mxu0 %v21940_v0  ;;  %v22002_v27 = vld [vmem:[%s29346_s5 + $0x15b4] ss:$40 sps:$4 sm:$0xff]  }
 0xd30   :  { %12585 = vmatprep.subr.bf16.mxu1 %v21945_v28  ;;  %12638 = vmatprep.subr.bf16.mxu0 %v21948_v38  ;;  %v22065_v0 = vld [vmem:[%s29344_s3 + $0x14a4] ss:$16 sps:$4 sm:$0xff]   ;;  %v22000_v28 = vld [vmem:[%s29346_s5 + $0x15b0] ss:$40 sps:$4 sm:$0xff]  }
 0xd31   :  { %v22063_v38 = vld [vmem:[%s29344_s3 + $0x14a0] ss:$16 sps:$4 sm:$0xff]  }
 0xd33   :  { %12586 = vmatpush1.bf16.msra.mxu1 %v21943_v44  ;;  %12639 = vmatpush1.bf16.msra.mxu0 %v21946_v33  ;;  %v22005_v44 = vld [vmem:[%s29346_s5 + $0x1604] ss:$40 sps:$4 sm:$0xff]  }
 0xd34   :  { %12587 = vmatprep.subr.bf16.mxu1 %v21951_v6  ;;  %12640 = vmatprep.subr.bf16.mxu0 %v21954_v47  ;;  %v22071_v33 = vld [vmem:[%s29344_s3 + $0x14c4] ss:$16 sps:$4 sm:$0xff]   ;;  %v22003_v6 = vld [vmem:[%s29346_s5 + $0x1600] ss:$40 sps:$4 sm:$0xff]  }
 0xd35   :  { %v22069_v47 = vld [vmem:[%s29344_s3 + $0x14c0] ss:$16 sps:$4 sm:$0xff]  }
 0xd37   :  { %12588 = vmatpush1.bf16.msra.mxu1 %v21949_v31  ;;  %12641 = vmatpush1.bf16.msra.mxu0 %v21952_v34  ;;  %v22008_v31 = vld [vmem:[%s29346_s5 + $0x1654] ss:$40 sps:$4 sm:$0xff]  }
 0xd38   :  { %12589 = vmatprep.subr.bf16.mxu1 %v21957_v42  ;;  %12642 = vmatprep.subr.bf16.mxu0 %v21960_v12  ;;  %v22077_v34 = vld [vmem:[%s29344_s3 + $0x14e4] ss:$16 sps:$4 sm:$0xff]   ;;  %v22006_v42 = vld [vmem:[%s29346_s5 + $0x1650] ss:$40 sps:$4 sm:$0xff]  }
 0xd39   :  { %v22075_v12 = vld [vmem:[%s29344_s3 + $0x14e0] ss:$16 sps:$4 sm:$0xff]  }
 0xd3b   :  { %12590 = vmatpush1.bf16.msra.mxu1 %v21955_v37  ;;  %12643 = vmatpush1.bf16.msra.mxu0 %v21958_v19  ;;  %v22011_v37 = vld [vmem:[%s29346_s5 + $0x16a4] ss:$40 sps:$4 sm:$0xff]  }
 0xd3c   :  { %12591 = vmatprep.subr.bf16.mxu1 %v21963_v46  ;;  %12644 = vmatprep.subr.bf16.mxu0 %v21966_v63  ;;  %v22083_v19 = vld [vmem:[%s29344_s3 + $0x1504] ss:$16 sps:$4 sm:$0xff]   ;;  %v22009_v46 = vld [vmem:[%s29346_s5 + $0x16a0] ss:$40 sps:$4 sm:$0xff]  }
 0xd3d   :  { %v22081_v63 = vld [vmem:[%s29344_s3 + $0x1500] ss:$16 sps:$4 sm:$0xff]  }
 0xd3f   :  { %12592 = vmatpush1.bf16.msra.mxu1 %v21961_v49  ;;  %12645 = vmatpush1.bf16.msra.mxu0 %v21964_v5  ;;  %v22014_v49 = vld [vmem:[%s29346_s5 + $0x16f4] ss:$40 sps:$4 sm:$0xff]   ;;  %v22012_v5 = vld [vmem:[%s29346_s5 + $0x16f0] ss:$40 sps:$4 sm:$0xff]  }
 0xd40   :  { %12593 = vmatprep.subr.bf16.mxu1 %v21969_v4  ;;  %12646 = vmatprep.subr.bf16.mxu0 %v21972_v21  ;;  %v22017_v4 = vld [vmem:[%s29346_s5 + $0x1744] ss:$40 sps:$4 sm:$0xff]   ;;  %v22015_v21 = vld [vmem:[%s29346_s5 + $0x1740] ss:$40 sps:$4 sm:$0xff]  }
 0xd43   :  { %12594 = vmatpush1.bf16.msra.mxu1 %v21967_v9  ;;  %12647 = vmatpush1.bf16.msra.mxu0 %v21970_v36  ;;  %v22020_v9 = vld [vmem:[%s29346_s5 + $0x1794] ss:$40 sps:$4 sm:$0xff]   ;;  %v22018_v36 = vld [vmem:[%s29346_s5 + $0x1790] ss:$40 sps:$4 sm:$0xff]  }
 0xd44   :  { %12595 = vmatprep.subr.bf16.mxu1 %v21975_v20  ;;  %12648 = vmatprep.subr.bf16.mxu0 %v21978_v7  ;;  %v22023_v20 = vld [vmem:[%s29346_s5 + $0x17e4] ss:$40 sps:$4 sm:$0xff]   ;;  %v22021_v7 = vld [vmem:[%s29346_s5 + $0x17e0] ss:$40 sps:$4 sm:$0xff]  }
 0xd47   :  { %12596 = vmatpush1.bf16.msra.mxu1 %v21973_v57  ;;  %12649 = vmatpush1.bf16.msra.mxu0 %v21976_v14  ;;  %v22026_v57 = vld [vmem:[%s29346_s5 + $0x1834] ss:$40 sps:$4 sm:$0xff]   ;;  %v22024_v14 = vld [vmem:[%s29346_s5 + $0x1830] ss:$40 sps:$4 sm:$0xff]  }
 0xd48   :  { %12597 = vmatprep.subr.bf16.mxu1 %v21981_v3  ;;  %12650 = vmatprep.subr.bf16.mxu0 %v21984_v45  ;;  %v22029_v3 = vld [vmem:[%s29346_s5 + $0x1884] ss:$40 sps:$4 sm:$0xff]   ;;  %v22027_v45 = vld [vmem:[%s29346_s5 + $0x1880] ss:$40 sps:$4 sm:$0xff]  }
 0xd4b   :  { %12598 = vmatpush1.bf16.msra.mxu1 %v21979_v24  ;;  %12651 = vmatpush1.bf16.msra.mxu0 %v21982_v52  ;;  %v22032_v24 = vld [vmem:[%s29346_s5 + $0x18d4] ss:$40 sps:$4 sm:$0xff]   ;;  %v22030_v52 = vld [vmem:[%s29346_s5 + $0x18d0] ss:$40 sps:$4 sm:$0xff]  }
 0xd4c   :  { %12673 = vmatprep.subr.bf16.mxu1 %v21987_v40  ;;  %13774 = vmatprep.subr.bf16.mxu0 %v22035_v61  ;;  %v22038_v40 = vld [vmem:[%s29344_s3 + $0x140c] ss:$16 sps:$4 sm:$0xff]   ;;  %v22036_v61 = vld [vmem:[%s29344_s3 + $0x1408] ss:$16 sps:$4 sm:$0xff]  }
 0xd4e   :  { %12600 = vmatmul.mubr.bf16.vlgmr.msra.gmra.mrb[24].mxu1 %v27592_v60  ;;  %12653 = vmatmul.mubr.bf16.vlgmr.msra.gmra.mrb[24].mxu0 %v27592_v60 }
 0xd4f   :  { %12609 = vmatprep.mubr.bf16.mxu1 %v27626_v48  ;;  %12662 = vmatprep.mubr.bf16.mxu0 %v27626_v48 }
 0xd50   :  { %12674 = vmatpush1.bf16.msra.mxu1 %v21985_v22  ;;  %13775 = vmatpush1.bf16.msra.mxu0 %v22033_v55  ;;  %v22044_v22 = vld [vmem:[%s29344_s3 + $0x142c] ss:$16 sps:$4 sm:$0xff]   ;;  %v22042_v55 = vld [vmem:[%s29344_s3 + $0x1428] ss:$16 sps:$4 sm:$0xff]  }
 0xd51   :  { %12675 = vmatprep.subr.bf16.mxu1 %v21990_v35  ;;  %13776 = vmatprep.subr.bf16.mxu0 %v22041_v17  ;;  %v22050_v35 = vld [vmem:[%s29344_s3 + $0x144c] ss:$16 sps:$4 sm:$0xff]   ;;  %v22048_v17 = vld [vmem:[%s29344_s3 + $0x1448] ss:$16 sps:$4 sm:$0xff]  }
 0xd54   :  { %12676 = vmatpush1.bf16.msra.mxu1 %v21988_v54  ;;  %13777 = vmatpush1.bf16.msra.mxu0 %v22039_v53  ;;  %v22062_v54 = vld [vmem:[%s29344_s3 + $0x148c] ss:$16 sps:$4 sm:$0xff]   ;;  %v22060_v53 = vld [vmem:[%s29344_s3 + $0x1488] ss:$16 sps:$4 sm:$0xff]  }
 0xd55   :  { %12677 = vmatprep.subr.bf16.mxu1 %v21993_v25  ;;  %13778 = vmatprep.subr.bf16.mxu0 %v22047_v29  ;;  %v22066_v25 = vld [vmem:[%s29344_s3 + $0x14a8] ss:$16 sps:$4 sm:$0xff]   ;;  %v22074_v29 = vld [vmem:[%s29344_s3 + $0x14cc] ss:$16 sps:$4 sm:$0xff]  }
 0xd56   :  { %12610 = vmatmul.mubr.bf16.gmra.mrb[28].mxu1 %v27624_v23  ;;  %12663 = vmatmul.mubr.bf16.gmra.mrb[28].mxu0 %v27624_v23 }
 0xd57   :  { %12705 = vmatprep.mubr.bf16.mxu1 %v27594_v43  ;;  %v22059_v43 = vld [vmem:[%s29344_s3 + $0x1484] ss:$16 sps:$4 sm:$0xff]  }
 0xd58   :  { %12678 = vmatpush1.bf16.msra.mxu1 %v21991_v16  ;;  %13779 = vmatpush1.bf16.msra.mxu0 %v22045_v50  ;;  %v22072_v16 = vld [vmem:[%s29344_s3 + $0x14c8] ss:$16 sps:$4 sm:$0xff]   ;;  %v22080_v50 = vld [vmem:[%s29344_s3 + $0x14ec] ss:$16 sps:$4 sm:$0xff]  }
 0xd59   :  { %12679 = vmatprep.subr.bf16.mxu1 %v21996_v56  ;;  %13780 = vmatprep.subr.bf16.mxu0 %v22053_v15  ;;  %v22078_v56 = vld [vmem:[%s29344_s3 + $0x14e8] ss:$16 sps:$4 sm:$0xff]   ;;  %v22086_v15 = vld [vmem:[%s29344_s3 + $0x150c] ss:$16 sps:$4 sm:$0xff]  }
 0xd5c   :  { %12680 = vmatpush1.bf16.msra.mxu1 %v21994_v58  ;;  %13781 = vmatpush1.bf16.msra.mxu0 %v22051_v51  ;;  %v22084_v58 = vld [vmem:[%s29344_s3 + $0x1508] ss:$16 sps:$4 sm:$0xff]   ;;  %v22089_v51 = vld [vmem:[%s29344_s3 + $0x1524] ss:$16 sps:$4 sm:$0xff]  }
 0xd5d   :  { %12681 = vmatprep.subr.bf16.mxu1 %v21999_v32  ;;  %13782 = vmatprep.subr.bf16.mxu0 %v22059_v43  ;;  %v22092_v32 = vld [vmem:[%s29344_s3 + $0x152c] ss:$16 sps:$4 sm:$0xff]   ;;  %v22087_v43 = vld [vmem:[%s29344_s3 + $0x1520] ss:$16 sps:$4 sm:$0xff]  }
 0xd60   :  { %12682 = vmatpush1.bf16.msra.mxu1 %v21997_v13  ;;  %13783 = vmatpush1.bf16.msra.mxu0 %v22057_v18  ;;  %v22090_v13 = vld [vmem:[%s29344_s3 + $0x1528] ss:$16 sps:$4 sm:$0xff]   ;;  %v22095_v18 = vld [vmem:[%s29344_s3 + $0x1544] ss:$16 sps:$4 sm:$0xff]  }
 0xd61   :  { %12683 = vmatprep.subr.bf16.mxu1 %v22002_v27  ;;  %13784 = vmatprep.subr.bf16.mxu0 %v22065_v0  ;;  %v22098_v27 = vld [vmem:[%s29344_s3 + $0x154c] ss:$16 sps:$4 sm:$0xff]   ;;  %v22093_v0 = vld [vmem:[%s29344_s3 + $0x1540] ss:$16 sps:$4 sm:$0xff]  }
 0xd64   :  { %12684 = vmatpush1.bf16.msra.mxu1 %v22000_v28  ;;  %13785 = vmatpush1.bf16.msra.mxu0 %v22063_v38  ;;  %v22096_v28 = vld [vmem:[%s29344_s3 + $0x1548] ss:$16 sps:$4 sm:$0xff]   ;;  %v22101_v38 = vld [vmem:[%s29344_s3 + $0x1564] ss:$16 sps:$4 sm:$0xff]  }
 0xd65   :  { %12685 = vmatprep.subr.bf16.mxu1 %v22005_v44  ;;  %13786 = vmatprep.subr.bf16.mxu0 %v22071_v33  ;;  %v22104_v44 = vld [vmem:[%s29344_s3 + $0x156c] ss:$16 sps:$4 sm:$0xff]   ;;  %v22099_v33 = vld [vmem:[%s29344_s3 + $0x1560] ss:$16 sps:$4 sm:$0xff]  }
 0xd68   :  { %12686 = vmatpush1.bf16.msra.mxu1 %v22003_v6  ;;  %13787 = vmatpush1.bf16.msra.mxu0 %v22069_v47  ;;  %v22102_v6 = vld [vmem:[%s29344_s3 + $0x1568] ss:$16 sps:$4 sm:$0xff]   ;;  %v22107_v47 = vld [vmem:[%s29344_s3 + $0x1584] ss:$16 sps:$4 sm:$0xff]  }
 0xd69   :  { %12687 = vmatprep.subr.bf16.mxu1 %v22008_v31  ;;  %13788 = vmatprep.subr.bf16.mxu0 %v22077_v34  ;;  %v22110_v31 = vld [vmem:[%s29344_s3 + $0x158c] ss:$16 sps:$4 sm:$0xff]   ;;  %v22105_v34 = vld [vmem:[%s29344_s3 + $0x1580] ss:$16 sps:$4 sm:$0xff]  }
 0xd6c   :  { %12688 = vmatpush1.bf16.msra.mxu1 %v22006_v42  ;;  %13789 = vmatpush1.bf16.msra.mxu0 %v22075_v12  ;;  %v22108_v42 = vld [vmem:[%s29344_s3 + $0x1588] ss:$16 sps:$4 sm:$0xff]   ;;  %v22113_v12 = vld [vmem:[%s29344_s3 + $0x15a4] ss:$16 sps:$4 sm:$0xff]  }
 0xd6d   :  { %12689 = vmatprep.subr.bf16.mxu1 %v22011_v37  ;;  %13790 = vmatprep.subr.bf16.mxu0 %v22083_v19  ;;  %v22116_v37 = vld [vmem:[%s29344_s3 + $0x15ac] ss:$16 sps:$4 sm:$0xff]   ;;  %v22111_v19 = vld [vmem:[%s29344_s3 + $0x15a0] ss:$16 sps:$4 sm:$0xff]  }
 0xd70   :  { %12690 = vmatpush1.bf16.msra.mxu1 %v22009_v46  ;;  %13791 = vmatpush1.bf16.msra.mxu0 %v22081_v63  ;;  %v22114_v46 = vld [vmem:[%s29344_s3 + $0x15a8] ss:$16 sps:$4 sm:$0xff]   ;;  %v22119_v63 = vld [vmem:[%s29344_s3 + $0x15c4] ss:$16 sps:$4 sm:$0xff]  }
 0xd71   :  { %12691 = vmatprep.subr.bf16.mxu1 %v22014_v49  ;;  %13792 = vmatprep.subr.bf16.mxu0 %v22089_v51  ;;  %v22122_v49 = vld [vmem:[%s29344_s3 + $0x15cc] ss:$16 sps:$4 sm:$0xff]  }
 0xd74   :  { %12692 = vmatpush1.bf16.msra.mxu1 %v22012_v5  ;;  %13793 = vmatpush1.bf16.msra.mxu0 %v22087_v43  ;;  %v22117_v5 = vld [vmem:[%s29344_s3 + $0x15c0] ss:$16 sps:$4 sm:$0xff]  }
 0xd75   :  { %12693 = vmatprep.subr.bf16.mxu1 %v22017_v4  ;;  %13794 = vmatprep.subr.bf16.mxu0 %v22095_v18  ;;  %v22120_v4 = vld [vmem:[%s29344_s3 + $0x15c8] ss:$16 sps:$4 sm:$0xff]  }
 0xd76   :  { %v22906_v18 = vld [vmem:[#allocation2 + $0x48] sm:$0xff] }
 0xd78   :  { %12694 = vmatpush1.bf16.msra.mxu1 %v22015_v21  ;;  %13795 = vmatpush1.bf16.msra.mxu0 %v22093_v0  ;;  %v22125_v21 = vld [vmem:[%s29344_s3 + $0x15e4] ss:$16 sps:$4 sm:$0xff]  }
 0xd79   :  { %12695 = vmatprep.subr.bf16.mxu1 %v22020_v9  ;;  %13796 = vmatprep.subr.bf16.mxu0 %v22101_v38  ;;  %v22128_v9 = vld [vmem:[%s29344_s3 + $0x15ec] ss:$16 sps:$4 sm:$0xff]  }
 0xd7c   :  { %12696 = vmatpush1.bf16.msra.mxu1 %v22018_v36  ;;  %13797 = vmatpush1.bf16.msra.mxu0 %v22099_v33  ;;  %v22123_v36 = vld [vmem:[%s29344_s3 + $0x15e0] ss:$16 sps:$4 sm:$0xff]  }
 0xd7d   :  { %12697 = vmatprep.subr.bf16.mxu1 %v22023_v20  ;;  %13798 = vmatprep.subr.bf16.mxu0 %v22107_v47  ;;  %v22126_v20 = vld [vmem:[%s29344_s3 + $0x15e8] ss:$16 sps:$4 sm:$0xff]  }
 0xd80   :  { %12698 = vmatpush1.bf16.msra.mxu1 %v22021_v7  ;;  %13799 = vmatpush1.bf16.msra.mxu0 %v22105_v34  ;;  %v22131_v7 = vld [vmem:[%s29344_s3 + $0x1604] ss:$16 sps:$4 sm:$0xff]  }
 0xd81   :  { %12699 = vmatprep.subr.bf16.mxu1 %v22026_v57  ;;  %13800 = vmatprep.subr.bf16.mxu0 %v22113_v12  ;;  %v22134_v57 = vld [vmem:[%s29344_s3 + $0x160c] ss:$16 sps:$4 sm:$0xff]  }
 0xd84   :  { %12700 = vmatpush1.bf16.msra.mxu1 %v22024_v14  ;;  %13801 = vmatpush1.bf16.msra.mxu0 %v22111_v19  ;;  %v18767_v14 = vld [vmem:[%s29348_s7 + $0x8] sm:$0x3] }
 0xd85   :  { %12701 = vmatprep.subr.bf16.mxu1 %v22029_v3  ;;  %13802 = vmatprep.subr.bf16.mxu0 %v22119_v63  ;;  %v18768_v3 = vld [vmem:[%s29349_s8 + $0x8] sm:$0x3] }
 0xd88   :  { %12702 = vmatpush1.bf16.msra.mxu1 %v22027_v45  ;;  %13803 = vmatpush1.bf16.msra.mxu0 %v22117_v5  ;;  %v12764_v45 = vrot.slane %v18767_v14, %v23184_v10 }
 0xd89   :  { %12703 = vmatprep.subr.bf16.mxu1 %v22032_v24  ;;  %13804 = vmatprep.subr.bf16.mxu0 %v22125_v21  ;;  %v12785_v24 = vrot.slane %v18768_v3, %v23184_v10 }
 0xd8b   :  { %v12796_v51 = vmul.f32 %v12785_v24, %v27165_v26 }
 0xd8c   :  { %12704 = vmatpush1.bf16.msra.mxu1 %v22030_v52  ;;  %13805 = vmatpush1.bf16.msra.mxu0 %v22123_v36  ;;  %v12768_v52 = vrot.slane %v18767_v14, %v23187_v11 }
 0xd8d   :  { %13880 = vmatprep.subr.bf16.mxu1 %v22038_v40  ;;  %13827 = vmatprep.subr.bf16.mxu0 %v22131_v7  ;;  %v12789_v40 = vrot.slane %v18768_v3, %v23187_v11 }
 0xd8f   :  { %12706 = vmatmul.mubr.bf16.vlgmr.msra.gmra.mrb[80].mxu1 %v27592_v60  ;;  %v22056_v60 = vld [vmem:[%s29344_s3 + $0x146c] ss:$16 sps:$4 sm:$0xff]  }
 0xd90   :  { %12715 = vmatprep.mubr.bf16.mxu1 %v27626_v48  ;;  %13881 = vmatpush1.bf16.msra.mxu1 %v22036_v61  ;;  %v22054_v48 = vld [vmem:[%s29344_s3 + $0x1468] ss:$16 sps:$4 sm:$0xff]  }
 0xd91   :  { %13882 = vmatprep.subr.bf16.mxu1 %v22044_v22 }
 0xd94   :  { %13883 = vmatpush1.bf16.msra.mxu1 %v22042_v55  ;;  %v12792_v55 = vmul.f32 %v12785_v24, %v27147_v41  ;;  %v12797_v41 = vmul.f32 %v12789_v40, %v27168_v39 }
 0xd95   :  { %13884 = vmatprep.subr.bf16.mxu1 %v22050_v35 }
 0xd97   :  { %12716 = vmatmul.mubr.bf16.gmra.mrb[84].mxu1 %v27624_v23  ;;  %v22068_v23 = vld [vmem:[%s29344_s3 + $0x14ac] ss:$16 sps:$4 sm:$0xff]  }
 0xd98   :  { %13885 = vmatpush1.bf16.msra.mxu1 %v22048_v17 }
 0xd99   :  { %13886 = vmatprep.subr.bf16.mxu1 %v22056_v60  ;;  %v12793_v60 = vmul.f32 %v12789_v40, %v27150_v1  ;;  %v22905_v1 = vld [vmem:[#allocation2 + $0x40] sm:$0xff] }
 0xd9c   :  { %13887 = vmatpush1.bf16.msra.mxu1 %v22054_v48 }
 0xd9d   :  { %13888 = vmatprep.subr.bf16.mxu1 %v22062_v54  ;;  %v12816_v54 = vld [vmem:[#allocation2] sm:$0xe0] }
 0xda0   :  { %13889 = vmatpush1.bf16.msra.mxu1 %v22060_v53 }
 0xda1   :  { %13890 = vmatprep.subr.bf16.mxu1 %v22068_v23 }
 0xda4   :  { %13891 = vmatpush1.bf16.msra.mxu1 %v22066_v25  ;;  %v12794_v25 = vmul.f32 %v12785_v24, %v27153_v2 }
 0xda5   :  { %13892 = vmatprep.subr.bf16.mxu1 %v22074_v29 }
 0xda8   :  { %13893 = vmatpush1.bf16.msra.mxu1 %v22072_v16  ;;  %v12817_v16 = vld [vmem:[#allocation2 + $0x8] sm:$0xe0] }
 0xda9   :  { %13894 = vmatprep.subr.bf16.mxu1 %v22080_v50 }
 0xdac   :  { %13895 = vmatpush1.bf16.msra.mxu1 %v22078_v56 }
 0xdad   :  { %13896 = vmatprep.subr.bf16.mxu1 %v22086_v15  ;;  %v12795_v15 = vmul.f32 %v12789_v40, %v27155_v30 }
 0xdb0   :  { %13897 = vmatpush1.bf16.msra.mxu1 %v22084_v58 }
 0xdb1   :  { %13898 = vmatprep.subr.bf16.mxu1 %v22092_v32 }
 0xdb4   :  { %13899 = vmatpush1.bf16.msra.mxu1 %v22090_v13  ;;  %v12798_v13 = vmul.f32 %v22905_v1, %v12785_v24 }
 0xdb5   :  { %13900 = vmatprep.subr.bf16.mxu1 %v22098_v27  ;;  %v12799_v27 = vmul.f32 %v22906_v18, %v12789_v40 }
 0xdb8   :  { %13901 = vmatpush1.bf16.msra.mxu1 %v22096_v28 }
 0xdb9   :  { %13902 = vmatprep.subr.bf16.mxu1 %v22104_v44 }
 0xdbc   :  { %13903 = vmatpush1.bf16.msra.mxu1 %v22102_v6 }
 0xdbd   :  { %13904 = vmatprep.subr.bf16.mxu1 %v22110_v31 }
 0xdc0   :  { %13905 = vmatpush1.bf16.msra.mxu1 %v22108_v42 }
 0xdc1   :  { %13906 = vmatprep.subr.bf16.mxu1 %v22116_v37 }
 0xdc4   :  { %13907 = vmatpush1.bf16.msra.mxu1 %v22114_v46 }
 0xdc5   :  { %13908 = vmatprep.subr.bf16.mxu1 %v22122_v49 }
 0xdc8   :  { %13909 = vmatpush1.bf16.msra.mxu1 %v22120_v4 }
 0xdc9   :  { %13910 = vmatprep.subr.bf16.mxu1 %v22128_v9 }
 0xdcc   :  { %13911 = vmatpush1.bf16.msra.mxu1 %v22126_v20 }
 0xdcd   :  { %13933 = vmatprep.subr.bf16.mxu1 %v22134_v57 }
 0xe62   :  { %v12707_v61 = vpop.f32.mrb[80].mxu1 }
 0xe63   :  { %v12771_v22 = vadd.f32 %v12764_v45, %v12707_v61  ;;  %v12709_v35 = vpop.f32.mrb[81].mxu1 }
 0xe64   :  { %v12772_v17 = vadd.f32 %v12768_v52, %v12709_v35  ;;  %v12711_v48 = vpop.f32.mrb[82].mxu1 }
 0xe65   :  { %v12800_v53 = vadd.f32 %v12792_v55, %v12771_v22  ;;  %v12773_v23 = vadd.f32 %v12764_v45, %v12711_v48  ;;  %v12713_v29 = vpop.f32.mrb[83].mxu1 }
 0xe66   :  { %v12801_v50 = vadd.f32 %v12793_v60, %v12772_v17  ;;  %v12774_v56 = vadd.f32 %v12768_v52, %v12713_v29 }
 0xe67   :  { %v12802_v58 = vadd.f32 %v12794_v25, %v12773_v23  ;;  %v12858_v32 = vpack.c.bf16 %v12800_v53, %v12816_v54  ;;  %v12834_v28 = vrot.slane %v12800_v53, 3 }
 0xe68   :  { %v12803_v43 = vadd.f32 %v12795_v15, %v12774_v56  ;;  %v12859_v0 = vpack.c.bf16 %v12801_v50, %v12817_v16  ;;  %v12835_v33 = vrot.slane %v12801_v50, 3 }
 0xe69   :  { %v12836_v2 = vrot.slane %v12802_v58, 3  ;;  %v13023_v38 = vshrl.u32 %v12858_v32, 16  ;;  %v13026_v44 = vshll.u32 %v12858_v32, 16 }
 0xe6a   :  { %v12838_v6 = vrot.slane %v12803_v43, 3  ;;  %v12717_v47 = vpop.f32.mrb[84].mxu1  ;;  %v13040_v30 = vshrl.u32 %v12859_v0, 16  ;;  %v13043_v31 = vshll.u32 %v12859_v0, 16 }
 0xe6b   :  { %v12837_v26 = vsel %vm2959_vm4, %v12834_v28, %v12836_v2  ;;  %v12775_v34 = vadd.f32 %v12764_v45, %v12717_v47  ;;  %v12719_v39 = vpop.f32.mrb[85].mxu1  ;;  %v28117_v42 = vrot.slane %v13023_v38, 2  ;;  %v28119_v12 = vrot.slane %v13026_v44, 3  ;;  %v22132_v44 = vld [vmem:[%s29344_s3 + $0x1608] ss:$16 sps:$4 sm:$0xff]  }
 0xe6c   :  { %v12860_v37 = vpack.c.bf16 %v12837_v26, %v12834_v28  ;;  %v12839_v19 = vsel %vm2959_vm4, %v12835_v33, %v12838_v6  ;;  %v12776_v46 = vadd.f32 %v12768_v52, %v12719_v39  ;;  %v12721_v63 = vpop.f32.mrb[86].mxu1  ;;  %v13042_v49 = vrot.slane %v13040_v30, 2 }
 0xe6d   :  { %v28122_v5 = vpack.c.bf16 %v12839_v19, %v12835_v33  ;;  %v12804_v4 = vadd.f32 %v12796_v51, %v12775_v34  ;;  %v12777_v21 = vadd.f32 %v12764_v45, %v12721_v63  ;;  %v12723_v9 = vpop.f32.mrb[87].mxu1  ;;  %v13045_v36 = vrot.slane %v13043_v31, 3 }
 0xe6e   :  { %v13057_v20 = vshrl.u32 %v12860_v37, 16  ;;  %v13060_v7 = vshll.u32 %v12860_v37, 16  ;;  %v12805_v57 = vadd.f32 %v12797_v41, %v12776_v46  ;;  %v12778_v14 = vadd.f32 %v12768_v52, %v12723_v9  ;;  %v22140_v46 = vld [vmem:[%s29344_s3 + $0x162c] ss:$16 sps:$4 sm:$0xff]  }
 0xe6f   :  { %v12840_v3 = vrot.slane %v12804_v4, 3  ;;  %v12806_v24 = vadd.f32 %v12798_v13, %v12777_v21  ;;  %v13046_v40 = vor.u32 %v13045_v36, %v13042_v49  ;;  %v12862_v61 = vpack.c.bf16 %v12804_v4, %v12802_v58  ;;  %v22135_v36 = vld [vmem:[%s29344_s3 + $0x1620] ss:$16 sps:$4 sm:$0xff]  }
 0xe70   :  { %v12842_v22 = vrot.slane %v12805_v57, 3  ;;  %v12807_v55 = vadd.f32 %v12799_v27, %v12778_v14  ;;  %v12863_v35 = vpack.c.bf16 %v12805_v57, %v12803_v43  ;;  %v13029_v17 = vor.u32 %v28119_v12, %v28117_v42 }
 0xe71   :  { %v12841_v60 = vsel %vm2959_vm4, %v12836_v2, %v12840_v3  ;;  %12814 = vst [vmem:[#allocation2 + $0x40] sm:$0xff] %v12806_v24  ;;  %v12844_v45 = vrot.slane %v12806_v24, 3  ;;  %v13031_v48 = vshrl.u32 %v12862_v61, 16  ;;  %v13034_v54 = vshll.u32 %v12862_v61, 16  ;;  %v22129_v2 = vld [vmem:[%s29344_s3 + $0x1600] ss:$16 sps:$4 sm:$0xff]  }
 0xe72   :  { %v12843_v53 = vsel %vm2959_vm4, %v12838_v6, %v12842_v22  ;;  %12815 = vst [vmem:[#allocation2 + $0x48] sm:$0xff] %v12807_v55  ;;  %v12846_v52 = vrot.slane %v12807_v55, 3  ;;  %v13048_v23 = vshrl.u32 %v12863_v35, 16  ;;  %v13051_v25 = vshll.u32 %v12863_v35, 16  ;;  %v22137_v6 = vld [vmem:[%s29344_s3 + $0x1624] ss:$16 sps:$4 sm:$0xff]  }
 0xe73   :  { %v12845_v29 = vsel %vm2959_vm4, %v12840_v3, %v12844_v45  ;;  %v28129_v16 = vpack.c.bf16 %v12844_v45, %v12844_v45  ;;  %v13033_v50 = vrot.slane %v13031_v48, 2  ;;  %v13036_v56 = vrot.slane %v13034_v54, 3  ;;  %v22143_v61 = vld [vmem:[%s29344_s3 + $0x1644] ss:$16 sps:$4 sm:$0xff]   ;;  %v22146_v35 = vld [vmem:[%s29344_s3 + $0x164c] ss:$16 sps:$4 sm:$0xff]  }
 0xe74   :  { %v12864_v15 = vpack.c.bf16 %v12845_v29, %v12841_v60  ;;  %v12847_v58 = vsel %vm2959_vm4, %v12842_v22, %v12846_v52  ;;  %v12869_v51 = vpack.c.bf16 %v12846_v52, %v12846_v52  ;;  %v13050_v41 = vrot.slane %v13048_v23, 2 }
 0xe75   :  { %v13109_v32 = vshrl.u32 %v28129_v16, 16  ;;  %v13112_v43 = vshll.u32 %v28129_v16, 16  ;;  %v12865_v1 = vpack.c.bf16 %v12847_v58, %v12843_v53  ;;  %v13053_v13 = vrot.slane %v13051_v25, 3  ;;  %v22141_v58 = vld [vmem:[%s29344_s3 + $0x1640] ss:$16 sps:$4 sm:$0xff]  }
 0xe76   :  { %v13065_v18 = vshrl.u32 %v12864_v15, 16  ;;  %v13068_v27 = vshll.u32 %v12864_v15, 16  ;;  %v13118_v0 = vshrl.u32 %v12869_v51, 16  ;;  %v13121_v28 = vshll.u32 %v12869_v51, 16  ;;  %v22144_v51 = vld [vmem:[%s29344_s3 + $0x1648] ss:$16 sps:$4 sm:$0xff]  }
 0xe77   :  { %v28137_v38 = vor.u32 %v13053_v13, %v13050_v41  ;;  %v28142_v33 = vor.u32 %v13036_v56, %v13033_v50  ;;  %v13074_v47 = vshrl.u32 %v28122_v5, 16  ;;  %v13077_v30 = vshll.u32 %v28122_v5, 16 }
 0xe78   :  { %v12824_v31 = vld [vmem:[#allocation2 + $0x40] sm:$0x1f]  ;;  %v13082_v26 = vshrl.u32 %v12865_v1, 16  ;;  %v13085_v34 = vshll.u32 %v12865_v1, 16  ;;  %v13059_v39 = vrot.slane %v13057_v20, 2  ;;  %v13062_v42 = vrot.slane %v13060_v7, 3 }
 0xe79   :  { %v13055_v12 = vsel %vm5431_vm5, %v13046_v40, %v28137_v38  ;;  %v13038_v37 = vsel %vm5431_vm5, %v13029_v17, %v28142_v33  ;;  %v12825_v19 = vld [vmem:[#allocation2 + $0x48] sm:$0x1f]  ;;  %v12866_v63 = vpack.c.bf16 %v12824_v31, %v12824_v31  ;;  %v13076_v49 = vrot.slane %v13074_v47, 2  ;;  %v22161_v47 = vld [vmem:[%s29344_s3 + $0x16a4] ss:$16 sps:$4 sm:$0xff]  }
 0xe7a   :  { %13806 = vmatprep.mubr.bf16.mxu0 %v13055_v12  ;;  %13912 = vmatprep.mubr.bf16.mxu1 %v13055_v12  ;;  %v12867_v5 = vpack.c.bf16 %v12825_v19, %v12825_v19  ;;  %v13079_v4 = vrot.slane %v13077_v30, 3  ;;  %v13084_v21 = vrot.slane %v13082_v26, 2  ;;  %v13087_v9 = vrot.slane %v13085_v34, 3  ;;  %v22138_v40 = vld [vmem:[%s29344_s3 + $0x1628] ss:$16 sps:$4 sm:$0xff]  }
 0xe7b   :  { %13807 = vmatmul.mubr.bf16.vlgmr.msra.gmra.mrb[80].mxu0 %v13038_v37  ;;  %13913 = vmatmul.mubr.bf16.vlgmr.msra.gmra.mrb[88].mxu1 %v13038_v37  ;;  %v13091_v20 = vshrl.u32 %v12866_v63, 16  ;;  %v13094_v7 = vshll.u32 %v12866_v63, 16  ;;  %v13063_v57 = vor.u32 %v13062_v42, %v13059_v39  ;;  %v13067_v14 = vrot.slane %v13065_v18, 2  ;;  %v22149_v18 = vld [vmem:[%s29344_s3 + $0x1664] ss:$16 sps:$4 sm:$0xff]  }
 0xe7c   :  { %13828 = vmatpush1.bf16.msra.mxu0 %v22129_v2  ;;  %13934 = vmatpush1.bf16.msra.mxu1 %v22132_v44  ;;  %v13100_v3 = vshrl.u32 %v12867_v5, 16  ;;  %v13103_v24 = vshll.u32 %v12867_v5, 16  ;;  %v13080_v22 = vor.u32 %v13079_v4, %v13076_v49  ;;  %v13088_v55 = vor.u32 %v13087_v9, %v13084_v21  ;;  %v22150_v2 = vld [vmem:[%s29344_s3 + $0x1668] ss:$16 sps:$4 sm:$0xff]   ;;  %v22158_v44 = vld [vmem:[%s29344_s3 + $0x168c] ss:$16 sps:$4 sm:$0xff]  }
 0xe7d   :  { %13829 = vmatprep.subr.bf16.mxu0 %v22137_v6  ;;  %13935 = vmatprep.subr.bf16.mxu1 %v22140_v46  ;;  %v13093_v17 = vrot.slane %v13091_v20, 2  ;;  %v13096_v60 = vrot.slane %v13094_v7, 3  ;;  %v13070_v45 = vrot.slane %v13068_v27, 3  ;;  %v13120_v48 = vrot.slane %v13118_v0, 2  ;;  %v22152_v27 = vld [vmem:[%s29344_s3 + $0x166c] ss:$16 sps:$4 sm:$0xff]  }
 0xe7e   :  { %v13102_v54 = vrot.slane %v13100_v3, 2  ;;  %v13105_v53 = vrot.slane %v13103_v24, 3  ;;  %v13089_v52 = vsel %vm5431_vm5, %v13080_v22, %v13088_v55  ;;  %v13123_v23 = vrot.slane %v13121_v28, 3  ;;  %v22147_v28 = vld [vmem:[%s29344_s3 + $0x1660] ss:$16 sps:$4 sm:$0xff]  }
 0xe7f   :  { %v13097_v25 = vor.u32 %v13096_v60, %v13093_v17  ;;  %v13071_v29 = vor.u32 %v13070_v45, %v13067_v14  ;;  %v13111_v16 = vrot.slane %v13109_v32, 2  ;;  %v13114_v50 = vrot.slane %v13112_v43, 3  ;;  %v22156_v6 = vld [vmem:[%s29344_s3 + $0x1688] ss:$16 sps:$4 sm:$0xff]   ;;  %v22164_v30 = vld [vmem:[%s29344_s3 + $0x16ac] ss:$16 sps:$4 sm:$0xff]  }
 0xe80   :  { %v13106_v56 = vor.u32 %v13105_v53, %v13102_v54  ;;  %13830 = vmatpush1.bf16.msra.mxu0 %v22135_v36  ;;  %13936 = vmatpush1.bf16.msra.mxu1 %v22138_v40  ;;  %v13124_v15 = vor.u32 %v13123_v23, %v13120_v48  ;;  %v22159_v31 = vld [vmem:[%s29344_s3 + $0x16a0] ss:$16 sps:$4 sm:$0xff]   ;;  %v22162_v26 = vld [vmem:[%s29344_s3 + $0x16a8] ss:$16 sps:$4 sm:$0xff]   ;;  %v22167_v34 = vld [vmem:[%s29344_s3 + $0x16c4] ss:$16 sps:$4 sm:$0xff]  }
 0xe81   :  { %13831 = vmatprep.subr.bf16.mxu0 %v22143_v61  ;;  %13937 = vmatprep.subr.bf16.mxu1 %v22146_v35  ;;  %v28176_v41 = vsel %vm5431_vm5, %v13063_v57, %v13071_v29  ;;  %v13115_v1 = vor.u32 %v13114_v50, %v13111_v16  ;;  %v13098_v13 = vsel %vm5431_vm5, %v28142_v33, %v13097_v25  ;;  %v22153_v33 = vld [vmem:[%s29344_s3 + $0x1680] ss:$16 sps:$4 sm:$0xff]   ;;  %v22170_v39 = vld [vmem:[%s29344_s3 + $0x16cc] ss:$16 sps:$4 sm:$0xff]   ;;  %v22168_v12 = vld [vmem:[%s29344_s3 + $0x16c8] ss:$16 sps:$4 sm:$0xff]  }
 0xe82   :  { %v13107_v32 = vsel %vm5431_vm5, %v28137_v38, %v13106_v56  ;;  %v28181_v43 = vsel %vm5431_vm5, %v13088_v55, %v13124_v15  ;;  %v22155_v38 = vld [vmem:[%s29344_s3 + $0x1684] ss:$16 sps:$4 sm:$0xff]   ;;  %v22165_v42 = vld [vmem:[%s29344_s3 + $0x16c0] ss:$16 sps:$4 sm:$0xff]   ;;  %v22176_v19 = vld [vmem:[%s29344_s3 + $0x16ec] ss:$16 sps:$4 sm:$0xff]  }
 0xe83   :  { %13816 = vmatprep.mubr.bf16.mxu0 %v13107_v32  ;;  %13922 = vmatprep.mubr.bf16.mxu1 %v13107_v32  ;;  %v28192_v0 = vsel %vm5431_vm5, %v13071_v29, %v13115_v1  ;;  %v22173_v37 = vld [vmem:[%s29344_s3 + $0x16e4] ss:$16 sps:$4 sm:$0xff]   ;;  %v22171_v46 = vld [vmem:[%s29344_s3 + $0x16e0] ss:$16 sps:$4 sm:$0xff]   ;;  %v22174_v63 = vld [vmem:[%s29344_s3 + $0x16e8] ss:$16 sps:$4 sm:$0xff]  }
 0xe84   :  { %13817 = vmatmul.mubr.bf16.gmra.mrb[84].mxu0 %v13098_v13  ;;  %13923 = vmatmul.mubr.bf16.gmra.mrb[92].mxu1 %v13098_v13  ;;  %v22179_v49 = vld [vmem:[%s29344_s3 + $0x1704] ss:$16 sps:$4 sm:$0xff]   ;;  %v22182_v5 = vld [vmem:[%s29344_s3 + $0x170c] ss:$16 sps:$4 sm:$0xff]   ;;  %v22177_v4 = vld [vmem:[%s29344_s3 + $0x1700] ss:$16 sps:$4 sm:$0xff]  }
 0xe85   :  { %13832 = vmatpush1.bf16.msra.mxu0 %v22141_v58  ;;  %13938 = vmatpush1.bf16.msra.mxu1 %v22144_v51  ;;  %v22180_v21 = vld [vmem:[%s29344_s3 + $0x1708] ss:$16 sps:$4 sm:$0xff]   ;;  %v22185_v9 = vld [vmem:[%s29344_s3 + $0x1724] ss:$16 sps:$4 sm:$0xff]   ;;  %v22188_v36 = vld [vmem:[%s29344_s3 + $0x172c] ss:$16 sps:$4 sm:$0xff]  }
 0xe86   :  { %13859 = vmatprep.mubr.bf16.mxu0 %v13089_v52  ;;  %13965 = vmatprep.mubr.bf16.mxu1 %v13089_v52  ;;  %v22183_v20 = vld [vmem:[%s29344_s3 + $0x1720] ss:$16 sps:$4 sm:$0xff]   ;;  %v22186_v7 = vld [vmem:[%s29344_s3 + $0x1728] ss:$16 sps:$4 sm:$0xff]   ;;  %v22191_v57 = vld [vmem:[%s29344_s3 + $0x1744] ss:$16 sps:$4 sm:$0xff]  }
 0xe87   :  { %13833 = vmatprep.subr.bf16.mxu0 %v22149_v18  ;;  %13939 = vmatprep.subr.bf16.mxu1 %v22152_v27  ;;  %v22194_v14 = vld [vmem:[%s29344_s3 + $0x174c] ss:$16 sps:$4 sm:$0xff]   ;;  %v22189_v3 = vld [vmem:[%s29344_s3 + $0x1740] ss:$16 sps:$4 sm:$0xff]   ;;  %v22192_v24 = vld [vmem:[%s29344_s3 + $0x1748] ss:$16 sps:$4 sm:$0xff]  }
 0xe88   :  { %v22197_v40 = vld [vmem:[%s29344_s3 + $0x1764] ss:$16 sps:$4 sm:$0xff]   ;;  %v22200_v61 = vld [vmem:[%s29344_s3 + $0x176c] ss:$16 sps:$4 sm:$0xff]   ;;  %v22195_v22 = vld [vmem:[%s29344_s3 + $0x1760] ss:$16 sps:$4 sm:$0xff]  }
 0xe89   :  { %13834 = vmatpush1.bf16.msra.mxu0 %v22147_v28  ;;  %13940 = vmatpush1.bf16.msra.mxu1 %v22150_v2  ;;  %v22198_v55 = vld [vmem:[%s29344_s3 + $0x1768] ss:$16 sps:$4 sm:$0xff]   ;;  %v22203_v35 = vld [vmem:[%s29344_s3 + $0x1784] ss:$16 sps:$4 sm:$0xff]   ;;  %v22206_v17 = vld [vmem:[%s29344_s3 + $0x178c] ss:$16 sps:$4 sm:$0xff]  }
 0xe8a   :  { %13835 = vmatprep.subr.bf16.mxu0 %v22155_v38  ;;  %13941 = vmatprep.subr.bf16.mxu1 %v22158_v44  ;;  %v22201_v60 = vld [vmem:[%s29344_s3 + $0x1780] ss:$16 sps:$4 sm:$0xff]   ;;  %v22204_v45 = vld [vmem:[%s29344_s3 + $0x1788] ss:$16 sps:$4 sm:$0xff]   ;;  %v22209_v48 = vld [vmem:[%s29344_s3 + $0x17a4] ss:$16 sps:$4 sm:$0xff]  }
 0xe8b   :  { %v22212_v54 = vld [vmem:[%s29344_s3 + $0x17ac] ss:$16 sps:$4 sm:$0xff]   ;;  %v22207_v53 = vld [vmem:[%s29344_s3 + $0x17a0] ss:$16 sps:$4 sm:$0xff]   ;;  %v22210_v52 = vld [vmem:[%s29344_s3 + $0x17a8] ss:$16 sps:$4 sm:$0xff]  }
 0xe8c   :  { %v22215_v23 = vld [vmem:[%s29344_s3 + $0x17c4] ss:$16 sps:$4 sm:$0xff]   ;;  %v22218_v25 = vld [vmem:[%s29344_s3 + $0x17cc] ss:$16 sps:$4 sm:$0xff]   ;;  %v22213_v29 = vld [vmem:[%s29344_s3 + $0x17c0] ss:$16 sps:$4 sm:$0xff]  }
 0xe8d   :  { %13836 = vmatpush1.bf16.msra.mxu0 %v22153_v33  ;;  %13942 = vmatpush1.bf16.msra.mxu1 %v22156_v6  ;;  %v22216_v16 = vld [vmem:[%s29344_s3 + $0x17c8] ss:$16 sps:$4 sm:$0xff]   ;;  %v22221_v50 = vld [vmem:[%s29344_s3 + $0x17e4] ss:$16 sps:$4 sm:$0xff]   ;;  %v22224_v56 = vld [vmem:[%s29344_s3 + $0x17ec] ss:$16 sps:$4 sm:$0xff]  }
 0xe8e   :  { %13837 = vmatprep.subr.bf16.mxu0 %v22161_v47  ;;  %13943 = vmatprep.subr.bf16.mxu1 %v22164_v30  ;;  %v22219_v15 = vld [vmem:[%s29344_s3 + $0x17e0] ss:$16 sps:$4 sm:$0xff]   ;;  %v22222_v58 = vld [vmem:[%s29344_s3 + $0x17e8] ss:$16 sps:$4 sm:$0xff]   ;;  %v22227_v51 = vld [vmem:[%s29346_s5 + $0x1904] ss:$40 sps:$4 sm:$0xff]  }
 0xe8f   :  { %v22230_v1 = vld [vmem:[%s29346_s5 + $0x190c] ss:$40 sps:$4 sm:$0xff]   ;;  %v22225_v32 = vld [vmem:[%s29346_s5 + $0x1900] ss:$40 sps:$4 sm:$0xff]   ;;  %v22236_v27 = vld [vmem:[%s29346_s5 + $0x195c] ss:$40 sps:$4 sm:$0xff]  }
 0xe90   :  { %v22228_v13 = vld [vmem:[%s29346_s5 + $0x1908] ss:$40 sps:$4 sm:$0xff]   ;;  %v22233_v18 = vld [vmem:[%s29346_s5 + $0x1954] ss:$40 sps:$4 sm:$0xff]   ;;  %v22234_v2 = vld [vmem:[%s29346_s5 + $0x1958] ss:$40 sps:$4 sm:$0xff]  }
 0xe91   :  { %13838 = vmatpush1.bf16.msra.mxu0 %v22159_v31  ;;  %13944 = vmatpush1.bf16.msra.mxu1 %v22162_v26  ;;  %v22231_v28 = vld [vmem:[%s29346_s5 + $0x1950] ss:$40 sps:$4 sm:$0xff]   ;;  %v22237_v38 = vld [vmem:[%s29346_s5 + $0x19a0] ss:$40 sps:$4 sm:$0xff]   ;;  %v22245_v33 = vld [vmem:[%s29346_s5 + $0x19f4] ss:$40 sps:$4 sm:$0xff]  }
 0xe92   :  { %13839 = vmatprep.subr.bf16.mxu0 %v22167_v34  ;;  %13945 = vmatprep.subr.bf16.mxu1 %v22170_v39  ;;  %v22240_v44 = vld [vmem:[%s29346_s5 + $0x19a8] ss:$40 sps:$4 sm:$0xff]   ;;  %v22248_v6 = vld [vmem:[%s29346_s5 + $0x19fc] ss:$40 sps:$4 sm:$0xff]   ;;  %v22246_v30 = vld [vmem:[%s29346_s5 + $0x19f8] ss:$40 sps:$4 sm:$0xff]  }
 0xe93   :  { %v22243_v47 = vld [vmem:[%s29346_s5 + $0x19f0] ss:$40 sps:$4 sm:$0xff]   ;;  %v22251_v31 = vld [vmem:[%s29346_s5 + $0x1a44] ss:$40 sps:$4 sm:$0xff]   ;;  %v22249_v26 = vld [vmem:[%s29346_s5 + $0x1a40] ss:$40 sps:$4 sm:$0xff]  }
 0xe94   :  { %v22252_v34 = vld [vmem:[%s29346_s5 + $0x1a48] ss:$40 sps:$4 sm:$0xff]   ;;  %v22257_v39 = vld [vmem:[%s29346_s5 + $0x1a94] ss:$40 sps:$4 sm:$0xff]  }
 0xe95   :  { %13840 = vmatpush1.bf16.msra.mxu0 %v22165_v42  ;;  %13946 = vmatpush1.bf16.msra.mxu1 %v22168_v12  ;;  %v22260_v42 = vld [vmem:[%s29346_s5 + $0x1a9c] ss:$40 sps:$4 sm:$0xff]   ;;  %v22255_v12 = vld [vmem:[%s29346_s5 + $0x1a90] ss:$40 sps:$4 sm:$0xff]  }
 0xe96   :  { %13841 = vmatprep.subr.bf16.mxu0 %v22173_v37  ;;  %13947 = vmatprep.subr.bf16.mxu1 %v22176_v19  ;;  %v22258_v37 = vld [vmem:[%s29346_s5 + $0x1a98] ss:$40 sps:$4 sm:$0xff]   ;;  %v22263_v19 = vld [vmem:[%s29346_s5 + $0x1ae4] ss:$40 sps:$4 sm:$0xff]  }
 0xe99   :  { %13842 = vmatpush1.bf16.msra.mxu0 %v22171_v46  ;;  %13948 = vmatpush1.bf16.msra.mxu1 %v22174_v63  ;;  %v22266_v46 = vld [vmem:[%s29346_s5 + $0x1aec] ss:$40 sps:$4 sm:$0xff]   ;;  %v22261_v63 = vld [vmem:[%s29346_s5 + $0x1ae0] ss:$40 sps:$4 sm:$0xff]  }
 0xe9a   :  { %13843 = vmatprep.subr.bf16.mxu0 %v22179_v49  ;;  %13949 = vmatprep.subr.bf16.mxu1 %v22182_v5  ;;  %v22264_v49 = vld [vmem:[%s29346_s5 + $0x1ae8] ss:$40 sps:$4 sm:$0xff]   ;;  %v22269_v5 = vld [vmem:[%s29346_s5 + $0x1b34] ss:$40 sps:$4 sm:$0xff]  }
 0xe9d   :  { %13844 = vmatpush1.bf16.msra.mxu0 %v22177_v4  ;;  %13950 = vmatpush1.bf16.msra.mxu1 %v22180_v21  ;;  %v22272_v4 = vld [vmem:[%s29346_s5 + $0x1b3c] ss:$40 sps:$4 sm:$0xff]   ;;  %v22267_v21 = vld [vmem:[%s29346_s5 + $0x1b30] ss:$40 sps:$4 sm:$0xff]  }
 0xe9e   :  { %13845 = vmatprep.subr.bf16.mxu0 %v22185_v9  ;;  %13951 = vmatprep.subr.bf16.mxu1 %v22188_v36  ;;  %v22270_v9 = vld [vmem:[%s29346_s5 + $0x1b38] ss:$40 sps:$4 sm:$0xff]   ;;  %v22275_v36 = vld [vmem:[%s29346_s5 + $0x1b84] ss:$40 sps:$4 sm:$0xff]  }
 0xea1   :  { %13846 = vmatpush1.bf16.msra.mxu0 %v22183_v20  ;;  %13952 = vmatpush1.bf16.msra.mxu1 %v22186_v7  ;;  %v22278_v20 = vld [vmem:[%s29346_s5 + $0x1b8c] ss:$40 sps:$4 sm:$0xff]   ;;  %v22273_v7 = vld [vmem:[%s29346_s5 + $0x1b80] ss:$40 sps:$4 sm:$0xff]  }
 0xea2   :  { %13847 = vmatprep.subr.bf16.mxu0 %v22191_v57  ;;  %13953 = vmatprep.subr.bf16.mxu1 %v22194_v14  ;;  %v22276_v57 = vld [vmem:[%s29346_s5 + $0x1b88] ss:$40 sps:$4 sm:$0xff]   ;;  %v22281_v14 = vld [vmem:[%s29346_s5 + $0x1bd4] ss:$40 sps:$4 sm:$0xff]  }
 0xea5   :  { %13848 = vmatpush1.bf16.msra.mxu0 %v22189_v3  ;;  %13954 = vmatpush1.bf16.msra.mxu1 %v22192_v24  ;;  %v22284_v3 = vld [vmem:[%s29346_s5 + $0x1bdc] ss:$40 sps:$4 sm:$0xff]   ;;  %v22279_v24 = vld [vmem:[%s29346_s5 + $0x1bd0] ss:$40 sps:$4 sm:$0xff]  }
 0xea6   :  { %13849 = vmatprep.subr.bf16.mxu0 %v22197_v40  ;;  %13955 = vmatprep.subr.bf16.mxu1 %v22200_v61  ;;  %v22282_v40 = vld [vmem:[%s29346_s5 + $0x1bd8] ss:$40 sps:$4 sm:$0xff]   ;;  %v22287_v61 = vld [vmem:[%s29346_s5 + $0x1c24] ss:$40 sps:$4 sm:$0xff]  }
 0xea9   :  { %13850 = vmatpush1.bf16.msra.mxu0 %v22195_v22  ;;  %13956 = vmatpush1.bf16.msra.mxu1 %v22198_v55  ;;  %v22290_v22 = vld [vmem:[%s29346_s5 + $0x1c2c] ss:$40 sps:$4 sm:$0xff]   ;;  %v22285_v55 = vld [vmem:[%s29346_s5 + $0x1c20] ss:$40 sps:$4 sm:$0xff]  }
 0xeaa   :  { %13851 = vmatprep.subr.bf16.mxu0 %v22203_v35  ;;  %13957 = vmatprep.subr.bf16.mxu1 %v22206_v17  ;;  %v22288_v35 = vld [vmem:[%s29346_s5 + $0x1c28] ss:$40 sps:$4 sm:$0xff]   ;;  %v22293_v17 = vld [vmem:[%s29346_s5 + $0x1c74] ss:$40 sps:$4 sm:$0xff]  }
 0xead   :  { %13852 = vmatpush1.bf16.msra.mxu0 %v22201_v60  ;;  %13958 = vmatpush1.bf16.msra.mxu1 %v22204_v45  ;;  %v22296_v60 = vld [vmem:[%s29346_s5 + $0x1c7c] ss:$40 sps:$4 sm:$0xff]   ;;  %v22291_v45 = vld [vmem:[%s29346_s5 + $0x1c70] ss:$40 sps:$4 sm:$0xff]  }
 0xeae   :  { %13853 = vmatprep.subr.bf16.mxu0 %v22209_v48  ;;  %13959 = vmatprep.subr.bf16.mxu1 %v22212_v54  ;;  %v22294_v48 = vld [vmem:[%s29346_s5 + $0x1c78] ss:$40 sps:$4 sm:$0xff]   ;;  %v22299_v54 = vld [vmem:[%s29346_s5 + $0x1cc4] ss:$40 sps:$4 sm:$0xff]  }
 0xeb1   :  { %13854 = vmatpush1.bf16.msra.mxu0 %v22207_v53  ;;  %13960 = vmatpush1.bf16.msra.mxu1 %v22210_v52  ;;  %v22302_v53 = vld [vmem:[%s29346_s5 + $0x1ccc] ss:$40 sps:$4 sm:$0xff]   ;;  %v22297_v52 = vld [vmem:[%s29346_s5 + $0x1cc0] ss:$40 sps:$4 sm:$0xff]  }
 0xeb2   :  { %13855 = vmatprep.subr.bf16.mxu0 %v22215_v23  ;;  %13961 = vmatprep.subr.bf16.mxu1 %v22218_v25  ;;  %v22300_v23 = vld [vmem:[%s29346_s5 + $0x1cc8] ss:$40 sps:$4 sm:$0xff]   ;;  %v22305_v25 = vld [vmem:[%s29346_s5 + $0x1d14] ss:$40 sps:$4 sm:$0xff]  }
 0xeb5   :  { %13856 = vmatpush1.bf16.msra.mxu0 %v22213_v29  ;;  %13962 = vmatpush1.bf16.msra.mxu1 %v22216_v16  ;;  %v22308_v29 = vld [vmem:[%s29346_s5 + $0x1d1c] ss:$40 sps:$4 sm:$0xff]   ;;  %v22303_v16 = vld [vmem:[%s29346_s5 + $0x1d10] ss:$40 sps:$4 sm:$0xff]  }
 0xeb6   :  { %13857 = vmatprep.subr.bf16.mxu0 %v22221_v50  ;;  %13963 = vmatprep.subr.bf16.mxu1 %v22224_v56  ;;  %v22306_v50 = vld [vmem:[%s29346_s5 + $0x1d18] ss:$40 sps:$4 sm:$0xff]   ;;  %v22311_v56 = vld [vmem:[%s29346_s5 + $0x1d64] ss:$40 sps:$4 sm:$0xff]  }
 0xeb9   :  { %13858 = vmatpush1.bf16.msra.mxu0 %v22219_v15  ;;  %13964 = vmatpush1.bf16.msra.mxu1 %v22222_v58  ;;  %v22314_v15 = vld [vmem:[%s29346_s5 + $0x1d6c] ss:$40 sps:$4 sm:$0xff]   ;;  %v22309_v58 = vld [vmem:[%s29346_s5 + $0x1d60] ss:$40 sps:$4 sm:$0xff]  }
 0xeba   :  { %14823 = vmatprep.subr.bf16.mxu1 %v22227_v51  ;;  %14876 = vmatprep.subr.bf16.mxu0 %v22230_v1  ;;  %v22312_v51 = vld [vmem:[%s29346_s5 + $0x1d68] ss:$40 sps:$4 sm:$0xff]   ;;  %v22317_v1 = vld [vmem:[%s29346_s5 + $0x1db4] ss:$40 sps:$4 sm:$0xff]  }
 0xebc   :  { %13860 = vmatmul.mubr.bf16.vlgmr.msra.gmra.mrb[80].mxu0 %v28176_v41  ;;  %13966 = vmatmul.mubr.bf16.vlgmr.msra.gmra.mrb[88].mxu1 %v28176_v41  ;;  %v22239_v41 = vld [vmem:[%s29346_s5 + $0x19a4] ss:$40 sps:$4 sm:$0xff]  }
 0xebd   :  { %13869 = vmatprep.mubr.bf16.mxu0 %v28181_v43  ;;  %13975 = vmatprep.mubr.bf16.mxu1 %v28181_v43  ;;  %v22242_v43 = vld [vmem:[%s29346_s5 + $0x19ac] ss:$40 sps:$4 sm:$0xff]  }
 0xebe   :  { %14824 = vmatpush1.bf16.msra.mxu1 %v22225_v32  ;;  %14877 = vmatpush1.bf16.msra.mxu0 %v22228_v13  ;;  %v22320_v32 = vld [vmem:[%s29346_s5 + $0x1dbc] ss:$40 sps:$4 sm:$0xff]   ;;  %v22315_v13 = vld [vmem:[%s29346_s5 + $0x1db0] ss:$40 sps:$4 sm:$0xff]  }
 0xebf   :  { %14825 = vmatprep.subr.bf16.mxu1 %v22233_v18  ;;  %14878 = vmatprep.subr.bf16.mxu0 %v22236_v27  ;;  %v22318_v18 = vld [vmem:[%s29346_s5 + $0x1db8] ss:$40 sps:$4 sm:$0xff]   ;;  %v22323_v27 = vld [vmem:[%s29346_s5 + $0x1914] ss:$40 sps:$4 sm:$0xff]  }
 0xec2   :  { %14826 = vmatpush1.bf16.msra.mxu1 %v22231_v28  ;;  %14879 = vmatpush1.bf16.msra.mxu0 %v22234_v2  ;;  %v22326_v28 = vld [vmem:[%s29346_s5 + $0x191c] ss:$40 sps:$4 sm:$0xff]   ;;  %v18897_v2 = vld [vmem:[%s29347_s4 + $0x14] sm:$0xf] }
 0xec3   :  { %14827 = vmatprep.subr.bf16.mxu1 %v22239_v41  ;;  %14880 = vmatprep.subr.bf16.mxu0 %v22242_v43  ;;  %v13013_v41 = vrot.slane %v18897_v2, %v23684_v59  ;;  %v13017_v43 = vrot.slane %v18897_v2, %v23690_v62 }
 0xec4   :  { %13870 = vmatmul.mubr.bf16.gmra.mrb[84].mxu0 %v28192_v0  ;;  %13976 = vmatmul.mubr.bf16.gmra.mrb[92].mxu1 %v28192_v0  ;;  %v22254_v0 = vld [vmem:[%s29346_s5 + $0x1a4c] ss:$40 sps:$4 sm:$0xff]  }
 0xec6   :  { %14828 = vmatpush1.bf16.msra.mxu1 %v22237_v38  ;;  %14881 = vmatpush1.bf16.msra.mxu0 %v22240_v44 }
 0xec7   :  { %14829 = vmatprep.subr.bf16.mxu1 %v22245_v33  ;;  %14882 = vmatprep.subr.bf16.mxu0 %v22248_v6 }
 0xeca   :  { %14830 = vmatpush1.bf16.msra.mxu1 %v22243_v47  ;;  %14883 = vmatpush1.bf16.msra.mxu0 %v22246_v30 }
 0xecb   :  { %14831 = vmatprep.subr.bf16.mxu1 %v22251_v31  ;;  %14884 = vmatprep.subr.bf16.mxu0 %v22254_v0 }
 0xece   :  { %14832 = vmatpush1.bf16.msra.mxu1 %v22249_v26  ;;  %14885 = vmatpush1.bf16.msra.mxu0 %v22252_v34 }
 0xecf   :  { %14833 = vmatprep.subr.bf16.mxu1 %v22257_v39  ;;  %14886 = vmatprep.subr.bf16.mxu0 %v22260_v42 }
 0xed2   :  { %14834 = vmatpush1.bf16.msra.mxu1 %v22255_v12  ;;  %14887 = vmatpush1.bf16.msra.mxu0 %v22258_v37  ;;  %v13005_v12 = vrot.slane %v18897_v2, %v23184_v10 }
 0xed3   :  { %14835 = vmatprep.subr.bf16.mxu1 %v22263_v19  ;;  %14888 = vmatprep.subr.bf16.mxu0 %v22266_v46 }
 0xed6   :  { %14836 = vmatpush1.bf16.msra.mxu1 %v22261_v63  ;;  %14889 = vmatpush1.bf16.msra.mxu0 %v22264_v49  ;;  %v13009_v49 = vrot.slane %v18897_v2, %v23187_v11 }
 0xed7   :  { %14837 = vmatprep.subr.bf16.mxu1 %v22269_v5  ;;  %14890 = vmatprep.subr.bf16.mxu0 %v22272_v4 }
 0xeda   :  { %14838 = vmatpush1.bf16.msra.mxu1 %v22267_v21  ;;  %14891 = vmatpush1.bf16.msra.mxu0 %v22270_v9 }
 0xedb   :  { %14839 = vmatprep.subr.bf16.mxu1 %v22275_v36  ;;  %14892 = vmatprep.subr.bf16.mxu0 %v22278_v20 }
 0xede   :  { %14840 = vmatpush1.bf16.msra.mxu1 %v22273_v7  ;;  %14893 = vmatpush1.bf16.msra.mxu0 %v22276_v57 }
 0xedf   :  { %14841 = vmatprep.subr.bf16.mxu1 %v22281_v14  ;;  %14894 = vmatprep.subr.bf16.mxu0 %v22284_v3 }
 0xee2   :  { %14842 = vmatpush1.bf16.msra.mxu1 %v22279_v24  ;;  %14895 = vmatpush1.bf16.msra.mxu0 %v22282_v40 }
 0xee3   :  { %14843 = vmatprep.subr.bf16.mxu1 %v22287_v61  ;;  %14896 = vmatprep.subr.bf16.mxu0 %v22290_v22 }
 0xee6   :  { %14844 = vmatpush1.bf16.msra.mxu1 %v22285_v55  ;;  %14897 = vmatpush1.bf16.msra.mxu0 %v22288_v35 }
 0xee7   :  { %14845 = vmatprep.subr.bf16.mxu1 %v22293_v17  ;;  %14898 = vmatprep.subr.bf16.mxu0 %v22296_v60 }
 0xeea   :  { %14846 = vmatpush1.bf16.msra.mxu1 %v22291_v45  ;;  %14899 = vmatpush1.bf16.msra.mxu0 %v22294_v48 }
 0xeeb   :  { %14847 = vmatprep.subr.bf16.mxu1 %v22299_v54  ;;  %14900 = vmatprep.subr.bf16.mxu0 %v22302_v53 }
 0xeee   :  { %14848 = vmatpush1.bf16.msra.mxu1 %v22297_v52  ;;  %14901 = vmatpush1.bf16.msra.mxu0 %v22300_v23 }
 0xeef   :  { %14849 = vmatprep.subr.bf16.mxu1 %v22305_v25  ;;  %14902 = vmatprep.subr.bf16.mxu0 %v22308_v29 }
 0xef2   :  { %14850 = vmatpush1.bf16.msra.mxu1 %v22303_v16  ;;  %14903 = vmatpush1.bf16.msra.mxu0 %v22306_v50 }
 0xef3   :  { %14851 = vmatprep.subr.bf16.mxu1 %v22311_v56  ;;  %14904 = vmatprep.subr.bf16.mxu0 %v22314_v15 }
 0xef6   :  { %14852 = vmatpush1.bf16.msra.mxu1 %v22309_v58  ;;  %14905 = vmatpush1.bf16.msra.mxu0 %v22312_v51 }
 0xef7   :  { %14853 = vmatprep.subr.bf16.mxu1 %v22317_v1  ;;  %14906 = vmatprep.subr.bf16.mxu0 %v22320_v32 }
 0xefa   :  { %14854 = vmatpush1.bf16.msra.mxu1 %v22315_v13  ;;  %14907 = vmatpush1.bf16.msra.mxu0 %v22318_v18 }
 0xefb   :  { %14929 = vmatprep.subr.bf16.mxu1 %v22323_v27  ;;  %14982 = vmatprep.subr.bf16.mxu0 %v22326_v28 }
 0xf8f   :  { %v13861_v38 = vpop.f32.mrb[80].mxu0  ;;  %v13967_v44 = vpop.f32.mrb[88].mxu1 }
 0xf90   :  { %v19578_v33 = vadd.f32 %v13967_v44, %v13013_v41  ;;  %v13863_v6 = vpop.f32.mrb[81].mxu0  ;;  %v13969_v47 = vpop.f32.mrb[89].mxu1  ;;  %v19570_v5 = vadd.f32 %v13861_v38, %v13005_v12 }
 0xf91   :  { %v19579_v30 = vadd.f32 %v13969_v47, %v13017_v43  ;;  %v13865_v31 = vpop.f32.mrb[82].mxu0  ;;  %v13971_v0 = vpop.f32.mrb[90].mxu1  ;;  %v19571_v3 = vadd.f32 %v13863_v6, %v13009_v49 }
 0xf92   :  { %v19026_v26 = vmul.f32 -1.442695, %v19578_v33  ;;  %v19580_v34 = vadd.f32 %v13971_v0, %v13013_v41  ;;  %v13867_v39 = vpop.f32.mrb[83].mxu0  ;;  %v13973_v42 = vpop.f32.mrb[91].mxu1  ;;  %v19572_v17 = vadd.f32 %v13865_v31, %v13005_v12 }
 0xf93   :  { %v19027_v37 = vmul.f32 -1.442695, %v19579_v30  ;;  %v19581_v19 = vadd.f32 %v13973_v42, %v13017_v43  ;;  %v19573_v25 = vadd.f32 %v13867_v39, %v13009_v49 }
 0xf94   :  { %22849 = vpow2.f32 %v19026_v26  ;;  %v19028_v46 = vmul.f32 -1.442695, %v19580_v34 }
 0xf95   :  { %22851 = vpow2.f32 %v19027_v37  ;;  %v19029_v63 = vmul.f32 -1.442695, %v19581_v19  ;;  %v22324_v37 = vld [vmem:[%s29346_s5 + $0x1918] ss:$40 sps:$4 sm:$0xff]  }
 0xf96   :  { %22853 = vpow2.f32 %v19028_v46 }
 0xf97   :  { %v13871_v4 = vpop.f32.mrb[84].mxu0  ;;  %v13977_v21 = vpop.f32.mrb[92].mxu1  ;;  %22855 = vpow2.f32 %v19029_v63  ;;  %v22329_v63 = vld [vmem:[%s29346_s5 + $0x1964] ss:$40 sps:$4 sm:$0xff]  }
 0xf98   :  { %v19582_v9 = vadd.f32 %v13977_v21, %v13013_v41  ;;  %v13873_v36 = vpop.f32.mrb[85].mxu0  ;;  %v13979_v20 = vpop.f32.mrb[93].mxu1  ;;  %22857 = vtanh.f32 %v19570_v5  ;;  %v19574_v50 = vadd.f32 %v13871_v4, %v13005_v12 }
 0xf99   :  { %v19583_v7 = vadd.f32 %v13979_v20, %v13017_v43  ;;  %v13875_v57 = vpop.f32.mrb[86].mxu0  ;;  %v13981_v14 = vpop.f32.mrb[94].mxu1  ;;  %v19575_v15 = vadd.f32 %v13873_v36, %v13009_v49 }
 0xf9a   :  { %v19030_v24 = vmul.f32 -1.442695, %v19582_v9  ;;  %v19584_v40 = vadd.f32 %v13981_v14, %v13013_v41  ;;  %v13877_v61 = vpop.f32.mrb[87].mxu0  ;;  %v13983_v22 = vpop.f32.mrb[95].mxu1  ;;  %v19576_v13 = vadd.f32 %v13875_v57, %v13005_v12  ;;  %v22321_v12 = vld [vmem:[%s29346_s5 + $0x1910] ss:$40 sps:$4 sm:$0xff]  }
 0xf9b   :  { %v19031_v55 = vmul.f32 -1.442695, %v19583_v7  ;;  %v19585_v35 = vadd.f32 %v13983_v22, %v13017_v43  ;;  %v19577_v38 = vadd.f32 %v13877_v61, %v13009_v49  ;;  %v22332_v49 = vld [vmem:[%s29346_s5 + $0x196c] ss:$40 sps:$4 sm:$0xff]   ;;  %v22327_v57 = vld [vmem:[%s29346_s5 + $0x1960] ss:$40 sps:$4 sm:$0xff]  }
 0xf9c   :  { %22859 = vpow2.f32 %v19030_v24  ;;  %v19032_v60 = vmul.f32 -1.442695, %v19584_v40  ;;  %v22330_v14 = vld [vmem:[%s29346_s5 + $0x1968] ss:$40 sps:$4 sm:$0xff]   ;;  %v22335_v24 = vld [vmem:[%s29346_s5 + $0x19b4] ss:$40 sps:$4 sm:$0xff]  }
 0xf9d   :  { %22861 = vpow2.f32 %v19031_v55  ;;  %v19033_v53 = vmul.f32 -1.442695, %v19585_v35  ;;  %v22338_v40 = vld [vmem:[%s29346_s5 + $0x19bc] ss:$40 sps:$4 sm:$0xff]  }
 0xf9e   :  { %v22850_v45 = vpop.eup %22849  ;;  %22863 = vtanh.f32 %v19571_v3 }
 0xf9f   :  { %v22852_v48 = vpop.eup %22851  ;;  %v14018_v54 = vadd.f32 1.0, %v22850_v45  ;;  %22865 = vpow2.f32 %v19032_v60  ;;  %v22333_v60 = vld [vmem:[%s29346_s5 + $0x19b0] ss:$40 sps:$4 sm:$0xff]  }
 0xfa0   :  { %v14019_v52 = vadd.f32 1.0, %v22852_v48  ;;  %22867 = vtanh.f32 %v19572_v17  ;;  %v22854_v23 = vpop.eup %22853  ;;  %v22336_v45 = vld [vmem:[%s29346_s5 + $0x19b8] ss:$40 sps:$4 sm:$0xff]   ;;  %v22341_v48 = vld [vmem:[%s29346_s5 + $0x1a04] ss:$40 sps:$4 sm:$0xff]  }
 0xfa1   :  { %22869 = vrcp.f32 %v14018_v54  ;;  %v14020_v29 = vadd.f32 1.0, %v22854_v23  ;;  %v22856_v16 = vpop.eup %22855  ;;  %v22344_v54 = vld [vmem:[%s29346_s5 + $0x1a0c] ss:$40 sps:$4 sm:$0xff]  }
 0xfa2   :  { %22871 = vrcp.f32 %v14019_v52  ;;  %v14021_v56 = vadd.f32 1.0, %v22856_v16  ;;  %v22858_v58 = vpop.eup %22857  ;;  %v22342_v52 = vld [vmem:[%s29346_s5 + $0x1a08] ss:$40 sps:$4 sm:$0xff]   ;;  %v22347_v23 = vld [vmem:[%s29346_s5 + $0x1a54] ss:$40 sps:$4 sm:$0xff]  }
 0xfa3   :  { %22873 = vpow2.f32 %v19033_v53  ;;  %v22339_v53 = vld [vmem:[%s29346_s5 + $0x1a00] ss:$40 sps:$4 sm:$0xff]  }
 0xfa4   :  { %22875 = vrcp.f32 %v14020_v29  ;;  %v22345_v29 = vld [vmem:[%s29346_s5 + $0x1a50] ss:$40 sps:$4 sm:$0xff]  }
 0xfa5   :  { %22877 = vtanh.f32 %v19573_v25  ;;  %v22350_v25 = vld [vmem:[%s29346_s5 + $0x1a5c] ss:$40 sps:$4 sm:$0xff]   ;;  %v22348_v16 = vld [vmem:[%s29346_s5 + $0x1a58] ss:$40 sps:$4 sm:$0xff]  }
 0xfa6   :  { %v22860_v51 = vpop.eup %22859  ;;  %22879 = vrcp.f32 %v14021_v56  ;;  %v22356_v56 = vld [vmem:[%s29346_s5 + $0x1aac] ss:$40 sps:$4 sm:$0xff]  }
 0xfa7   :  { %v22862_v1 = vpop.eup %22861  ;;  %22881 = vtanh.f32 %v19574_v50  ;;  %v14022_v32 = vadd.f32 1.0, %v22860_v51  ;;  %v22353_v50 = vld [vmem:[%s29346_s5 + $0x1aa4] ss:$40 sps:$4 sm:$0xff]   ;;  %v22359_v51 = vld [vmem:[%s29346_s5 + $0x1af4] ss:$40 sps:$4 sm:$0xff]  }
 0xfa8   :  { %v22864_v18 = vpop.eup %22863  ;;  %22883 = vtanh.f32 %v19575_v15  ;;  %v14023_v27 = vadd.f32 1.0, %v22862_v1  ;;  %v22351_v15 = vld [vmem:[%s29346_s5 + $0x1aa0] ss:$40 sps:$4 sm:$0xff]   ;;  %v22362_v1 = vld [vmem:[%s29346_s5 + $0x1afc] ss:$40 sps:$4 sm:$0xff]  }
 0xfa9   :  { %v22866_v28 = vpop.eup %22865  ;;  %22885 = vrcp.f32 %v14022_v32  ;;  %v22357_v32 = vld [vmem:[%s29346_s5 + $0x1af0] ss:$40 sps:$4 sm:$0xff]  }
 0xfaa   :  { %v22868_v2 = vpop.eup %22867  ;;  %22887 = vrcp.f32 %v14023_v27  ;;  %v14024_v41 = vadd.f32 1.0, %v22866_v28  ;;  %v22368_v27 = vld [vmem:[%s29346_s5 + $0x1b4c] ss:$40 sps:$4 sm:$0xff]   ;;  %v22363_v28 = vld [vmem:[%s29346_s5 + $0x1b40] ss:$40 sps:$4 sm:$0xff]  }
 0xfab   :  { %v22870_v43 = vpop.eup %22869  ;;  %22889 = vtanh.f32 %v19576_v13  ;;  %v22360_v13 = vld [vmem:[%s29346_s5 + $0x1af8] ss:$40 sps:$4 sm:$0xff]  }
 0xfac   :  { %v22872_v44 = vpop.eup %22871  ;;  %22891 = vrcp.f32 %v14024_v41  ;;  %v14042_v33 = vmul.f32 %v22870_v43, %v22858_v58  ;;  %v22354_v58 = vld [vmem:[%s29346_s5 + $0x1aa8] ss:$40 sps:$4 sm:$0xff]   ;;  %v22371_v41 = vld [vmem:[%s29346_s5 + $0x1b94] ss:$40 sps:$4 sm:$0xff]  }
 0xfad   :  { %v22874_v6 = vpop.eup %22873  ;;  %v14043_v47 = vmul.f32 %v22872_v44, %v22864_v18  ;;  %22893 = vtanh.f32 %v19577_v38  ;;  %v22365_v18 = vld [vmem:[%s29346_s5 + $0x1b44] ss:$40 sps:$4 sm:$0xff]   ;;  %v22369_v38 = vld [vmem:[%s29346_s5 + $0x1b90] ss:$40 sps:$4 sm:$0xff]  }
 0xfae   :  { %v22876_v30 = vpop.eup %22875  ;;  %v14025_v31 = vadd.f32 1.0, %v22874_v6  ;;  %v22374_v43 = vld [vmem:[%s29346_s5 + $0x1b9c] ss:$40 sps:$4 sm:$0xff]   ;;  %v22372_v44 = vld [vmem:[%s29346_s5 + $0x1b98] ss:$40 sps:$4 sm:$0xff]  }
 0xfaf   :  { %v22878_v0 = vpop.eup %22877  ;;  %v14044_v26 = vmul.f32 %v22876_v30, %v22868_v2  ;;  %v22366_v2 = vld [vmem:[%s29346_s5 + $0x1b48] ss:$40 sps:$4 sm:$0xff]   ;;  %v22380_v6 = vld [vmem:[%s29346_s5 + $0x1bec] ss:$40 sps:$4 sm:$0xff]  }
 0xfb0   :  { %v22880_v34 = vpop.eup %22879  ;;  %22895 = vrcp.f32 %v14025_v31  ;;  %v22378_v30 = vld [vmem:[%s29346_s5 + $0x1be8] ss:$40 sps:$4 sm:$0xff]   ;;  %v22383_v31 = vld [vmem:[%s29346_s5 + $0x1c34] ss:$40 sps:$4 sm:$0xff]  }
 0xfb1   :  { %v22882_v39 = vpop.eup %22881  ;;  %v14045_v42 = vmul.f32 %v22880_v34, %v22878_v0  ;;  %v28561_v19 = vpack.c.bf16 %v14044_v26, %v14042_v33  ;;  %v22377_v33 = vld [vmem:[%s29346_s5 + $0x1be4] ss:$40 sps:$4 sm:$0xff]   ;;  %v22381_v26 = vld [vmem:[%s29346_s5 + $0x1c30] ss:$40 sps:$4 sm:$0xff]  }
 0xfb2   :  { %v22884_v46 = vpop.eup %22883  ;;  %v22386_v0 = vld [vmem:[%s29346_s5 + $0x1c3c] ss:$40 sps:$4 sm:$0xff]   ;;  %v22384_v34 = vld [vmem:[%s29346_s5 + $0x1c38] ss:$40 sps:$4 sm:$0xff]  }
 0xfb3   :  { %v22886_v5 = vpop.eup %22885  ;;  %v14051_v4 = vpack.c.bf16 %v14045_v42, %v14043_v47  ;;  %v22375_v47 = vld [vmem:[%s29346_s5 + $0x1be0] ss:$40 sps:$4 sm:$0xff]   ;;  %v22392_v42 = vld [vmem:[%s29346_s5 + $0x1c8c] ss:$40 sps:$4 sm:$0xff]  }
 0xfb4   :  { %v22888_v21 = vpop.eup %22887  ;;  %v14046_v9 = vmul.f32 %v22886_v5, %v22882_v39  ;;  %v22389_v39 = vld [vmem:[%s29346_s5 + $0x1c84] ss:$40 sps:$4 sm:$0xff]   ;;  %v22396_v5 = vld [vmem:[%s29346_s5 + $0x1cd8] ss:$40 sps:$4 sm:$0xff]  }
 0xfb5   :  { %v22890_v36 = vpop.eup %22889  ;;  %14855 = vmatprep.mubr.bf16.mxu1 %v14051_v4  ;;  %14908 = vmatprep.mubr.bf16.mxu0 %v14051_v4  ;;  %v14047_v20 = vmul.f32 %v22888_v21, %v22884_v46  ;;  %v22395_v46 = vld [vmem:[%s29346_s5 + $0x1cd4] ss:$40 sps:$4 sm:$0xff]  }
 0xfb6   :  { %v22892_v7 = vpop.eup %22891  ;;  %14856 = vmatmul.mubr.bf16.vlgmr.msra.gmra.mrb[16].mxu1 %v28561_v19  ;;  %14909 = vmatmul.mubr.bf16.vlgmr.msra.gmra.mrb[16].mxu0 %v28561_v19  ;;  %v22404_v21 = vld [vmem:[%s29346_s5 + $0x1d2c] ss:$40 sps:$4 sm:$0xff]  }
 0xfb7   :  { %14930 = vmatpush1.bf16.msra.mxu1 %v22321_v12  ;;  %14983 = vmatpush1.bf16.msra.mxu0 %v22324_v37  ;;  %v14048_v3 = vmul.f32 %v22892_v7, %v22890_v36  ;;  %v22894_v61 = vpop.eup %22893  ;;  %v22387_v12 = vld [vmem:[%s29346_s5 + $0x1c80] ss:$40 sps:$4 sm:$0xff]   ;;  %v22410_v7 = vld [vmem:[%s29346_s5 + $0x1d7c] ss:$40 sps:$4 sm:$0xff]  }
 0xfb8   :  { %14931 = vmatprep.subr.bf16.mxu1 %v22329_v63  ;;  %14984 = vmatprep.subr.bf16.mxu0 %v22332_v49  ;;  %v22390_v37 = vld [vmem:[%s29346_s5 + $0x1c88] ss:$40 sps:$4 sm:$0xff]   ;;  %v22398_v63 = vld [vmem:[%s29346_s5 + $0x1cdc] ss:$40 sps:$4 sm:$0xff]  }
 0xfb9   :  { %v28583_v22 = vpack.c.bf16 %v14048_v3, %v14046_v9  ;;  %v22393_v49 = vld [vmem:[%s29346_s5 + $0x1cd0] ss:$40 sps:$4 sm:$0xff]   ;;  %v22399_v9 = vld [vmem:[%s29346_s5 + $0x1d20] ss:$40 sps:$4 sm:$0xff]   ;;  %v22413_v3 = vld [vmem:[%s29346_s5 + $0x1dc4] ss:$40 sps:$4 sm:$0xff]  }
 0xfba   :  { %v22896_v55 = vpop.eup %22895  ;;  %v22402_v36 = vld [vmem:[%s29346_s5 + $0x1d28] ss:$40 sps:$4 sm:$0xff]  }
 0xfbb   :  { %14932 = vmatpush1.bf16.msra.mxu1 %v22327_v57  ;;  %14985 = vmatpush1.bf16.msra.mxu0 %v22330_v14  ;;  %v14049_v35 = vmul.f32 %v22896_v55, %v22894_v61  ;;  %v22405_v57 = vld [vmem:[%s29346_s5 + $0x1d70] ss:$40 sps:$4 sm:$0xff]   ;;  %v22419_v55 = vld [vmem:[%s29350_s9 + $0x4] ss:$8 sps:$4 sm:$0xff]  }
 0xfbc   :  { %14933 = vmatprep.subr.bf16.mxu1 %v22335_v24  ;;  %14986 = vmatprep.subr.bf16.mxu0 %v22338_v40  ;;  %v22408_v14 = vld [vmem:[%s29346_s5 + $0x1d78] ss:$40 sps:$4 sm:$0xff]   ;;  %v22416_v24 = vld [vmem:[%s29346_s5 + $0x1dcc] ss:$40 sps:$4 sm:$0xff]   ;;  %v22414_v61 = vld [vmem:[%s29346_s5 + $0x1dc8] ss:$40 sps:$4 sm:$0xff]  }
 0xfbd   :  { %v28585_v17 = vpack.c.bf16 %v14049_v35, %v14047_v20  ;;  %v22407_v20 = vld [vmem:[%s29346_s5 + $0x1d74] ss:$40 sps:$4 sm:$0xff]   ;;  %v22411_v40 = vld [vmem:[%s29346_s5 + $0x1dc0] ss:$40 sps:$4 sm:$0xff]  }
 0xfbe   :  { %v22417_v35 = vld [vmem:[%s29350_s9] ss:$8 sps:$4 sm:$0xff]  }
 0xfbf   :  { %14865 = vmatprep.mubr.bf16.mxu1 %v28585_v17  ;;  %14918 = vmatprep.mubr.bf16.mxu0 %v28585_v17 }
 0xfc0   :  { %14866 = vmatmul.mubr.bf16.gmra.mrb[20].mxu1 %v28583_v22  ;;  %14919 = vmatmul.mubr.bf16.gmra.mrb[20].mxu0 %v28583_v22 }
 0xfc1   :  { %14934 = vmatpush1.bf16.msra.mxu1 %v22333_v60  ;;  %14987 = vmatpush1.bf16.msra.mxu0 %v22336_v45  ;;  %v22422_v60 = vld [vmem:[%s29350_s9 + $0x14] ss:$8 sps:$4 sm:$0xff]   ;;  %v22420_v45 = vld [vmem:[%s29350_s9 + $0x10] ss:$8 sps:$4 sm:$0xff]  }
 0xfc2   :  { %14961 = vmatprep.mubr.bf16.mxu1 %v14051_v4  ;;  %15014 = vmatprep.mubr.bf16.mxu0 %v14051_v4  ;;  %v22401_v4 = vld [vmem:[%s29346_s5 + $0x1d24] ss:$40 sps:$4 sm:$0xff]  }
 0xfc3   :  { %14935 = vmatprep.subr.bf16.mxu1 %v22341_v48  ;;  %14988 = vmatprep.subr.bf16.mxu0 %v22344_v54  ;;  %v22425_v48 = vld [vmem:[%s29350_s9 + $0x24] ss:$8 sps:$4 sm:$0xff]   ;;  %v22423_v54 = vld [vmem:[%s29350_s9 + $0x20] ss:$8 sps:$4 sm:$0xff]  }
 0xfc5   :  { %14936 = vmatpush1.bf16.msra.mxu1 %v22339_v53  ;;  %14989 = vmatpush1.bf16.msra.mxu0 %v22342_v52  ;;  %v22431_v53 = vld [vmem:[%s29350_s9 + $0x44] ss:$8 sps:$4 sm:$0xff]   ;;  %v22429_v52 = vld [vmem:[%s29350_s9 + $0x40] ss:$8 sps:$4 sm:$0xff]  }
 0xfc6   :  { %14937 = vmatprep.subr.bf16.mxu1 %v22347_v23  ;;  %14990 = vmatprep.subr.bf16.mxu0 %v22350_v25  ;;  %v22432_v23 = vld [vmem:[%s29350_s9 + $0x50] ss:$8 sps:$4 sm:$0xff]   ;;  %v22437_v25 = vld [vmem:[%s29350_s9 + $0x64] ss:$8 sps:$4 sm:$0xff]  }
 0xfc9   :  { %14938 = vmatpush1.bf16.msra.mxu1 %v22345_v29  ;;  %14991 = vmatpush1.bf16.msra.mxu0 %v22348_v16  ;;  %v22435_v29 = vld [vmem:[%s29350_s9 + $0x60] ss:$8 sps:$4 sm:$0xff]   ;;  %v22440_v16 = vld [vmem:[%s29350_s9 + $0x74] ss:$8 sps:$4 sm:$0xff]  }
 0xfca   :  { %14939 = vmatprep.subr.bf16.mxu1 %v22353_v50  ;;  %14992 = vmatprep.subr.bf16.mxu0 %v22356_v56  ;;  %v22438_v50 = vld [vmem:[%s29350_s9 + $0x70] ss:$8 sps:$4 sm:$0xff]   ;;  %v22443_v56 = vld [vmem:[%s29350_s9 + $0x84] ss:$8 sps:$4 sm:$0xff]  }
 0xfcd   :  { %14940 = vmatpush1.bf16.msra.mxu1 %v22351_v15  ;;  %14993 = vmatpush1.bf16.msra.mxu0 %v22354_v58  ;;  %v22441_v15 = vld [vmem:[%s29350_s9 + $0x80] ss:$8 sps:$4 sm:$0xff]   ;;  %v22446_v58 = vld [vmem:[%s29350_s9 + $0x94] ss:$8 sps:$4 sm:$0xff]  }
 0xfce   :  { %14941 = vmatprep.subr.bf16.mxu1 %v22359_v51  ;;  %14994 = vmatprep.subr.bf16.mxu0 %v22362_v1  ;;  %v22444_v51 = vld [vmem:[%s29350_s9 + $0x90] ss:$8 sps:$4 sm:$0xff]   ;;  %v22449_v1 = vld [vmem:[%s29350_s9 + $0xa4] ss:$8 sps:$4 sm:$0xff]  }
 0xfd1   :  { %14942 = vmatpush1.bf16.msra.mxu1 %v22357_v32  ;;  %14995 = vmatpush1.bf16.msra.mxu0 %v22360_v13  ;;  %v28825_v32 = vld [vmem:[%s29350_s9 + $0x300] ss:$8 sps:$4 sm:$0xff]  }
 0xfd2   :  { %14943 = vmatprep.subr.bf16.mxu1 %v22365_v18  ;;  %14996 = vmatprep.subr.bf16.mxu0 %v22368_v27  ;;  %v22447_v13 = vld [vmem:[%s29350_s9 + $0xa0] ss:$8 sps:$4 sm:$0xff]   ;;  %v28833_v18 = vld [vmem:[%s29350_s9 + $0x304] ss:$8 sps:$4 sm:$0xff]   ;;  %v22452_v27 = vld [vmem:[%s29350_s9 + $0xb4] ss:$8 sps:$4 sm:$0xff]  }
 0xfd5   :  { %14944 = vmatpush1.bf16.msra.mxu1 %v22363_v28  ;;  %14997 = vmatpush1.bf16.msra.mxu0 %v22366_v2  ;;  %v28842_v28 = vld [vmem:[%s29350_s9 + $0x314] ss:$8 sps:$4 sm:$0xff]   ;;  %v28848_v2 = vld [vmem:[%s29350_s9 + $0x310] ss:$8 sps:$4 sm:$0xff]  }
 0xfd6   :  { %14945 = vmatprep.subr.bf16.mxu1 %v22371_v41  ;;  %14998 = vmatprep.subr.bf16.mxu0 %v22374_v43  ;;  %v22450_v41 = vld [vmem:[%s29350_s9 + $0xb0] ss:$8 sps:$4 sm:$0xff]   ;;  %v28857_v43 = vld [vmem:[%s29350_s9 + $0x324] ss:$8 sps:$4 sm:$0xff]  }
 0xfd9   :  { %14946 = vmatpush1.bf16.msra.mxu1 %v22369_v38  ;;  %14999 = vmatpush1.bf16.msra.mxu0 %v22372_v44  ;;  %v22455_v38 = vld [vmem:[%s29350_s9 + $0xc4] ss:$8 sps:$4 sm:$0xff]   ;;  %v28866_v44 = vld [vmem:[%s29350_s9 + $0x320] ss:$8 sps:$4 sm:$0xff]  }
 0xfda   :  { %14947 = vmatprep.subr.bf16.mxu1 %v22377_v33  ;;  %15000 = vmatprep.subr.bf16.mxu0 %v22380_v6  ;;  %v22453_v33 = vld [vmem:[%s29350_s9 + $0xc0] ss:$8 sps:$4 sm:$0xff]   ;;  %v28875_v6 = vld [vmem:[%s29350_s9 + $0x334] ss:$8 sps:$4 sm:$0xff]  }
 0xfdd   :  { %14948 = vmatpush1.bf16.msra.mxu1 %v22375_v47  ;;  %15001 = vmatpush1.bf16.msra.mxu0 %v22378_v30  ;;  %v22458_v47 = vld [vmem:[%s29350_s9 + $0xd4] ss:$8 sps:$4 sm:$0xff]   ;;  %v28884_v30 = vld [vmem:[%s29350_s9 + $0x330] ss:$8 sps:$4 sm:$0xff]  }
 0xfde   :  { %14949 = vmatprep.subr.bf16.mxu1 %v22383_v31  ;;  %15002 = vmatprep.subr.bf16.mxu0 %v22386_v0  ;;  %v22456_v31 = vld [vmem:[%s29350_s9 + $0xd0] ss:$8 sps:$4 sm:$0xff]   ;;  %v28893_v0 = vld [vmem:[%s29350_s9 + $0x344] ss:$8 sps:$4 sm:$0xff]  }
 0xfe1   :  { %14950 = vmatpush1.bf16.msra.mxu1 %v22381_v26  ;;  %15003 = vmatpush1.bf16.msra.mxu0 %v22384_v34  ;;  %v22461_v26 = vld [vmem:[%s29350_s9 + $0xe4] ss:$8 sps:$4 sm:$0xff]   ;;  %v28902_v34 = vld [vmem:[%s29350_s9 + $0x340] ss:$8 sps:$4 sm:$0xff]  }
 0xfe2   :  { %14951 = vmatprep.subr.bf16.mxu1 %v22389_v39  ;;  %15004 = vmatprep.subr.bf16.mxu0 %v22392_v42  ;;  %v22459_v39 = vld [vmem:[%s29350_s9 + $0xe0] ss:$8 sps:$4 sm:$0xff]   ;;  %v28911_v42 = vld [vmem:[%s29350_s9 + $0x354] ss:$8 sps:$4 sm:$0xff]  }
 0xfe5   :  { %14952 = vmatpush1.bf16.msra.mxu1 %v22387_v12  ;;  %15005 = vmatpush1.bf16.msra.mxu0 %v22390_v37  ;;  %v22464_v12 = vld [vmem:[%s29350_s9 + $0xf4] ss:$8 sps:$4 sm:$0xff]   ;;  %v28920_v37 = vld [vmem:[%s29350_s9 + $0x350] ss:$8 sps:$4 sm:$0xff]  }
 0xfe6   :  { %14953 = vmatprep.subr.bf16.mxu1 %v22395_v46  ;;  %15006 = vmatprep.subr.bf16.mxu0 %v22398_v63  ;;  %v22462_v46 = vld [vmem:[%s29350_s9 + $0xf0] ss:$8 sps:$4 sm:$0xff]   ;;  %v28929_v63 = vld [vmem:[%s29350_s9 + $0x364] ss:$8 sps:$4 sm:$0xff]  }
 0xfe9   :  { %14954 = vmatpush1.bf16.msra.mxu1 %v22393_v49  ;;  %15007 = vmatpush1.bf16.msra.mxu0 %v22396_v5  ;;  %v22467_v49 = vld [vmem:[%s29350_s9 + $0x104] ss:$8 sps:$4 sm:$0xff]   ;;  %v28938_v5 = vld [vmem:[%s29350_s9 + $0x360] ss:$8 sps:$4 sm:$0xff]  }
 0xfea   :  { %14955 = vmatprep.subr.bf16.mxu1 %v22401_v4  ;;  %15008 = vmatprep.subr.bf16.mxu0 %v22404_v21  ;;  %v28944_v4 = vld [vmem:[%s29350_s9 + $0x374] ss:$8 sps:$4 sm:$0xff]   ;;  %v28950_v21 = vld [vmem:[%s29350_s9 + $0x370] ss:$8 sps:$4 sm:$0xff]  }
 0xfed   :  { %14956 = vmatpush1.bf16.msra.mxu1 %v22399_v9  ;;  %15009 = vmatpush1.bf16.msra.mxu0 %v22402_v36  ;;  %v28956_v9 = vld [vmem:[%s29350_s9 + $0x384] ss:$8 sps:$4 sm:$0xff]   ;;  %v28962_v36 = vld [vmem:[%s29350_s9 + $0x380] ss:$8 sps:$4 sm:$0xff]  }
 0xfee   :  { %14957 = vmatprep.subr.bf16.mxu1 %v22407_v20  ;;  %15010 = vmatprep.subr.bf16.mxu0 %v22410_v7  ;;  %v28968_v20 = vld [vmem:[%s29350_s9 + $0x394] ss:$8 sps:$4 sm:$0xff]   ;;  %v28974_v7 = vld [vmem:[%s29350_s9 + $0x390] ss:$8 sps:$4 sm:$0xff]  }
 0xff1   :  { %14958 = vmatpush1.bf16.msra.mxu1 %v22405_v57  ;;  %15011 = vmatpush1.bf16.msra.mxu0 %v22408_v14  ;;  %v28980_v57 = vld [vmem:[%s29350_s9 + $0x3a4] ss:$8 sps:$4 sm:$0xff]   ;;  %v28986_v14 = vld [vmem:[%s29350_s9 + $0x3a0] ss:$8 sps:$4 sm:$0xff]  }
 0xff2   :  { %14959 = vmatprep.subr.bf16.mxu1 %v22413_v3  ;;  %15012 = vmatprep.subr.bf16.mxu0 %v22416_v24  ;;  %v28992_v3 = vld [vmem:[%s29350_s9 + $0x3b4] ss:$8 sps:$4 sm:$0xff]   ;;  %v28998_v24 = vld [vmem:[%s29350_s9 + $0x3b0] ss:$8 sps:$4 sm:$0xff]  }
 0xff5   :  { %14960 = vmatpush1.bf16.msra.mxu1 %v22411_v40  ;;  %15013 = vmatpush1.bf16.msra.mxu0 %v22414_v61  ;;  %v29005_v40 = vld [vmem:[%s29350_s9 + $0x3c4] ss:$8 sps:$4 sm:$0xff]   ;;  %v29010_v61 = vld [vmem:[%s29350_s9 + $0x3c0] ss:$8 sps:$4 sm:$0xff]  }
 0xff6   :  { %15895 = vmatprep.subr.bf16.mxu0 %v22419_v55  ;;  %19418 = vmatprep.subr.bf16.mxu1 %v28833_v18  ;;  %v29017_v55 = vld [vmem:[%s29350_s9 + $0x3d4] ss:$8 sps:$4 sm:$0xff]  }
 0xff8   :  { %14962 = vmatmul.mubr.bf16.vlgmr.msra.gmra.mrb[24].mxu1 %v28561_v19  ;;  %15015 = vmatmul.mubr.bf16.vlgmr.msra.gmra.mrb[24].mxu0 %v28561_v19  ;;  %v22428_v19 = vld [vmem:[%s29350_s9 + $0x34] ss:$8 sps:$4 sm:$0xff]  }
 0xff9   :  { %14971 = vmatprep.mubr.bf16.mxu1 %v28585_v17  ;;  %15024 = vmatprep.mubr.bf16.mxu0 %v28585_v17  ;;  %v22426_v17 = vld [vmem:[%s29350_s9 + $0x30] ss:$8 sps:$4 sm:$0xff]  }
 0xffa   :  { %15896 = vmatpush1.bf16.msra.mxu0 %v22417_v35  ;;  %19434 = vmatpush1.bf16.msra.mxu1 %v28825_v32  ;;  %v29022_v35 = vld [vmem:[%s29350_s9 + $0x3d0] ss:$8 sps:$4 sm:$0xff]  }
 0xffb   :  { %15897 = vmatprep.subr.bf16.mxu0 %v22422_v60  ;;  %19419 = vmatprep.subr.bf16.mxu1 %v28842_v28  ;;  %v29029_v60 = vld [vmem:[%s29350_s9 + $0x3e4] ss:$8 sps:$4 sm:$0xff]  }
 0xffe   :  { %15898 = vmatpush1.bf16.msra.mxu0 %v22420_v45  ;;  %19435 = vmatpush1.bf16.msra.mxu1 %v28848_v2  ;;  %v29034_v45 = vld [vmem:[%s29350_s9 + $0x3e0] ss:$8 sps:$4 sm:$0xff]  }
 0xfff   :  { %15899 = vmatprep.subr.bf16.mxu0 %v22425_v48  ;;  %19420 = vmatprep.subr.bf16.mxu1 %v28857_v43  ;;  %v29041_v48 = vld [vmem:[%s29350_s9 + $0x3f4] ss:$8 sps:$4 sm:$0xff]  }
0x1000   :  { %14972 = vmatmul.mubr.bf16.gmra.mrb[28].mxu1 %v28583_v22  ;;  %15025 = vmatmul.mubr.bf16.gmra.mrb[28].mxu0 %v28583_v22  ;;  %v22434_v22 = vld [vmem:[%s29350_s9 + $0x54] ss:$8 sps:$4 sm:$0xff]  }
0x1002   :  { %15900 = vmatpush1.bf16.msra.mxu0 %v22423_v54  ;;  %19436 = vmatpush1.bf16.msra.mxu1 %v28866_v44  ;;  %v29046_v54 = vld [vmem:[%s29350_s9 + $0x3f0] ss:$8 sps:$4 sm:$0xff]  }
0x1003   :  { %15901 = vmatprep.subr.bf16.mxu0 %v22428_v19  ;;  %19421 = vmatprep.subr.bf16.mxu1 %v28875_v6  ;;  %v29053_v19 = vld [vmem:[%s29351_s6] sm:$0xff] }
0x1006   :  { %15902 = vmatpush1.bf16.msra.mxu0 %v22426_v17  ;;  %19437 = vmatpush1.bf16.msra.mxu1 %v28884_v30  ;;  %v144_v17 = vrot.slane %v29053_v19, %v23184_v10 }
0x1007   :  { %15903 = vmatprep.subr.bf16.mxu0 %v22431_v53  ;;  %19422 = vmatprep.subr.bf16.mxu1 %v28893_v0  ;;  %v152_v53 = vrot.slane %v29053_v19, %v23684_v59 }
0x100a   :  { %15904 = vmatpush1.bf16.msra.mxu0 %v22429_v52  ;;  %19438 = vmatpush1.bf16.msra.mxu1 %v28902_v34  ;;  %v148_v52 = vrot.slane %v29053_v19, %v23187_v11 }
0x100b   :  { %15905 = vmatprep.subr.bf16.mxu0 %v22434_v22  ;;  %19423 = vmatprep.subr.bf16.mxu1 %v28911_v42  ;;  %v156_v22 = vrot.slane %v29053_v19, %v23690_v62 }
0x100e   :  { %15906 = vmatpush1.bf16.msra.mxu0 %v22432_v23  ;;  %19439 = vmatpush1.bf16.msra.mxu1 %v28920_v37 }
0x100f   :  { %15907 = vmatprep.subr.bf16.mxu0 %v22437_v25  ;;  %19424 = vmatprep.subr.bf16.mxu1 %v28929_v63 }
0x1012   :  { %15908 = vmatpush1.bf16.msra.mxu0 %v22435_v29  ;;  %19440 = vmatpush1.bf16.msra.mxu1 %v28938_v5 }
0x1013   :  { %15909 = vmatprep.subr.bf16.mxu0 %v22440_v16  ;;  %19425 = vmatprep.subr.bf16.mxu1 %v28944_v4 }
0x1016   :  { %15910 = vmatpush1.bf16.msra.mxu0 %v22438_v50  ;;  %19441 = vmatpush1.bf16.msra.mxu1 %v28950_v21 }
0x1017   :  { %15911 = vmatprep.subr.bf16.mxu0 %v22443_v56  ;;  %19426 = vmatprep.subr.bf16.mxu1 %v28956_v9 }
0x101a   :  { %15912 = vmatpush1.bf16.msra.mxu0 %v22441_v15  ;;  %19442 = vmatpush1.bf16.msra.mxu1 %v28962_v36 }
0x101b   :  { %15913 = vmatprep.subr.bf16.mxu0 %v22446_v58  ;;  %19427 = vmatprep.subr.bf16.mxu1 %v28968_v20 }
0x101e   :  { %15914 = vmatpush1.bf16.msra.mxu0 %v22444_v51  ;;  %19443 = vmatpush1.bf16.msra.mxu1 %v28974_v7 }
0x101f   :  { %15915 = vmatprep.subr.bf16.mxu0 %v22449_v1  ;;  %19428 = vmatprep.subr.bf16.mxu1 %v28980_v57 }
0x1022   :  { %15916 = vmatpush1.bf16.msra.mxu0 %v22447_v13  ;;  %19444 = vmatpush1.bf16.msra.mxu1 %v28986_v14 }
0x1023   :  { %15917 = vmatprep.subr.bf16.mxu0 %v22452_v27  ;;  %19429 = vmatprep.subr.bf16.mxu1 %v28992_v3 }
0x1026   :  { %15918 = vmatpush1.bf16.msra.mxu0 %v22450_v41  ;;  %19445 = vmatpush1.bf16.msra.mxu1 %v28998_v24 }
0x1027   :  { %15919 = vmatprep.subr.bf16.mxu0 %v22455_v38  ;;  %19430 = vmatprep.subr.bf16.mxu1 %v29005_v40 }
0x102a   :  { %15920 = vmatpush1.bf16.msra.mxu0 %v22453_v33  ;;  %19446 = vmatpush1.bf16.msra.mxu1 %v29010_v61 }
0x102b   :  { %15921 = vmatprep.subr.bf16.mxu0 %v22458_v47  ;;  %19431 = vmatprep.subr.bf16.mxu1 %v29017_v55 }
0x102e   :  { %15922 = vmatpush1.bf16.msra.mxu0 %v22456_v31  ;;  %19447 = vmatpush1.bf16.msra.mxu1 %v29022_v35 }
0x102f   :  { %15923 = vmatprep.subr.bf16.mxu0 %v22461_v26  ;;  %19432 = vmatprep.subr.bf16.mxu1 %v29029_v60 }
0x1032   :  { %15924 = vmatpush1.bf16.msra.mxu0 %v22459_v39  ;;  %19448 = vmatpush1.bf16.msra.mxu1 %v29034_v45 }
0x1033   :  { %15925 = vmatprep.subr.bf16.mxu0 %v22464_v12  ;;  %19433 = vmatprep.subr.bf16.mxu1 %v29041_v48 }
0x1036   :  { %15926 = vmatpush1.bf16.msra.mxu0 %v22462_v46  ;;  %19449 = vmatpush1.bf16.msra.mxu1 %v29046_v54 }
0x1037   :  { %15948 = vmatprep.subr.bf16.mxu0 %v22467_v49 }
0x1089   :  { %v14857_v23 = vpop.f32.mrb[16].mxu1  ;;  %v14910_v25 = vpop.f32.mrb[16].mxu0 }
0x108a   :  { %v19474_v29 = vadd.f32 %v14857_v23, %v144_v17  ;;  %v19482_v16 = vadd.f32 %v14910_v25, %v152_v53  ;;  %v14859_v50 = vpop.f32.mrb[17].mxu1  ;;  %v14912_v56 = vpop.f32.mrb[17].mxu0 }
0x108b   :  { %v19475_v15 = vadd.f32 %v14859_v50, %v148_v52  ;;  %v19483_v58 = vadd.f32 %v14912_v56, %v156_v22  ;;  %v14861_v51 = vpop.f32.mrb[18].mxu1  ;;  %v14914_v1 = vpop.f32.mrb[18].mxu0 }
0x108c   :  { %v19476_v13 = vadd.f32 %v14861_v51, %v144_v17  ;;  %v19484_v27 = vadd.f32 %v14914_v1, %v152_v53  ;;  %v14863_v41 = vpop.f32.mrb[19].mxu1  ;;  %v14916_v59 = vpop.f32.mrb[19].mxu0  ;;  %v15067_v47 = vmax.f32 %v19474_v29, 0.0  ;;  %v15069_v31 = vmax.f32 %v19482_v16, 0.0  ;;  %v22465_v51 = vld [vmem:[%s29350_s9 + $0x100] ss:$8 sps:$4 sm:$0xff]  }
0x108d   :  { %v19477_v38 = vadd.f32 %v14863_v41, %v148_v52  ;;  %v19485_v33 = vadd.f32 %v14916_v59, %v156_v22  ;;  %v15068_v39 = vmax.f32 %v19475_v15, 0.0  ;;  %v15070_v12 = vmax.f32 %v19483_v58, 0.0  ;;  %v22470_v29 = vld [vmem:[%s29350_s9 + $0x114] ss:$8 sps:$4 sm:$0xff]  }
0x108e   :  { %v15075_v26 = vmax.f32 %v19476_v13, 0.0  ;;  %v15077_v62 = vmax.f32 %v19484_v27, 0.0 }
0x108f   :  { %v15076_v46 = vmax.f32 %v19477_v38, 0.0  ;;  %v15078_v49 = vmax.f32 %v19485_v33, 0.0 }
0x1090   :  { %v15099_v23 = vpack.c.bf16 %v15075_v26, %v15067_v47  ;;  %v29063_v25 = vpack.c.bf16 %v15077_v62, %v15069_v31  ;;  %v22468_v47 = vld [vmem:[%s29350_s9 + $0x110] ss:$8 sps:$4 sm:$0xff]  }
0x1091   :  { %v15100_v50 = vpack.c.bf16 %v15076_v46, %v15068_v39  ;;  %v15102_v56 = vpack.c.bf16 %v15078_v49, %v15070_v12  ;;  %v22473_v12 = vld [vmem:[%s29350_s9 + $0x124] ss:$8 sps:$4 sm:$0xff]  }
0x1093   :  { %v14867_v16 = vpop.f32.mrb[20].mxu1  ;;  %v14920_v1 = vpop.f32.mrb[20].mxu0  ;;  %15927 = vmatprep.mubr.bf16.mxu0 %v15100_v50 }
0x1094   :  { %v19478_v15 = vadd.f32 %v14867_v16, %v144_v17  ;;  %v19486_v58 = vadd.f32 %v14920_v1, %v152_v53  ;;  %v14869_v13 = vpop.f32.mrb[21].mxu1  ;;  %v14922_v27 = vpop.f32.mrb[21].mxu0  ;;  %15928 = vmatmul.mubr.bf16.vlgmr.msra.gmra.mrb[88].mxu0 %v15099_v23 }
0x1095   :  { %v19479_v41 = vadd.f32 %v14869_v13, %v148_v52  ;;  %v19487_v59 = vadd.f32 %v14922_v27, %v156_v22  ;;  %v14871_v38 = vpop.f32.mrb[22].mxu1  ;;  %v14924_v33 = vpop.f32.mrb[22].mxu0  ;;  %15949 = vmatpush1.bf16.msra.mxu0 %v22465_v51 }
0x1096   :  { %v19480_v31 = vadd.f32 %v14871_v38, %v144_v17  ;;  %v19488_v26 = vadd.f32 %v14924_v33, %v152_v53  ;;  %v14873_v62 = vpop.f32.mrb[23].mxu1  ;;  %v14926_v39 = vpop.f32.mrb[23].mxu0  ;;  %15950 = vmatprep.subr.bf16.mxu0 %v22470_v29  ;;  %v15083_v23 = vmax.f32 %v19478_v15, 0.0  ;;  %v15085_v50 = vmax.f32 %v19486_v58, 0.0  ;;  %v22471_v17 = vld [vmem:[%s29350_s9 + $0x120] ss:$8 sps:$4 sm:$0xff]  }
0x1097   :  { %v19481_v46 = vadd.f32 %v14873_v62, %v148_v52  ;;  %v19489_v49 = vadd.f32 %v14926_v39, %v156_v22  ;;  %v15084_v51 = vmax.f32 %v19479_v41, 0.0  ;;  %v15086_v13 = vmax.f32 %v19487_v59, 0.0  ;;  %v22479_v52 = vld [vmem:[%s29350_s9 + $0x134] ss:$8 sps:$4 sm:$0xff]   ;;  %v22477_v58 = vld [vmem:[%s29350_s9 + $0x130] ss:$8 sps:$4 sm:$0xff]  }
0x1098   :  { %v15091_v16 = vmax.f32 %v19480_v31, 0.0  ;;  %v15093_v1 = vmax.f32 %v19488_v26, 0.0  ;;  %v22485_v41 = vld [vmem:[%s29350_s9 + $0x144] ss:$8 sps:$4 sm:$0xff]   ;;  %v22483_v59 = vld [vmem:[%s29350_s9 + $0x140] ss:$8 sps:$4 sm:$0xff]  }
0x1099   :  { %v15092_v27 = vmax.f32 %v19481_v46, 0.0  ;;  %v15094_v11 = vmax.f32 %v19489_v49, 0.0  ;;  %15951 = vmatpush1.bf16.msra.mxu0 %v22468_v47  ;;  %v22489_v38 = vld [vmem:[%s29350_s9 + $0x150] ss:$8 sps:$4 sm:$0xff]   ;;  %v22495_v33 = vld [vmem:[%s29350_s9 + $0x160] ss:$8 sps:$4 sm:$0xff]  }
0x109a   :  { %v15107_v53 = vpack.c.bf16 %v15091_v16, %v15083_v23  ;;  %v29080_v29 = vpack.c.bf16 %v15093_v1, %v15085_v50  ;;  %15952 = vmatprep.subr.bf16.mxu0 %v22473_v12  ;;  %v22503_v47 = vld [vmem:[%s29350_s9 + $0x174] ss:$8 sps:$4 sm:$0xff]   ;;  %v22501_v31 = vld [vmem:[%s29350_s9 + $0x170] ss:$8 sps:$4 sm:$0xff]   ;;  %v22509_v26 = vld [vmem:[%s29350_s9 + $0x184] ss:$8 sps:$4 sm:$0xff]  }
0x109b   :  { %v15108_v22 = vpack.c.bf16 %v15092_v27, %v15084_v51  ;;  %v29085_v15 = vpack.c.bf16 %v15094_v11, %v15086_v13  ;;  %v22491_v11 = vld [vmem:[%s29350_s9 + $0x154] ss:$8 sps:$4 sm:$0xff]   ;;  %v22507_v62 = vld [vmem:[%s29350_s9 + $0x180] ss:$8 sps:$4 sm:$0xff]   ;;  %v22513_v12 = vld [vmem:[%s29350_s9 + $0x190] ss:$8 sps:$4 sm:$0xff]  }
0x109c   :  { %v22515_v39 = vld [vmem:[%s29350_s9 + $0x194] ss:$8 sps:$4 sm:$0xff]   ;;  %v22521_v46 = vld [vmem:[%s29350_s9 + $0x1a4] ss:$8 sps:$4 sm:$0xff]   ;;  %v22519_v49 = vld [vmem:[%s29350_s9 + $0x1a0] ss:$8 sps:$4 sm:$0xff]  }
0x109d   :  { %15937 = vmatprep.mubr.bf16.mxu0 %v15108_v22  ;;  %15953 = vmatpush1.bf16.msra.mxu0 %v22471_v17  ;;  %v22527_v23 = vld [vmem:[%s29350_s9 + $0x1b4] ss:$8 sps:$4 sm:$0xff]   ;;  %v22525_v50 = vld [vmem:[%s29350_s9 + $0x1b0] ss:$8 sps:$4 sm:$0xff]   ;;  %v22533_v16 = vld [vmem:[%s29350_s9 + $0x1c4] ss:$8 sps:$4 sm:$0xff]  }
0x109e   :  { %15938 = vmatmul.mubr.bf16.gmra.mrb[92].mxu0 %v15107_v53  ;;  %15954 = vmatprep.subr.bf16.mxu0 %v22479_v52  ;;  %v22531_v1 = vld [vmem:[%s29350_s9 + $0x1c0] ss:$8 sps:$4 sm:$0xff]   ;;  %v22539_v51 = vld [vmem:[%s29350_s9 + $0x1d4] ss:$8 sps:$4 sm:$0xff]   ;;  %v159_v13 = vsub.s32 4, %v23178_v8  ;;  %v167_v27 = vsub.s32 6, %v23178_v8 }
0x109f   :  { %15980 = vmatprep.mubr.bf16.mxu0 %v15102_v56  ;;  %v22497_v56 = vld [vmem:[%s29350_s9 + $0x164] ss:$8 sps:$4 sm:$0xff]   ;;  %v22537_v17 = vld [vmem:[%s29350_s9 + $0x1d0] ss:$8 sps:$4 sm:$0xff]   ;;  %v163_v53 = vsub.s32 5, %v23178_v8  ;;  %v171_v52 = vsub.s32 7, %v23178_v8 }
0x10a0   :  { %v22545_v22 = vld [vmem:[%s29350_s9 + $0x1e4] ss:$8 sps:$4 sm:$0xff]   ;;  %v22551_v8 = vld [vmem:[%s29350_s9 + $0x1f4] ss:$8 sps:$4 sm:$0xff]  }
0x10a1   :  { %15955 = vmatpush1.bf16.msra.mxu0 %v22477_v58  ;;  %v160_v58 = vrot.slane %v29053_v19, %v159_v13 }
0x10a2   :  { %15956 = vmatprep.subr.bf16.mxu0 %v22485_v41  ;;  %v168_v41 = vrot.slane %v29053_v19, %v167_v27 }
0x10a5   :  { %15957 = vmatpush1.bf16.msra.mxu0 %v22483_v59  ;;  %v164_v59 = vrot.slane %v29053_v19, %v163_v53 }
0x10a6   :  { %15958 = vmatprep.subr.bf16.mxu0 %v22491_v11  ;;  %v172_v11 = vrot.slane %v29053_v19, %v171_v52  ;;  %v22549_v19 = vld [vmem:[%s29350_s9 + $0x1f0] ss:$8 sps:$4 sm:$0xff]  }
0x10a9   :  { %15959 = vmatpush1.bf16.msra.mxu0 %v22489_v38  ;;  %v22543_v38 = vld [vmem:[%s29350_s9 + $0x1e0] ss:$8 sps:$4 sm:$0xff]  }
0x10aa   :  { %15960 = vmatprep.subr.bf16.mxu0 %v22497_v56 }
0x10ad   :  { %15961 = vmatpush1.bf16.msra.mxu0 %v22495_v33 }
0x10ae   :  { %15962 = vmatprep.subr.bf16.mxu0 %v22503_v47 }
0x10b1   :  { %15963 = vmatpush1.bf16.msra.mxu0 %v22501_v31 }
0x10b2   :  { %15964 = vmatprep.subr.bf16.mxu0 %v22509_v26 }
0x10b5   :  { %15965 = vmatpush1.bf16.msra.mxu0 %v22507_v62 }
0x10b6   :  { %15966 = vmatprep.subr.bf16.mxu0 %v22515_v39 }
0x10b9   :  { %15967 = vmatpush1.bf16.msra.mxu0 %v22513_v12 }
0x10ba   :  { %15968 = vmatprep.subr.bf16.mxu0 %v22521_v46 }
0x10bd   :  { %15969 = vmatpush1.bf16.msra.mxu0 %v22519_v49 }
0x10be   :  { %15970 = vmatprep.subr.bf16.mxu0 %v22527_v23 }
0x10c1   :  { %15971 = vmatpush1.bf16.msra.mxu0 %v22525_v50 }
0x10c2   :  { %15972 = vmatprep.subr.bf16.mxu0 %v22533_v16 }
0x10c5   :  { %15973 = vmatpush1.bf16.msra.mxu0 %v22531_v1 }
0x10c6   :  { %15974 = vmatprep.subr.bf16.mxu0 %v22539_v51  ;;  %v22557_v51 = vld [vmem:[%s29350_s9 + $0x204] ss:$8 sps:$4 sm:$0xff]  }
0x10c9   :  { %15975 = vmatpush1.bf16.msra.mxu0 %v22537_v17 }
0x10ca   :  { %15976 = vmatprep.subr.bf16.mxu0 %v22545_v22 }
0x10cb   :  { %v14963_v56 = vpop.f32.mrb[24].mxu1  ;;  %v15016_v33 = vpop.f32.mrb[24].mxu0 }
0x10cc   :  { %v19490_v47 = vadd.f32 %v14963_v56, %v160_v58  ;;  %v19498_v31 = vadd.f32 %v15016_v33, %v168_v41  ;;  %v14965_v26 = vpop.f32.mrb[25].mxu1  ;;  %v15018_v62 = vpop.f32.mrb[25].mxu0 }
0x10cd   :  { %v19491_v39 = vadd.f32 %v14965_v26, %v164_v59  ;;  %v19499_v12 = vadd.f32 %v15018_v62, %v172_v11  ;;  %v14967_v46 = vpop.f32.mrb[26].mxu1  ;;  %v15020_v49 = vpop.f32.mrb[26].mxu0  ;;  %15977 = vmatpush1.bf16.msra.mxu0 %v22543_v38  ;;  %v22555_v62 = vld [vmem:[%s29350_s9 + $0x200] ss:$8 sps:$4 sm:$0xff]  }
0x10ce   :  { %v19492_v23 = vadd.f32 %v14967_v46, %v160_v58  ;;  %v19500_v50 = vadd.f32 %v15020_v49, %v168_v41  ;;  %v14969_v16 = vpop.f32.mrb[27].mxu1  ;;  %v15022_v1 = vpop.f32.mrb[27].mxu0  ;;  %15978 = vmatprep.subr.bf16.mxu0 %v22551_v8  ;;  %v15071_v17 = vmax.f32 %v19490_v47, 0.0  ;;  %v15073_v53 = vmax.f32 %v19498_v31, 0.0  ;;  %v22563_v47 = vld [vmem:[%s29350_s9 + $0x214] ss:$8 sps:$4 sm:$0xff]  }
0x10cf   :  { %v19493_v13 = vadd.f32 %v14969_v16, %v164_v59  ;;  %v19501_v27 = vadd.f32 %v15022_v1, %v172_v11  ;;  %v15072_v38 = vmax.f32 %v19491_v39, 0.0  ;;  %v15074_v56 = vmax.f32 %v19499_v12, 0.0 }
0x10d0   :  { %v15079_v52 = vmax.f32 %v19492_v23, 0.0  ;;  %v15081_v22 = vmax.f32 %v19500_v50, 0.0 }
0x10d1   :  { %v15080_v33 = vmax.f32 %v19493_v13, 0.0  ;;  %v15082_v26 = vmax.f32 %v19501_v27, 0.0  ;;  %15979 = vmatpush1.bf16.msra.mxu0 %v22549_v19 }
0x10d2   :  { %v29176_v8 = vpack.c.bf16 %v15079_v52, %v15071_v17  ;;  %v29178_v46 = vpack.c.bf16 %v15081_v22, %v15073_v53  ;;  %16001 = vmatprep.subr.bf16.mxu0 %v22557_v51  ;;  %v22561_v51 = vld [vmem:[%s29350_s9 + $0x210] ss:$8 sps:$4 sm:$0xff]  }
0x10d3   :  { %v15104_v31 = vpack.c.bf16 %v15080_v33, %v15072_v38  ;;  %v29183_v49 = vpack.c.bf16 %v15082_v26, %v15074_v56  ;;  %v14973_v39 = vpop.f32.mrb[28].mxu1  ;;  %v15026_v12 = vpop.f32.mrb[28].mxu0 }
0x10d4   :  { %v19494_v23 = vadd.f32 %v14973_v39, %v160_v58  ;;  %v19502_v19 = vadd.f32 %v15026_v12, %v168_v41  ;;  %v14975_v50 = vpop.f32.mrb[29].mxu1  ;;  %v15028_v16 = vpop.f32.mrb[29].mxu0  ;;  %15981 = vmatmul.mubr.bf16.vlgmr.msra.gmra.mrb[88].mxu0 %v29063_v25  ;;  %v22569_v25 = vld [vmem:[%s29350_s9 + $0x224] ss:$8 sps:$4 sm:$0xff]  }
0x10d5   :  { %v19495_v1 = vadd.f32 %v14975_v50, %v164_v59  ;;  %v19503_v13 = vadd.f32 %v15028_v16, %v172_v11  ;;  %v14977_v27 = vpop.f32.mrb[30].mxu1  ;;  %v15030_v17 = vpop.f32.mrb[30].mxu0  ;;  %15990 = vmatprep.mubr.bf16.mxu0 %v29085_v15  ;;  %16002 = vmatpush1.bf16.msra.mxu0 %v22555_v62 }
0x10d6   :  { %v19496_v53 = vadd.f32 %v14977_v27, %v160_v58  ;;  %v19504_v52 = vadd.f32 %v15030_v17, %v168_v41  ;;  %v14979_v22 = vpop.f32.mrb[31].mxu1  ;;  %v15032_v38 = vpop.f32.mrb[31].mxu0  ;;  %16003 = vmatprep.subr.bf16.mxu0 %v22563_v47  ;;  %v15087_v26 = vmax.f32 %v19494_v23, 0.0  ;;  %v15089_v39 = vmax.f32 %v19502_v19, 0.0  ;;  %v22567_v58 = vld [vmem:[%s29350_s9 + $0x220] ss:$8 sps:$4 sm:$0xff]  }
0x10d7   :  { %v19497_v56 = vadd.f32 %v14979_v22, %v164_v59  ;;  %v19505_v33 = vadd.f32 %v15032_v38, %v172_v11  ;;  %v15088_v62 = vmax.f32 %v19495_v1, 0.0  ;;  %v15090_v50 = vmax.f32 %v19503_v13, 0.0  ;;  %v22572_v11 = vld [vmem:[%s29350_s9 + $0x234] ss:$8 sps:$4 sm:$0xff]   ;;  %v22570_v23 = vld [vmem:[%s29350_s9 + $0x230] ss:$8 sps:$4 sm:$0xff]  }
0x10d8   :  { %v15095_v12 = vmax.f32 %v19496_v53, 0.0  ;;  %v15097_v15 = vmax.f32 %v19504_v52, 0.0  ;;  %v22575_v19 = vld [vmem:[%s29350_s9 + $0x244] ss:$8 sps:$4 sm:$0xff]   ;;  %v22579_v13 = vld [vmem:[%s29350_s9 + $0x260] ss:$8 sps:$4 sm:$0xff]  }
0x10d9   :  { %v15096_v16 = vmax.f32 %v19497_v56, 0.0  ;;  %v15098_v10 = vmax.f32 %v19505_v33, 0.0  ;;  %16004 = vmatpush1.bf16.msra.mxu0 %v22561_v51  ;;  %v22581_v1 = vld [vmem:[%s29350_s9 + $0x264] ss:$8 sps:$4 sm:$0xff]   ;;  %v22584_v17 = vld [vmem:[%s29350_s9 + $0x274] ss:$8 sps:$4 sm:$0xff]  }
0x10da   :  { %v29196_v41 = vpack.c.bf16 %v15095_v12, %v15087_v26  ;;  %v15113_v47 = vpack.c.bf16 %v15097_v15, %v15089_v39  ;;  %16005 = vmatprep.subr.bf16.mxu0 %v22569_v25  ;;  %v22582_v51 = vld [vmem:[%s29350_s9 + $0x270] ss:$8 sps:$4 sm:$0xff]   ;;  %v22587_v53 = vld [vmem:[%s29350_s9 + $0x284] ss:$8 sps:$4 sm:$0xff]   ;;  %v22585_v52 = vld [vmem:[%s29350_s9 + $0x280] ss:$8 sps:$4 sm:$0xff]  }
0x10db   :  { %v15112_v27 = vpack.c.bf16 %v15096_v16, %v15088_v62  ;;  %v15114_v59 = vpack.c.bf16 %v15098_v10, %v15090_v50  ;;  %v22573_v10 = vld [vmem:[%s29350_s9 + $0x240] ss:$8 sps:$4 sm:$0xff]   ;;  %v22590_v22 = vld [vmem:[%s29350_s9 + $0x294] ss:$8 sps:$4 sm:$0xff]   ;;  %v22588_v38 = vld [vmem:[%s29350_s9 + $0x290] ss:$8 sps:$4 sm:$0xff]  }
0x10dc   :  { %15991 = vmatmul.mubr.bf16.gmra.mrb[92].mxu0 %v29080_v29  ;;  %v22578_v29 = vld [vmem:[%s29350_s9 + $0x254] ss:$8 sps:$4 sm:$0xff]   ;;  %v22593_v25 = vld [vmem:[%s29350_s9 + $0x2a4] ss:$8 sps:$4 sm:$0xff]   ;;  %v22591_v56 = vld [vmem:[%s29350_s9 + $0x2a0] ss:$8 sps:$4 sm:$0xff]  }
0x10dd   :  { %16096 = vmatprep.mubr.bf16.mxu1 %v15114_v59  ;;  %16006 = vmatpush1.bf16.msra.mxu0 %v22567_v58  ;;  %v22596_v33 = vld [vmem:[%s29350_s9 + $0x2b4] ss:$8 sps:$4 sm:$0xff]   ;;  %v22594_v26 = vld [vmem:[%s29350_s9 + $0x2b0] ss:$8 sps:$4 sm:$0xff]   ;;  %v22599_v39 = vld [vmem:[%s29350_s9 + $0x2c4] ss:$8 sps:$4 sm:$0xff]  }
0x10de   :  { %16097 = vmatmul.mubr.bf16.vlgmr.msra.gmra.mrb[96].mxu1 %v15113_v47  ;;  %16033 = vmatprep.mubr.bf16.mxu0 %v15104_v31  ;;  %v22576_v31 = vld [vmem:[%s29350_s9 + $0x250] ss:$8 sps:$4 sm:$0xff]   ;;  %v22597_v12 = vld [vmem:[%s29350_s9 + $0x2c0] ss:$8 sps:$4 sm:$0xff]   ;;  %v22602_v15 = vld [vmem:[%s29350_s9 + $0x2d4] ss:$8 sps:$4 sm:$0xff]  }
0x10df   :  { %16007 = vmatprep.subr.bf16.mxu0 %v22572_v11  ;;  %v22600_v62 = vld [vmem:[%s29350_s9 + $0x2d0] ss:$8 sps:$4 sm:$0xff]   ;;  %v22605_v50 = vld [vmem:[%s29350_s9 + $0x2e4] ss:$8 sps:$4 sm:$0xff]   ;;  %v22603_v16 = vld [vmem:[%s29350_s9 + $0x2e0] ss:$8 sps:$4 sm:$0xff]  }
0x10e0   :  { %v22608_v58 = vld [vmem:[%s29350_s9 + $0x2f4] ss:$8 sps:$4 sm:$0xff]   ;;  %v22606_v47 = vld [vmem:[%s29350_s9 + $0x2f0] ss:$8 sps:$4 sm:$0xff]  }
0x10e1   :  { %16008 = vmatpush1.bf16.msra.mxu0 %v22570_v23 }
0x10e2   :  { %16009 = vmatprep.subr.bf16.mxu0 %v22575_v19 }
0x10e5   :  { %16010 = vmatpush1.bf16.msra.mxu0 %v22573_v10 }
0x10e6   :  { %16011 = vmatprep.subr.bf16.mxu0 %v22578_v29 }
0x10e9   :  { %16012 = vmatpush1.bf16.msra.mxu0 %v22576_v31 }
0x10ea   :  { %16013 = vmatprep.subr.bf16.mxu0 %v22581_v1 }
0x10ed   :  { %16014 = vmatpush1.bf16.msra.mxu0 %v22579_v13 }
0x10ee   :  { %16015 = vmatprep.subr.bf16.mxu0 %v22584_v17 }
0x10f1   :  { %16016 = vmatpush1.bf16.msra.mxu0 %v22582_v51 }
0x10f2   :  { %16017 = vmatprep.subr.bf16.mxu0 %v22587_v53 }
0x10f5   :  { %16018 = vmatpush1.bf16.msra.mxu0 %v22585_v52 }
0x10f6   :  { %16019 = vmatprep.subr.bf16.mxu0 %v22590_v22 }
0x10f9   :  { %16020 = vmatpush1.bf16.msra.mxu0 %v22588_v38 }
0x10fa   :  { %16021 = vmatprep.subr.bf16.mxu0 %v22593_v25 }
0x10fd   :  { %16022 = vmatpush1.bf16.msra.mxu0 %v22591_v56 }
0x10fe   :  { %16023 = vmatprep.subr.bf16.mxu0 %v22596_v33 }
0x1101   :  { %16024 = vmatpush1.bf16.msra.mxu0 %v22594_v26 }
0x1102   :  { %16025 = vmatprep.subr.bf16.mxu0 %v22599_v39 }
0x1105   :  { %16026 = vmatpush1.bf16.msra.mxu0 %v22597_v12 }
0x1106   :  { %16027 = vmatprep.subr.bf16.mxu0 %v22602_v15 }
0x1109   :  { %16028 = vmatpush1.bf16.msra.mxu0 %v22600_v62 }
0x110a   :  { %16029 = vmatprep.subr.bf16.mxu0 %v22605_v50 }
0x110d   :  { %16030 = vmatpush1.bf16.msra.mxu0 %v22603_v16 }
0x110e   :  { %16031 = vmatprep.subr.bf16.mxu0 %v22608_v58 }
0x1111   :  { %16032 = vmatpush1.bf16.msra.mxu0 %v22606_v47 }
0x1112   :  { %16054 = vmatprep.subr.bf16.mxu0 %v28833_v18 }
0x1114   :  { %16034 = vmatmul.mubr.bf16.vlgmr.msra.gmra.mrb[88].mxu0 %v29176_v8 }
0x1115   :  { %16043 = vmatprep.mubr.bf16.mxu0 %v15112_v27  ;;  %16055 = vmatpush1.bf16.msra.mxu0 %v28825_v32 }
0x1116   :  { %16056 = vmatprep.subr.bf16.mxu0 %v28842_v28 }
0x1119   :  { %16057 = vmatpush1.bf16.msra.mxu0 %v28848_v2 }
0x111a   :  { %16058 = vmatprep.subr.bf16.mxu0 %v28857_v43  ;;  %v15243_v43 = vld [vmem:[%s29352_s10] sm:$0x3] }
0x111c   :  { %16044 = vmatmul.mubr.bf16.gmra.mrb[92].mxu0 %v29196_v41 }
0x111d   :  { %16059 = vmatpush1.bf16.msra.mxu0 %v28866_v44  ;;  %16086 = vmatprep.mubr.bf16.mxu0 %v29183_v49  ;;  %v29358_v44 = vld [vmem:[#allocation3_spill] sm:$0xff] }
0x111e   :  { %16060 = vmatprep.subr.bf16.mxu0 %v28875_v6  ;;  %v15248_v6 = vrot.slane %v15243_v43, %v29358_v44 }
0x1121   :  { %16061 = vmatpush1.bf16.msra.mxu0 %v28884_v30  ;;  %v29359_v30 = vld [vmem:[#allocation4_spill] sm:$0xff] }
0x1122   :  { %16062 = vmatprep.subr.bf16.mxu0 %v28893_v0  ;;  %v15252_v0 = vrot.slane %v15243_v43, %v29359_v30 }
0x1125   :  { %16063 = vmatpush1.bf16.msra.mxu0 %v28902_v34 }
0x1126   :  { %16064 = vmatprep.subr.bf16.mxu0 %v28911_v42 }
0x1129   :  { %16065 = vmatpush1.bf16.msra.mxu0 %v28920_v37 }
0x112a   :  { %16066 = vmatprep.subr.bf16.mxu0 %v28929_v63 }
0x112d   :  { %16067 = vmatpush1.bf16.msra.mxu0 %v28938_v5 }
0x112e   :  { %16068 = vmatprep.subr.bf16.mxu0 %v28944_v4 }
0x1131   :  { %16069 = vmatpush1.bf16.msra.mxu0 %v28950_v21 }
0x1132   :  { %16070 = vmatprep.subr.bf16.mxu0 %v28956_v9 }
0x1135   :  { %16071 = vmatpush1.bf16.msra.mxu0 %v28962_v36 }
0x1136   :  { %16072 = vmatprep.subr.bf16.mxu0 %v28968_v20 }
0x1139   :  { %16073 = vmatpush1.bf16.msra.mxu0 %v28974_v7 }
0x113a   :  { %16074 = vmatprep.subr.bf16.mxu0 %v28980_v57 }
0x113d   :  { %16075 = vmatpush1.bf16.msra.mxu0 %v28986_v14 }
0x113e   :  { %16076 = vmatprep.subr.bf16.mxu0 %v28992_v3 }
0x1141   :  { %16077 = vmatpush1.bf16.msra.mxu0 %v28998_v24 }
0x1142   :  { %16078 = vmatprep.subr.bf16.mxu0 %v29005_v40 }
0x1145   :  { %16079 = vmatpush1.bf16.msra.mxu0 %v29010_v61 }
0x1146   :  { %16080 = vmatprep.subr.bf16.mxu0 %v29017_v55 }
0x1149   :  { %16081 = vmatpush1.bf16.msra.mxu0 %v29022_v35 }
0x114a   :  { %16082 = vmatprep.subr.bf16.mxu0 %v29029_v60 }
0x114d   :  { %16083 = vmatpush1.bf16.msra.mxu0 %v29034_v45 }
0x114e   :  { %16084 = vmatprep.subr.bf16.mxu0 %v29041_v48 }
0x1151   :  { %16085 = vmatpush1.bf16.msra.mxu0 %v29046_v54 }
0x1154   :  { %16087 = vmatmul.mubr.bf16.vlgmr.msra.gmra.mrb[88].mxu0 %v29178_v46 }
0x11b1   :  { %v16098_v32 = vpop.f32.mrb[96].mxu1 }
0x11b2   :  { %v16100_v18 = vpop.f32.mrb[97].mxu1 }
0x11b3   :  { %v16102_v28 = vpop.f32.mrb[98].mxu1 }
0x11b4   :  { %v16104_v2 = vpop.f32.mrb[99].mxu1 }
0x11ef   :  { %v16045_v34 = vpop.f32.mrb[92].mxu0 }
0x11f0   :  { %v19590_v42 = vadd.f32 %v16045_v34, %v15248_v6  ;;  %v16047_v37 = vpop.f32.mrb[93].mxu0 }
0x11f1   :  { %v19592_v63 = vadd.f32 %v16047_v37, %v15252_v0  ;;  %v16049_v5 = vpop.f32.mrb[94].mxu0 }
0x11f2   :  { %v19591_v4 = vadd.f32 %v19590_v42, %v16098_v32  ;;  %v19594_v21 = vadd.f32 %v16049_v5, %v15248_v6  ;;  %v16051_v9 = vpop.f32.mrb[95].mxu0 }
0x11f3   :  { %v19593_v36 = vadd.f32 %v19592_v63, %v16100_v18  ;;  %v19596_v20 = vadd.f32 %v16051_v9, %v15252_v0 }
0x11f4   :  { %16111 = vst [vmem:[%s29353_s11 + $0x20] sm:$0xff] %v19591_v4  ;;  %v19595_v7 = vadd.f32 %v19594_v21, %v16102_v28 }
0x11f5   :  { %16112 = vst [vmem:[%s29353_s11 + $0x28] sm:$0xff] %v19593_v36  ;;  %v19597_v57 = vadd.f32 %v19596_v20, %v16104_v2 }
0x11f6   :  { %16113 = vst [vmem:[%s29353_s11 + $0x30] sm:$0xff] %v19595_v7 }
0x11f7   :  { %16114 = vst [vmem:[%s29353_s11 + $0x38] sm:$0xff] %v19597_v57 }
0x1227   :  { %v16088_v14 = vpop.f32.mrb[88].mxu0 }
0x1228   :  { %v19586_v3 = vadd.f32 %v16088_v14, %v15248_v6  ;;  %v16090_v24 = vpop.f32.mrb[89].mxu0 }
0x1229   :  { %v19587_v40 = vadd.f32 %v16090_v24, %v15252_v0  ;;  %v16092_v61 = vpop.f32.mrb[90].mxu0 }
0x122a   :  { %16107 = vst [vmem:[%s29353_s11] sm:$0xff] %v19586_v3  ;;  %v19588_v55 = vadd.f32 %v16092_v61, %v15248_v6  ;;  %v16094_v35 = vpop.f32.mrb[91].mxu0 }
0x122b   :  { %16108 = vst [vmem:[%s29353_s11 + $0x8] sm:$0xff] %v19587_v40  ;;  %v19589_v60 = vadd.f32 %v16094_v35, %v15252_v0 }
0x122c   :  { %16109 = vst [vmem:[%s29353_s11 + $0x10] sm:$0xff] %v19588_v55 }
0x122d   :  { %16110 = vst [vmem:[%s29353_s11 + $0x18] sm:$0xff] %v19589_v60 }

</bundles_post_ra>
